<compile_context>
chip_gen: v5e
topology: v5e:2x2
jax: 0.10.0
libtpu: 0.0.40
codegen_flags: <defaults>
</compile_context>

<pallas_src>
import functools

import jax
import jax.numpy as jnp
from jax.experimental import pallas as pl
from jax.experimental.pallas import tpu as pltpu


# ----------------------------------------------------------------------------
# Fused Pallas kernel: whole res2net block, G images per grid step (lane axis).
# ----------------------------------------------------------------------------
def _res2net_kernel(row_ref, col_ref, x_ref,
                    w13_ref, b1_ref, wn_ref, bn_ref, w2_ref, b23_ref,
                    o_ref, *, H, W, G, P, cout, tap_dtype):
    HW = H * W
    L = G * HW                       # lanes handled by this grid step
    inv_hw = 1.0 / HW

    # ---- hoisted border masks: computed once, (1, L), broadcast by where ----
    row = row_ref[...]
    col = col_ref[...]
    row_lo = row == 0
    row_hi = row == H - 1
    col_lo = col == 0
    col_hi = col == W - 1

    def taps9(a):
        """Reflection-padded 3x3 taps of a (C, L) activation (tap k = 3*kh+kw).

        Spatial shifts are XLU lane rotations (pltpu.roll); reflection at the
        image border is a select against the hoisted masks.  Rolls that wrap
        across image/buffer boundaries only hit border lanes, which the
        selects overwrite.
        """
        up = pltpu.roll(a, W, axis=1)          # a[h-1, w]  (valid for h >= 1)
        dn = pltpu.roll(a, L - W, axis=1)      # a[h+1, w]  (valid for h <= H-2)
        a_hm = jnp.where(row_lo, dn, up)       # kh = 0 : reflect(h-1)
        a_hp = jnp.where(row_hi, up, dn)       # kh = 2 : reflect(h+1)
        taps = []
        for ah in (a_hm, a, a_hp):             # kh = 0, 1, 2
            lf = pltpu.roll(ah, 1, axis=1)         # ah[h, w-1]
            rt = pltpu.roll(ah, L - 1, axis=1)     # ah[h, w+1]
            taps.append(jnp.where(col_lo, rt, lf))     # kw = 0
            taps.append(ah)                            # kw = 1
            taps.append(jnp.where(col_hi, lf, rt))     # kw = 2
        return taps

    def conv_acc(taps, wsel):
        """sum_k W_k @ tap_k with f32 MXU accumulation (no tap concat)."""
        acc = jnp.dot(wsel(0), taps[0].astype(jnp.bfloat16),
                      preferred_element_type=jnp.float32)
        for k in range(1, 9):
            acc = acc + jnp.dot(wsel(k), taps[k].astype(jnp.bfloat16),
                                preferred_element_type=jnp.float32)
        return acc

    def lrelu_in(y):
        """LeakyReLU(0.2) then InstanceNorm2d(affine=False), per image."""
        y = jnp.maximum(y, 0.2 * y)
        parts = []
        for g in range(G):                      # aligned HW-lane segments
            yg = y[:, g * HW:(g + 1) * HW]
            s1 = jnp.sum(yg, axis=1, keepdims=True)
            s2 = jnp.sum(yg * yg, axis=1, keepdims=True)
            mean = s1 * inv_hw
            var = s2 * inv_hw - mean * mean     # one-pass (biased) variance
            parts.append((yg - mean) * jax.lax.rsqrt(var + 1e-5))
        return parts[0] if G == 1 else jnp.concatenate(parts, axis=1)

    # ---- conv1 + conv3 share the taps of x (one stacked per-tap weight) -----
    x = x_ref[0].astype(tap_dtype)                            # (Cin, L)
    x_taps = taps9(x)
    y13 = conv_acc(x_taps, lambda k: w13_ref[k])              # (4P + cout, L)
    y3 = y13[4 * P:4 * P + cout]                              # conv3 (bias later)

    # conv1 groups occupy 8-aligned row blocks -> tile-aligned, copy-free slices.
    spx = [lrelu_in(y13[g * P:(g + 1) * P] + b1_ref[g]) for g in range(4)]

    # ---- res2net neck: three sequential 3x3 convs on the width-sized groups -
    outs = []
    sp = spx[0]
    for i in range(3):
        if i > 0:
            sp = sp + spx[i]
        y = conv_acc(taps9(sp.astype(tap_dtype)),
                     lambda k, _i=i: wn_ref[_i, k]) + bn_ref[i]
        sp = lrelu_in(y)
        outs.append(sp)

    # ---- conv2 on out2 = cat(neck outs, spx[3]); 8-aligned f32 concat -------
    out2 = jnp.concatenate(outs + [spx[3]], axis=0).astype(tap_dtype)  # (4P, L)
    y2 = conv_acc(taps9(out2), lambda k: w2_ref[k])                    # (cout, L)

    s = y2 + y3 + b23_ref[...]
    o_ref[0] = jnp.maximum(s, 0.2 * s).astype(o_ref.dtype)


# ----------------------------------------------------------------------------
# Wrapper: weight layout prep + pallas_call
# ----------------------------------------------------------------------------
def _tapped(w):
    """(K, K, Cin, Cout) conv weight -> (K*K, Cout, Cin), tap k = kh*K + kw."""
    K, _, cin, cout = w.shape
    return jnp.transpose(w, (0, 1, 3, 2)).reshape(K * K, cout, cin)


def _device_prefs():
    kind = ""
    try:
        kind = jax.devices()[0].device_kind.lower()
    except Exception:
        pass
    # bf16 tap/shuffle math only where the VPU has a native bf16 path (v6e+).
    bf16_taps = ("v6" in kind) or ("v7" in kind)
    # Two TensorCores per chip (v4/v5p megacore, v7x): keep >= 2 grid steps.
    dual_core = ("v7" in kind) or ("v4" in kind) or ("v5p" in kind)
    return bf16_taps, (2 if dual_core else 1)


def res2net_block(x_nchw, params, width):
    N, Cin, H, W = x_nchw.shape
    HW = H * W
    w1, b1 = params["conv1"]
    w2, b2 = params["conv2"]
    w3, b3 = params["conv3"]
    assert w1.shape[0] == 3 and w2.shape[0] == 3 and w3.shape[0] == 3, \
        "fused kernel implements the 3x3 / stride-1 instantiation of ConvLayer"
    assert params["convs"][0][0].shape[0] == 3
    assert w1.shape[3] == 4 * width
    cout = w2.shape[3]
    P = ((width + 7) // 8) * 8            # padded channel group (sublane tile)

    bf16_taps, n_cores = _device_prefs()
    tap_dtype = jnp.bfloat16 if bf16_taps else jnp.float32

    # Grid: one lane-batched step per TensorCore (v5e/v6e -> 1, v4/v5p/v7x -> 2).
    grid_n = n_cores if (n_cores > 1 and N % n_cores == 0) else 1
    G = N // grid_n
    L = G * HW

    # Lane-batched activations: image g of step s sits at lanes [g*HW,(g+1)*HW).
    x_flat = (x_nchw.reshape(grid_n, G, Cin, HW)
              .transpose(0, 2, 1, 3).reshape(grid_n, Cin, L))
    lane = jnp.arange(L, dtype=jnp.int32)
    row_ids = ((lane % HW) // W).reshape(1, L)
    col_ids = (lane % W).reshape(1, L)

    # conv1 (4 groups of `width` rows, each padded to P rows) stacked with conv3.
    w1t, w2t, w3t = _tapped(w1), _tapped(w2), _tapped(w3)
    w13 = jnp.zeros((9, 4 * P + cout, Cin), jnp.float32)
    b1p = jnp.zeros((4, P, 1), jnp.float32)
    for g in range(4):
        w13 = w13.at[:, g * P:g * P + width, :].set(
            w1t[:, g * width:(g + 1) * width, :])
        b1p = b1p.at[g, :width, 0].set(b1[g * width:(g + 1) * width])
    w13 = w13.at[:, 4 * P:, :].set(w3t).astype(jnp.bfloat16)

    # Neck convs, zero-padded to (P, P) per tap (padding lives in the weights).
    wn = jnp.zeros((3, 9, P, P), jnp.float32)
    bn = jnp.zeros((3, P, 1), jnp.float32)
    for i in range(3):
        wn = wn.at[i, :, :width, :width].set(_tapped(params["convs"][i][0]))
        bn = bn.at[i, :width, 0].set(params["convs"][i][1])
    wn = wn.astype(jnp.bfloat16)

    # conv2: out2's channel groups live at padded row blocks g*P .. g*P+width.
    w2p = jnp.zeros((9, cout, 4 * P), jnp.float32)
    for g in range(4):
        w2p = w2p.at[:, :, g * P:g * P + width].set(
            w2t[:, :, g * width:(g + 1) * width])
    w2p = w2p.astype(jnp.bfloat16)
    b23 = (b2 + b3).reshape(cout, 1).astype(jnp.float32)

    def whole(a):
        nd = a.ndim
        return pl.BlockSpec(a.shape, lambda s, _nd=nd: (0,) * _nd)

    kernel = functools.partial(_res2net_kernel, H=H, W=W, G=G, P=P, cout=cout,
                               tap_dtype=tap_dtype)
    out = pl.pallas_call(
        kernel,
        out_shape=jax.ShapeDtypeStruct((grid_n, cout, L), x_nchw.dtype),
        grid=(grid_n,),
        in_specs=[
            whole(row_ids), whole(col_ids),
            pl.BlockSpec((1, Cin, L), lambda s: (s, 0, 0)),
            whole(w13), whole(b1p), whole(wn), whole(bn), whole(w2p),
            whole(b23),
        ],
        out_specs=pl.BlockSpec((1, cout, L), lambda s: (s, 0, 0)),
        compiler_params=pltpu.CompilerParams(
            dimension_semantics=("parallel",)),
    )(row_ids, col_ids, x_flat, w13, b1p, wn, bn, w2p, b23)

    return (out.reshape(grid_n, cout, G, HW)
            .transpose(0, 2, 1, 3).reshape(N, cout, H, W))


# ----------------------------------------------------------------------------
# Deterministic parameter construction (synthetic, no checkpoint load)
# ----------------------------------------------------------------------------
def make_conv_params(key, cin, cout, k):
    k1, k2 = jax.random.split(key)
    fan_in = cin * k * k
    w = jax.random.normal(k1, (k, k, cin, cout), jnp.float32) / (fan_in ** 0.5)
    b = 0.01 * jax.random.normal(k2, (cout,), jnp.float32)
    return w, b


def make_params(key, in_channels, out_channels, kernel_size, kernel_size_neck,
                width):
    keys = jax.random.split(key, 6)
    return {
        "conv1": make_conv_params(keys[0], in_channels, width * 4, kernel_size),
        "convs": [
            make_conv_params(keys[1 + i], width, width, kernel_size_neck)
            for i in range(3)
        ],
        "conv2": make_conv_params(keys[4], width * 4, out_channels, kernel_size),
        "conv3": make_conv_params(keys[5], in_channels, out_channels, kernel_size),
    }


# ----------------------------------------------------------------------------
if __name__ == "__main__":
    # Small, module-consistent shapes (NCHW, matching the PyTorch convention).
    N, IN_C, H, W = 2, 4, 16, 16
    OUT_C = 8
    K = 3              # kernel_size
    K_NECK = 3         # kernel_size_neck
    WIDTH = 4          # width (conv1 out channels = width*4 = 16); stride = 1

    key = jax.random.PRNGKey(0)
    kx, kp = jax.random.split(key)

    x_nchw = jax.random.normal(kx, (N, IN_C, H, W), jnp.float32)
    params = make_params(kp, IN_C, OUT_C, K, K_NECK, WIDTH)

    fwd = jax.jit(functools.partial(res2net_block, width=WIDTH))
    out_nchw = jax.block_until_ready(fwd(x_nchw, params))

    assert out_nchw.shape == (N, OUT_C, H, W)
    assert bool(jnp.all(jnp.isfinite(out_nchw)))

    print("KERNEL_OK")
</pallas_src>

<mosaic_0001>
module attributes {stable_mosaic.version = 11 : i64} {
  func.func @_res2net_kernel(%arg0: i32, %arg1: memref<1x512xi32, #tpu.memory_space<vmem>>, %arg2: memref<1x512xi32, #tpu.memory_space<vmem>>, %arg3: memref<1x4x512xf32, #tpu.memory_space<vmem>>, %arg4: memref<9x40x4xbf16, #tpu.memory_space<vmem>>, %arg5: memref<4x8x1xf32, #tpu.memory_space<vmem>>, %arg6: memref<3x9x8x8xbf16, #tpu.memory_space<vmem>>, %arg7: memref<3x8x1xf32, #tpu.memory_space<vmem>>, %arg8: memref<9x8x32xbf16, #tpu.memory_space<vmem>>, %arg9: memref<8x1xf32, #tpu.memory_space<vmem>>, %arg10: memref<1x8x512xf32, #tpu.memory_space<vmem>>) attributes {dimension_semantics = [#tpu.dimension_semantics<parallel>], iteration_bounds = array<i64: 1>, scalar_prefetch = 0 : i64, scratch_operands = 0 : i64, tpu.core_type = #tpu.core_type<tc>, window_params = [{pipeline_mode = #tpu.pipeline_mode<synchronous>, transform_indices = @transform_0, window_bounds = array<i64: 1, 512>}, {pipeline_mode = #tpu.pipeline_mode<synchronous>, transform_indices = @transform_1, window_bounds = array<i64: 1, 512>}, {transform_indices = @transform_2, window_bounds = array<i64: 1, 4, 512>}, {pipeline_mode = #tpu.pipeline_mode<synchronous>, transform_indices = @transform_3, window_bounds = array<i64: 9, 40, 4>}, {pipeline_mode = #tpu.pipeline_mode<synchronous>, transform_indices = @transform_4, window_bounds = array<i64: 4, 8, 1>}, {pipeline_mode = #tpu.pipeline_mode<synchronous>, transform_indices = @transform_5, window_bounds = array<i64: 3, 9, 8, 8>}, {pipeline_mode = #tpu.pipeline_mode<synchronous>, transform_indices = @transform_6, window_bounds = array<i64: 3, 8, 1>}, {pipeline_mode = #tpu.pipeline_mode<synchronous>, transform_indices = @transform_7, window_bounds = array<i64: 9, 8, 32>}, {pipeline_mode = #tpu.pipeline_mode<synchronous>, transform_indices = @transform_8, window_bounds = array<i64: 8, 1>}, {transform_indices = @transform_9, window_bounds = array<i64: 1, 8, 512>}]} {
    %c0 = arith.constant 0 : index
    %c0_0 = arith.constant 0 : index
    %0 = vector.load %arg1[%c0, %c0_0] : memref<1x512xi32, #tpu.memory_space<vmem>>, vector<1x512xi32>
    %c0_1 = arith.constant 0 : index
    %c0_2 = arith.constant 0 : index
    %1 = vector.load %arg2[%c0_1, %c0_2] : memref<1x512xi32, #tpu.memory_space<vmem>>, vector<1x512xi32>
    %c0_i32 = arith.constant 0 : i32
    %2 = vector.broadcast %c0_i32 : i32 to vector<1x512xi32>
    %3 = arith.cmpi eq, %0, %2 : vector<1x512xi32>
    %c15_i32 = arith.constant 15 : i32
    %4 = vector.broadcast %c15_i32 : i32 to vector<1x512xi32>
    %5 = arith.cmpi eq, %0, %4 : vector<1x512xi32>
    %c0_i32_3 = arith.constant 0 : i32
    %6 = vector.broadcast %c0_i32_3 : i32 to vector<1x512xi32>
    %7 = arith.cmpi eq, %1, %6 : vector<1x512xi32>
    %c15_i32_4 = arith.constant 15 : i32
    %8 = vector.broadcast %c15_i32_4 : i32 to vector<1x512xi32>
    %9 = arith.cmpi eq, %1, %8 : vector<1x512xi32>
    %c0_5 = arith.constant 0 : index
    %c0_6 = arith.constant 0 : index
    %c0_7 = arith.constant 0 : index
    %10 = vector.load %arg3[%c0_5, %c0_6, %c0_7] : memref<1x4x512xf32, #tpu.memory_space<vmem>>, vector<1x4x512xf32>
    %11 = vector.shape_cast %10 : vector<1x4x512xf32> to vector<4x512xf32>
    %c16_i32 = arith.constant 16 : i32
    %12 = tpu.dynamic_rotate %11 by %c16_i32 dim 1 : vector<4x512xf32>, i32 -> vector<4x512xf32>
    %c496_i32 = arith.constant 496 : i32
    %13 = tpu.dynamic_rotate %11 by %c496_i32 dim 1 : vector<4x512xf32>, i32 -> vector<4x512xf32>
    %14 = vector.shape_cast %3 : vector<1x512xi1> to vector<1x512xi1>
    %15 = vector.broadcast %14 : vector<1x512xi1> to vector<4x512xi1>
    %16 = arith.select %15, %13, %12 : vector<4x512xi1>, vector<4x512xf32>
    %17 = vector.shape_cast %5 : vector<1x512xi1> to vector<1x512xi1>
    %18 = vector.broadcast %17 : vector<1x512xi1> to vector<4x512xi1>
    %19 = arith.select %18, %12, %13 : vector<4x512xi1>, vector<4x512xf32>
    %c1_i32 = arith.constant 1 : i32
    %20 = tpu.dynamic_rotate %16 by %c1_i32 dim 1 : vector<4x512xf32>, i32 -> vector<4x512xf32>
    %c511_i32 = arith.constant 511 : i32
    %21 = tpu.dynamic_rotate %16 by %c511_i32 dim 1 : vector<4x512xf32>, i32 -> vector<4x512xf32>
    %22 = vector.shape_cast %7 : vector<1x512xi1> to vector<1x512xi1>
    %23 = vector.broadcast %22 : vector<1x512xi1> to vector<4x512xi1>
    %24 = arith.select %23, %21, %20 : vector<4x512xi1>, vector<4x512xf32>
    %25 = vector.shape_cast %9 : vector<1x512xi1> to vector<1x512xi1>
    %26 = vector.broadcast %25 : vector<1x512xi1> to vector<4x512xi1>
    %27 = arith.select %26, %20, %21 : vector<4x512xi1>, vector<4x512xf32>
    %c1_i32_8 = arith.constant 1 : i32
    %28 = tpu.dynamic_rotate %11 by %c1_i32_8 dim 1 : vector<4x512xf32>, i32 -> vector<4x512xf32>
    %c511_i32_9 = arith.constant 511 : i32
    %29 = tpu.dynamic_rotate %11 by %c511_i32_9 dim 1 : vector<4x512xf32>, i32 -> vector<4x512xf32>
    %30 = vector.shape_cast %7 : vector<1x512xi1> to vector<1x512xi1>
    %31 = vector.broadcast %30 : vector<1x512xi1> to vector<4x512xi1>
    %32 = arith.select %31, %29, %28 : vector<4x512xi1>, vector<4x512xf32>
    %33 = vector.shape_cast %9 : vector<1x512xi1> to vector<1x512xi1>
    %34 = vector.broadcast %33 : vector<1x512xi1> to vector<4x512xi1>
    %35 = arith.select %34, %28, %29 : vector<4x512xi1>, vector<4x512xf32>
    %c1_i32_10 = arith.constant 1 : i32
    %36 = tpu.dynamic_rotate %19 by %c1_i32_10 dim 1 : vector<4x512xf32>, i32 -> vector<4x512xf32>
    %c511_i32_11 = arith.constant 511 : i32
    %37 = tpu.dynamic_rotate %19 by %c511_i32_11 dim 1 : vector<4x512xf32>, i32 -> vector<4x512xf32>
    %38 = vector.shape_cast %7 : vector<1x512xi1> to vector<1x512xi1>
    %39 = vector.broadcast %38 : vector<1x512xi1> to vector<4x512xi1>
    %40 = arith.select %39, %37, %36 : vector<4x512xi1>, vector<4x512xf32>
    %41 = vector.shape_cast %9 : vector<1x512xi1> to vector<1x512xi1>
    %42 = vector.broadcast %41 : vector<1x512xi1> to vector<4x512xi1>
    %43 = arith.select %42, %36, %37 : vector<4x512xi1>, vector<4x512xf32>
    %c0_12 = arith.constant 0 : index
    %c0_13 = arith.constant 0 : index
    %c0_14 = arith.constant 0 : index
    %44 = vector.load %arg4[%c0_12, %c0_13, %c0_14] : memref<9x40x4xbf16, #tpu.memory_space<vmem>>, vector<1x40x4xbf16>
    %45 = vector.shape_cast %44 : vector<1x40x4xbf16> to vector<40x4xbf16>
    %46 = arith.truncf %24 : vector<4x512xf32> to vector<4x512xbf16>
    %cst = arith.constant dense<0.000000e+00> : vector<40x512xf32>
    %47 = tpu.matmul %45, %46, %cst {dimension_numbers = #tpu.dot_dimension_numbers<[1], [0], [0], [1], [0, 0, 1, 1], [], []>} : vector<40x4xbf16>, vector<4x512xbf16>, vector<40x512xf32> -> vector<40x512xf32>
    %c1 = arith.constant 1 : index
    %c0_15 = arith.constant 0 : index
    %c0_16 = arith.constant 0 : index
    %48 = vector.load %arg4[%c1, %c0_15, %c0_16] : memref<9x40x4xbf16, #tpu.memory_space<vmem>>, vector<1x40x4xbf16>
    %49 = vector.shape_cast %48 : vector<1x40x4xbf16> to vector<40x4xbf16>
    %50 = arith.truncf %16 : vector<4x512xf32> to vector<4x512xbf16>
    %cst_17 = arith.constant dense<0.000000e+00> : vector<40x512xf32>
    %51 = tpu.matmul %49, %50, %cst_17 {dimension_numbers = #tpu.dot_dimension_numbers<[1], [0], [0], [1], [0, 0, 1, 1], [], []>} : vector<40x4xbf16>, vector<4x512xbf16>, vector<40x512xf32> -> vector<40x512xf32>
    %52 = arith.addf %47, %51 : vector<40x512xf32>
    %c2 = arith.constant 2 : index
    %c0_18 = arith.constant 0 : index
    %c0_19 = arith.constant 0 : index
    %53 = vector.load %arg4[%c2, %c0_18, %c0_19] : memref<9x40x4xbf16, #tpu.memory_space<vmem>>, vector<1x40x4xbf16>
    %54 = vector.shape_cast %53 : vector<1x40x4xbf16> to vector<40x4xbf16>
    %55 = arith.truncf %27 : vector<4x512xf32> to vector<4x512xbf16>
    %cst_20 = arith.constant dense<0.000000e+00> : vector<40x512xf32>
    %56 = tpu.matmul %54, %55, %cst_20 {dimension_numbers = #tpu.dot_dimension_numbers<[1], [0], [0], [1], [0, 0, 1, 1], [], []>} : vector<40x4xbf16>, vector<4x512xbf16>, vector<40x512xf32> -> vector<40x512xf32>
    %57 = arith.addf %52, %56 : vector<40x512xf32>
    %c3 = arith.constant 3 : index
    %c0_21 = arith.constant 0 : index
    %c0_22 = arith.constant 0 : index
    %58 = vector.load %arg4[%c3, %c0_21, %c0_22] : memref<9x40x4xbf16, #tpu.memory_space<vmem>>, vector<1x40x4xbf16>
    %59 = vector.shape_cast %58 : vector<1x40x4xbf16> to vector<40x4xbf16>
    %60 = arith.truncf %32 : vector<4x512xf32> to vector<4x512xbf16>
    %cst_23 = arith.constant dense<0.000000e+00> : vector<40x512xf32>
    %61 = tpu.matmul %59, %60, %cst_23 {dimension_numbers = #tpu.dot_dimension_numbers<[1], [0], [0], [1], [0, 0, 1, 1], [], []>} : vector<40x4xbf16>, vector<4x512xbf16>, vector<40x512xf32> -> vector<40x512xf32>
    %62 = arith.addf %57, %61 : vector<40x512xf32>
    %c4 = arith.constant 4 : index
    %c0_24 = arith.constant 0 : index
    %c0_25 = arith.constant 0 : index
    %63 = vector.load %arg4[%c4, %c0_24, %c0_25] : memref<9x40x4xbf16, #tpu.memory_space<vmem>>, vector<1x40x4xbf16>
    %64 = vector.shape_cast %63 : vector<1x40x4xbf16> to vector<40x4xbf16>
    %65 = arith.truncf %11 : vector<4x512xf32> to vector<4x512xbf16>
    %cst_26 = arith.constant dense<0.000000e+00> : vector<40x512xf32>
    %66 = tpu.matmul %64, %65, %cst_26 {dimension_numbers = #tpu.dot_dimension_numbers<[1], [0], [0], [1], [0, 0, 1, 1], [], []>} : vector<40x4xbf16>, vector<4x512xbf16>, vector<40x512xf32> -> vector<40x512xf32>
    %67 = arith.addf %62, %66 : vector<40x512xf32>
    %c5 = arith.constant 5 : index
    %c0_27 = arith.constant 0 : index
    %c0_28 = arith.constant 0 : index
    %68 = vector.load %arg4[%c5, %c0_27, %c0_28] : memref<9x40x4xbf16, #tpu.memory_space<vmem>>, vector<1x40x4xbf16>
    %69 = vector.shape_cast %68 : vector<1x40x4xbf16> to vector<40x4xbf16>
    %70 = arith.truncf %35 : vector<4x512xf32> to vector<4x512xbf16>
    %cst_29 = arith.constant dense<0.000000e+00> : vector<40x512xf32>
    %71 = tpu.matmul %69, %70, %cst_29 {dimension_numbers = #tpu.dot_dimension_numbers<[1], [0], [0], [1], [0, 0, 1, 1], [], []>} : vector<40x4xbf16>, vector<4x512xbf16>, vector<40x512xf32> -> vector<40x512xf32>
    %72 = arith.addf %67, %71 : vector<40x512xf32>
    %c6 = arith.constant 6 : index
    %c0_30 = arith.constant 0 : index
    %c0_31 = arith.constant 0 : index
    %73 = vector.load %arg4[%c6, %c0_30, %c0_31] : memref<9x40x4xbf16, #tpu.memory_space<vmem>>, vector<1x40x4xbf16>
    %74 = vector.shape_cast %73 : vector<1x40x4xbf16> to vector<40x4xbf16>
    %75 = arith.truncf %40 : vector<4x512xf32> to vector<4x512xbf16>
    %cst_32 = arith.constant dense<0.000000e+00> : vector<40x512xf32>
    %76 = tpu.matmul %74, %75, %cst_32 {dimension_numbers = #tpu.dot_dimension_numbers<[1], [0], [0], [1], [0, 0, 1, 1], [], []>} : vector<40x4xbf16>, vector<4x512xbf16>, vector<40x512xf32> -> vector<40x512xf32>
    %77 = arith.addf %72, %76 : vector<40x512xf32>
    %c7 = arith.constant 7 : index
    %c0_33 = arith.constant 0 : index
    %c0_34 = arith.constant 0 : index
    %78 = vector.load %arg4[%c7, %c0_33, %c0_34] : memref<9x40x4xbf16, #tpu.memory_space<vmem>>, vector<1x40x4xbf16>
    %79 = vector.shape_cast %78 : vector<1x40x4xbf16> to vector<40x4xbf16>
    %80 = arith.truncf %19 : vector<4x512xf32> to vector<4x512xbf16>
    %cst_35 = arith.constant dense<0.000000e+00> : vector<40x512xf32>
    %81 = tpu.matmul %79, %80, %cst_35 {dimension_numbers = #tpu.dot_dimension_numbers<[1], [0], [0], [1], [0, 0, 1, 1], [], []>} : vector<40x4xbf16>, vector<4x512xbf16>, vector<40x512xf32> -> vector<40x512xf32>
    %82 = arith.addf %77, %81 : vector<40x512xf32>
    %c8 = arith.constant 8 : index
    %c0_36 = arith.constant 0 : index
    %c0_37 = arith.constant 0 : index
    %83 = vector.load %arg4[%c8, %c0_36, %c0_37] : memref<9x40x4xbf16, #tpu.memory_space<vmem>>, vector<1x40x4xbf16>
    %84 = vector.shape_cast %83 : vector<1x40x4xbf16> to vector<40x4xbf16>
    %85 = arith.truncf %43 : vector<4x512xf32> to vector<4x512xbf16>
    %cst_38 = arith.constant dense<0.000000e+00> : vector<40x512xf32>
    %86 = tpu.matmul %84, %85, %cst_38 {dimension_numbers = #tpu.dot_dimension_numbers<[1], [0], [0], [1], [0, 0, 1, 1], [], []>} : vector<40x4xbf16>, vector<4x512xbf16>, vector<40x512xf32> -> vector<40x512xf32>
    %87 = arith.addf %82, %86 : vector<40x512xf32>
    %88 = vector.extract_strided_slice %87 {offsets = [32, 0], sizes = [8, 512], strides = [1, 1]} : vector<40x512xf32> to vector<8x512xf32>
    %89 = vector.extract_strided_slice %87 {offsets = [0, 0], sizes = [8, 512], strides = [1, 1]} : vector<40x512xf32> to vector<8x512xf32>
    %c0_39 = arith.constant 0 : index
    %c0_40 = arith.constant 0 : index
    %c0_41 = arith.constant 0 : index
    %90 = vector.load %arg5[%c0_39, %c0_40, %c0_41] : memref<4x8x1xf32, #tpu.memory_space<vmem>>, vector<1x8x1xf32>
    %91 = vector.shape_cast %90 : vector<1x8x1xf32> to vector<8x1xf32>
    %92 = vector.broadcast %91 : vector<8x1xf32> to vector<8x512xf32>
    %93 = arith.addf %89, %92 : vector<8x512xf32>
    %cst_42 = arith.constant 2.000000e-01 : f32
    %94 = vector.broadcast %cst_42 : f32 to vector<8x512xf32>
    %95 = arith.mulf %94, %93 : vector<8x512xf32>
    %96 = arith.maximumf %93, %95 : vector<8x512xf32>
    %97 = vector.extract_strided_slice %96 {offsets = [0, 0], sizes = [8, 256], strides = [1, 1]} : vector<8x512xf32> to vector<8x256xf32>
    %cst_43 = arith.constant dense<0.000000e+00> : vector<8xf32>
    %98 = vector.multi_reduction <add>, %97, %cst_43 [1] : vector<8x256xf32> to vector<8xf32>
    %99 = vector.shape_cast %98 : vector<8xf32> to vector<8x1xf32>
    %100 = arith.mulf %97, %97 : vector<8x256xf32>
    %cst_44 = arith.constant dense<0.000000e+00> : vector<8xf32>
    %101 = vector.multi_reduction <add>, %100, %cst_44 [1] : vector<8x256xf32> to vector<8xf32>
    %102 = vector.shape_cast %101 : vector<8xf32> to vector<8x1xf32>
    %cst_45 = arith.constant 3.906250e-03 : f32
    %103 = vector.broadcast %cst_45 : f32 to vector<8x1xf32>
    %104 = arith.mulf %99, %103 : vector<8x1xf32>
    %cst_46 = arith.constant 3.906250e-03 : f32
    %105 = vector.broadcast %cst_46 : f32 to vector<8x1xf32>
    %106 = arith.mulf %102, %105 : vector<8x1xf32>
    %107 = arith.mulf %104, %104 : vector<8x1xf32>
    %108 = arith.subf %106, %107 : vector<8x1xf32>
    %109 = vector.broadcast %104 : vector<8x1xf32> to vector<8x256xf32>
    %110 = arith.subf %97, %109 : vector<8x256xf32>
    %cst_47 = arith.constant 9.99999974E-6 : f32
    %111 = vector.broadcast %cst_47 : f32 to vector<8x1xf32>
    %112 = arith.addf %108, %111 : vector<8x1xf32>
    %113 = math.rsqrt %112 : vector<8x1xf32>
    %114 = vector.broadcast %113 : vector<8x1xf32> to vector<8x256xf32>
    %115 = arith.mulf %110, %114 : vector<8x256xf32>
    %116 = vector.extract_strided_slice %96 {offsets = [0, 256], sizes = [8, 256], strides = [1, 1]} : vector<8x512xf32> to vector<8x256xf32>
    %cst_48 = arith.constant dense<0.000000e+00> : vector<8xf32>
    %117 = vector.multi_reduction <add>, %116, %cst_48 [1] : vector<8x256xf32> to vector<8xf32>
    %118 = vector.shape_cast %117 : vector<8xf32> to vector<8x1xf32>
    %119 = arith.mulf %116, %116 : vector<8x256xf32>
    %cst_49 = arith.constant dense<0.000000e+00> : vector<8xf32>
    %120 = vector.multi_reduction <add>, %119, %cst_49 [1] : vector<8x256xf32> to vector<8xf32>
    %121 = vector.shape_cast %120 : vector<8xf32> to vector<8x1xf32>
    %cst_50 = arith.constant 3.906250e-03 : f32
    %122 = vector.broadcast %cst_50 : f32 to vector<8x1xf32>
    %123 = arith.mulf %118, %122 : vector<8x1xf32>
    %cst_51 = arith.constant 3.906250e-03 : f32
    %124 = vector.broadcast %cst_51 : f32 to vector<8x1xf32>
    %125 = arith.mulf %121, %124 : vector<8x1xf32>
    %126 = arith.mulf %123, %123 : vector<8x1xf32>
    %127 = arith.subf %125, %126 : vector<8x1xf32>
    %128 = vector.broadcast %123 : vector<8x1xf32> to vector<8x256xf32>
    %129 = arith.subf %116, %128 : vector<8x256xf32>
    %cst_52 = arith.constant 9.99999974E-6 : f32
    %130 = vector.broadcast %cst_52 : f32 to vector<8x1xf32>
    %131 = arith.addf %127, %130 : vector<8x1xf32>
    %132 = math.rsqrt %131 : vector<8x1xf32>
    %133 = vector.broadcast %132 : vector<8x1xf32> to vector<8x256xf32>
    %134 = arith.mulf %129, %133 : vector<8x256xf32>
    %135 = tpu.concatenate %115, %134 in 1 : vector<8x256xf32>, vector<8x256xf32> -> vector<8x512xf32>
    %136 = vector.extract_strided_slice %87 {offsets = [8, 0], sizes = [8, 512], strides = [1, 1]} : vector<40x512xf32> to vector<8x512xf32>
    %c1_53 = arith.constant 1 : index
    %c0_54 = arith.constant 0 : index
    %c0_55 = arith.constant 0 : index
    %137 = vector.load %arg5[%c1_53, %c0_54, %c0_55] : memref<4x8x1xf32, #tpu.memory_space<vmem>>, vector<1x8x1xf32>
    %138 = vector.shape_cast %137 : vector<1x8x1xf32> to vector<8x1xf32>
    %139 = vector.broadcast %138 : vector<8x1xf32> to vector<8x512xf32>
    %140 = arith.addf %136, %139 : vector<8x512xf32>
    %cst_56 = arith.constant 2.000000e-01 : f32
    %141 = vector.broadcast %cst_56 : f32 to vector<8x512xf32>
    %142 = arith.mulf %141, %140 : vector<8x512xf32>
    %143 = arith.maximumf %140, %142 : vector<8x512xf32>
    %144 = vector.extract_strided_slice %143 {offsets = [0, 0], sizes = [8, 256], strides = [1, 1]} : vector<8x512xf32> to vector<8x256xf32>
    %cst_57 = arith.constant dense<0.000000e+00> : vector<8xf32>
    %145 = vector.multi_reduction <add>, %144, %cst_57 [1] : vector<8x256xf32> to vector<8xf32>
    %146 = vector.shape_cast %145 : vector<8xf32> to vector<8x1xf32>
    %147 = arith.mulf %144, %144 : vector<8x256xf32>
    %cst_58 = arith.constant dense<0.000000e+00> : vector<8xf32>
    %148 = vector.multi_reduction <add>, %147, %cst_58 [1] : vector<8x256xf32> to vector<8xf32>
    %149 = vector.shape_cast %148 : vector<8xf32> to vector<8x1xf32>
    %cst_59 = arith.constant 3.906250e-03 : f32
    %150 = vector.broadcast %cst_59 : f32 to vector<8x1xf32>
    %151 = arith.mulf %146, %150 : vector<8x1xf32>
    %cst_60 = arith.constant 3.906250e-03 : f32
    %152 = vector.broadcast %cst_60 : f32 to vector<8x1xf32>
    %153 = arith.mulf %149, %152 : vector<8x1xf32>
    %154 = arith.mulf %151, %151 : vector<8x1xf32>
    %155 = arith.subf %153, %154 : vector<8x1xf32>
    %156 = vector.broadcast %151 : vector<8x1xf32> to vector<8x256xf32>
    %157 = arith.subf %144, %156 : vector<8x256xf32>
    %cst_61 = arith.constant 9.99999974E-6 : f32
    %158 = vector.broadcast %cst_61 : f32 to vector<8x1xf32>
    %159 = arith.addf %155, %158 : vector<8x1xf32>
    %160 = math.rsqrt %159 : vector<8x1xf32>
    %161 = vector.broadcast %160 : vector<8x1xf32> to vector<8x256xf32>
    %162 = arith.mulf %157, %161 : vector<8x256xf32>
    %163 = vector.extract_strided_slice %143 {offsets = [0, 256], sizes = [8, 256], strides = [1, 1]} : vector<8x512xf32> to vector<8x256xf32>
    %cst_62 = arith.constant dense<0.000000e+00> : vector<8xf32>
    %164 = vector.multi_reduction <add>, %163, %cst_62 [1] : vector<8x256xf32> to vector<8xf32>
    %165 = vector.shape_cast %164 : vector<8xf32> to vector<8x1xf32>
    %166 = arith.mulf %163, %163 : vector<8x256xf32>
    %cst_63 = arith.constant dense<0.000000e+00> : vector<8xf32>
    %167 = vector.multi_reduction <add>, %166, %cst_63 [1] : vector<8x256xf32> to vector<8xf32>
    %168 = vector.shape_cast %167 : vector<8xf32> to vector<8x1xf32>
    %cst_64 = arith.constant 3.906250e-03 : f32
    %169 = vector.broadcast %cst_64 : f32 to vector<8x1xf32>
    %170 = arith.mulf %165, %169 : vector<8x1xf32>
    %cst_65 = arith.constant 3.906250e-03 : f32
    %171 = vector.broadcast %cst_65 : f32 to vector<8x1xf32>
    %172 = arith.mulf %168, %171 : vector<8x1xf32>
    %173 = arith.mulf %170, %170 : vector<8x1xf32>
    %174 = arith.subf %172, %173 : vector<8x1xf32>
    %175 = vector.broadcast %170 : vector<8x1xf32> to vector<8x256xf32>
    %176 = arith.subf %163, %175 : vector<8x256xf32>
    %cst_66 = arith.constant 9.99999974E-6 : f32
    %177 = vector.broadcast %cst_66 : f32 to vector<8x1xf32>
    %178 = arith.addf %174, %177 : vector<8x1xf32>
    %179 = math.rsqrt %178 : vector<8x1xf32>
    %180 = vector.broadcast %179 : vector<8x1xf32> to vector<8x256xf32>
    %181 = arith.mulf %176, %180 : vector<8x256xf32>
    %182 = tpu.concatenate %162, %181 in 1 : vector<8x256xf32>, vector<8x256xf32> -> vector<8x512xf32>
    %183 = vector.extract_strided_slice %87 {offsets = [16, 0], sizes = [8, 512], strides = [1, 1]} : vector<40x512xf32> to vector<8x512xf32>
    %c2_67 = arith.constant 2 : index
    %c0_68 = arith.constant 0 : index
    %c0_69 = arith.constant 0 : index
    %184 = vector.load %arg5[%c2_67, %c0_68, %c0_69] : memref<4x8x1xf32, #tpu.memory_space<vmem>>, vector<1x8x1xf32>
    %185 = vector.shape_cast %184 : vector<1x8x1xf32> to vector<8x1xf32>
    %186 = vector.broadcast %185 : vector<8x1xf32> to vector<8x512xf32>
    %187 = arith.addf %183, %186 : vector<8x512xf32>
    %cst_70 = arith.constant 2.000000e-01 : f32
    %188 = vector.broadcast %cst_70 : f32 to vector<8x512xf32>
    %189 = arith.mulf %188, %187 : vector<8x512xf32>
    %190 = arith.maximumf %187, %189 : vector<8x512xf32>
    %191 = vector.extract_strided_slice %190 {offsets = [0, 0], sizes = [8, 256], strides = [1, 1]} : vector<8x512xf32> to vector<8x256xf32>
    %cst_71 = arith.constant dense<0.000000e+00> : vector<8xf32>
    %192 = vector.multi_reduction <add>, %191, %cst_71 [1] : vector<8x256xf32> to vector<8xf32>
    %193 = vector.shape_cast %192 : vector<8xf32> to vector<8x1xf32>
    %194 = arith.mulf %191, %191 : vector<8x256xf32>
    %cst_72 = arith.constant dense<0.000000e+00> : vector<8xf32>
    %195 = vector.multi_reduction <add>, %194, %cst_72 [1] : vector<8x256xf32> to vector<8xf32>
    %196 = vector.shape_cast %195 : vector<8xf32> to vector<8x1xf32>
    %cst_73 = arith.constant 3.906250e-03 : f32
    %197 = vector.broadcast %cst_73 : f32 to vector<8x1xf32>
    %198 = arith.mulf %193, %197 : vector<8x1xf32>
    %cst_74 = arith.constant 3.906250e-03 : f32
    %199 = vector.broadcast %cst_74 : f32 to vector<8x1xf32>
    %200 = arith.mulf %196, %199 : vector<8x1xf32>
    %201 = arith.mulf %198, %198 : vector<8x1xf32>
    %202 = arith.subf %200, %201 : vector<8x1xf32>
    %203 = vector.broadcast %198 : vector<8x1xf32> to vector<8x256xf32>
    %204 = arith.subf %191, %203 : vector<8x256xf32>
    %cst_75 = arith.constant 9.99999974E-6 : f32
    %205 = vector.broadcast %cst_75 : f32 to vector<8x1xf32>
    %206 = arith.addf %202, %205 : vector<8x1xf32>
    %207 = math.rsqrt %206 : vector<8x1xf32>
    %208 = vector.broadcast %207 : vector<8x1xf32> to vector<8x256xf32>
    %209 = arith.mulf %204, %208 : vector<8x256xf32>
    %210 = vector.extract_strided_slice %190 {offsets = [0, 256], sizes = [8, 256], strides = [1, 1]} : vector<8x512xf32> to vector<8x256xf32>
    %cst_76 = arith.constant dense<0.000000e+00> : vector<8xf32>
    %211 = vector.multi_reduction <add>, %210, %cst_76 [1] : vector<8x256xf32> to vector<8xf32>
    %212 = vector.shape_cast %211 : vector<8xf32> to vector<8x1xf32>
    %213 = arith.mulf %210, %210 : vector<8x256xf32>
    %cst_77 = arith.constant dense<0.000000e+00> : vector<8xf32>
    %214 = vector.multi_reduction <add>, %213, %cst_77 [1] : vector<8x256xf32> to vector<8xf32>
    %215 = vector.shape_cast %214 : vector<8xf32> to vector<8x1xf32>
    %cst_78 = arith.constant 3.906250e-03 : f32
    %216 = vector.broadcast %cst_78 : f32 to vector<8x1xf32>
    %217 = arith.mulf %212, %216 : vector<8x1xf32>
    %cst_79 = arith.constant 3.906250e-03 : f32
    %218 = vector.broadcast %cst_79 : f32 to vector<8x1xf32>
    %219 = arith.mulf %215, %218 : vector<8x1xf32>
    %220 = arith.mulf %217, %217 : vector<8x1xf32>
    %221 = arith.subf %219, %220 : vector<8x1xf32>
    %222 = vector.broadcast %217 : vector<8x1xf32> to vector<8x256xf32>
    %223 = arith.subf %210, %222 : vector<8x256xf32>
    %cst_80 = arith.constant 9.99999974E-6 : f32
    %224 = vector.broadcast %cst_80 : f32 to vector<8x1xf32>
    %225 = arith.addf %221, %224 : vector<8x1xf32>
    %226 = math.rsqrt %225 : vector<8x1xf32>
    %227 = vector.broadcast %226 : vector<8x1xf32> to vector<8x256xf32>
    %228 = arith.mulf %223, %227 : vector<8x256xf32>
    %229 = tpu.concatenate %209, %228 in 1 : vector<8x256xf32>, vector<8x256xf32> -> vector<8x512xf32>
    %230 = vector.extract_strided_slice %87 {offsets = [24, 0], sizes = [8, 512], strides = [1, 1]} : vector<40x512xf32> to vector<8x512xf32>
    %c3_81 = arith.constant 3 : index
    %c0_82 = arith.constant 0 : index
    %c0_83 = arith.constant 0 : index
    %231 = vector.load %arg5[%c3_81, %c0_82, %c0_83] : memref<4x8x1xf32, #tpu.memory_space<vmem>>, vector<1x8x1xf32>
    %232 = vector.shape_cast %231 : vector<1x8x1xf32> to vector<8x1xf32>
    %233 = vector.broadcast %232 : vector<8x1xf32> to vector<8x512xf32>
    %234 = arith.addf %230, %233 : vector<8x512xf32>
    %cst_84 = arith.constant 2.000000e-01 : f32
    %235 = vector.broadcast %cst_84 : f32 to vector<8x512xf32>
    %236 = arith.mulf %235, %234 : vector<8x512xf32>
    %237 = arith.maximumf %234, %236 : vector<8x512xf32>
    %238 = vector.extract_strided_slice %237 {offsets = [0, 0], sizes = [8, 256], strides = [1, 1]} : vector<8x512xf32> to vector<8x256xf32>
    %cst_85 = arith.constant dense<0.000000e+00> : vector<8xf32>
    %239 = vector.multi_reduction <add>, %238, %cst_85 [1] : vector<8x256xf32> to vector<8xf32>
    %240 = vector.shape_cast %239 : vector<8xf32> to vector<8x1xf32>
    %241 = arith.mulf %238, %238 : vector<8x256xf32>
    %cst_86 = arith.constant dense<0.000000e+00> : vector<8xf32>
    %242 = vector.multi_reduction <add>, %241, %cst_86 [1] : vector<8x256xf32> to vector<8xf32>
    %243 = vector.shape_cast %242 : vector<8xf32> to vector<8x1xf32>
    %cst_87 = arith.constant 3.906250e-03 : f32
    %244 = vector.broadcast %cst_87 : f32 to vector<8x1xf32>
    %245 = arith.mulf %240, %244 : vector<8x1xf32>
    %cst_88 = arith.constant 3.906250e-03 : f32
    %246 = vector.broadcast %cst_88 : f32 to vector<8x1xf32>
    %247 = arith.mulf %243, %246 : vector<8x1xf32>
    %248 = arith.mulf %245, %245 : vector<8x1xf32>
    %249 = arith.subf %247, %248 : vector<8x1xf32>
    %250 = vector.broadcast %245 : vector<8x1xf32> to vector<8x256xf32>
    %251 = arith.subf %238, %250 : vector<8x256xf32>
    %cst_89 = arith.constant 9.99999974E-6 : f32
    %252 = vector.broadcast %cst_89 : f32 to vector<8x1xf32>
    %253 = arith.addf %249, %252 : vector<8x1xf32>
    %254 = math.rsqrt %253 : vector<8x1xf32>
    %255 = vector.broadcast %254 : vector<8x1xf32> to vector<8x256xf32>
    %256 = arith.mulf %251, %255 : vector<8x256xf32>
    %257 = vector.extract_strided_slice %237 {offsets = [0, 256], sizes = [8, 256], strides = [1, 1]} : vector<8x512xf32> to vector<8x256xf32>
    %cst_90 = arith.constant dense<0.000000e+00> : vector<8xf32>
    %258 = vector.multi_reduction <add>, %257, %cst_90 [1] : vector<8x256xf32> to vector<8xf32>
    %259 = vector.shape_cast %258 : vector<8xf32> to vector<8x1xf32>
    %260 = arith.mulf %257, %257 : vector<8x256xf32>
    %cst_91 = arith.constant dense<0.000000e+00> : vector<8xf32>
    %261 = vector.multi_reduction <add>, %260, %cst_91 [1] : vector<8x256xf32> to vector<8xf32>
    %262 = vector.shape_cast %261 : vector<8xf32> to vector<8x1xf32>
    %cst_92 = arith.constant 3.906250e-03 : f32
    %263 = vector.broadcast %cst_92 : f32 to vector<8x1xf32>
    %264 = arith.mulf %259, %263 : vector<8x1xf32>
    %cst_93 = arith.constant 3.906250e-03 : f32
    %265 = vector.broadcast %cst_93 : f32 to vector<8x1xf32>
    %266 = arith.mulf %262, %265 : vector<8x1xf32>
    %267 = arith.mulf %264, %264 : vector<8x1xf32>
    %268 = arith.subf %266, %267 : vector<8x1xf32>
    %269 = vector.broadcast %264 : vector<8x1xf32> to vector<8x256xf32>
    %270 = arith.subf %257, %269 : vector<8x256xf32>
    %cst_94 = arith.constant 9.99999974E-6 : f32
    %271 = vector.broadcast %cst_94 : f32 to vector<8x1xf32>
    %272 = arith.addf %268, %271 : vector<8x1xf32>
    %273 = math.rsqrt %272 : vector<8x1xf32>
    %274 = vector.broadcast %273 : vector<8x1xf32> to vector<8x256xf32>
    %275 = arith.mulf %270, %274 : vector<8x256xf32>
    %276 = tpu.concatenate %256, %275 in 1 : vector<8x256xf32>, vector<8x256xf32> -> vector<8x512xf32>
    %c16_i32_95 = arith.constant 16 : i32
    %277 = tpu.dynamic_rotate %135 by %c16_i32_95 dim 1 : vector<8x512xf32>, i32 -> vector<8x512xf32>
    %c496_i32_96 = arith.constant 496 : i32
    %278 = tpu.dynamic_rotate %135 by %c496_i32_96 dim 1 : vector<8x512xf32>, i32 -> vector<8x512xf32>
    %279 = vector.shape_cast %3 : vector<1x512xi1> to vector<1x512xi1>
    %280 = vector.broadcast %279 : vector<1x512xi1> to vector<8x512xi1>
    %281 = arith.select %280, %278, %277 : vector<8x512xi1>, vector<8x512xf32>
    %282 = vector.shape_cast %5 : vector<1x512xi1> to vector<1x512xi1>
    %283 = vector.broadcast %282 : vector<1x512xi1> to vector<8x512xi1>
    %284 = arith.select %283, %277, %278 : vector<8x512xi1>, vector<8x512xf32>
    %c1_i32_97 = arith.constant 1 : i32
    %285 = tpu.dynamic_rotate %281 by %c1_i32_97 dim 1 : vector<8x512xf32>, i32 -> vector<8x512xf32>
    %c511_i32_98 = arith.constant 511 : i32
    %286 = tpu.dynamic_rotate %281 by %c511_i32_98 dim 1 : vector<8x512xf32>, i32 -> vector<8x512xf32>
    %287 = vector.shape_cast %7 : vector<1x512xi1> to vector<1x512xi1>
    %288 = vector.broadcast %287 : vector<1x512xi1> to vector<8x512xi1>
    %289 = arith.select %288, %286, %285 : vector<8x512xi1>, vector<8x512xf32>
    %290 = vector.shape_cast %9 : vector<1x512xi1> to vector<1x512xi1>
    %291 = vector.broadcast %290 : vector<1x512xi1> to vector<8x512xi1>
    %292 = arith.select %291, %285, %286 : vector<8x512xi1>, vector<8x512xf32>
    %c1_i32_99 = arith.constant 1 : i32
    %293 = tpu.dynamic_rotate %135 by %c1_i32_99 dim 1 : vector<8x512xf32>, i32 -> vector<8x512xf32>
    %c511_i32_100 = arith.constant 511 : i32
    %294 = tpu.dynamic_rotate %135 by %c511_i32_100 dim 1 : vector<8x512xf32>, i32 -> vector<8x512xf32>
    %295 = vector.shape_cast %7 : vector<1x512xi1> to vector<1x512xi1>
    %296 = vector.broadcast %295 : vector<1x512xi1> to vector<8x512xi1>
    %297 = arith.select %296, %294, %293 : vector<8x512xi1>, vector<8x512xf32>
    %298 = vector.shape_cast %9 : vector<1x512xi1> to vector<1x512xi1>
    %299 = vector.broadcast %298 : vector<1x512xi1> to vector<8x512xi1>
    %300 = arith.select %299, %293, %294 : vector<8x512xi1>, vector<8x512xf32>
    %c1_i32_101 = arith.constant 1 : i32
    %301 = tpu.dynamic_rotate %284 by %c1_i32_101 dim 1 : vector<8x512xf32>, i32 -> vector<8x512xf32>
    %c511_i32_102 = arith.constant 511 : i32
    %302 = tpu.dynamic_rotate %284 by %c511_i32_102 dim 1 : vector<8x512xf32>, i32 -> vector<8x512xf32>
    %303 = vector.shape_cast %7 : vector<1x512xi1> to vector<1x512xi1>
    %304 = vector.broadcast %303 : vector<1x512xi1> to vector<8x512xi1>
    %305 = arith.select %304, %302, %301 : vector<8x512xi1>, vector<8x512xf32>
    %306 = vector.shape_cast %9 : vector<1x512xi1> to vector<1x512xi1>
    %307 = vector.broadcast %306 : vector<1x512xi1> to vector<8x512xi1>
    %308 = arith.select %307, %301, %302 : vector<8x512xi1>, vector<8x512xf32>
    %c0_103 = arith.constant 0 : index
    %c0_104 = arith.constant 0 : index
    %c0_105 = arith.constant 0 : index
    %c0_106 = arith.constant 0 : index
    %309 = vector.load %arg6[%c0_103, %c0_104, %c0_105, %c0_106] : memref<3x9x8x8xbf16, #tpu.memory_space<vmem>>, vector<1x1x8x8xbf16>
    %310 = vector.shape_cast %309 : vector<1x1x8x8xbf16> to vector<8x8xbf16>
    %311 = arith.truncf %289 : vector<8x512xf32> to vector<8x512xbf16>
    %cst_107 = arith.constant dense<0.000000e+00> : vector<8x512xf32>
    %312 = tpu.matmul %310, %311, %cst_107 {dimension_numbers = #tpu.dot_dimension_numbers<[1], [0], [0], [1], [0, 0, 1, 1], [], []>} : vector<8x8xbf16>, vector<8x512xbf16>, vector<8x512xf32> -> vector<8x512xf32>
    %c0_108 = arith.constant 0 : index
    %c1_109 = arith.constant 1 : index
    %c0_110 = arith.constant 0 : index
    %c0_111 = arith.constant 0 : index
    %313 = vector.load %arg6[%c0_108, %c1_109, %c0_110, %c0_111] : memref<3x9x8x8xbf16, #tpu.memory_space<vmem>>, vector<1x1x8x8xbf16>
    %314 = vector.shape_cast %313 : vector<1x1x8x8xbf16> to vector<8x8xbf16>
    %315 = arith.truncf %281 : vector<8x512xf32> to vector<8x512xbf16>
    %cst_112 = arith.constant dense<0.000000e+00> : vector<8x512xf32>
    %316 = tpu.matmul %314, %315, %cst_112 {dimension_numbers = #tpu.dot_dimension_numbers<[1], [0], [0], [1], [0, 0, 1, 1], [], []>} : vector<8x8xbf16>, vector<8x512xbf16>, vector<8x512xf32> -> vector<8x512xf32>
    %317 = arith.addf %312, %316 : vector<8x512xf32>
    %c0_113 = arith.constant 0 : index
    %c2_114 = arith.constant 2 : index
    %c0_115 = arith.constant 0 : index
    %c0_116 = arith.constant 0 : index
    %318 = vector.load %arg6[%c0_113, %c2_114, %c0_115, %c0_116] : memref<3x9x8x8xbf16, #tpu.memory_space<vmem>>, vector<1x1x8x8xbf16>
    %319 = vector.shape_cast %318 : vector<1x1x8x8xbf16> to vector<8x8xbf16>
    %320 = arith.truncf %292 : vector<8x512xf32> to vector<8x512xbf16>
    %cst_117 = arith.constant dense<0.000000e+00> : vector<8x512xf32>
    %321 = tpu.matmul %319, %320, %cst_117 {dimension_numbers = #tpu.dot_dimension_numbers<[1], [0], [0], [1], [0, 0, 1, 1], [], []>} : vector<8x8xbf16>, vector<8x512xbf16>, vector<8x512xf32> -> vector<8x512xf32>
    %322 = arith.addf %317, %321 : vector<8x512xf32>
    %c0_118 = arith.constant 0 : index
    %c3_119 = arith.constant 3 : index
    %c0_120 = arith.constant 0 : index
    %c0_121 = arith.constant 0 : index
    %323 = vector.load %arg6[%c0_118, %c3_119, %c0_120, %c0_121] : memref<3x9x8x8xbf16, #tpu.memory_space<vmem>>, vector<1x1x8x8xbf16>
    %324 = vector.shape_cast %323 : vector<1x1x8x8xbf16> to vector<8x8xbf16>
    %325 = arith.truncf %297 : vector<8x512xf32> to vector<8x512xbf16>
    %cst_122 = arith.constant dense<0.000000e+00> : vector<8x512xf32>
    %326 = tpu.matmul %324, %325, %cst_122 {dimension_numbers = #tpu.dot_dimension_numbers<[1], [0], [0], [1], [0, 0, 1, 1], [], []>} : vector<8x8xbf16>, vector<8x512xbf16>, vector<8x512xf32> -> vector<8x512xf32>
    %327 = arith.addf %322, %326 : vector<8x512xf32>
    %c0_123 = arith.constant 0 : index
    %c4_124 = arith.constant 4 : index
    %c0_125 = arith.constant 0 : index
    %c0_126 = arith.constant 0 : index
    %328 = vector.load %arg6[%c0_123, %c4_124, %c0_125, %c0_126] : memref<3x9x8x8xbf16, #tpu.memory_space<vmem>>, vector<1x1x8x8xbf16>
    %329 = vector.shape_cast %328 : vector<1x1x8x8xbf16> to vector<8x8xbf16>
    %330 = arith.truncf %135 : vector<8x512xf32> to vector<8x512xbf16>
    %cst_127 = arith.constant dense<0.000000e+00> : vector<8x512xf32>
    %331 = tpu.matmul %329, %330, %cst_127 {dimension_numbers = #tpu.dot_dimension_numbers<[1], [0], [0], [1], [0, 0, 1, 1], [], []>} : vector<8x8xbf16>, vector<8x512xbf16>, vector<8x512xf32> -> vector<8x512xf32>
    %332 = arith.addf %327, %331 : vector<8x512xf32>
    %c0_128 = arith.constant 0 : index
    %c5_129 = arith.constant 5 : index
    %c0_130 = arith.constant 0 : index
    %c0_131 = arith.constant 0 : index
    %333 = vector.load %arg6[%c0_128, %c5_129, %c0_130, %c0_131] : memref<3x9x8x8xbf16, #tpu.memory_space<vmem>>, vector<1x1x8x8xbf16>
    %334 = vector.shape_cast %333 : vector<1x1x8x8xbf16> to vector<8x8xbf16>
    %335 = arith.truncf %300 : vector<8x512xf32> to vector<8x512xbf16>
    %cst_132 = arith.constant dense<0.000000e+00> : vector<8x512xf32>
    %336 = tpu.matmul %334, %335, %cst_132 {dimension_numbers = #tpu.dot_dimension_numbers<[1], [0], [0], [1], [0, 0, 1, 1], [], []>} : vector<8x8xbf16>, vector<8x512xbf16>, vector<8x512xf32> -> vector<8x512xf32>
    %337 = arith.addf %332, %336 : vector<8x512xf32>
    %c0_133 = arith.constant 0 : index
    %c6_134 = arith.constant 6 : index
    %c0_135 = arith.constant 0 : index
    %c0_136 = arith.constant 0 : index
    %338 = vector.load %arg6[%c0_133, %c6_134, %c0_135, %c0_136] : memref<3x9x8x8xbf16, #tpu.memory_space<vmem>>, vector<1x1x8x8xbf16>
    %339 = vector.shape_cast %338 : vector<1x1x8x8xbf16> to vector<8x8xbf16>
    %340 = arith.truncf %305 : vector<8x512xf32> to vector<8x512xbf16>
    %cst_137 = arith.constant dense<0.000000e+00> : vector<8x512xf32>
    %341 = tpu.matmul %339, %340, %cst_137 {dimension_numbers = #tpu.dot_dimension_numbers<[1], [0], [0], [1], [0, 0, 1, 1], [], []>} : vector<8x8xbf16>, vector<8x512xbf16>, vector<8x512xf32> -> vector<8x512xf32>
    %342 = arith.addf %337, %341 : vector<8x512xf32>
    %c0_138 = arith.constant 0 : index
    %c7_139 = arith.constant 7 : index
    %c0_140 = arith.constant 0 : index
    %c0_141 = arith.constant 0 : index
    %343 = vector.load %arg6[%c0_138, %c7_139, %c0_140, %c0_141] : memref<3x9x8x8xbf16, #tpu.memory_space<vmem>>, vector<1x1x8x8xbf16>
    %344 = vector.shape_cast %343 : vector<1x1x8x8xbf16> to vector<8x8xbf16>
    %345 = arith.truncf %284 : vector<8x512xf32> to vector<8x512xbf16>
    %cst_142 = arith.constant dense<0.000000e+00> : vector<8x512xf32>
    %346 = tpu.matmul %344, %345, %cst_142 {dimension_numbers = #tpu.dot_dimension_numbers<[1], [0], [0], [1], [0, 0, 1, 1], [], []>} : vector<8x8xbf16>, vector<8x512xbf16>, vector<8x512xf32> -> vector<8x512xf32>
    %347 = arith.addf %342, %346 : vector<8x512xf32>
    %c0_143 = arith.constant 0 : index
    %c8_144 = arith.constant 8 : index
    %c0_145 = arith.constant 0 : index
    %c0_146 = arith.constant 0 : index
    %348 = vector.load %arg6[%c0_143, %c8_144, %c0_145, %c0_146] : memref<3x9x8x8xbf16, #tpu.memory_space<vmem>>, vector<1x1x8x8xbf16>
    %349 = vector.shape_cast %348 : vector<1x1x8x8xbf16> to vector<8x8xbf16>
    %350 = arith.truncf %308 : vector<8x512xf32> to vector<8x512xbf16>
    %cst_147 = arith.constant dense<0.000000e+00> : vector<8x512xf32>
    %351 = tpu.matmul %349, %350, %cst_147 {dimension_numbers = #tpu.dot_dimension_numbers<[1], [0], [0], [1], [0, 0, 1, 1], [], []>} : vector<8x8xbf16>, vector<8x512xbf16>, vector<8x512xf32> -> vector<8x512xf32>
    %352 = arith.addf %347, %351 : vector<8x512xf32>
    %c0_148 = arith.constant 0 : index
    %c0_149 = arith.constant 0 : index
    %c0_150 = arith.constant 0 : index
    %353 = vector.load %arg7[%c0_148, %c0_149, %c0_150] : memref<3x8x1xf32, #tpu.memory_space<vmem>>, vector<1x8x1xf32>
    %354 = vector.shape_cast %353 : vector<1x8x1xf32> to vector<8x1xf32>
    %355 = vector.broadcast %354 : vector<8x1xf32> to vector<8x512xf32>
    %356 = arith.addf %352, %355 : vector<8x512xf32>
    %cst_151 = arith.constant 2.000000e-01 : f32
    %357 = vector.broadcast %cst_151 : f32 to vector<8x512xf32>
    %358 = arith.mulf %357, %356 : vector<8x512xf32>
    %359 = arith.maximumf %356, %358 : vector<8x512xf32>
    %360 = vector.extract_strided_slice %359 {offsets = [0, 0], sizes = [8, 256], strides = [1, 1]} : vector<8x512xf32> to vector<8x256xf32>
    %cst_152 = arith.constant dense<0.000000e+00> : vector<8xf32>
    %361 = vector.multi_reduction <add>, %360, %cst_152 [1] : vector<8x256xf32> to vector<8xf32>
    %362 = vector.shape_cast %361 : vector<8xf32> to vector<8x1xf32>
    %363 = arith.mulf %360, %360 : vector<8x256xf32>
    %cst_153 = arith.constant dense<0.000000e+00> : vector<8xf32>
    %364 = vector.multi_reduction <add>, %363, %cst_153 [1] : vector<8x256xf32> to vector<8xf32>
    %365 = vector.shape_cast %364 : vector<8xf32> to vector<8x1xf32>
    %cst_154 = arith.constant 3.906250e-03 : f32
    %366 = vector.broadcast %cst_154 : f32 to vector<8x1xf32>
    %367 = arith.mulf %362, %366 : vector<8x1xf32>
    %cst_155 = arith.constant 3.906250e-03 : f32
    %368 = vector.broadcast %cst_155 : f32 to vector<8x1xf32>
    %369 = arith.mulf %365, %368 : vector<8x1xf32>
    %370 = arith.mulf %367, %367 : vector<8x1xf32>
    %371 = arith.subf %369, %370 : vector<8x1xf32>
    %372 = vector.broadcast %367 : vector<8x1xf32> to vector<8x256xf32>
    %373 = arith.subf %360, %372 : vector<8x256xf32>
    %cst_156 = arith.constant 9.99999974E-6 : f32
    %374 = vector.broadcast %cst_156 : f32 to vector<8x1xf32>
    %375 = arith.addf %371, %374 : vector<8x1xf32>
    %376 = math.rsqrt %375 : vector<8x1xf32>
    %377 = vector.broadcast %376 : vector<8x1xf32> to vector<8x256xf32>
    %378 = arith.mulf %373, %377 : vector<8x256xf32>
    %379 = vector.extract_strided_slice %359 {offsets = [0, 256], sizes = [8, 256], strides = [1, 1]} : vector<8x512xf32> to vector<8x256xf32>
    %cst_157 = arith.constant dense<0.000000e+00> : vector<8xf32>
    %380 = vector.multi_reduction <add>, %379, %cst_157 [1] : vector<8x256xf32> to vector<8xf32>
    %381 = vector.shape_cast %380 : vector<8xf32> to vector<8x1xf32>
    %382 = arith.mulf %379, %379 : vector<8x256xf32>
    %cst_158 = arith.constant dense<0.000000e+00> : vector<8xf32>
    %383 = vector.multi_reduction <add>, %382, %cst_158 [1] : vector<8x256xf32> to vector<8xf32>
    %384 = vector.shape_cast %383 : vector<8xf32> to vector<8x1xf32>
    %cst_159 = arith.constant 3.906250e-03 : f32
    %385 = vector.broadcast %cst_159 : f32 to vector<8x1xf32>
    %386 = arith.mulf %381, %385 : vector<8x1xf32>
    %cst_160 = arith.constant 3.906250e-03 : f32
    %387 = vector.broadcast %cst_160 : f32 to vector<8x1xf32>
    %388 = arith.mulf %384, %387 : vector<8x1xf32>
    %389 = arith.mulf %386, %386 : vector<8x1xf32>
    %390 = arith.subf %388, %389 : vector<8x1xf32>
    %391 = vector.broadcast %386 : vector<8x1xf32> to vector<8x256xf32>
    %392 = arith.subf %379, %391 : vector<8x256xf32>
    %cst_161 = arith.constant 9.99999974E-6 : f32
    %393 = vector.broadcast %cst_161 : f32 to vector<8x1xf32>
    %394 = arith.addf %390, %393 : vector<8x1xf32>
    %395 = math.rsqrt %394 : vector<8x1xf32>
    %396 = vector.broadcast %395 : vector<8x1xf32> to vector<8x256xf32>
    %397 = arith.mulf %392, %396 : vector<8x256xf32>
    %398 = tpu.concatenate %378, %397 in 1 : vector<8x256xf32>, vector<8x256xf32> -> vector<8x512xf32>
    %399 = arith.addf %398, %182 : vector<8x512xf32>
    %c16_i32_162 = arith.constant 16 : i32
    %400 = tpu.dynamic_rotate %399 by %c16_i32_162 dim 1 : vector<8x512xf32>, i32 -> vector<8x512xf32>
    %c496_i32_163 = arith.constant 496 : i32
    %401 = tpu.dynamic_rotate %399 by %c496_i32_163 dim 1 : vector<8x512xf32>, i32 -> vector<8x512xf32>
    %402 = vector.shape_cast %3 : vector<1x512xi1> to vector<1x512xi1>
    %403 = vector.broadcast %402 : vector<1x512xi1> to vector<8x512xi1>
    %404 = arith.select %403, %401, %400 : vector<8x512xi1>, vector<8x512xf32>
    %405 = vector.shape_cast %5 : vector<1x512xi1> to vector<1x512xi1>
    %406 = vector.broadcast %405 : vector<1x512xi1> to vector<8x512xi1>
    %407 = arith.select %406, %400, %401 : vector<8x512xi1>, vector<8x512xf32>
    %c1_i32_164 = arith.constant 1 : i32
    %408 = tpu.dynamic_rotate %404 by %c1_i32_164 dim 1 : vector<8x512xf32>, i32 -> vector<8x512xf32>
    %c511_i32_165 = arith.constant 511 : i32
    %409 = tpu.dynamic_rotate %404 by %c511_i32_165 dim 1 : vector<8x512xf32>, i32 -> vector<8x512xf32>
    %410 = vector.shape_cast %7 : vector<1x512xi1> to vector<1x512xi1>
    %411 = vector.broadcast %410 : vector<1x512xi1> to vector<8x512xi1>
    %412 = arith.select %411, %409, %408 : vector<8x512xi1>, vector<8x512xf32>
    %413 = vector.shape_cast %9 : vector<1x512xi1> to vector<1x512xi1>
    %414 = vector.broadcast %413 : vector<1x512xi1> to vector<8x512xi1>
    %415 = arith.select %414, %408, %409 : vector<8x512xi1>, vector<8x512xf32>
    %c1_i32_166 = arith.constant 1 : i32
    %416 = tpu.dynamic_rotate %399 by %c1_i32_166 dim 1 : vector<8x512xf32>, i32 -> vector<8x512xf32>
    %c511_i32_167 = arith.constant 511 : i32
    %417 = tpu.dynamic_rotate %399 by %c511_i32_167 dim 1 : vector<8x512xf32>, i32 -> vector<8x512xf32>
    %418 = vector.shape_cast %7 : vector<1x512xi1> to vector<1x512xi1>
    %419 = vector.broadcast %418 : vector<1x512xi1> to vector<8x512xi1>
    %420 = arith.select %419, %417, %416 : vector<8x512xi1>, vector<8x512xf32>
    %421 = vector.shape_cast %9 : vector<1x512xi1> to vector<1x512xi1>
    %422 = vector.broadcast %421 : vector<1x512xi1> to vector<8x512xi1>
    %423 = arith.select %422, %416, %417 : vector<8x512xi1>, vector<8x512xf32>
    %c1_i32_168 = arith.constant 1 : i32
    %424 = tpu.dynamic_rotate %407 by %c1_i32_168 dim 1 : vector<8x512xf32>, i32 -> vector<8x512xf32>
    %c511_i32_169 = arith.constant 511 : i32
    %425 = tpu.dynamic_rotate %407 by %c511_i32_169 dim 1 : vector<8x512xf32>, i32 -> vector<8x512xf32>
    %426 = vector.shape_cast %7 : vector<1x512xi1> to vector<1x512xi1>
    %427 = vector.broadcast %426 : vector<1x512xi1> to vector<8x512xi1>
    %428 = arith.select %427, %425, %424 : vector<8x512xi1>, vector<8x512xf32>
    %429 = vector.shape_cast %9 : vector<1x512xi1> to vector<1x512xi1>
    %430 = vector.broadcast %429 : vector<1x512xi1> to vector<8x512xi1>
    %431 = arith.select %430, %424, %425 : vector<8x512xi1>, vector<8x512xf32>
    %c1_170 = arith.constant 1 : index
    %c0_171 = arith.constant 0 : index
    %c0_172 = arith.constant 0 : index
    %c0_173 = arith.constant 0 : index
    %432 = vector.load %arg6[%c1_170, %c0_171, %c0_172, %c0_173] : memref<3x9x8x8xbf16, #tpu.memory_space<vmem>>, vector<1x1x8x8xbf16>
    %433 = vector.shape_cast %432 : vector<1x1x8x8xbf16> to vector<8x8xbf16>
    %434 = arith.truncf %412 : vector<8x512xf32> to vector<8x512xbf16>
    %cst_174 = arith.constant dense<0.000000e+00> : vector<8x512xf32>
    %435 = tpu.matmul %433, %434, %cst_174 {dimension_numbers = #tpu.dot_dimension_numbers<[1], [0], [0], [1], [0, 0, 1, 1], [], []>} : vector<8x8xbf16>, vector<8x512xbf16>, vector<8x512xf32> -> vector<8x512xf32>
    %c1_175 = arith.constant 1 : index
    %c1_176 = arith.constant 1 : index
    %c0_177 = arith.constant 0 : index
    %c0_178 = arith.constant 0 : index
    %436 = vector.load %arg6[%c1_175, %c1_176, %c0_177, %c0_178] : memref<3x9x8x8xbf16, #tpu.memory_space<vmem>>, vector<1x1x8x8xbf16>
    %437 = vector.shape_cast %436 : vector<1x1x8x8xbf16> to vector<8x8xbf16>
    %438 = arith.truncf %404 : vector<8x512xf32> to vector<8x512xbf16>
    %cst_179 = arith.constant dense<0.000000e+00> : vector<8x512xf32>
    %439 = tpu.matmul %437, %438, %cst_179 {dimension_numbers = #tpu.dot_dimension_numbers<[1], [0], [0], [1], [0, 0, 1, 1], [], []>} : vector<8x8xbf16>, vector<8x512xbf16>, vector<8x512xf32> -> vector<8x512xf32>
    %440 = arith.addf %435, %439 : vector<8x512xf32>
    %c1_180 = arith.constant 1 : index
    %c2_181 = arith.constant 2 : index
    %c0_182 = arith.constant 0 : index
    %c0_183 = arith.constant 0 : index
    %441 = vector.load %arg6[%c1_180, %c2_181, %c0_182, %c0_183] : memref<3x9x8x8xbf16, #tpu.memory_space<vmem>>, vector<1x1x8x8xbf16>
    %442 = vector.shape_cast %441 : vector<1x1x8x8xbf16> to vector<8x8xbf16>
    %443 = arith.truncf %415 : vector<8x512xf32> to vector<8x512xbf16>
    %cst_184 = arith.constant dense<0.000000e+00> : vector<8x512xf32>
    %444 = tpu.matmul %442, %443, %cst_184 {dimension_numbers = #tpu.dot_dimension_numbers<[1], [0], [0], [1], [0, 0, 1, 1], [], []>} : vector<8x8xbf16>, vector<8x512xbf16>, vector<8x512xf32> -> vector<8x512xf32>
    %445 = arith.addf %440, %444 : vector<8x512xf32>
    %c1_185 = arith.constant 1 : index
    %c3_186 = arith.constant 3 : index
    %c0_187 = arith.constant 0 : index
    %c0_188 = arith.constant 0 : index
    %446 = vector.load %arg6[%c1_185, %c3_186, %c0_187, %c0_188] : memref<3x9x8x8xbf16, #tpu.memory_space<vmem>>, vector<1x1x8x8xbf16>
    %447 = vector.shape_cast %446 : vector<1x1x8x8xbf16> to vector<8x8xbf16>
    %448 = arith.truncf %420 : vector<8x512xf32> to vector<8x512xbf16>
    %cst_189 = arith.constant dense<0.000000e+00> : vector<8x512xf32>
    %449 = tpu.matmul %447, %448, %cst_189 {dimension_numbers = #tpu.dot_dimension_numbers<[1], [0], [0], [1], [0, 0, 1, 1], [], []>} : vector<8x8xbf16>, vector<8x512xbf16>, vector<8x512xf32> -> vector<8x512xf32>
    %450 = arith.addf %445, %449 : vector<8x512xf32>
    %c1_190 = arith.constant 1 : index
    %c4_191 = arith.constant 4 : index
    %c0_192 = arith.constant 0 : index
    %c0_193 = arith.constant 0 : index
    %451 = vector.load %arg6[%c1_190, %c4_191, %c0_192, %c0_193] : memref<3x9x8x8xbf16, #tpu.memory_space<vmem>>, vector<1x1x8x8xbf16>
    %452 = vector.shape_cast %451 : vector<1x1x8x8xbf16> to vector<8x8xbf16>
    %453 = arith.truncf %399 : vector<8x512xf32> to vector<8x512xbf16>
    %cst_194 = arith.constant dense<0.000000e+00> : vector<8x512xf32>
    %454 = tpu.matmul %452, %453, %cst_194 {dimension_numbers = #tpu.dot_dimension_numbers<[1], [0], [0], [1], [0, 0, 1, 1], [], []>} : vector<8x8xbf16>, vector<8x512xbf16>, vector<8x512xf32> -> vector<8x512xf32>
    %455 = arith.addf %450, %454 : vector<8x512xf32>
    %c1_195 = arith.constant 1 : index
    %c5_196 = arith.constant 5 : index
    %c0_197 = arith.constant 0 : index
    %c0_198 = arith.constant 0 : index
    %456 = vector.load %arg6[%c1_195, %c5_196, %c0_197, %c0_198] : memref<3x9x8x8xbf16, #tpu.memory_space<vmem>>, vector<1x1x8x8xbf16>
    %457 = vector.shape_cast %456 : vector<1x1x8x8xbf16> to vector<8x8xbf16>
    %458 = arith.truncf %423 : vector<8x512xf32> to vector<8x512xbf16>
    %cst_199 = arith.constant dense<0.000000e+00> : vector<8x512xf32>
    %459 = tpu.matmul %457, %458, %cst_199 {dimension_numbers = #tpu.dot_dimension_numbers<[1], [0], [0], [1], [0, 0, 1, 1], [], []>} : vector<8x8xbf16>, vector<8x512xbf16>, vector<8x512xf32> -> vector<8x512xf32>
    %460 = arith.addf %455, %459 : vector<8x512xf32>
    %c1_200 = arith.constant 1 : index
    %c6_201 = arith.constant 6 : index
    %c0_202 = arith.constant 0 : index
    %c0_203 = arith.constant 0 : index
    %461 = vector.load %arg6[%c1_200, %c6_201, %c0_202, %c0_203] : memref<3x9x8x8xbf16, #tpu.memory_space<vmem>>, vector<1x1x8x8xbf16>
    %462 = vector.shape_cast %461 : vector<1x1x8x8xbf16> to vector<8x8xbf16>
    %463 = arith.truncf %428 : vector<8x512xf32> to vector<8x512xbf16>
    %cst_204 = arith.constant dense<0.000000e+00> : vector<8x512xf32>
    %464 = tpu.matmul %462, %463, %cst_204 {dimension_numbers = #tpu.dot_dimension_numbers<[1], [0], [0], [1], [0, 0, 1, 1], [], []>} : vector<8x8xbf16>, vector<8x512xbf16>, vector<8x512xf32> -> vector<8x512xf32>
    %465 = arith.addf %460, %464 : vector<8x512xf32>
    %c1_205 = arith.constant 1 : index
    %c7_206 = arith.constant 7 : index
    %c0_207 = arith.constant 0 : index
    %c0_208 = arith.constant 0 : index
    %466 = vector.load %arg6[%c1_205, %c7_206, %c0_207, %c0_208] : memref<3x9x8x8xbf16, #tpu.memory_space<vmem>>, vector<1x1x8x8xbf16>
    %467 = vector.shape_cast %466 : vector<1x1x8x8xbf16> to vector<8x8xbf16>
    %468 = arith.truncf %407 : vector<8x512xf32> to vector<8x512xbf16>
    %cst_209 = arith.constant dense<0.000000e+00> : vector<8x512xf32>
    %469 = tpu.matmul %467, %468, %cst_209 {dimension_numbers = #tpu.dot_dimension_numbers<[1], [0], [0], [1], [0, 0, 1, 1], [], []>} : vector<8x8xbf16>, vector<8x512xbf16>, vector<8x512xf32> -> vector<8x512xf32>
    %470 = arith.addf %465, %469 : vector<8x512xf32>
    %c1_210 = arith.constant 1 : index
    %c8_211 = arith.constant 8 : index
    %c0_212 = arith.constant 0 : index
    %c0_213 = arith.constant 0 : index
    %471 = vector.load %arg6[%c1_210, %c8_211, %c0_212, %c0_213] : memref<3x9x8x8xbf16, #tpu.memory_space<vmem>>, vector<1x1x8x8xbf16>
    %472 = vector.shape_cast %471 : vector<1x1x8x8xbf16> to vector<8x8xbf16>
    %473 = arith.truncf %431 : vector<8x512xf32> to vector<8x512xbf16>
    %cst_214 = arith.constant dense<0.000000e+00> : vector<8x512xf32>
    %474 = tpu.matmul %472, %473, %cst_214 {dimension_numbers = #tpu.dot_dimension_numbers<[1], [0], [0], [1], [0, 0, 1, 1], [], []>} : vector<8x8xbf16>, vector<8x512xbf16>, vector<8x512xf32> -> vector<8x512xf32>
    %475 = arith.addf %470, %474 : vector<8x512xf32>
    %c1_215 = arith.constant 1 : index
    %c0_216 = arith.constant 0 : index
    %c0_217 = arith.constant 0 : index
    %476 = vector.load %arg7[%c1_215, %c0_216, %c0_217] : memref<3x8x1xf32, #tpu.memory_space<vmem>>, vector<1x8x1xf32>
    %477 = vector.shape_cast %476 : vector<1x8x1xf32> to vector<8x1xf32>
    %478 = vector.broadcast %477 : vector<8x1xf32> to vector<8x512xf32>
    %479 = arith.addf %475, %478 : vector<8x512xf32>
    %cst_218 = arith.constant 2.000000e-01 : f32
    %480 = vector.broadcast %cst_218 : f32 to vector<8x512xf32>
    %481 = arith.mulf %480, %479 : vector<8x512xf32>
    %482 = arith.maximumf %479, %481 : vector<8x512xf32>
    %483 = vector.extract_strided_slice %482 {offsets = [0, 0], sizes = [8, 256], strides = [1, 1]} : vector<8x512xf32> to vector<8x256xf32>
    %cst_219 = arith.constant dense<0.000000e+00> : vector<8xf32>
    %484 = vector.multi_reduction <add>, %483, %cst_219 [1] : vector<8x256xf32> to vector<8xf32>
    %485 = vector.shape_cast %484 : vector<8xf32> to vector<8x1xf32>
    %486 = arith.mulf %483, %483 : vector<8x256xf32>
    %cst_220 = arith.constant dense<0.000000e+00> : vector<8xf32>
    %487 = vector.multi_reduction <add>, %486, %cst_220 [1] : vector<8x256xf32> to vector<8xf32>
    %488 = vector.shape_cast %487 : vector<8xf32> to vector<8x1xf32>
    %cst_221 = arith.constant 3.906250e-03 : f32
    %489 = vector.broadcast %cst_221 : f32 to vector<8x1xf32>
    %490 = arith.mulf %485, %489 : vector<8x1xf32>
    %cst_222 = arith.constant 3.906250e-03 : f32
    %491 = vector.broadcast %cst_222 : f32 to vector<8x1xf32>
    %492 = arith.mulf %488, %491 : vector<8x1xf32>
    %493 = arith.mulf %490, %490 : vector<8x1xf32>
    %494 = arith.subf %492, %493 : vector<8x1xf32>
    %495 = vector.broadcast %490 : vector<8x1xf32> to vector<8x256xf32>
    %496 = arith.subf %483, %495 : vector<8x256xf32>
    %cst_223 = arith.constant 9.99999974E-6 : f32
    %497 = vector.broadcast %cst_223 : f32 to vector<8x1xf32>
    %498 = arith.addf %494, %497 : vector<8x1xf32>
    %499 = math.rsqrt %498 : vector<8x1xf32>
    %500 = vector.broadcast %499 : vector<8x1xf32> to vector<8x256xf32>
    %501 = arith.mulf %496, %500 : vector<8x256xf32>
    %502 = vector.extract_strided_slice %482 {offsets = [0, 256], sizes = [8, 256], strides = [1, 1]} : vector<8x512xf32> to vector<8x256xf32>
    %cst_224 = arith.constant dense<0.000000e+00> : vector<8xf32>
    %503 = vector.multi_reduction <add>, %502, %cst_224 [1] : vector<8x256xf32> to vector<8xf32>
    %504 = vector.shape_cast %503 : vector<8xf32> to vector<8x1xf32>
    %505 = arith.mulf %502, %502 : vector<8x256xf32>
    %cst_225 = arith.constant dense<0.000000e+00> : vector<8xf32>
    %506 = vector.multi_reduction <add>, %505, %cst_225 [1] : vector<8x256xf32> to vector<8xf32>
    %507 = vector.shape_cast %506 : vector<8xf32> to vector<8x1xf32>
    %cst_226 = arith.constant 3.906250e-03 : f32
    %508 = vector.broadcast %cst_226 : f32 to vector<8x1xf32>
    %509 = arith.mulf %504, %508 : vector<8x1xf32>
    %cst_227 = arith.constant 3.906250e-03 : f32
    %510 = vector.broadcast %cst_227 : f32 to vector<8x1xf32>
    %511 = arith.mulf %507, %510 : vector<8x1xf32>
    %512 = arith.mulf %509, %509 : vector<8x1xf32>
    %513 = arith.subf %511, %512 : vector<8x1xf32>
    %514 = vector.broadcast %509 : vector<8x1xf32> to vector<8x256xf32>
    %515 = arith.subf %502, %514 : vector<8x256xf32>
    %cst_228 = arith.constant 9.99999974E-6 : f32
    %516 = vector.broadcast %cst_228 : f32 to vector<8x1xf32>
    %517 = arith.addf %513, %516 : vector<8x1xf32>
    %518 = math.rsqrt %517 : vector<8x1xf32>
    %519 = vector.broadcast %518 : vector<8x1xf32> to vector<8x256xf32>
    %520 = arith.mulf %515, %519 : vector<8x256xf32>
    %521 = tpu.concatenate %501, %520 in 1 : vector<8x256xf32>, vector<8x256xf32> -> vector<8x512xf32>
    %522 = arith.addf %521, %229 : vector<8x512xf32>
    %c16_i32_229 = arith.constant 16 : i32
    %523 = tpu.dynamic_rotate %522 by %c16_i32_229 dim 1 : vector<8x512xf32>, i32 -> vector<8x512xf32>
    %c496_i32_230 = arith.constant 496 : i32
    %524 = tpu.dynamic_rotate %522 by %c496_i32_230 dim 1 : vector<8x512xf32>, i32 -> vector<8x512xf32>
    %525 = vector.shape_cast %3 : vector<1x512xi1> to vector<1x512xi1>
    %526 = vector.broadcast %525 : vector<1x512xi1> to vector<8x512xi1>
    %527 = arith.select %526, %524, %523 : vector<8x512xi1>, vector<8x512xf32>
    %528 = vector.shape_cast %5 : vector<1x512xi1> to vector<1x512xi1>
    %529 = vector.broadcast %528 : vector<1x512xi1> to vector<8x512xi1>
    %530 = arith.select %529, %523, %524 : vector<8x512xi1>, vector<8x512xf32>
    %c1_i32_231 = arith.constant 1 : i32
    %531 = tpu.dynamic_rotate %527 by %c1_i32_231 dim 1 : vector<8x512xf32>, i32 -> vector<8x512xf32>
    %c511_i32_232 = arith.constant 511 : i32
    %532 = tpu.dynamic_rotate %527 by %c511_i32_232 dim 1 : vector<8x512xf32>, i32 -> vector<8x512xf32>
    %533 = vector.shape_cast %7 : vector<1x512xi1> to vector<1x512xi1>
    %534 = vector.broadcast %533 : vector<1x512xi1> to vector<8x512xi1>
    %535 = arith.select %534, %532, %531 : vector<8x512xi1>, vector<8x512xf32>
    %536 = vector.shape_cast %9 : vector<1x512xi1> to vector<1x512xi1>
    %537 = vector.broadcast %536 : vector<1x512xi1> to vector<8x512xi1>
    %538 = arith.select %537, %531, %532 : vector<8x512xi1>, vector<8x512xf32>
    %c1_i32_233 = arith.constant 1 : i32
    %539 = tpu.dynamic_rotate %522 by %c1_i32_233 dim 1 : vector<8x512xf32>, i32 -> vector<8x512xf32>
    %c511_i32_234 = arith.constant 511 : i32
    %540 = tpu.dynamic_rotate %522 by %c511_i32_234 dim 1 : vector<8x512xf32>, i32 -> vector<8x512xf32>
    %541 = vector.shape_cast %7 : vector<1x512xi1> to vector<1x512xi1>
    %542 = vector.broadcast %541 : vector<1x512xi1> to vector<8x512xi1>
    %543 = arith.select %542, %540, %539 : vector<8x512xi1>, vector<8x512xf32>
    %544 = vector.shape_cast %9 : vector<1x512xi1> to vector<1x512xi1>
    %545 = vector.broadcast %544 : vector<1x512xi1> to vector<8x512xi1>
    %546 = arith.select %545, %539, %540 : vector<8x512xi1>, vector<8x512xf32>
    %c1_i32_235 = arith.constant 1 : i32
    %547 = tpu.dynamic_rotate %530 by %c1_i32_235 dim 1 : vector<8x512xf32>, i32 -> vector<8x512xf32>
    %c511_i32_236 = arith.constant 511 : i32
    %548 = tpu.dynamic_rotate %530 by %c511_i32_236 dim 1 : vector<8x512xf32>, i32 -> vector<8x512xf32>
    %549 = vector.shape_cast %7 : vector<1x512xi1> to vector<1x512xi1>
    %550 = vector.broadcast %549 : vector<1x512xi1> to vector<8x512xi1>
    %551 = arith.select %550, %548, %547 : vector<8x512xi1>, vector<8x512xf32>
    %552 = vector.shape_cast %9 : vector<1x512xi1> to vector<1x512xi1>
    %553 = vector.broadcast %552 : vector<1x512xi1> to vector<8x512xi1>
    %554 = arith.select %553, %547, %548 : vector<8x512xi1>, vector<8x512xf32>
    %c2_237 = arith.constant 2 : index
    %c0_238 = arith.constant 0 : index
    %c0_239 = arith.constant 0 : index
    %c0_240 = arith.constant 0 : index
    %555 = vector.load %arg6[%c2_237, %c0_238, %c0_239, %c0_240] : memref<3x9x8x8xbf16, #tpu.memory_space<vmem>>, vector<1x1x8x8xbf16>
    %556 = vector.shape_cast %555 : vector<1x1x8x8xbf16> to vector<8x8xbf16>
    %557 = arith.truncf %535 : vector<8x512xf32> to vector<8x512xbf16>
    %cst_241 = arith.constant dense<0.000000e+00> : vector<8x512xf32>
    %558 = tpu.matmul %556, %557, %cst_241 {dimension_numbers = #tpu.dot_dimension_numbers<[1], [0], [0], [1], [0, 0, 1, 1], [], []>} : vector<8x8xbf16>, vector<8x512xbf16>, vector<8x512xf32> -> vector<8x512xf32>
    %c2_242 = arith.constant 2 : index
    %c1_243 = arith.constant 1 : index
    %c0_244 = arith.constant 0 : index
    %c0_245 = arith.constant 0 : index
    %559 = vector.load %arg6[%c2_242, %c1_243, %c0_244, %c0_245] : memref<3x9x8x8xbf16, #tpu.memory_space<vmem>>, vector<1x1x8x8xbf16>
    %560 = vector.shape_cast %559 : vector<1x1x8x8xbf16> to vector<8x8xbf16>
    %561 = arith.truncf %527 : vector<8x512xf32> to vector<8x512xbf16>
    %cst_246 = arith.constant dense<0.000000e+00> : vector<8x512xf32>
    %562 = tpu.matmul %560, %561, %cst_246 {dimension_numbers = #tpu.dot_dimension_numbers<[1], [0], [0], [1], [0, 0, 1, 1], [], []>} : vector<8x8xbf16>, vector<8x512xbf16>, vector<8x512xf32> -> vector<8x512xf32>
    %563 = arith.addf %558, %562 : vector<8x512xf32>
    %c2_247 = arith.constant 2 : index
    %c2_248 = arith.constant 2 : index
    %c0_249 = arith.constant 0 : index
    %c0_250 = arith.constant 0 : index
    %564 = vector.load %arg6[%c2_247, %c2_248, %c0_249, %c0_250] : memref<3x9x8x8xbf16, #tpu.memory_space<vmem>>, vector<1x1x8x8xbf16>
    %565 = vector.shape_cast %564 : vector<1x1x8x8xbf16> to vector<8x8xbf16>
    %566 = arith.truncf %538 : vector<8x512xf32> to vector<8x512xbf16>
    %cst_251 = arith.constant dense<0.000000e+00> : vector<8x512xf32>
    %567 = tpu.matmul %565, %566, %cst_251 {dimension_numbers = #tpu.dot_dimension_numbers<[1], [0], [0], [1], [0, 0, 1, 1], [], []>} : vector<8x8xbf16>, vector<8x512xbf16>, vector<8x512xf32> -> vector<8x512xf32>
    %568 = arith.addf %563, %567 : vector<8x512xf32>
    %c2_252 = arith.constant 2 : index
    %c3_253 = arith.constant 3 : index
    %c0_254 = arith.constant 0 : index
    %c0_255 = arith.constant 0 : index
    %569 = vector.load %arg6[%c2_252, %c3_253, %c0_254, %c0_255] : memref<3x9x8x8xbf16, #tpu.memory_space<vmem>>, vector<1x1x8x8xbf16>
    %570 = vector.shape_cast %569 : vector<1x1x8x8xbf16> to vector<8x8xbf16>
    %571 = arith.truncf %543 : vector<8x512xf32> to vector<8x512xbf16>
    %cst_256 = arith.constant dense<0.000000e+00> : vector<8x512xf32>
    %572 = tpu.matmul %570, %571, %cst_256 {dimension_numbers = #tpu.dot_dimension_numbers<[1], [0], [0], [1], [0, 0, 1, 1], [], []>} : vector<8x8xbf16>, vector<8x512xbf16>, vector<8x512xf32> -> vector<8x512xf32>
    %573 = arith.addf %568, %572 : vector<8x512xf32>
    %c2_257 = arith.constant 2 : index
    %c4_258 = arith.constant 4 : index
    %c0_259 = arith.constant 0 : index
    %c0_260 = arith.constant 0 : index
    %574 = vector.load %arg6[%c2_257, %c4_258, %c0_259, %c0_260] : memref<3x9x8x8xbf16, #tpu.memory_space<vmem>>, vector<1x1x8x8xbf16>
    %575 = vector.shape_cast %574 : vector<1x1x8x8xbf16> to vector<8x8xbf16>
    %576 = arith.truncf %522 : vector<8x512xf32> to vector<8x512xbf16>
    %cst_261 = arith.constant dense<0.000000e+00> : vector<8x512xf32>
    %577 = tpu.matmul %575, %576, %cst_261 {dimension_numbers = #tpu.dot_dimension_numbers<[1], [0], [0], [1], [0, 0, 1, 1], [], []>} : vector<8x8xbf16>, vector<8x512xbf16>, vector<8x512xf32> -> vector<8x512xf32>
    %578 = arith.addf %573, %577 : vector<8x512xf32>
    %c2_262 = arith.constant 2 : index
    %c5_263 = arith.constant 5 : index
    %c0_264 = arith.constant 0 : index
    %c0_265 = arith.constant 0 : index
    %579 = vector.load %arg6[%c2_262, %c5_263, %c0_264, %c0_265] : memref<3x9x8x8xbf16, #tpu.memory_space<vmem>>, vector<1x1x8x8xbf16>
    %580 = vector.shape_cast %579 : vector<1x1x8x8xbf16> to vector<8x8xbf16>
    %581 = arith.truncf %546 : vector<8x512xf32> to vector<8x512xbf16>
    %cst_266 = arith.constant dense<0.000000e+00> : vector<8x512xf32>
    %582 = tpu.matmul %580, %581, %cst_266 {dimension_numbers = #tpu.dot_dimension_numbers<[1], [0], [0], [1], [0, 0, 1, 1], [], []>} : vector<8x8xbf16>, vector<8x512xbf16>, vector<8x512xf32> -> vector<8x512xf32>
    %583 = arith.addf %578, %582 : vector<8x512xf32>
    %c2_267 = arith.constant 2 : index
    %c6_268 = arith.constant 6 : index
    %c0_269 = arith.constant 0 : index
    %c0_270 = arith.constant 0 : index
    %584 = vector.load %arg6[%c2_267, %c6_268, %c0_269, %c0_270] : memref<3x9x8x8xbf16, #tpu.memory_space<vmem>>, vector<1x1x8x8xbf16>
    %585 = vector.shape_cast %584 : vector<1x1x8x8xbf16> to vector<8x8xbf16>
    %586 = arith.truncf %551 : vector<8x512xf32> to vector<8x512xbf16>
    %cst_271 = arith.constant dense<0.000000e+00> : vector<8x512xf32>
    %587 = tpu.matmul %585, %586, %cst_271 {dimension_numbers = #tpu.dot_dimension_numbers<[1], [0], [0], [1], [0, 0, 1, 1], [], []>} : vector<8x8xbf16>, vector<8x512xbf16>, vector<8x512xf32> -> vector<8x512xf32>
    %588 = arith.addf %583, %587 : vector<8x512xf32>
    %c2_272 = arith.constant 2 : index
    %c7_273 = arith.constant 7 : index
    %c0_274 = arith.constant 0 : index
    %c0_275 = arith.constant 0 : index
    %589 = vector.load %arg6[%c2_272, %c7_273, %c0_274, %c0_275] : memref<3x9x8x8xbf16, #tpu.memory_space<vmem>>, vector<1x1x8x8xbf16>
    %590 = vector.shape_cast %589 : vector<1x1x8x8xbf16> to vector<8x8xbf16>
    %591 = arith.truncf %530 : vector<8x512xf32> to vector<8x512xbf16>
    %cst_276 = arith.constant dense<0.000000e+00> : vector<8x512xf32>
    %592 = tpu.matmul %590, %591, %cst_276 {dimension_numbers = #tpu.dot_dimension_numbers<[1], [0], [0], [1], [0, 0, 1, 1], [], []>} : vector<8x8xbf16>, vector<8x512xbf16>, vector<8x512xf32> -> vector<8x512xf32>
    %593 = arith.addf %588, %592 : vector<8x512xf32>
    %c2_277 = arith.constant 2 : index
    %c8_278 = arith.constant 8 : index
    %c0_279 = arith.constant 0 : index
    %c0_280 = arith.constant 0 : index
    %594 = vector.load %arg6[%c2_277, %c8_278, %c0_279, %c0_280] : memref<3x9x8x8xbf16, #tpu.memory_space<vmem>>, vector<1x1x8x8xbf16>
    %595 = vector.shape_cast %594 : vector<1x1x8x8xbf16> to vector<8x8xbf16>
    %596 = arith.truncf %554 : vector<8x512xf32> to vector<8x512xbf16>
    %cst_281 = arith.constant dense<0.000000e+00> : vector<8x512xf32>
    %597 = tpu.matmul %595, %596, %cst_281 {dimension_numbers = #tpu.dot_dimension_numbers<[1], [0], [0], [1], [0, 0, 1, 1], [], []>} : vector<8x8xbf16>, vector<8x512xbf16>, vector<8x512xf32> -> vector<8x512xf32>
    %598 = arith.addf %593, %597 : vector<8x512xf32>
    %c2_282 = arith.constant 2 : index
    %c0_283 = arith.constant 0 : index
    %c0_284 = arith.constant 0 : index
    %599 = vector.load %arg7[%c2_282, %c0_283, %c0_284] : memref<3x8x1xf32, #tpu.memory_space<vmem>>, vector<1x8x1xf32>
    %600 = vector.shape_cast %599 : vector<1x8x1xf32> to vector<8x1xf32>
    %601 = vector.broadcast %600 : vector<8x1xf32> to vector<8x512xf32>
    %602 = arith.addf %598, %601 : vector<8x512xf32>
    %cst_285 = arith.constant 2.000000e-01 : f32
    %603 = vector.broadcast %cst_285 : f32 to vector<8x512xf32>
    %604 = arith.mulf %603, %602 : vector<8x512xf32>
    %605 = arith.maximumf %602, %604 : vector<8x512xf32>
    %606 = vector.extract_strided_slice %605 {offsets = [0, 0], sizes = [8, 256], strides = [1, 1]} : vector<8x512xf32> to vector<8x256xf32>
    %cst_286 = arith.constant dense<0.000000e+00> : vector<8xf32>
    %607 = vector.multi_reduction <add>, %606, %cst_286 [1] : vector<8x256xf32> to vector<8xf32>
    %608 = vector.shape_cast %607 : vector<8xf32> to vector<8x1xf32>
    %609 = arith.mulf %606, %606 : vector<8x256xf32>
    %cst_287 = arith.constant dense<0.000000e+00> : vector<8xf32>
    %610 = vector.multi_reduction <add>, %609, %cst_287 [1] : vector<8x256xf32> to vector<8xf32>
    %611 = vector.shape_cast %610 : vector<8xf32> to vector<8x1xf32>
    %cst_288 = arith.constant 3.906250e-03 : f32
    %612 = vector.broadcast %cst_288 : f32 to vector<8x1xf32>
    %613 = arith.mulf %608, %612 : vector<8x1xf32>
    %cst_289 = arith.constant 3.906250e-03 : f32
    %614 = vector.broadcast %cst_289 : f32 to vector<8x1xf32>
    %615 = arith.mulf %611, %614 : vector<8x1xf32>
    %616 = arith.mulf %613, %613 : vector<8x1xf32>
    %617 = arith.subf %615, %616 : vector<8x1xf32>
    %618 = vector.broadcast %613 : vector<8x1xf32> to vector<8x256xf32>
    %619 = arith.subf %606, %618 : vector<8x256xf32>
    %cst_290 = arith.constant 9.99999974E-6 : f32
    %620 = vector.broadcast %cst_290 : f32 to vector<8x1xf32>
    %621 = arith.addf %617, %620 : vector<8x1xf32>
    %622 = math.rsqrt %621 : vector<8x1xf32>
    %623 = vector.broadcast %622 : vector<8x1xf32> to vector<8x256xf32>
    %624 = arith.mulf %619, %623 : vector<8x256xf32>
    %625 = vector.extract_strided_slice %605 {offsets = [0, 256], sizes = [8, 256], strides = [1, 1]} : vector<8x512xf32> to vector<8x256xf32>
    %cst_291 = arith.constant dense<0.000000e+00> : vector<8xf32>
    %626 = vector.multi_reduction <add>, %625, %cst_291 [1] : vector<8x256xf32> to vector<8xf32>
    %627 = vector.shape_cast %626 : vector<8xf32> to vector<8x1xf32>
    %628 = arith.mulf %625, %625 : vector<8x256xf32>
    %cst_292 = arith.constant dense<0.000000e+00> : vector<8xf32>
    %629 = vector.multi_reduction <add>, %628, %cst_292 [1] : vector<8x256xf32> to vector<8xf32>
    %630 = vector.shape_cast %629 : vector<8xf32> to vector<8x1xf32>
    %cst_293 = arith.constant 3.906250e-03 : f32
    %631 = vector.broadcast %cst_293 : f32 to vector<8x1xf32>
    %632 = arith.mulf %627, %631 : vector<8x1xf32>
    %cst_294 = arith.constant 3.906250e-03 : f32
    %633 = vector.broadcast %cst_294 : f32 to vector<8x1xf32>
    %634 = arith.mulf %630, %633 : vector<8x1xf32>
    %635 = arith.mulf %632, %632 : vector<8x1xf32>
    %636 = arith.subf %634, %635 : vector<8x1xf32>
    %637 = vector.broadcast %632 : vector<8x1xf32> to vector<8x256xf32>
    %638 = arith.subf %625, %637 : vector<8x256xf32>
    %cst_295 = arith.constant 9.99999974E-6 : f32
    %639 = vector.broadcast %cst_295 : f32 to vector<8x1xf32>
    %640 = arith.addf %636, %639 : vector<8x1xf32>
    %641 = math.rsqrt %640 : vector<8x1xf32>
    %642 = vector.broadcast %641 : vector<8x1xf32> to vector<8x256xf32>
    %643 = arith.mulf %638, %642 : vector<8x256xf32>
    %644 = tpu.concatenate %624, %643 in 1 : vector<8x256xf32>, vector<8x256xf32> -> vector<8x512xf32>
    %645 = tpu.concatenate %398, %521, %644, %276 in 0 : vector<8x512xf32>, vector<8x512xf32>, vector<8x512xf32>, vector<8x512xf32> -> vector<32x512xf32>
    %c16_i32_296 = arith.constant 16 : i32
    %646 = tpu.dynamic_rotate %645 by %c16_i32_296 dim 1 : vector<32x512xf32>, i32 -> vector<32x512xf32>
    %c496_i32_297 = arith.constant 496 : i32
    %647 = tpu.dynamic_rotate %645 by %c496_i32_297 dim 1 : vector<32x512xf32>, i32 -> vector<32x512xf32>
    %648 = vector.shape_cast %3 : vector<1x512xi1> to vector<1x512xi1>
    %649 = vector.broadcast %648 : vector<1x512xi1> to vector<32x512xi1>
    %650 = arith.select %649, %647, %646 : vector<32x512xi1>, vector<32x512xf32>
    %651 = vector.shape_cast %5 : vector<1x512xi1> to vector<1x512xi1>
    %652 = vector.broadcast %651 : vector<1x512xi1> to vector<32x512xi1>
    %653 = arith.select %652, %646, %647 : vector<32x512xi1>, vector<32x512xf32>
    %c1_i32_298 = arith.constant 1 : i32
    %654 = tpu.dynamic_rotate %650 by %c1_i32_298 dim 1 : vector<32x512xf32>, i32 -> vector<32x512xf32>
    %c511_i32_299 = arith.constant 511 : i32
    %655 = tpu.dynamic_rotate %650 by %c511_i32_299 dim 1 : vector<32x512xf32>, i32 -> vector<32x512xf32>
    %656 = vector.shape_cast %7 : vector<1x512xi1> to vector<1x512xi1>
    %657 = vector.broadcast %656 : vector<1x512xi1> to vector<32x512xi1>
    %658 = arith.select %657, %655, %654 : vector<32x512xi1>, vector<32x512xf32>
    %659 = vector.shape_cast %9 : vector<1x512xi1> to vector<1x512xi1>
    %660 = vector.broadcast %659 : vector<1x512xi1> to vector<32x512xi1>
    %661 = arith.select %660, %654, %655 : vector<32x512xi1>, vector<32x512xf32>
    %c1_i32_300 = arith.constant 1 : i32
    %662 = tpu.dynamic_rotate %645 by %c1_i32_300 dim 1 : vector<32x512xf32>, i32 -> vector<32x512xf32>
    %c511_i32_301 = arith.constant 511 : i32
    %663 = tpu.dynamic_rotate %645 by %c511_i32_301 dim 1 : vector<32x512xf32>, i32 -> vector<32x512xf32>
    %664 = vector.shape_cast %7 : vector<1x512xi1> to vector<1x512xi1>
    %665 = vector.broadcast %664 : vector<1x512xi1> to vector<32x512xi1>
    %666 = arith.select %665, %663, %662 : vector<32x512xi1>, vector<32x512xf32>
    %667 = vector.shape_cast %9 : vector<1x512xi1> to vector<1x512xi1>
    %668 = vector.broadcast %667 : vector<1x512xi1> to vector<32x512xi1>
    %669 = arith.select %668, %662, %663 : vector<32x512xi1>, vector<32x512xf32>
    %c1_i32_302 = arith.constant 1 : i32
    %670 = tpu.dynamic_rotate %653 by %c1_i32_302 dim 1 : vector<32x512xf32>, i32 -> vector<32x512xf32>
    %c511_i32_303 = arith.constant 511 : i32
    %671 = tpu.dynamic_rotate %653 by %c511_i32_303 dim 1 : vector<32x512xf32>, i32 -> vector<32x512xf32>
    %672 = vector.shape_cast %7 : vector<1x512xi1> to vector<1x512xi1>
    %673 = vector.broadcast %672 : vector<1x512xi1> to vector<32x512xi1>
    %674 = arith.select %673, %671, %670 : vector<32x512xi1>, vector<32x512xf32>
    %675 = vector.shape_cast %9 : vector<1x512xi1> to vector<1x512xi1>
    %676 = vector.broadcast %675 : vector<1x512xi1> to vector<32x512xi1>
    %677 = arith.select %676, %670, %671 : vector<32x512xi1>, vector<32x512xf32>
    %c0_304 = arith.constant 0 : index
    %c0_305 = arith.constant 0 : index
    %c0_306 = arith.constant 0 : index
    %678 = vector.load %arg8[%c0_304, %c0_305, %c0_306] : memref<9x8x32xbf16, #tpu.memory_space<vmem>>, vector<1x8x32xbf16>
    %679 = vector.shape_cast %678 : vector<1x8x32xbf16> to vector<8x32xbf16>
    %680 = arith.truncf %658 : vector<32x512xf32> to vector<32x512xbf16>
    %cst_307 = arith.constant dense<0.000000e+00> : vector<8x512xf32>
    %681 = tpu.matmul %679, %680, %cst_307 {dimension_numbers = #tpu.dot_dimension_numbers<[1], [0], [0], [1], [0, 0, 1, 1], [], []>} : vector<8x32xbf16>, vector<32x512xbf16>, vector<8x512xf32> -> vector<8x512xf32>
    %c1_308 = arith.constant 1 : index
    %c0_309 = arith.constant 0 : index
    %c0_310 = arith.constant 0 : index
    %682 = vector.load %arg8[%c1_308, %c0_309, %c0_310] : memref<9x8x32xbf16, #tpu.memory_space<vmem>>, vector<1x8x32xbf16>
    %683 = vector.shape_cast %682 : vector<1x8x32xbf16> to vector<8x32xbf16>
    %684 = arith.truncf %650 : vector<32x512xf32> to vector<32x512xbf16>
    %cst_311 = arith.constant dense<0.000000e+00> : vector<8x512xf32>
    %685 = tpu.matmul %683, %684, %cst_311 {dimension_numbers = #tpu.dot_dimension_numbers<[1], [0], [0], [1], [0, 0, 1, 1], [], []>} : vector<8x32xbf16>, vector<32x512xbf16>, vector<8x512xf32> -> vector<8x512xf32>
    %686 = arith.addf %681, %685 : vector<8x512xf32>
    %c2_312 = arith.constant 2 : index
    %c0_313 = arith.constant 0 : index
    %c0_314 = arith.constant 0 : index
    %687 = vector.load %arg8[%c2_312, %c0_313, %c0_314] : memref<9x8x32xbf16, #tpu.memory_space<vmem>>, vector<1x8x32xbf16>
    %688 = vector.shape_cast %687 : vector<1x8x32xbf16> to vector<8x32xbf16>
    %689 = arith.truncf %661 : vector<32x512xf32> to vector<32x512xbf16>
    %cst_315 = arith.constant dense<0.000000e+00> : vector<8x512xf32>
    %690 = tpu.matmul %688, %689, %cst_315 {dimension_numbers = #tpu.dot_dimension_numbers<[1], [0], [0], [1], [0, 0, 1, 1], [], []>} : vector<8x32xbf16>, vector<32x512xbf16>, vector<8x512xf32> -> vector<8x512xf32>
    %691 = arith.addf %686, %690 : vector<8x512xf32>
    %c3_316 = arith.constant 3 : index
    %c0_317 = arith.constant 0 : index
    %c0_318 = arith.constant 0 : index
    %692 = vector.load %arg8[%c3_316, %c0_317, %c0_318] : memref<9x8x32xbf16, #tpu.memory_space<vmem>>, vector<1x8x32xbf16>
    %693 = vector.shape_cast %692 : vector<1x8x32xbf16> to vector<8x32xbf16>
    %694 = arith.truncf %666 : vector<32x512xf32> to vector<32x512xbf16>
    %cst_319 = arith.constant dense<0.000000e+00> : vector<8x512xf32>
    %695 = tpu.matmul %693, %694, %cst_319 {dimension_numbers = #tpu.dot_dimension_numbers<[1], [0], [0], [1], [0, 0, 1, 1], [], []>} : vector<8x32xbf16>, vector<32x512xbf16>, vector<8x512xf32> -> vector<8x512xf32>
    %696 = arith.addf %691, %695 : vector<8x512xf32>
    %c4_320 = arith.constant 4 : index
    %c0_321 = arith.constant 0 : index
    %c0_322 = arith.constant 0 : index
    %697 = vector.load %arg8[%c4_320, %c0_321, %c0_322] : memref<9x8x32xbf16, #tpu.memory_space<vmem>>, vector<1x8x32xbf16>
    %698 = vector.shape_cast %697 : vector<1x8x32xbf16> to vector<8x32xbf16>
    %699 = arith.truncf %645 : vector<32x512xf32> to vector<32x512xbf16>
    %cst_323 = arith.constant dense<0.000000e+00> : vector<8x512xf32>
    %700 = tpu.matmul %698, %699, %cst_323 {dimension_numbers = #tpu.dot_dimension_numbers<[1], [0], [0], [1], [0, 0, 1, 1], [], []>} : vector<8x32xbf16>, vector<32x512xbf16>, vector<8x512xf32> -> vector<8x512xf32>
    %701 = arith.addf %696, %700 : vector<8x512xf32>
    %c5_324 = arith.constant 5 : index
    %c0_325 = arith.constant 0 : index
    %c0_326 = arith.constant 0 : index
    %702 = vector.load %arg8[%c5_324, %c0_325, %c0_326] : memref<9x8x32xbf16, #tpu.memory_space<vmem>>, vector<1x8x32xbf16>
    %703 = vector.shape_cast %702 : vector<1x8x32xbf16> to vector<8x32xbf16>
    %704 = arith.truncf %669 : vector<32x512xf32> to vector<32x512xbf16>
    %cst_327 = arith.constant dense<0.000000e+00> : vector<8x512xf32>
    %705 = tpu.matmul %703, %704, %cst_327 {dimension_numbers = #tpu.dot_dimension_numbers<[1], [0], [0], [1], [0, 0, 1, 1], [], []>} : vector<8x32xbf16>, vector<32x512xbf16>, vector<8x512xf32> -> vector<8x512xf32>
    %706 = arith.addf %701, %705 : vector<8x512xf32>
    %c6_328 = arith.constant 6 : index
    %c0_329 = arith.constant 0 : index
    %c0_330 = arith.constant 0 : index
    %707 = vector.load %arg8[%c6_328, %c0_329, %c0_330] : memref<9x8x32xbf16, #tpu.memory_space<vmem>>, vector<1x8x32xbf16>
    %708 = vector.shape_cast %707 : vector<1x8x32xbf16> to vector<8x32xbf16>
    %709 = arith.truncf %674 : vector<32x512xf32> to vector<32x512xbf16>
    %cst_331 = arith.constant dense<0.000000e+00> : vector<8x512xf32>
    %710 = tpu.matmul %708, %709, %cst_331 {dimension_numbers = #tpu.dot_dimension_numbers<[1], [0], [0], [1], [0, 0, 1, 1], [], []>} : vector<8x32xbf16>, vector<32x512xbf16>, vector<8x512xf32> -> vector<8x512xf32>
    %711 = arith.addf %706, %710 : vector<8x512xf32>
    %c7_332 = arith.constant 7 : index
    %c0_333 = arith.constant 0 : index
    %c0_334 = arith.constant 0 : index
    %712 = vector.load %arg8[%c7_332, %c0_333, %c0_334] : memref<9x8x32xbf16, #tpu.memory_space<vmem>>, vector<1x8x32xbf16>
    %713 = vector.shape_cast %712 : vector<1x8x32xbf16> to vector<8x32xbf16>
    %714 = arith.truncf %653 : vector<32x512xf32> to vector<32x512xbf16>
    %cst_335 = arith.constant dense<0.000000e+00> : vector<8x512xf32>
    %715 = tpu.matmul %713, %714, %cst_335 {dimension_numbers = #tpu.dot_dimension_numbers<[1], [0], [0], [1], [0, 0, 1, 1], [], []>} : vector<8x32xbf16>, vector<32x512xbf16>, vector<8x512xf32> -> vector<8x512xf32>
    %716 = arith.addf %711, %715 : vector<8x512xf32>
    %c8_336 = arith.constant 8 : index
    %c0_337 = arith.constant 0 : index
    %c0_338 = arith.constant 0 : index
    %717 = vector.load %arg8[%c8_336, %c0_337, %c0_338] : memref<9x8x32xbf16, #tpu.memory_space<vmem>>, vector<1x8x32xbf16>
    %718 = vector.shape_cast %717 : vector<1x8x32xbf16> to vector<8x32xbf16>
    %719 = arith.truncf %677 : vector<32x512xf32> to vector<32x512xbf16>
    %cst_339 = arith.constant dense<0.000000e+00> : vector<8x512xf32>
    %720 = tpu.matmul %718, %719, %cst_339 {dimension_numbers = #tpu.dot_dimension_numbers<[1], [0], [0], [1], [0, 0, 1, 1], [], []>} : vector<8x32xbf16>, vector<32x512xbf16>, vector<8x512xf32> -> vector<8x512xf32>
    %721 = arith.addf %716, %720 : vector<8x512xf32>
    %722 = arith.addf %721, %88 : vector<8x512xf32>
    %c0_340 = arith.constant 0 : index
    %c0_341 = arith.constant 0 : index
    %723 = vector.load %arg9[%c0_340, %c0_341] : memref<8x1xf32, #tpu.memory_space<vmem>>, vector<8x1xf32>
    %724 = vector.broadcast %723 : vector<8x1xf32> to vector<8x512xf32>
    %725 = arith.addf %722, %724 : vector<8x512xf32>
    %cst_342 = arith.constant 2.000000e-01 : f32
    %726 = vector.broadcast %cst_342 : f32 to vector<8x512xf32>
    %727 = arith.mulf %726, %725 : vector<8x512xf32>
    %728 = arith.maximumf %725, %727 : vector<8x512xf32>
    %c0_343 = arith.constant 0 : index
    %c0_344 = arith.constant 0 : index
    %c0_345 = arith.constant 0 : index
    %729 = vector.load %arg10[%c0_343, %c0_344, %c0_345] : memref<1x8x512xf32, #tpu.memory_space<vmem>>, vector<1x8x512xf32>
    %730 = vector.shape_cast %729 : vector<1x8x512xf32> to vector<8x512xf32>
    %731 = vector.shape_cast %728 : vector<8x512xf32> to vector<1x8x512xf32>
    tpu.vector_store %arg10[%c0_343, %c0_344, %c0_345], %731 {strides = array<i32>} : memref<1x8x512xf32, #tpu.memory_space<vmem>>, vector<1x8x512xf32>,
    return
  }
  func.func @transform_0(%arg0: i32) -> (i32, i32) {
    %c0_i32 = arith.constant 0 : i32
    %c0_i32_0 = arith.constant 0 : i32
    %c0_i32_1 = arith.constant 0 : i32
    return %c0_i32, %c0_i32_0 : i32, i32
  }
  func.func @transform_1(%arg0: i32) -> (i32, i32) {
    %c0_i32 = arith.constant 0 : i32
    %c0_i32_0 = arith.constant 0 : i32
    %c0_i32_1 = arith.constant 0 : i32
    return %c0_i32, %c0_i32_0 : i32, i32
  }
  func.func @transform_2(%arg0: i32) -> (i32, i32, i32) {
    %c0_i32 = arith.constant 0 : i32
    %c0_i32_0 = arith.constant 0 : i32
    %c0_i32_1 = arith.constant 0 : i32
    return %arg0, %c0_i32, %c0_i32_0 : i32, i32, i32
  }
  func.func @transform_3(%arg0: i32) -> (i32, i32, i32) {
    %c0_i32 = arith.constant 0 : i32
    %c0_i32_0 = arith.constant 0 : i32
    %c0_i32_1 = arith.constant 0 : i32
    %c0_i32_2 = arith.constant 0 : i32
    return %c0_i32, %c0_i32_0, %c0_i32_1 : i32, i32, i32
  }
  func.func @transform_4(%arg0: i32) -> (i32, i32, i32) {
    %c0_i32 = arith.constant 0 : i32
    %c0_i32_0 = arith.constant 0 : i32
    %c0_i32_1 = arith.constant 0 : i32
    %c0_i32_2 = arith.constant 0 : i32
    return %c0_i32, %c0_i32_0, %c0_i32_1 : i32, i32, i32
  }
  func.func @transform_5(%arg0: i32) -> (i32, i32, i32, i32) {
    %c0_i32 = arith.constant 0 : i32
    %c0_i32_0 = arith.constant 0 : i32
    %c0_i32_1 = arith.constant 0 : i32
    %c0_i32_2 = arith.constant 0 : i32
    %c0_i32_3 = arith.constant 0 : i32
    return %c0_i32, %c0_i32_0, %c0_i32_1, %c0_i32_2 : i32, i32, i32, i32
  }
  func.func @transform_6(%arg0: i32) -> (i32, i32, i32) {
    %c0_i32 = arith.constant 0 : i32
    %c0_i32_0 = arith.constant 0 : i32
    %c0_i32_1 = arith.constant 0 : i32
    %c0_i32_2 = arith.constant 0 : i32
    return %c0_i32, %c0_i32_0, %c0_i32_1 : i32, i32, i32
  }
  func.func @transform_7(%arg0: i32) -> (i32, i32, i32) {
    %c0_i32 = arith.constant 0 : i32
    %c0_i32_0 = arith.constant 0 : i32
    %c0_i32_1 = arith.constant 0 : i32
    %c0_i32_2 = arith.constant 0 : i32
    return %c0_i32, %c0_i32_0, %c0_i32_1 : i32, i32, i32
  }
  func.func @transform_8(%arg0: i32) -> (i32, i32) {
    %c0_i32 = arith.constant 0 : i32
    %c0_i32_0 = arith.constant 0 : i32
    %c0_i32_1 = arith.constant 0 : i32
    return %c0_i32, %c0_i32_0 : i32, i32
  }
  func.func @transform_9(%arg0: i32) -> (i32, i32, i32) {
    %c0_i32 = arith.constant 0 : i32
    %c0_i32_0 = arith.constant 0 : i32
    %c0_i32_1 = arith.constant 0 : i32
    return %arg0, %c0_i32, %c0_i32_0 : i32, i32, i32
  }
}

</mosaic_0001>

<bundles_post_ra>
// kernel: res2net_block.1
= control target key start
LH: loop header
LB: loop body
LE: loop exit
PB: predicated region body
PF: predicated region fallthrough
CT: control target
= control target key end

     0   :  { %s6732_s13 = smov 16   ;;  %v6734_v12 = vmov 0   ;;  %v62_v20 = vlaneseq  ;;  %v10530_v31 = vmov 0  ;;  %v10532_v32 = vmov 0  ;;  %s6736_s16 = smov 127   ;;  %s10422_s2 = inlined_call_operand.vmem [shape: f32[1,4,512], index: 2, kind: input, shape index: {}]   ;;  %s10423_s0 = inlined_call_operand.vmem [shape: s32[1,512], index: 0, kind: input, shape index: {}]   ;;  %s10424_s3 = inlined_call_operand.vmem [shape: bf16[9,40,4], index: 3, kind: input, shape index: {}]   ;;  %s10425_s1 = inlined_call_operand.vmem [shape: s32[1,512], index: 1, kind: input, shape index: {}]   ;;  %s10426_s4 = inlined_call_operand.vmem [shape: f32[4,8,1], index: 4, kind: input, shape index: {}]   ;;  %s10427_s5 = inlined_call_operand.vmem [shape: bf16[3,9,8,8], index: 5, kind: input, shape index: {}]   ;;  %s10428_s6 = inlined_call_operand.vmem [shape: f32[3,8,1], index: 6, kind: input, shape index: {}]   ;;  %s10429_s7 = inlined_call_operand.vmem [shape: bf16[9,8,32], index: 7, kind: input, shape index: {}]   ;;  %s10430_s8 = inlined_call_operand.vmem [shape: f32[8,1], index: 8, kind: input, shape index: {}]   ;;  %s10431_s9 = inlined_call_operand.vmem [shape: f32[1,8,512], index: 9, kind: output, shape index: {}]  }
   0x1   :  { %v6790_v0 = vld [vmem:[%s10422_s2] sm:$0xff]  ;;  %v6795_v1 = vld [vmem:[%s10422_s2 + $0x8] sm:$0xff]  ;;  %s6733_s2 = smov 112   ;;  %6211 = vset.pattern.permute.xlu0 %v6734_v12  ;;  %6262 = vset.pattern.permute.xlu2 %v6734_v12  ;;  %vm10435_vm5 = vcmask 1041408   ;;  %v10535_v48 = vmov 0  ;;  %v10537_v49 = vmov 0 }
   0x2   :  { %43 = vst [vmem:[#allocation1] ss:$2 sm:$0xff] %v6790_v0  ;;  %6263 = vset.pattern.permute.xlu1 %v6734_v12  ;;  %v6823_v17 = vld [vmem:[%s10423_s0] sm:$0xf]  ;;  %v6829_v22 = vand.u32 127, %v62_v20  ;;  %s6735_s0 = smov 1  }
   0x3   :  { %45 = vst [vmem:[#allocation1 + $0x10] ss:$2 sm:$0xff] %v6795_v1  ;;  %vm35_vm0 = vcmp.eq.s32.totalorder %v6823_v17, 0  ;;  %vm10434_vm8 = vcmask 31744   ;;  %vm36_vm9 = vcmp.eq.s32.totalorder %v6823_v17, 15  ;;  %v6151_v20 = vld [vmem:[%s10424_s3 + $0x1c] sm:$0xff] }
   0x4   :  { %v93_v21 = vsel %vm35_vm0, 1, %v6734_v12  ;;  %vm10432_vm1 = vcmp.lt.s32.totalorder %v6829_v22, 16  ;;  %vm10433_vm2 = vcmp.lt.s32.totalorder %v6829_v22, 112 }
   0x5   :  { %v94_v23 = vperm.slane %v93_v21, 0  ;;  %v95_v24 = vperm.slane %v93_v21, 1  ;;  %v96_v34 = vperm.slane %v93_v21, 2  ;;  %v97_v35 = vperm.slane %v93_v21, 3  ;;  %v5749_v21 = vld [vmem:[%s10424_s3 + $0x24] sm:$0xf] }
   0x7   :  { %vm6833_vm3 = vcmp.eq.s32.totalorder %v94_v23, 1  ;;  %vm6837_vm4 = vcmp.eq.s32.totalorder %v95_v24, 1  ;;  %vm6867_vm6 = vcmp.eq.s32.totalorder %v96_v34, 1  ;;  %vm6871_vm7 = vcmp.eq.s32.totalorder %v97_v35, 1 }
   0x8   :  { %v10531_v31 = vsel %vm6833_vm3, 4294967295, %v10530_v31  ;;  %v10533_v32 = vsel %vm6837_vm4, 4294967295, %v10532_v32  ;;  %v10536_v48 = vsel %vm6867_vm6, 4294967295, %v10535_v48  ;;  %v10538_v49 = vsel %vm6871_vm7, 4294967295, %v10537_v49 }
   0x9   :  { %v47_v2 = vld.sshfl [vmem:[#allocation1 + $0x8] sm:$0xff pattern:$0x75316420]  ;;  %v46_v3 = vld.sshfl [vmem:[#allocation1] sm:$0xff pattern:$0x75316420]  ;;  %v285_v23 = vunpack.c.l.b16 %v5749_v21 }
   0xa   :  { %v48_v4 = vld.sshfl [vmem:[#allocation1 + $0x10] sm:$0xff pattern:$0x75316420]  ;;  %69 = vst [vmem:[#allocation1] ss:$2 sm:$0xff] %v6790_v0  ;;  %54 = vrot.lane.b32.xlu2 %v46_v3, %s6732_s13 }
   0xb   :  { %v6171_v5 = vpack.i.bf16 %v48_v4, %v47_v2  ;;  %v49_v6 = vld.sshfl [vmem:[#allocation1 + $0x18] sm:$0xff pattern:$0x75316420]  ;;  %10534 = vst [vmem:[#allocation2_spill] sm:$0xff] %v10533_v32  ;;  %v106_v4 = vsel %vm36_vm9, 1, %v6734_v12  ;;  %v288_v24 = vpack.c.b16 %v285_v23, %v285_v23 }
   0xc   :  { %71 = vst [vmem:[#allocation1 + $0x10] ss:$2 sm:$0xff] %v6795_v1 }
   0xd   :  { %6172 = vrot.lane.b32.xlu0 %v6171_v5, %s6732_s13  ;;  %v109_v5 = vperm.slane %v106_v4, 2 }
   0xf   :  { %vm6914_vm10 = vcmp.eq.s32.totalorder %v109_v5, 1 }
  0x11   :  { %v72_v7 = vld.sshfl [vmem:[#allocation1] sm:$0xff pattern:$0x75316420]  ;;  %v73_v8 = vld.sshfl [vmem:[#allocation1 + $0x8] sm:$0xff pattern:$0x75316420] }
  0x12   :  { %82 = vrot.lane.b32.xlu2 %v73_v8, %s6733_s2  ;;  %171 = vst [vmem:[#allocation1] ss:$2 sm:$0xff] %v6790_v0  ;;  %v110_v8 = vperm.slane %v106_v4, 3 }
  0x13   :  { %v74_v9 = vld.sshfl [vmem:[#allocation1 + $0x10] sm:$0xff pattern:$0x75316420]  ;;  %v75_v10 = vld.sshfl [vmem:[#allocation1 + $0x18] sm:$0xff pattern:$0x75316420] }
  0x14   :  { %v6176_v11 = vpack.i.bf16 %v74_v9, %v72_v7  ;;  %173 = vst [vmem:[#allocation1 + $0x10] ss:$2 sm:$0xff] %v6795_v1  ;;  %v108_v7 = vperm.slane %v106_v4, 1  ;;  %v10539_v9 = vmov 0  ;;  %vm6928_vm13 = vcmp.eq.s32.totalorder %v110_v8, 1 }
  0x15   :  { %60 = vrot.lane.b32.xlu0 %v49_v6, %s6732_s13  ;;  %v107_v6 = vperm.slane %v106_v4, 0  ;;  %v10540_v9 = vsel %vm6914_vm10, 4294967295, %v10539_v9 }
  0x16   :  { %6177 = vrot.lane.b32.xlu1 %v6176_v11, %s6733_s2  ;;  %10541 = vst [vmem:[#allocation3_spill] sm:$0xff] %v10540_v9  ;;  %vm6924_vm12 = vcmp.eq.s32.totalorder %v108_v7, 1  ;;  %v10545_v11 = vmov 0 }
  0x17   :  { %vm6920_vm11 = vcmp.eq.s32.totalorder %v107_v6, 1  ;;  %v10546_v11 = vsel %vm6924_vm12, 4294967295, %v10545_v11 }
  0x18   :  { %10547 = vst [vmem:[#allocation5_spill] sm:$0xff] %v10546_v11 }
  0x19   :  { %v6814_v14 = vld.sshfl [vmem:[#allocation1 + $0x8] sm:$0xff pattern:$0x75316420]  ;;  %v6818_v16 = vld.sshfl [vmem:[#allocation1] sm:$0xff pattern:$0x75316420] }
  0x1a   :  { %194 = vst [vmem:[#allocation1] ss:$2 sm:$0xff] %v6790_v0 }
  0x1b   :  { %v6812_v13 = vld.sshfl [vmem:[#allocation1 + $0x18] sm:$0xff pattern:$0x75316420]  ;;  %v6816_v15 = vld.sshfl [vmem:[#allocation1 + $0x10] sm:$0xff pattern:$0x75316420] }
  0x1c   :  { %196 = vst [vmem:[#allocation1 + $0x10] ss:$2 sm:$0xff] %v6795_v1  ;;  %v6191_v2 = vpack.i.bf16 %v6816_v15, %v6814_v14 }
  0x1e   :  { %86 = vrot.lane.b32.xlu1 %v75_v10, %s6733_s2  ;;  %v10542_v10 = vmov 0 }
  0x1f   :  { %v10543_v10 = vsel %vm6920_vm11, 4294967295, %v10542_v10 }
  0x20   :  { %10544 = vst [vmem:[#allocation4_spill] sm:$0xff] %v10543_v10 }
  0x21   :  { %v197_v41 = vld.sshfl [vmem:[#allocation1] sm:$0xff pattern:$0x75316420]  ;;  %v198_v45 = vld.sshfl [vmem:[#allocation1 + $0x8] sm:$0xff pattern:$0x75316420] }
  0x22   :  { %848 = vst [vmem:[#allocation1] ss:$2 sm:$0xff] %v6790_v0 }
  0x23   :  { %v199_v36 = vld.sshfl [vmem:[#allocation1 + $0x10] sm:$0xff pattern:$0x75316420]  ;;  %v200_v42 = vld.sshfl [vmem:[#allocation1 + $0x18] sm:$0xff pattern:$0x75316420] }
  0x24   :  { %850 = vst [vmem:[#allocation1 + $0x10] ss:$2 sm:$0xff] %v6795_v1  ;;  %v6150_v1 = vld [vmem:[%s10424_s3 + $0x14] sm:$0xff]  ;;  %v6196_v3 = vpack.i.bf16 %v199_v36, %v197_v41 }
  0x64   :  { %v55_v18 = vpop.permute.xlu2 %54 }
  0x6c   :  { %v83_v26 = vpop.permute.xlu2 %82 }
  0x7f   :  { %v6173_v19 = vpop.permute.xlu0 %6172 }
  0x80   :  { %v6174_v25 = vunpack.i.l.bf16 %v6173_v19  ;;  %v6175_v33 = vunpack.i.h.bf16 %v6173_v19 }
  0x82   :  { %v6843_v37 = vsel %vm10432_vm1, %v55_v18, %v6174_v25  ;;  %v66_v51 = vsel %vm10432_vm1, %v6174_v25, %v6175_v33 }
  0x87   :  { %v61_v27 = vpop.permute.xlu0 %60 }
  0x88   :  { %v6178_v28 = vpop.permute.xlu1 %6177  ;;  %v6847_v38 = vsel %vm10432_vm1, %v61_v27, %v55_v18  ;;  %v65_v50 = vsel %vm10432_vm1, %v6175_v33, %v61_v27 }
  0x89   :  { %v6180_v29 = vunpack.i.h.bf16 %v6178_v28  ;;  %v6179_v30 = vunpack.i.l.bf16 %v6178_v28 }
  0x8b   :  { %v6851_v39 = vsel %vm10433_vm2, %v83_v26, %v6180_v29  ;;  %v6855_v40 = vsel %vm10433_vm2, %v6179_v30, %v83_v26  ;;  %v34_v26 = vld [vmem:[%s10425_s1] sm:$0xf] }
  0x8c   :  { %v102_v43 = vsel %vm6833_vm3, %v6855_v40, %v6847_v38  ;;  %v103_v44 = vsel %vm6837_vm4, %v6851_v39, %v6843_v37  ;;  %v6940_v15 = vsel %vm6920_vm11, %v6847_v38, %v6855_v40  ;;  %vm37_vm14 = vcmp.eq.s32.totalorder %v34_v26, 0 }
  0x8d   :  { %v272_v46 = vpack.c.bf16 %v102_v43, %v102_v43  ;;  %v273_v47 = vpack.c.bf16 %v103_v44, %v103_v44  ;;  %vm38_vm15 = vcmp.eq.s32.totalorder %v34_v26, 15  ;;  %v145_v28 = vsel %vm37_vm14, 1, %v6734_v12 }
  0x8e   :  { %v146_v33 = vperm.slane %v145_v28, 0  ;;  %v147_v34 = vperm.slane %v145_v28, 1  ;;  %v148_v35 = vperm.slane %v145_v28, 2  ;;  %vm10584_vm4 = vcmask 31744  }
  0x8f   :  { %v301_v52 = vsel %vm10435_vm5, %v272_v46, 0  ;;  %v304_v53 = vsel %vm10435_vm5, %v273_v47, 0  ;;  %vm10587_vm3 = vmmov %vm10584_vm4 }
  0x90   :  { %v87_v54 = vpop.permute.xlu1 %86  ;;  %319 = vmatpush.bf16.msra.mxu0 %v301_v52  ;;  %342 = vmatpush.bf16.msra.mxu1 %v304_v53  ;;  %vm6985_vm0 = vcmp.eq.s32.totalorder %v146_v33, 1  ;;  %vm6989_vm9 = vcmp.eq.s32.totalorder %v147_v34, 1  ;;  %vm6993_vm14 = vcmp.eq.s32.totalorder %v148_v35, 1  ;;  %v10565_v53 = vmov 0 }
  0x91   :  { %v89_v55 = vsel %vm10433_vm2, %v6180_v29, %v87_v54  ;;  %v92_v56 = vsel %vm10433_vm2, %v87_v54, %v6179_v30  ;;  %v158_v29 = vsel %vm38_vm15, 1, %v6734_v12  ;;  %v10568_v54 = vmov 0 }
  0x92   :  { %v104_v57 = vsel %vm6867_vm6, %v89_v55, %v66_v51  ;;  %v105_v58 = vsel %vm6871_vm7, %v92_v56, %v65_v50  ;;  %v6934_v14 = vsel %vm6914_vm10, %v66_v51, %v89_v55  ;;  %v6950_v17 = vsel %vm6928_vm13, %v65_v50, %v92_v56  ;;  %vm10585_vm6 = vmmov %vm10584_vm4 }
  0x93   :  { %125 = vrot.lane.b32.xlu1 %v105_v58, %s6735_s0  ;;  %v6181_v59 = vpack.i.bf16 %v104_v57, %v103_v44  ;;  %v6186_v60 = vpack.i.bf16 %v104_v57, %v102_v43  ;;  %v274_v61 = vpack.c.bf16 %v104_v57, %v104_v57  ;;  %v275_v62 = vpack.c.bf16 %v105_v58, %v105_v58  ;;  %vm10586_vm7 = vmmov %vm10584_vm4 }
  0x94   :  { %5758 = vmatmul.msk.bf16.vlgmr.msra.gmra.mxu0 %vm10434_vm8, %v6150_v1  ;;  %5761 = vmatmul.msk.bf16.vlgmr.msra.gmra.mxu1 %vm10434_vm8, %v6150_v1  ;;  %v6206_v19 = vpack.i.bf16 %v6934_v14, %v6940_v15  ;;  %v159_v36 = vperm.slane %v158_v29, 0  ;;  %v161_v40 = vperm.slane %v158_v29, 2  ;;  %v162_v41 = vperm.slane %v158_v29, 3 }
  0x95   :  { %6182 = vrot.lane.b32.xlu0 %v6181_v59, %s6735_s0  ;;  %6187 = vrot.lane.b32.xlu2 %v6186_v60, %s6736_s16  ;;  %v307_v63 = vsel %vm10435_vm5, %v274_v61, 0  ;;  %v310_v0 = vsel %vm10435_vm5, %v275_v62, 0  ;;  %v10571_v55 = vmov 0  ;;  %vm10442_vm2 = vcmp.lt.s32.totalorder %v6829_v22, 1 }
  0x96   :  { %365 = vmatpush.bf16.msra.mxu2 %v307_v63  ;;  %388 = vmatpush.bf16.msra.mxu3 %v310_v0  ;;  %vm6997_vm15 = vcmp.eq.s32.totalorder %v159_v36, 1  ;;  %vm7012_vm5 = vcmp.eq.s32.totalorder %v161_v40, 1  ;;  %vm7016_vm11 = vcmp.eq.s32.totalorder %v162_v41, 1 }
  0x97   :  { %v10569_v54 = vsel %vm7012_vm5, 4294967295, %v10568_v54  ;;  %v10572_v55 = vsel %vm7016_vm11, 4294967295, %v10571_v55 }
  0x98   :  { %10570 = vst [vmem:[#allocation12_spill] sm:$0xff] %v10569_v54 }
  0x99   :  { %5764 = vmatmul.msk.bf16.vlgmr.msra.gmra.mxu2 %vm10434_vm8, %v6150_v1  ;;  %5767 = vmatmul.msk.bf16.vlgmr.msra.gmra.mxu3 %vm10434_vm8, %v6150_v1  ;;  %10573 = vst [vmem:[#allocation13_spill] sm:$0xff] %v10572_v55 }
  0x9b   :  { %119 = vrot.lane.b32.xlu1 %v102_v43, %s6735_s0  ;;  %v10554_v43 = vmov 0 }
  0x9c   :  { %v10555_v43 = vsel %vm6989_vm9, 4294967295, %v10554_v43 }
  0x9d   :  { %138 = vrot.lane.b32.xlu0 %v105_v58, %s6736_s16  ;;  %134 = vrot.lane.b32.xlu2 %v103_v44, %s6736_s16  ;;  %10556 = vst [vmem:[#allocation8_spill] sm:$0xff] %v10555_v43  ;;  %v10559_v44 = vmov 0 }
  0x9e   :  { %v10560_v44 = vsel %vm6997_vm15, 4294967295, %v10559_v44 }
  0x9f   :  { %10561 = vst [vmem:[#allocation9_spill] sm:$0xff] %v10560_v44 }
  0xa3   :  { %188 = vrot.lane.b32.xlu1 %v6812_v13, %s6735_s0  ;;  %v10548_v13 = vmov 0 }
  0xa4   :  { %v10549_v13 = vsel %vm6928_vm13, 4294967295, %v10548_v13  ;;  %5759 = vmatmul.msk.bf16.gmra.mxu0 %vm10434_vm8, %v6151_v20  ;;  %5762 = vmatmul.msk.bf16.gmra.mxu1 %vm10434_vm8, %v6151_v20  ;;  %vm10574_vm13 = vcmp.lt.s32.totalorder %v6829_v22, 127 }
  0xa5   :  { %6192 = vrot.lane.b32.xlu0 %v6191_v2, %s6735_s0  ;;  %6197 = vrot.lane.b32.xlu2 %v6196_v3, %s6736_s16  ;;  %10550 = vst [vmem:[#allocation6_spill] sm:$0xff] %v10549_v13 }
  0xa9   :  { %5765 = vmatmul.msk.bf16.gmra.mxu2 %vm10434_vm8, %v6151_v20  ;;  %5768 = vmatmul.msk.bf16.gmra.mxu3 %vm10434_vm8, %v6151_v20 }
  0xab   :  { %182 = vrot.lane.b32.xlu1 %v6818_v16, %s6735_s0  ;;  %v6946_v16 = vsel %vm6924_vm12, %v6843_v37, %v6851_v39  ;;  %v160_v37 = vperm.slane %v158_v29, 1  ;;  %v149_v39 = vperm.slane %v145_v28, 3  ;;  %vm10575_vm12 = vmmov %vm10574_vm13 }
  0xac   :  { %v6201_v18 = vpack.i.bf16 %v6934_v14, %v6946_v16 }
  0xad   :  { %211 = vrot.lane.b32.xlu0 %v200_v42, %s6736_s16  ;;  %207 = vrot.lane.b32.xlu2 %v198_v45, %s6736_s16  ;;  %v10551_v42 = vmov 0  ;;  %vm7001_vm1 = vcmp.eq.s32.totalorder %v160_v37, 1  ;;  %v10562_v45 = vmov 0 }
  0xae   :  { %v10552_v42 = vsel %vm6985_vm0, 4294967295, %v10551_v42  ;;  %v10563_v45 = vsel %vm7001_vm1, 4294967295, %v10562_v45 }
  0xaf   :  { %10553 = vst [vmem:[#allocation7_spill] sm:$0xff] %v10552_v42 }
  0xb0   :  { %10564 = vst [vmem:[#allocation10_spill] sm:$0xff] %v10563_v45 }
  0xb3   :  { %231 = vrot.lane.b32.xlu1 %v6950_v17, %s6735_s0 }
  0xb4   :  { %5760 = vmatmul.msk.bf16.gmra.mxu0 %vm10434_vm8, %v288_v24  ;;  %5763 = vmatmul.msk.bf16.gmra.mxu1 %vm10434_vm8, %v288_v24 }
  0xb5   :  { %6202 = vrot.lane.b32.xlu0 %v6201_v18, %s6735_s0  ;;  %6207 = vrot.lane.b32.xlu2 %v6206_v19, %s6736_s16 }
  0xb9   :  { %5766 = vmatmul.msk.bf16.gmra.mxu2 %vm10434_vm8, %v288_v24  ;;  %5769 = vmatmul.msk.bf16.gmra.mxu3 %vm10434_vm8, %v288_v24  ;;  %vm7008_vm8 = vcmp.eq.s32.totalorder %v149_v39, 1 }
  0xba   :  { %v10566_v53 = vsel %vm7008_vm8, 4294967295, %v10565_v53 }
  0xbb   :  { %225 = vrot.lane.b32.xlu1 %v6940_v15, %s6735_s0  ;;  %10567 = vst [vmem:[#allocation11_spill] sm:$0xff] %v10566_v53 }
  0xbd   :  { %243 = vrot.lane.b32.xlu0 %v6950_v17, %s6736_s16  ;;  %239 = vrot.lane.b32.xlu2 %v6946_v16, %s6736_s16 }
  0xef   :  { %v6188_v25 = vpop.permute.xlu2 %6187 }
  0xf0   :  { %v6190_v46 = vunpack.i.h.bf16 %v6188_v25  ;;  %v6189_v47 = vunpack.i.l.bf16 %v6188_v25 }
  0xf7   :  { %v135_v27 = vpop.permute.xlu2 %134 }
  0xf8   :  { %v142_v57 = vsel %vm10574_vm13, %v135_v27, %v6190_v46  ;;  %v143_v58 = vsel %vm10575_vm12, %v6189_v47, %v135_v27  ;;  %vm10576_vm13 = vmmov %vm10575_vm12 }
  0xff   :  { %v7006_v50 = vpop.permute.xlu2 %6197 }
 0x105   :  { %v126_v30 = vpop.permute.xlu1 %125 }
 0x107   :  { %v6183_v38 = vpop.permute.xlu0 %6182  ;;  %v208_v36 = vpop.permute.xlu2 %207 }
 0x108   :  { %v6185_v51 = vunpack.i.h.bf16 %v6183_v38  ;;  %v6184_v52 = vunpack.i.l.bf16 %v6183_v38 }
 0x10a   :  { %v129_v4 = vsel %vm10442_vm2, %v6184_v52, %v6185_v51  ;;  %v128_v5 = vsel %vm10442_vm2, %v6185_v51, %v126_v30 }
 0x10d   :  { %v120_v56 = vpop.permute.xlu1 %119 }
 0x10e   :  { %v130_v59 = vsel %vm10442_vm2, %v120_v56, %v6184_v52  ;;  %v131_v60 = vsel %vm10442_vm2, %v126_v30, %v120_v56  ;;  %v6148_v30 = vld [vmem:[%s10424_s3] sm:$0xff]  ;;  %v6149_v52 = vld [vmem:[%s10424_s3 + $0x8] sm:$0xff] }
 0x10f   :  { %v139_v61 = vpop.permute.xlu0 %138  ;;  %v154_v62 = vsel %vm6985_vm0, %v143_v58, %v131_v60  ;;  %v155_v63 = vsel %vm6989_vm9, %v142_v57, %v130_v59  ;;  %v167_v0 = vsel %vm6997_vm15, %v131_v60, %v143_v58  ;;  %v168_v1 = vsel %vm7001_vm1, %v130_v59, %v142_v57  ;;  %v6208_v51 = vpop.permute.xlu2 %6207 }
 0x110   :  { %v141_v2 = vsel %vm10575_vm12, %v6190_v46, %v139_v61  ;;  %v144_v3 = vsel %vm10576_vm13, %v139_v61, %v6189_v47  ;;  %v262_v6 = vpack.c.bf16 %v154_v62, %v154_v62  ;;  %v263_v7 = vpack.c.bf16 %v155_v63, %v155_v63 }
 0x111   :  { %v536_v8 = vpack.c.bf16 %v167_v0, %v167_v0  ;;  %v537_v18 = vpack.c.bf16 %v168_v1, %v168_v1  ;;  %v156_v19 = vsel %vm6993_vm14, %v141_v2, %v129_v4  ;;  %v157_v20 = vsel %vm7008_vm8, %v144_v3, %v128_v5  ;;  %v261_v0 = vld [vmem:[%s10424_s3 + $0x10] sm:$0xf] }
 0x112   :  { %v169_v21 = vsel %vm7012_vm5, %v129_v4, %v141_v2  ;;  %v170_v23 = vsel %vm7016_vm11, %v128_v5, %v144_v3  ;;  %vm10577_vm12 = vcmask 1041408   ;;  %v264_v28 = vpack.c.bf16 %v156_v19, %v156_v19 }
 0x113   :  { %v427_v24 = vsel %vm10577_vm12, %v262_v6, 0  ;;  %vm10578_vm13 = vmmov %vm10577_vm12  ;;  %v265_v29 = vpack.c.bf16 %v157_v20, %v157_v20  ;;  %v538_v33 = vpack.c.bf16 %v169_v21, %v169_v21  ;;  %v539_v35 = vpack.c.bf16 %v170_v23, %v170_v23 }
 0x114   :  { %v430_v25 = vsel %vm10578_vm13, %v263_v7, 0  ;;  %vm10579_vm2 = vmmov %vm10577_vm12  ;;  %445 = vmatpush.bf16.msrb.mxu0 %v427_v24  ;;  %v6210_v59 = vunpack.i.h.bf16 %v6208_v51  ;;  %v6209_v60 = vunpack.i.l.bf16 %v6208_v51  ;;  %v413_v19 = vunpack.c.l.b16 %v261_v0 }
 0x115   :  { %v563_v26 = vsel %vm10579_vm2, %v536_v8, 0  ;;  %vm10580_vm10 = vmmov %vm10579_vm2  ;;  %468 = vmatpush.bf16.msrb.mxu1 %v430_v25  ;;  %v7060_v34 = vpop.permute.xlu1 %188  ;;  %v436_v38 = vsel %vm10579_vm2, %v265_v29, 0 }
 0x116   :  { %v566_v27 = vsel %vm10580_vm10, %v537_v18, 0  ;;  %vm10581_vm12 = vmmov %vm10579_vm2  ;;  %514 = vmatpush.bf16.msrb.mxu3 %v436_v38  ;;  %v416_v25 = vpack.c.b16 %v413_v19, %v413_v19 }
 0x117   :  { %v433_v37 = vsel %vm10581_vm12, %v264_v28, 0  ;;  %vm10582_vm10 = vmmov %vm10579_vm2  ;;  %v7066_v41 = vpop.permute.xlu0 %6192  ;;  %5778 = vmatmul.msk.bf16.vlgmr.msrb.gmra.mxu0 %vm10584_vm4, %v6148_v30  ;;  %v240_v58 = vpop.permute.xlu2 %239  ;;  %v6200_v28 = vunpack.i.h.bf16 %v7006_v50 }
 0x118   :  { %581 = vmatpush.bf16.msra.mxu0 %v563_v26  ;;  %v569_v39 = vsel %vm10582_vm10, %v538_v33, 0  ;;  %491 = vmatpush.bf16.msrb.mxu2 %v433_v37  ;;  %vm10583_vm13 = vmmov %vm10579_vm2  ;;  %vm10594_vm10 = vcmp.lt.s32.totalorder %v6829_v22, 1  ;;  %v7142_v26 = vpop.f32.mrf.mxu0  ;;  %v6194_v29 = vunpack.i.l.bf16 %v7066_v41  ;;  %v6152_v33 = vld [vmem:[%s10424_s3 + $0x28] sm:$0xff] }
 0x119   :  { %604 = vmatpush.bf16.msra.mxu1 %v566_v27  ;;  %v572_v40 = vsel %vm10583_vm13, %v539_v35, 0  ;;  %5787 = vmatmul.msk.bf16.vlgmr.msrb.gmra.mxu3 %vm10587_vm3, %v6148_v30  ;;  %vm10588_vm12 = vmmov %vm10587_vm3  ;;  %v7144_v27 = vpop.f32.mrf.mxu1  ;;  %v6195_v35 = vunpack.i.h.bf16 %v7066_v41 }
 0x11a   :  { %5781 = vmatmul.msk.bf16.vlgmr.msrb.gmra.mxu1 %vm10585_vm6, %v6148_v30  ;;  %650 = vmatpush.bf16.msra.mxu3 %v572_v40  ;;  %vm10589_vm4 = vmmov %vm10587_vm3 }
 0x11b   :  { %5784 = vmatmul.msk.bf16.vlgmr.msrb.gmra.mxu2 %vm10586_vm7, %v6148_v30  ;;  %vm10590_vm6 = vmmov %vm10587_vm3  ;;  %v6199_v30 = vunpack.i.l.bf16 %v7006_v50 }
 0x11c   :  { %627 = vmatpush.bf16.msra.mxu2 %v569_v39  ;;  %vm10591_vm2 = vmmov %vm10587_vm3  ;;  %vm10592_vm3 = vcmp.lt.s32.totalorder %v6829_v22, 127  ;;  %v7153_v37 = vpop.f32.mrf.mxu2  ;;  %v7155_v38 = vpop.f32.mrf.mxu3 }
 0x11d   :  { %v183_v46 = vpop.permute.xlu1 %182  ;;  %v7081_v62 = vsel %vm10592_vm3, %v240_v58, %v6210_v59  ;;  %vm10593_vm7 = vmmov %vm10592_vm3 }
 0x11e   :  { %v7088_v1 = vsel %vm10593_vm7, %v6209_v60, %v240_v58  ;;  %vm10595_vm13 = vmmov %vm10594_vm10  ;;  %v851_v58 = vld.sshfl [vmem:[#allocation1] sm:$0xff pattern:$0x75316420] }
 0x11f   :  { %v212_v47 = vpop.permute.xlu0 %211  ;;  %v859_v19 = vpack.c.bf16 %v851_v58, %v851_v58 }
 0x125   :  { %v232_v56 = vpop.permute.xlu1 %231 }
 0x127   :  { %v6203_v57 = vpop.permute.xlu0 %6202  ;;  %5779 = vmatmul.msk.bf16.gmra.mxu0 %vm10588_vm12, %v6149_v52  ;;  %vm10596_vm12 = vmmov %vm10592_vm3 }
 0x128   :  { %v6204_v61 = vunpack.i.l.bf16 %v6203_v57  ;;  %v6205_v2 = vunpack.i.h.bf16 %v6203_v57 }
 0x129   :  { %5788 = vmatmul.msk.bf16.gmra.mxu3 %vm10591_vm2, %v6149_v52 }
 0x12a   :  { %5782 = vmatmul.msk.bf16.gmra.mxu1 %vm10589_vm4, %v6149_v52  ;;  %vm10597_vm4 = vmmov %vm10592_vm3  ;;  %vm10600_vm3 = vcmask 31744  }
 0x12b   :  { %5785 = vmatmul.msk.bf16.gmra.mxu2 %vm10590_vm6, %v6149_v52  ;;  %vm10598_vm6 = vmmov %vm10594_vm10  ;;  %v7163_v40 = vsel %vm10597_vm4, %v6199_v30, %v208_v36 }
 0x12c   :  { %v7120_v20 = vsel %vm10598_vm6, %v6204_v61, %v6205_v2  ;;  %vm10599_vm2 = vmmov %vm10598_vm6 }
 0x12d   :  { %v226_v63 = vpop.permute.xlu1 %225  ;;  %v7124_v21 = vsel %vm10599_vm2, %v6205_v2, %v232_v56  ;;  %vm10601_vm7 = vmmov %vm10600_vm3  ;;  %v7172_v41 = vsel %vm10599_vm2, %v7060_v34, %v183_v46  ;;  %v7201_v57 = vsel %vm10599_vm2, %v6195_v35, %v7060_v34 }
 0x12e   :  { %v7092_v3 = vsel %vm10594_vm10, %v226_v63, %v6204_v61  ;;  %v7096_v4 = vsel %vm10595_vm13, %v232_v56, %v226_v63  ;;  %vm10602_vm10 = vmmov %vm10600_vm3  ;;  %v217_v0 = vsel %vm6985_vm0, %v7163_v40, %v7172_v41 }
 0x12f   :  { %v244_v5 = vpop.permute.xlu0 %243  ;;  %v7102_v6 = vsel %vm6997_vm15, %v7096_v4, %v7088_v1  ;;  %v7108_v7 = vsel %vm7001_vm1, %v7092_v3, %v7081_v62  ;;  %vm10603_vm13 = vmmov %vm10600_vm3 }
 0x130   :  { %v7112_v8 = vsel %vm10596_vm12, %v6210_v59, %v244_v5  ;;  %v7116_v18 = vsel %vm10597_vm4, %v244_v5, %v6209_v60  ;;  %vm10604_vm12 = vmmov %vm10597_vm4  ;;  %v852_v59 = vld.sshfl [vmem:[#allocation1 + $0x8] sm:$0xff pattern:$0x75316420]  ;;  %v692_v5 = vpack.c.bf16 %v217_v0, %v217_v0  ;;  %v854_v0 = vld.sshfl [vmem:[#allocation1 + $0x18] sm:$0xff pattern:$0x75316420] }
 0x131   :  { %v7130_v23 = vsel %vm7012_vm5, %v7120_v20, %v7112_v8  ;;  %v7136_v24 = vsel %vm7016_vm11, %v7124_v21, %v7116_v18  ;;  %v7159_v39 = vsel %vm10604_vm12, %v208_v36, %v6200_v28  ;;  %vm10605_vm6 = vmmov %vm10599_vm2  ;;  %v7186_v36 = vpop.f32.mrf.mxu0 }
 0x132   :  { %v7167_v50 = vsel %vm10605_vm6, %v183_v46, %v6194_v29  ;;  %vm10609_vm12 = vmmov %vm10602_vm10  ;;  %v7188_v46 = vpop.f32.mrf.mxu1 }
 0x133   :  { %v218_v56 = vsel %vm6989_vm9, %v7159_v39, %v7167_v50  ;;  %vm10611_vm6 = vmmov %vm10599_vm2  ;;  %v222_v9 = vsel %vm7001_vm1, %v7167_v50, %v7159_v39 }
 0x134   :  { %v693_v60 = vpack.c.bf16 %v218_v56, %v218_v56  ;;  %v7221_v56 = vpop.f32.mrf.mxu3 }
 0x137   :  { %5780 = vmatmul.msk.bf16.gmra.mxu0 %vm10600_vm3, %v416_v25  ;;  %vm10606_vm3 = vmmov %vm10597_vm4 }
 0x138   :  { %v7176_v51 = vsel %vm10606_vm3, %v6200_v28, %v212_v47  ;;  %vm10610_vm4 = vmmov %vm10602_vm10  ;;  %v860_v28 = vpack.c.bf16 %v852_v59, %v852_v59 }
 0x139   :  { %5789 = vmatmul.msk.bf16.gmra.mxu3 %vm10603_vm13, %v416_v25  ;;  %vm10608_vm13 = vmmov %vm10602_vm10  ;;  %v7225_v59 = vpop.f32.mrf.mxu0 }
 0x13a   :  { %5783 = vmatmul.msk.bf16.gmra.mxu1 %vm10601_vm7, %v416_v25  ;;  %vm10607_vm7 = vmmov %vm10606_vm3  ;;  %vm10612_vm3 = vcmask 1041408  }
 0x13b   :  { %5786 = vmatmul.msk.bf16.gmra.mxu2 %vm10602_vm10, %v416_v25  ;;  %v7180_v52 = vsel %vm10607_vm7, %v212_v47, %v6199_v30  ;;  %v7196_v47 = vsel %vm10611_vm6, %v6194_v29, %v6195_v35  ;;  %v722_v25 = vsel %vm10612_vm3, %v693_v60, 0  ;;  %vm10613_vm7 = vmmov %vm10612_vm3  ;;  %v7219_v35 = vpop.f32.mrf.mxu2  ;;  %v7227_v60 = vpop.f32.mrf.mxu1  ;;  %vm10618_vm6 = vcmask 31744  }
 0x13c   :  { %v219_v61 = vsel %vm6993_vm14, %v7176_v51, %v7196_v47  ;;  %v220_v63 = vsel %vm7008_vm8, %v7180_v52, %v7201_v57  ;;  %760 = vmatpush.bf16.msrb.mxu1 %v722_v25  ;;  %vm10619_vm2 = vmmov %vm10618_vm6  ;;  %v223_v32 = vsel %vm7012_vm5, %v7196_v47, %v7176_v51 }
 0x13d   :  { %v694_v34 = vpack.c.bf16 %v219_v61, %v219_v61  ;;  %v695_v2 = vpack.c.bf16 %v220_v63, %v220_v63  ;;  %v6153_v61 = vld [vmem:[%s10424_s3 + $0x30] sm:$0xff] }
 0x13e   :  { %v853_v63 = vld.sshfl [vmem:[#allocation1 + $0x10] sm:$0xff pattern:$0x75316420] }
 0x13f   :  { %v725_v29 = vsel %vm10613_vm7, %v694_v34, 0  ;;  %vm10620_vm7 = vmmov %vm10612_vm3 }
 0x140   :  { %783 = vmatpush.bf16.msrb.mxu2 %v725_v29 }
 0x143   :  { %v7232_v34 = vpop.f32.mrf.mxu2  ;;  %v7244_v29 = vpop.f32.mrf.mxu1 }
 0x147   :  { %5803 = vmatmul.msk.bf16.vlgmr.msra.gmra.mxu0 %vm10602_vm10, %v6152_v33  ;;  %vm10614_vm10 = vmmov %vm10612_vm3 }
 0x148   :  { %v728_v30 = vsel %vm10614_vm10, %v695_v2, 0  ;;  %v7234_v2 = vpop.f32.mrf.mxu3  ;;  %vm10621_vm10 = vmmov %vm10619_vm2 }
 0x149   :  { %5812 = vmatmul.msk.bf16.vlgmr.msra.gmra.mxu3 %vm10610_vm4, %v6152_v33  ;;  %vm10617_vm4 = vmmov %vm10612_vm3 }
 0x14a   :  { %5806 = vmatmul.msk.bf16.vlgmr.msra.gmra.mxu1 %vm10608_vm13, %v6152_v33  ;;  %vm10615_vm13 = vmmov %vm10612_vm3  ;;  %806 = vmatpush.bf16.msrb.mxu3 %v728_v30  ;;  %v889_v58 = vsel %vm10617_vm4, %v860_v28, 0  ;;  %v7242_v28 = vpop.f32.mrf.mxu0  ;;  %v5794_v30 = vld [vmem:[%s10424_s3 + $0x38] sm:$0xf] }
 0x14b   :  { %5809 = vmatmul.msk.bf16.vlgmr.msra.gmra.mxu2 %vm10609_vm12, %v6152_v33  ;;  %v719_v33 = vsel %vm10615_vm13, %v692_v5, 0  ;;  %vm10616_vm12 = vmmov %vm10612_vm3  ;;  %927 = vmatpush.bf16.msra.mxu1 %v889_v58  ;;  %v861_v5 = vpack.c.bf16 %v853_v63, %v853_v63  ;;  %v549_v63 = vunpack.c.l.b16 %v5794_v30 }
 0x14c   :  { %v886_v10 = vsel %vm10616_vm12, %v859_v19, 0  ;;  %737 = vmatpush.bf16.msrb.mxu0 %v719_v33  ;;  %v862_v19 = vpack.c.bf16 %v854_v0, %v854_v0  ;;  %vm10622_vm13 = vmmov %vm10619_vm2  ;;  %v7249_v33 = vpop.f32.mrf.mxu2 }
 0x14d   :  { %vm10623_vm12 = vmmov %vm10619_vm2 }
 0x14e   :  { %v895_v25 = vsel %vm10620_vm7, %v862_v19, 0  ;;  %vm10624_vm4 = vmmov %vm10619_vm2 }
 0x14f   :  { %973 = vmatpush.bf16.msra.mxu3 %v895_v25  ;;  %vm10627_vm7 = vmmov %vm10619_vm2 }
 0x150   :  { %904 = vmatpush.bf16.msra.mxu0 %v886_v10  ;;  %v892_v10 = vsel %vm10612_vm3, %v861_v5, 0  ;;  %v7251_v58 = vpop.f32.mrf.mxu3  ;;  %v7255_v5 = vpop.f32.mrf.mxu1  ;;  %vm10626_vm3 = vmmov %vm10619_vm2 }
 0x151   :  { %950 = vmatpush.bf16.msra.mxu2 %v892_v10 }
 0x152   :  { %v7253_v0 = vpop.f32.mrf.mxu0 }
 0x154   :  { %v7257_v19 = vpop.f32.mrf.mxu2 }
 0x157   :  { %5804 = vmatmul.msk.bf16.gmra.mxu0 %vm10618_vm6, %v6153_v61  ;;  %vm10625_vm6 = vmmov %vm10619_vm2 }
 0x158   :  { %v7259_v10 = vpop.f32.mrf.mxu3  ;;  %v356_v13 = vpop.f32.mrf.mxu1 }
 0x159   :  { %5813 = vmatmul.msk.bf16.gmra.mxu3 %vm10622_vm13, %v6153_v61  ;;  %v6154_v13 = vld [vmem:[%s10424_s3 + $0x3c] sm:$0xff] }
 0x15a   :  { %5807 = vmatmul.msk.bf16.gmra.mxu1 %vm10619_vm2, %v6153_v61  ;;  %v333_v25 = vpop.f32.mrf.mxu0 }
 0x15b   :  { %5810 = vmatmul.msk.bf16.gmra.mxu2 %vm10621_vm10, %v6153_v61  ;;  %v552_v61 = vpack.c.b16 %v549_v63, %v549_v63  ;;  %v221_v63 = vsel %vm6997_vm15, %v7172_v41, %v7163_v40  ;;  %v1016_v41 = vpack.c.bf16 %v222_v9, %v222_v9  ;;  %vm10628_vm10 = vcmask 1041408  }
 0x15c   :  { %v379_v30 = vpop.f32.mrf.mxu2  ;;  %v1015_v40 = vpack.c.bf16 %v221_v63, %v221_v63  ;;  %vm10629_vm13 = vmmov %vm10628_vm10 }
 0x15d   :  { %v1045_v50 = vsel %vm10629_vm13, %v1016_v41, 0  ;;  %vm10636_vm13 = vmmov %vm10626_vm3 }
 0x15e   :  { %v1042_v39 = vsel %vm10628_vm10, %v1015_v40, 0 }
 0x160   :  { %v402_v11 = vpop.f32.mrf.mxu3 }
 0x161   :  { %v224_v11 = vsel %vm7016_vm11, %v7201_v57, %v7180_v52  ;;  %v5819_v52 = vld [vmem:[%s10424_s3 + $0x4c] sm:$0xf] }
 0x162   :  { %v1018_v25 = vpack.c.bf16 %v224_v11, %v224_v11  ;;  %v705_v47 = vunpack.c.l.b16 %v5819_v52 }
 0x164   :  { %v708_v57 = vpack.c.b16 %v705_v47, %v705_v47 }
 0x167   :  { %5805 = vmatmul.msk.bf16.gmra.mxu0 %vm10623_vm12, %v552_v61  ;;  %vm10630_vm12 = vmmov %vm10619_vm2 }
 0x169   :  { %5814 = vmatmul.msk.bf16.gmra.mxu3 %vm10619_vm2, %v552_v61 }
 0x16a   :  { %5808 = vmatmul.msk.bf16.gmra.mxu1 %vm10624_vm4, %v552_v61  ;;  %vm10631_vm4 = vmmov %vm10619_vm2 }
 0x16b   :  { %5811 = vmatmul.msk.bf16.gmra.mxu2 %vm10625_vm6, %v552_v61  ;;  %v1017_v61 = vpack.c.bf16 %v223_v32, %v223_v32  ;;  %vm10632_vm6 = vmmov %vm10628_vm10  ;;  %v6155_v32 = vld [vmem:[%s10424_s3 + $0x44] sm:$0xff] }
 0x16c   :  { %vm10633_vm2 = vmmov %vm10632_vm6 }
 0x16d   :  { %v1048_v51 = vsel %vm10632_vm6, %v1017_v61, 0  ;;  %v1051_v9 = vsel %vm10633_vm2, %v1018_v25, 0  ;;  %vm10635_vm10 = vmmov %vm10626_vm3  ;;  %v249_v61 = vsel %vm6985_vm0, %v7088_v1, %v7096_v4  ;;  %v250_v25 = vsel %vm6989_vm9, %v7081_v62, %v7092_v3 }
 0x16e   :  { %vm10639_vm6 = vmmov %vm10626_vm3  ;;  %v1171_v1 = vpack.c.bf16 %v249_v61, %v249_v61  ;;  %v1172_v4 = vpack.c.bf16 %v250_v25, %v250_v25 }
 0x16f   :  { %vm10640_vm2 = vmmov %vm10626_vm3 }
 0x177   :  { %5828 = vmatmul.msk.bf16.vlgmr.msrb.gmra.mxu0 %vm10626_vm3, %v6154_v13 }
 0x178   :  { %1060 = vmatpush.bf16.msrb.mxu0 %v1042_v39  ;;  %v251_v39 = vsel %vm6993_vm14, %v7112_v8, %v7120_v20 }
 0x179   :  { %5837 = vmatmul.msk.bf16.vlgmr.msrb.gmra.mxu3 %vm10631_vm4, %v6154_v13  ;;  %vm10638_vm4 = vmmov %vm10626_vm3  ;;  %v1173_v3 = vpack.c.bf16 %v251_v39, %v251_v39 }
 0x17a   :  { %5831 = vmatmul.msk.bf16.vlgmr.msrb.gmra.mxu1 %vm10627_vm7, %v6154_v13  ;;  %1129 = vmatpush.bf16.msrb.mxu3 %v1051_v9  ;;  %vm10634_vm7 = vmmov %vm10626_vm3 }
 0x17b   :  { %1083 = vmatpush.bf16.msrb.mxu1 %v1045_v50  ;;  %5834 = vmatmul.msk.bf16.vlgmr.msrb.gmra.mxu2 %vm10630_vm12, %v6154_v13  ;;  %vm10637_vm12 = vmmov %vm10626_vm3  ;;  %v252_v50 = vsel %vm7008_vm8, %v7116_v18, %v7124_v21 }
 0x17c   :  { %1106 = vmatpush.bf16.msrb.mxu2 %v1048_v51  ;;  %v6156_v51 = vld [vmem:[%s10424_s3 + $0x50] sm:$0xff]  ;;  %v1174_v47 = vpack.c.bf16 %v252_v50, %v252_v50  ;;  %v6157_v50 = vld [vmem:[%s10424_s3 + $0x58] sm:$0xff] }
 0x187   :  { %5829 = vmatmul.msk.bf16.gmra.mxu0 %vm10626_vm3, %v6155_v32  ;;  %vm10641_vm3 = vmmov %vm10640_vm2 }
 0x189   :  { %5838 = vmatmul.msk.bf16.gmra.mxu3 %vm10636_vm13, %v6155_v32 }
 0x18a   :  { %5832 = vmatmul.msk.bf16.gmra.mxu1 %vm10634_vm7, %v6155_v32  ;;  %vm10642_vm7 = vmmov %vm10640_vm2 }
 0x18b   :  { %5835 = vmatmul.msk.bf16.gmra.mxu2 %vm10635_vm10, %v6155_v32  ;;  %vm10643_vm10 = vcmask 1041408  }
 0x18c   :  { %v1198_v8 = vsel %vm10643_vm10, %v1171_v1, 0  ;;  %vm10644_vm13 = vmmov %vm10643_vm10 }
 0x18d   :  { %v1201_v18 = vsel %vm10644_vm13, %v1172_v4, 0  ;;  %vm10651_vm13 = vmmov %vm10641_vm3 }
 0x194   :  { %v447_v30 = vpop.f32.mrf.mxu0 }
 0x195   :  { %v448_v44 = vadd.f32 %v447_v30, %v7142_v26 }
 0x197   :  { %v470_v63 = vpop.f32.mrf.mxu1  ;;  %5830 = vmatmul.msk.bf16.gmra.mxu0 %vm10637_vm12, %v708_v57  ;;  %vm10645_vm12 = vmmov %vm10640_vm2 }
 0x198   :  { %v471_v43 = vadd.f32 %v470_v63, %v7144_v27 }
 0x199   :  { %5839 = vmatmul.msk.bf16.gmra.mxu3 %vm10640_vm2, %v708_v57 }
 0x19a   :  { %5833 = vmatmul.msk.bf16.gmra.mxu1 %vm10638_vm4, %v708_v57  ;;  %vm10646_vm4 = vmmov %vm10640_vm2 }
 0x19b   :  { %5836 = vmatmul.msk.bf16.gmra.mxu2 %vm10639_vm6, %v708_v57  ;;  %vm10647_vm6 = vmmov %vm10643_vm10 }
 0x19c   :  { %v449_v11 = vpop.f32.mrf.mxu0  ;;  %v516_v41 = vpop.f32.mrf.mxu3  ;;  %v1204_v20 = vsel %vm10647_vm6, %v1173_v3, 0  ;;  %vm10648_vm2 = vmmov %vm10647_vm6 }
 0x19d   :  { %v1207_v21 = vsel %vm10648_vm2, %v1174_v47, 0  ;;  %vm10650_vm10 = vmmov %vm10641_vm3  ;;  %v450_v26 = vadd.f32 %v449_v11, %v7186_v36 }
 0x19e   :  { %v493_v40 = vpop.f32.mrf.mxu2  ;;  %vm10654_vm6 = vmmov %vm10641_vm3 }
 0x19f   :  { %v472_v13 = vpop.f32.mrf.mxu1  ;;  %vm10655_vm2 = vmmov %vm10641_vm3  ;;  %v494_v27 = vadd.f32 %v493_v40, %v7153_v37  ;;  %v6158_v37 = vld [vmem:[%s10424_s3 + $0x64] sm:$0xff] }
 0x1a4   :  { %v452_v9 = vpop.f32.mrf.mxu0  ;;  %v7327_v62 = vpop.f32.mrf.mxu3 }
 0x1a6   :  { %v7325_v52 = vpop.f32.mrf.mxu2 }
 0x1a7   :  { %v475_v32 = vpop.f32.mrf.mxu1  ;;  %5853 = vmatmul.msk.bf16.vlgmr.msra.gmra.mxu0 %vm10641_vm3, %v6156_v51  ;;  %v496_v11 = vadd.f32 %v7325_v52, %v7219_v35 }
 0x1a8   :  { %1216 = vmatpush.bf16.msra.mxu0 %v1198_v8  ;;  %v476_v36 = vadd.f32 %v475_v32, %v7227_v60  ;;  %v1330_v60 = vpack.c.bf16 %v6950_v17, %v6950_v17 }
 0x1a9   :  { %5862 = vmatmul.msk.bf16.vlgmr.msra.gmra.mxu3 %vm10646_vm4, %v6156_v51  ;;  %vm10653_vm4 = vmmov %vm10641_vm3 }
 0x1aa   :  { %5856 = vmatmul.msk.bf16.vlgmr.msra.gmra.mxu1 %vm10642_vm7, %v6156_v51  ;;  %1285 = vmatpush.bf16.msra.mxu3 %v1207_v21  ;;  %vm10649_vm7 = vmmov %vm10641_vm3 }
 0x1ab   :  { %1239 = vmatpush.bf16.msra.mxu1 %v1201_v18  ;;  %5859 = vmatmul.msk.bf16.vlgmr.msra.gmra.mxu2 %vm10645_vm12, %v6156_v51  ;;  %v5844_v18 = vld [vmem:[%s10424_s3 + $0x60] sm:$0xf]  ;;  %vm10652_vm12 = vmmov %vm10641_vm3 }
 0x1ac   :  { %1262 = vmatpush.bf16.msra.mxu2 %v1204_v20  ;;  %v7337_v57 = vpop.f32.mrf.mxu0  ;;  %v7343_v39 = vpop.f32.mrf.mxu3  ;;  %v872_v45 = vunpack.c.l.b16 %v5844_v18 }
 0x1ae   :  { %v7341_v25 = vpop.f32.mrf.mxu2  ;;  %v875_v42 = vpack.c.b16 %v872_v45, %v872_v45  ;;  %v473_v45 = vadd.f32 %v472_v13, %v7188_v46  ;;  %v1328_v46 = vpack.c.bf16 %v6946_v16, %v6946_v16  ;;  %v519_v13 = vadd.f32 %v7327_v62, %v7221_v56 }
 0x1af   :  { %v7339_v61 = vpop.f32.mrf.mxu1  ;;  %v1329_v16 = vpack.c.bf16 %v6934_v14, %v6934_v14  ;;  %v455_v62 = vadd.f32 %v7337_v57, %v7242_v28 }
 0x1b4   :  { %v7348_v1 = vpop.f32.mrf.mxu0  ;;  %v7354_v3 = vpop.f32.mrf.mxu3 }
 0x1b6   :  { %v7352_v4 = vpop.f32.mrf.mxu2 }
 0x1b7   :  { %v7350_v51 = vpop.f32.mrf.mxu1  ;;  %5854 = vmatmul.msk.bf16.gmra.mxu0 %vm10641_vm3, %v6157_v50  ;;  %vm10656_vm3 = vmmov %vm10655_vm2  ;;  %v501_v57 = vadd.f32 %v7352_v4, %v7249_v33 }
 0x1b9   :  { %5863 = vmatmul.msk.bf16.gmra.mxu3 %vm10651_vm13, %v6157_v50 }
 0x1ba   :  { %5857 = vmatmul.msk.bf16.gmra.mxu1 %vm10649_vm7, %v6157_v50  ;;  %vm10657_vm7 = vmmov %vm10655_vm2 }
 0x1bb   :  { %5860 = vmatmul.msk.bf16.gmra.mxu2 %vm10650_vm10, %v6157_v50  ;;  %vm10658_vm10 = vcmask 1041408  }
 0x1bc   :  { %v459_v47 = vpop.f32.mrf.mxu0  ;;  %v7365_v21 = vpop.f32.mrf.mxu3  ;;  %vm10659_vm13 = vmmov %vm10658_vm10 }
 0x1bd   :  { %v1357_v17 = vsel %vm10659_vm13, %v1328_v46, 0  ;;  %vm10666_vm13 = vmmov %vm10656_vm3 }
 0x1be   :  { %v7363_v20 = vpop.f32.mrf.mxu2 }
 0x1bf   :  { %v482_v8 = vpop.f32.mrf.mxu1  ;;  %v504_v33 = vadd.f32 %v7363_v20, %v7257_v19 }
 0x1c4   :  { %v583_v55 = vpop.f32.mrf.mxu0  ;;  %v528_v50 = vpop.f32.mrf.mxu3 }
 0x1c5   :  { %v7369_v47 = vadd.f32 %v583_v55, %v448_v44 }
 0x1c6   :  { %v505_v53 = vpop.f32.mrf.mxu2 }
 0x1c7   :  { %v606_v54 = vpop.f32.mrf.mxu1  ;;  %5855 = vmatmul.msk.bf16.gmra.mxu0 %vm10652_vm12, %v875_v42  ;;  %v517_v53 = vadd.f32 %v516_v41, %v7155_v38  ;;  %v1327_v38 = vpack.c.bf16 %v6940_v15, %v6940_v15  ;;  %vm10660_vm12 = vmmov %vm10655_vm2 }
 0x1c8   :  { %v7371_v8 = vadd.f32 %v606_v54, %v471_v43 }
 0x1c9   :  { %5864 = vmatmul.msk.bf16.gmra.mxu3 %vm10655_vm2, %v875_v42  ;;  %v1354_v56 = vsel %vm10658_vm10, %v1327_v38, 0 }
 0x1ca   :  { %5858 = vmatmul.msk.bf16.gmra.mxu1 %vm10653_vm4, %v875_v42  ;;  %vm10661_vm4 = vmmov %vm10655_vm2 }
 0x1cb   :  { %5861 = vmatmul.msk.bf16.gmra.mxu2 %vm10654_vm6, %v875_v42  ;;  %v453_v42 = vadd.f32 %v452_v9, %v7225_v59  ;;  %vm10662_vm6 = vmmov %vm10658_vm10 }
 0x1cc   :  { %v585_v44 = vpop.f32.mrf.mxu0  ;;  %v652_v63 = vpop.f32.mrf.mxu3  ;;  %v1360_v14 = vsel %vm10662_vm6, %v1329_v16, 0  ;;  %vm10663_vm2 = vmmov %vm10662_vm6 }
 0x1cd   :  { %v7381_v43 = vadd.f32 %v585_v44, %v450_v26  ;;  %v7387_v50 = vadd.f32 %v652_v63, %v517_v53  ;;  %v1363_v52 = vsel %vm10663_vm2, %v1330_v60, 0  ;;  %v522_v53 = vadd.f32 %v7343_v39, %v7234_v2  ;;  %v6159_v2 = vld [vmem:[%s10424_s3 + $0x6c] sm:$0xff]  ;;  %vm10665_vm10 = vmmov %vm10656_vm3 }
 0x1ce   :  { %v629_v30 = vpop.f32.mrf.mxu2  ;;  %vm10669_vm6 = vmmov %vm10656_vm3 }
 0x1cf   :  { %v608_v55 = vpop.f32.mrf.mxu1  ;;  %v7385_v18 = vadd.f32 %v629_v30, %v494_v27  ;;  %v499_v27 = vadd.f32 %v7341_v25, %v7232_v34  ;;  %v481_v34 = vadd.f32 %v7350_v51, %v7255_v5  ;;  %vm10670_vm2 = vmmov %vm10656_vm3 }
 0x1d0   :  { %v7383_v54 = vadd.f32 %v608_v55, %v473_v45  ;;  %v478_v45 = vadd.f32 %v7339_v61, %v7244_v29  ;;  %v458_v29 = vadd.f32 %v7348_v1, %v7253_v0  ;;  %v524_v61 = vadd.f32 %v7354_v3, %v7251_v58  ;;  %v5869_v3 = vld [vmem:[%s10424_s3 + $0x74] sm:$0xf] }
 0x1d1   :  { %v527_v58 = vadd.f32 %v7365_v21, %v7259_v10 }
 0x1d4   :  { %v588_v40 = vpop.f32.mrf.mxu0  ;;  %v654_v15 = vpop.f32.mrf.mxu3 }
 0x1d5   :  { %v7404_v41 = vadd.f32 %v588_v40, %v453_v42  ;;  %v7412_v35 = vadd.f32 %v654_v15, %v519_v13 }
 0x1d6   :  { %v631_v32 = vpop.f32.mrf.mxu2 }
 0x1d7   :  { %v611_v59 = vpop.f32.mrf.mxu1  ;;  %v7410_v26 = vadd.f32 %v631_v32, %v496_v11  ;;  %5878 = vmatmul.msk.bf16.vlgmr.msrb.gmra.mxu0 %vm10656_vm3, %v6158_v37  ;;  %v1028_v32 = vunpack.c.l.b16 %v5869_v3 }
 0x1d8   :  { %v7406_v9 = vadd.f32 %v611_v59, %v476_v36  ;;  %1372 = vmatpush.bf16.msrb.mxu0 %v1354_v56 }
 0x1d9   :  { %5887 = vmatmul.msk.bf16.vlgmr.msrb.gmra.mxu3 %vm10661_vm4, %v6158_v37  ;;  %v1031_v15 = vpack.c.b16 %v1028_v32, %v1028_v32  ;;  %vm10668_vm4 = vmmov %vm10656_vm3 }
 0x1da   :  { %5881 = vmatmul.msk.bf16.vlgmr.msrb.gmra.mxu1 %vm10657_vm7, %v6158_v37  ;;  %1441 = vmatpush.bf16.msrb.mxu3 %v1363_v52  ;;  %vm10664_vm7 = vmmov %vm10656_vm3 }
 0x1db   :  { %1395 = vmatpush.bf16.msrb.mxu1 %v1357_v17  ;;  %5884 = vmatmul.msk.bf16.vlgmr.msrb.gmra.mxu2 %vm10660_vm12, %v6158_v37  ;;  %vm10667_vm12 = vmmov %vm10656_vm3 }
 0x1dc   :  { %1418 = vmatpush.bf16.msrb.mxu2 %v1360_v14  ;;  %v590_v44 = vpop.f32.mrf.mxu0  ;;  %v657_v36 = vpop.f32.mrf.mxu3 }
 0x1dd   :  { %v7430_v30 = vadd.f32 %v590_v44, %v455_v62  ;;  %v7436_v28 = vadd.f32 %v657_v36, %v522_v53  ;;  %v6160_v53 = vld [vmem:[%s10424_s3 + $0x78] sm:$0xff]  ;;  %v1483_v44 = vpack.c.bf16 %v7102_v6, %v7102_v6 }
 0x1de   :  { %v634_v42 = vpop.f32.mrf.mxu2 }
 0x1df   :  { %v613_v55 = vpop.f32.mrf.mxu1  ;;  %v7434_v37 = vadd.f32 %v634_v42, %v499_v27 }
 0x1e0   :  { %v7432_v63 = vadd.f32 %v613_v55, %v478_v45 }
 0x1e4   :  { %v593_v25 = vpop.f32.mrf.mxu0  ;;  %v659_v1 = vpop.f32.mrf.mxu3 }
 0x1e5   :  { %v7449_v38 = vadd.f32 %v593_v25, %v458_v29  ;;  %v7455_v5 = vadd.f32 %v659_v1, %v524_v61  ;;  %v1485_v29 = vpack.c.bf16 %v7130_v23, %v7130_v23  ;;  %v6161_v1 = vld [vmem:[%s10424_s3 + $0x80] sm:$0xff] }
 0x1e6   :  { %v636_v0 = vpop.f32.mrf.mxu2 }
 0x1e7   :  { %v616_v39 = vpop.f32.mrf.mxu1  ;;  %v7453_v11 = vadd.f32 %v636_v0, %v501_v57  ;;  %5879 = vmatmul.msk.bf16.gmra.mxu0 %vm10656_vm3, %v6159_v2  ;;  %vm10671_vm3 = vmmov %vm10670_vm2 }
 0x1e8   :  { %v7451_v46 = vadd.f32 %v616_v39, %v481_v34  ;;  %v1486_v34 = vpack.c.bf16 %v7136_v24, %v7136_v24 }
 0x1e9   :  { %5888 = vmatmul.msk.bf16.gmra.mxu3 %vm10666_vm13, %v6159_v2 }
 0x1ea   :  { %5882 = vmatmul.msk.bf16.gmra.mxu1 %vm10664_vm7, %v6159_v2  ;;  %vm10672_vm7 = vmmov %vm10670_vm2 }
 0x1eb   :  { %5885 = vmatmul.msk.bf16.gmra.mxu2 %vm10665_vm10, %v6159_v2  ;;  %vm10673_vm10 = vcmask 1041408  }
 0x1ec   :  { %v595_v51 = vpop.f32.mrf.mxu0  ;;  %v662_v40 = vpop.f32.mrf.mxu3  ;;  %vm10674_vm13 = vmmov %vm10673_vm10 }
 0x1ed   :  { %v7470_v60 = vadd.f32 %v662_v40, %v527_v58 }
 0x1ee   :  { %v639_v13 = vpop.f32.mrf.mxu2 }
 0x1ef   :  { %v618_v4 = vpop.f32.mrf.mxu1  ;;  %v7468_v59 = vadd.f32 %v639_v13, %v504_v33 }
 0x1f4   :  { %v739_v16 = vpop.f32.mrf.mxu0  ;;  %v664_v20 = vpop.f32.mrf.mxu3 }
 0x1f5   :  { %v7473_v10 = vadd.f32 %v739_v16, %v7369_v47 }
 0x1f6   :  { %v641_v19 = vpop.f32.mrf.mxu2 }
 0x1f7   :  { %v762_v56 = vpop.f32.mrf.mxu1  ;;  %5880 = vmatmul.msk.bf16.gmra.mxu0 %vm10667_vm12, %v1031_v15  ;;  %vm10675_vm12 = vmmov %vm10670_vm2 }
 0x1f8   :  { %v7476_v21 = vadd.f32 %v762_v56, %v7371_v8 }
 0x1f9   :  { %5889 = vmatmul.msk.bf16.gmra.mxu3 %vm10670_vm2, %v1031_v15 }
 0x1fa   :  { %5883 = vmatmul.msk.bf16.gmra.mxu1 %vm10668_vm4, %v1031_v15  ;;  %vm10676_vm4 = vmmov %vm10670_vm2 }
 0x1fb   :  { %5886 = vmatmul.msk.bf16.gmra.mxu2 %vm10669_vm6, %v1031_v15  ;;  %vm10677_vm6 = vmmov %vm10673_vm10 }
 0x1fc   :  { %v741_v17 = vpop.f32.mrf.mxu0  ;;  %v808_v45 = vpop.f32.mrf.mxu3  ;;  %v1516_v23 = vsel %vm10677_vm6, %v1485_v29, 0  ;;  %vm10678_vm2 = vmmov %vm10677_vm6 }
 0x1fd   :  { %v7483_v52 = vadd.f32 %v741_v17, %v7381_v43  ;;  %v7492_v27 = vadd.f32 %v808_v45, %v7387_v50  ;;  %v1484_v43 = vpack.c.bf16 %v7108_v7, %v7108_v7  ;;  %v1519_v24 = vsel %vm10678_vm2, %v1486_v34, 0  ;;  %vm10684_vm6 = vmmov %vm10671_vm3 }
 0x1fe   :  { %v785_v47 = vpop.f32.mrf.mxu2  ;;  %vm10685_vm2 = vmmov %vm10671_vm3 }
 0x1ff   :  { %v764_v14 = vpop.f32.mrf.mxu1  ;;  %v7489_v8 = vadd.f32 %v785_v47, %v7385_v18 }
 0x200   :  { %v7486_v62 = vadd.f32 %v764_v14, %v7383_v54 }
 0x204   :  { %v744_v54 = vpop.f32.mrf.mxu0  ;;  %v810_v36 = vpop.f32.mrf.mxu3 }
 0x205   :  { %v7502_v42 = vadd.f32 %v744_v54, %v7404_v41  ;;  %v7515_v7 = vadd.f32 %v810_v36, %v7412_v35  ;;  %v1510_v41 = vsel %vm10673_vm10, %v1483_v44, 0  ;;  %vm10680_vm10 = vmmov %vm10671_vm3 }
 0x206   :  { %v787_v50 = vpop.f32.mrf.mxu2 }
 0x207   :  { %v767_v55 = vpop.f32.mrf.mxu1  ;;  %v7512_v6 = vadd.f32 %v787_v50, %v7410_v26  ;;  %5903 = vmatmul.msk.bf16.vlgmr.msra.gmra.mxu0 %vm10671_vm3, %v6160_v53 }
 0x208   :  { %v7505_v18 = vadd.f32 %v767_v55, %v7406_v9  ;;  %v1513_v9 = vsel %vm10674_vm13, %v1484_v43, 0  ;;  %1528 = vmatpush.bf16.msra.mxu0 %v1510_v41  ;;  %vm10681_vm13 = vmmov %vm10671_vm3  ;;  %v6162_v43 = vld [vmem:[%s10424_s3 + $0x8c] sm:$0xff] }
 0x209   :  { %5912 = vmatmul.msk.bf16.vlgmr.msra.gmra.mxu3 %vm10676_vm4, %v6160_v53  ;;  %vm10683_vm4 = vmmov %vm10671_vm3 }
 0x20a   :  { %5906 = vmatmul.msk.bf16.vlgmr.msra.gmra.mxu1 %vm10672_vm7, %v6160_v53  ;;  %1597 = vmatpush.bf16.msra.mxu3 %v1519_v24  ;;  %vm10679_vm7 = vmmov %vm10671_vm3 }
 0x20b   :  { %1551 = vmatpush.bf16.msra.mxu1 %v1513_v9  ;;  %5909 = vmatmul.msk.bf16.vlgmr.msra.gmra.mxu2 %vm10675_vm12, %v6160_v53  ;;  %vm10682_vm12 = vmmov %vm10671_vm3 }
 0x20c   :  { %1574 = vmatpush.bf16.msra.mxu2 %v1516_v23  ;;  %v746_v26 = vpop.f32.mrf.mxu0  ;;  %v813_v25 = vpop.f32.mrf.mxu3 }
 0x20d   :  { %v834_v2 = vadd.f32 %v746_v26, %v7430_v30  ;;  %v833_v0 = vadd.f32 %v813_v25, %v7436_v28 }
 0x20e   :  { %v790_v61 = vpop.f32.mrf.mxu2 }
 0x20f   :  { %v769_v35 = vpop.f32.mrf.mxu1  ;;  %v832_v39 = vadd.f32 %v790_v61, %v7434_v37 }
 0x210   :  { %v835_v57 = vadd.f32 %v769_v35, %v7432_v63 }
 0x214   :  { %v749_v33 = vpop.f32.mrf.mxu0  ;;  %v815_v30 = vpop.f32.mrf.mxu3 }
 0x215   :  { %v838_v51 = vadd.f32 %v749_v33, %v7449_v38  ;;  %v837_v13 = vadd.f32 %v815_v30, %v7455_v5  ;;  %v5894_v38 = vld [vmem:[%s10424_s3 + $0x88] sm:$0xf]  ;;  %v1633_v30 = vld [vmem:[%s10426_s4] sm:$0xff] }
 0x216   :  { %v792_v3 = vpop.f32.mrf.mxu2  ;;  %v1184_v32 = vunpack.c.l.b16 %v5894_v38  ;;  %1636 = vperm.xlu0 %6211, %v1633_v30  }
 0x217   :  { %v772_v58 = vpop.f32.mrf.mxu1  ;;  %v836_v63 = vadd.f32 %v792_v3, %v7453_v11  ;;  %5904 = vmatmul.msk.bf16.gmra.mxu0 %vm10671_vm3, %v6161_v1  ;;  %vm10686_vm3 = vmmov %vm10685_vm2 }
 0x218   :  { %v839_v4 = vadd.f32 %v772_v58, %v7451_v46  ;;  %v1187_v15 = vpack.c.b16 %v1184_v32, %v1184_v32 }
 0x219   :  { %5913 = vmatmul.msk.bf16.gmra.mxu3 %vm10681_vm13, %v6161_v1  ;;  %vm10689_vm13 = vmmov %vm10685_vm2 }
 0x21a   :  { %5907 = vmatmul.msk.bf16.gmra.mxu1 %vm10679_vm7, %v6161_v1  ;;  %vm10687_vm7 = vmmov %vm10685_vm2 }
 0x21b   :  { %5910 = vmatmul.msk.bf16.gmra.mxu2 %vm10680_vm10, %v6161_v1  ;;  %vm10688_vm10 = vmmov %vm10685_vm2 }
 0x21c   :  { %v751_v37 = vpop.f32.mrf.mxu0  ;;  %v818_v40 = vpop.f32.mrf.mxu3 }
 0x21d   :  { %v841_v5 = vadd.f32 %v818_v40, %v7470_v60 }
 0x21e   :  { %v795_v46 = vpop.f32.mrf.mxu2 }
 0x21f   :  { %v774_v28 = vpop.f32.mrf.mxu1  ;;  %v840_v11 = vadd.f32 %v795_v46, %v7468_v59 }
 0x224   :  { %v906_v16 = vpop.f32.mrf.mxu0  ;;  %v820_v20 = vpop.f32.mrf.mxu3 }
 0x225   :  { %v7546_v17 = vadd.f32 %v906_v16, %v7473_v10  ;;  %v6164_v20 = vld [vmem:[%s10424_s3 + $0xa0] sm:$0xff] }
 0x226   :  { %v797_v19 = vpop.f32.mrf.mxu2 }
 0x227   :  { %v929_v56 = vpop.f32.mrf.mxu1  ;;  %5905 = vmatmul.msk.bf16.gmra.mxu0 %vm10682_vm12, %v1187_v15  ;;  %vm10694_vm12 = vmmov %vm10685_vm2 }
 0x228   :  { %v7549_v14 = vadd.f32 %v929_v56, %v7476_v21 }
 0x229   :  { %5914 = vmatmul.msk.bf16.gmra.mxu3 %vm10685_vm2, %v1187_v15 }
 0x22a   :  { %5908 = vmatmul.msk.bf16.gmra.mxu1 %vm10683_vm4, %v1187_v15  ;;  %vm10695_vm4 = vmmov %vm10685_vm2 }
 0x22b   :  { %5911 = vmatmul.msk.bf16.gmra.mxu2 %vm10684_vm6, %v1187_v15  ;;  %vm10696_vm6 = vmmov %vm10685_vm2 }
 0x22c   :  { %v908_v59 = vpop.f32.mrf.mxu0  ;;  %v975_v53 = vpop.f32.mrf.mxu3 }
 0x22d   :  { %v7556_v47 = vadd.f32 %v908_v59, %v7483_v52  ;;  %v992_v44 = vadd.f32 %v975_v53, %v7492_v27 }
 0x22e   :  { %v952_v10 = vpop.f32.mrf.mxu2 }
 0x22f   :  { %v931_v60 = vpop.f32.mrf.mxu1  ;;  %v991_v21 = vadd.f32 %v952_v10, %v7489_v8 }
 0x230   :  { %v7559_v45 = vadd.f32 %v931_v60, %v7486_v62 }
 0x234   :  { %v911_v54 = vpop.f32.mrf.mxu0  ;;  %v977_v29 = vpop.f32.mrf.mxu3 }
 0x235   :  { %v997_v50 = vadd.f32 %v911_v54, %v7502_v42  ;;  %v7572_v34 = vadd.f32 %v977_v29, %v7515_v7  ;;  %v6163_v7 = vld [vmem:[%s10424_s3 + $0x94] sm:$0xff] }
 0x236   :  { %v954_v36 = vpop.f32.mrf.mxu2 }
 0x237   :  { %v934_v55 = vpop.f32.mrf.mxu1  ;;  %v7569_v62 = vadd.f32 %v954_v36, %v7512_v6  ;;  %5928 = vmatmul.msk.bf16.vlgmr.msrb.gmra.mxu0 %vm10686_vm3, %v6162_v43  ;;  %vm10697_vm3 = vmmov %vm10685_vm2 }
 0x238   :  { %v998_v52 = vadd.f32 %v934_v55, %v7505_v18 }
 0x239   :  { %5937 = vmatmul.msk.bf16.vlgmr.msrb.gmra.mxu3 %vm10689_vm13, %v6162_v43  ;;  %vm10700_vm13 = vmmov %vm10685_vm2 }
 0x23a   :  { %5931 = vmatmul.msk.bf16.vlgmr.msrb.gmra.mxu1 %vm10687_vm7, %v6162_v43  ;;  %vm10698_vm7 = vmmov %vm10685_vm2 }
 0x23b   :  { %5934 = vmatmul.msk.bf16.vlgmr.msrb.gmra.mxu2 %vm10688_vm10, %v6162_v43  ;;  %vm10699_vm10 = vmmov %vm10685_vm2 }
 0x23c   :  { %v913_v8 = vpop.f32.mrf.mxu0  ;;  %v980_v6 = vpop.f32.mrf.mxu3 }
 0x23d   :  { %v7578_v42 = vadd.f32 %v913_v8, %v834_v2  ;;  %v1000_v23 = vadd.f32 %v980_v6, %v833_v0  ;;  %v5919_v0 = vld [vmem:[%s10424_s3 + $0x9c] sm:$0xf] }
 0x23e   :  { %v957_v41 = vpop.f32.mrf.mxu2 }
 0x23f   :  { %v936_v27 = vpop.f32.mrf.mxu1  ;;  %10690 = vst [vmem:[#allocation14_spill] sm:$0xff] %v7578_v42  ;;  %v999_v9 = vadd.f32 %v957_v41, %v832_v39 }
 0x240   :  { %v7580_v18 = vadd.f32 %v936_v27, %v835_v57 }
 0x242   :  { %10691 = vst [vmem:[#allocation15_spill] sm:$0xff] %v7580_v18 }
 0x244   :  { %v916_v24 = vpop.f32.mrf.mxu0  ;;  %v982_v1 = vpop.f32.mrf.mxu3 }
 0x245   :  { %v1005_v35 = vadd.f32 %v916_v24, %v838_v51  ;;  %v7587_v2 = vadd.f32 %v982_v1, %v837_v13 }
 0x246   :  { %v959_v25 = vpop.f32.mrf.mxu2 }
 0x247   :  { %v939_v26 = vpop.f32.mrf.mxu1  ;;  %v7585_v33 = vadd.f32 %v959_v25, %v836_v63  ;;  %10693 = vst [vmem:[#allocation17_spill] sm:$0xff] %v7587_v2  ;;  %5929 = vmatmul.msk.bf16.gmra.mxu0 %vm10694_vm12, %v6163_v7  ;;  %v1340_v63 = vunpack.c.l.b16 %v5919_v0  ;;  %vm10701_vm12 = vmmov %vm10685_vm2 }
 0x248   :  { %v1006_v61 = vadd.f32 %v939_v26, %v839_v4 }
 0x249   :  { %10692 = vst [vmem:[#allocation16_spill] sm:$0xff] %v7585_v33  ;;  %5938 = vmatmul.msk.bf16.gmra.mxu3 %vm10685_vm2, %v6163_v7  ;;  %v1343_v13 = vpack.c.b16 %v1340_v63, %v1340_v63  ;;  %v10765_v33 = vld [vmem:[#allocation13_spill] sm:$0xff] }
 0x24a   :  { %5932 = vmatmul.msk.bf16.gmra.mxu1 %vm10695_vm4, %v6163_v7  ;;  %vm10702_vm4 = vmmov %vm10685_vm2 }
 0x24b   :  { %5935 = vmatmul.msk.bf16.gmra.mxu2 %vm10696_vm6, %v6163_v7  ;;  %vm10703_vm6 = vmmov %vm10685_vm2  ;;  %v5944_v7 = vld [vmem:[%s10424_s3 + $0xb0] sm:$0xf] }
 0x24c   :  { %v918_v57 = vpop.f32.mrf.mxu0  ;;  %v985_v51 = vpop.f32.mrf.mxu3  ;;  %v1496_v25 = vunpack.c.l.b16 %v5944_v7 }
 0x24d   :  { %v1008_v3 = vadd.f32 %v985_v51, %v841_v5 }
 0x24e   :  { %v962_v58 = vpop.f32.mrf.mxu2  ;;  %v1499_v1 = vpack.c.b16 %v1496_v25, %v1496_v25 }
 0x24f   :  { %v941_v39 = vpop.f32.mrf.mxu1  ;;  %v1007_v4 = vadd.f32 %v962_v58, %v840_v11 }
 0x254   :  { %v1062_v37 = vpop.f32.mrf.mxu0  ;;  %v987_v46 = vpop.f32.mrf.mxu3 }
 0x255   :  { %v1145_v40 = vadd.f32 %v1062_v37, %v7546_v17 }
 0x256   :  { %v964_v38 = vpop.f32.mrf.mxu2 }
 0x257   :  { %v1085_v28 = vpop.f32.mrf.mxu1  ;;  %5930 = vmatmul.msk.bf16.gmra.mxu0 %vm10697_vm3, %v1343_v13  ;;  %vm10708_vm3 = vmmov %vm10685_vm2 }
 0x258   :  { %v1146_v32 = vadd.f32 %v1085_v28, %v7549_v14 }
 0x259   :  { %5939 = vmatmul.msk.bf16.gmra.mxu3 %vm10700_vm13, %v1343_v13  ;;  %vm10711_vm13 = vmmov %vm10685_vm2 }
 0x25a   :  { %5933 = vmatmul.msk.bf16.gmra.mxu1 %vm10698_vm7, %v1343_v13  ;;  %vm10709_vm7 = vmmov %vm10685_vm2 }
 0x25b   :  { %5936 = vmatmul.msk.bf16.gmra.mxu2 %vm10699_vm10, %v1343_v13  ;;  %vm10710_vm10 = vmmov %vm10685_vm2 }
 0x25c   :  { %v7605_v11 = vpop.f32.mrf.mxu0  ;;  %v1131_v16 = vpop.f32.mrf.mxu3 }
 0x25d   :  { %v1148_v19 = vadd.f32 %v1131_v16, %v992_v44 }
 0x25e   :  { %v1108_v15 = vpop.f32.mrf.mxu2 }
 0x25f   :  { %v7607_v5 = vpop.f32.mrf.mxu1  ;;  %v1147_v56 = vadd.f32 %v1108_v15, %v991_v21 }
 0x264   :  { %v1067_v17 = vpop.f32.mrf.mxu0  ;;  %v7614_v53 = vpop.f32.mrf.mxu3 }
 0x265   :  { %v1153_v59 = vadd.f32 %v1067_v17, %v997_v50 }
 0x266   :  { %v7612_v10 = vpop.f32.mrf.mxu2 }
 0x267   :  { %v1090_v14 = vpop.f32.mrf.mxu1  ;;  %5953 = vmatmul.msk.bf16.vlgmr.msra.gmra.mxu0 %vm10701_vm12, %v6164_v20  ;;  %vm10712_vm12 = vmmov %vm10685_vm2 }
 0x268   :  { %v1154_v60 = vadd.f32 %v1090_v14, %v998_v52  ;;  %v6165_v52 = vld [vmem:[%s10424_s3 + $0xa8] sm:$0xff] }
 0x269   :  { %5962 = vmatmul.msk.bf16.vlgmr.msra.gmra.mxu3 %vm10685_vm2, %v6164_v20 }
 0x26a   :  { %5956 = vmatmul.msk.bf16.vlgmr.msra.gmra.mxu1 %vm10702_vm4, %v6164_v20  ;;  %vm10713_vm4 = vmmov %vm10685_vm2 }
 0x26b   :  { %5959 = vmatmul.msk.bf16.vlgmr.msra.gmra.mxu2 %vm10703_vm6, %v6164_v20  ;;  %vm10714_vm6 = vmmov %vm10685_vm2 }
 0x26c   :  { %v7620_v21 = vpop.f32.mrf.mxu0  ;;  %v1136_v54 = vpop.f32.mrf.mxu3 }
 0x26d   :  { %10704 = vst [vmem:[#allocation18_spill] sm:$0xff] %v7620_v21  ;;  %v1156_v50 = vadd.f32 %v1136_v54, %v1000_v23 }
 0x26e   :  { %v1113_v43 = vpop.f32.mrf.mxu2 }
 0x26f   :  { %v7622_v44 = vpop.f32.mrf.mxu1  ;;  %v1155_v55 = vadd.f32 %v1113_v43, %v999_v9 }
 0x270   :  { %10705 = vst [vmem:[#allocation19_spill] sm:$0xff] %v7622_v44 }
 0x274   :  { %v1072_v36 = vpop.f32.mrf.mxu0  ;;  %v7629_v6 = vpop.f32.mrf.mxu3 }
 0x275   :  { %v1161_v8 = vadd.f32 %v1072_v36, %v1005_v35  ;;  %10707 = vst [vmem:[#allocation21_spill] sm:$0xff] %v7629_v6  ;;  %v10763_v6 = vld [vmem:[#allocation11_spill] sm:$0xff] }
 0x276   :  { %v7627_v41 = vpop.f32.mrf.mxu2 }
 0x277   :  { %v1095_v29 = vpop.f32.mrf.mxu1  ;;  %10706 = vst [vmem:[#allocation20_spill] sm:$0xff] %v7627_v41  ;;  %5954 = vmatmul.msk.bf16.gmra.mxu0 %vm10708_vm3, %v6165_v52  ;;  %v10764_v41 = vld [vmem:[#allocation12_spill] sm:$0xff] }
 0x278   :  { %v1162_v27 = vadd.f32 %v1095_v29, %v1006_v61 }
 0x279   :  { %5963 = vmatmul.msk.bf16.gmra.mxu3 %vm10711_vm13, %v6165_v52 }
 0x27a   :  { %5957 = vmatmul.msk.bf16.gmra.mxu1 %vm10709_vm7, %v6165_v52 }
 0x27b   :  { %5960 = vmatmul.msk.bf16.gmra.mxu2 %vm10710_vm10, %v6165_v52 }
 0x27c   :  { %v1074_v9 = vpop.f32.mrf.mxu0  ;;  %v1141_v26 = vpop.f32.mrf.mxu3 }
 0x27d   :  { %v1164_v61 = vadd.f32 %v1141_v26, %v1008_v3 }
 0x27e   :  { %v1118_v24 = vpop.f32.mrf.mxu2 }
 0x27f   :  { %v1097_v23 = vpop.f32.mrf.mxu1  ;;  %v1163_v35 = vadd.f32 %v1118_v24, %v1007_v4 }
 0x284   :  { %v1218_v57 = vpop.f32.mrf.mxu0  ;;  %v1143_v58 = vpop.f32.mrf.mxu3 }
 0x285   :  { %v7638_v51 = vadd.f32 %v1218_v57, %v1145_v40 }
 0x286   :  { %v1120_v0 = vpop.f32.mrf.mxu2 }
 0x287   :  { %v1241_v39 = vpop.f32.mrf.mxu1  ;;  %5955 = vmatmul.msk.bf16.gmra.mxu0 %vm10712_vm12, %v1499_v1 }
 0x288   :  { %v7640_v30 = vadd.f32 %v1241_v39, %v1146_v32 }
 0x289   :  { %5964 = vmatmul.msk.bf16.gmra.mxu3 %vm10685_vm2, %v1499_v1  ;;  %vm10736_vm2 = vcmp.lt.s32.totalorder %v6829_v22, 16 }
 0x28a   :  { %5958 = vmatmul.msk.bf16.gmra.mxu1 %vm10713_vm4, %v1499_v1 }
 0x28b   :  { %5961 = vmatmul.msk.bf16.gmra.mxu2 %vm10714_vm6, %v1499_v1  ;;  %vm10735_vm6 = vcmp.lt.s32.totalorder %v6829_v22, 112 }
 0x28c   :  { %v7646_v4 = vpop.f32.mrf.mxu0  ;;  %v1287_v13 = vpop.f32.mrf.mxu3 }
 0x28d   :  { %v7652_v28 = vadd.f32 %v1287_v13, %v1148_v19 }
 0x28e   :  { %v1264_v63 = vpop.f32.mrf.mxu2 }
 0x28f   :  { %v7648_v3 = vpop.f32.mrf.mxu1  ;;  %v7650_v37 = vadd.f32 %v1264_v63, %v1147_v56 }
 0x294   :  { %v1223_v38 = vpop.f32.mrf.mxu0  ;;  %v7656_v16 = vpop.f32.mrf.mxu3 }
 0x295   :  { %v1309_v40 = vadd.f32 %v1223_v38, %v1153_v59 }
 0x296   :  { %v7654_v15 = vpop.f32.mrf.mxu2 }
 0x297   :  { %v1246_v46 = vpop.f32.mrf.mxu1 }
 0x298   :  { %v1310_v32 = vadd.f32 %v1246_v46, %v1154_v60 }
 0x29c   :  { %v7658_v20 = vpop.f32.mrf.mxu0  ;;  %v1292_v43 = vpop.f32.mrf.mxu3 }
 0x29d   :  { %10715 = vst [vmem:[#allocation22_spill] sm:$0xff] %v7658_v20  ;;  %v1312_v52 = vadd.f32 %v1292_v43, %v1156_v50 }
 0x29e   :  { %v1269_v14 = vpop.f32.mrf.mxu2 }
 0x29f   :  { %v7660_v17 = vpop.f32.mrf.mxu1  ;;  %v1311_v54 = vadd.f32 %v1269_v14, %v1155_v55 }
 0x2a0   :  { %10716 = vst [vmem:[#allocation23_spill] sm:$0xff] %v7660_v17 }
 0x2a4   :  { %v1228_v56 = vpop.f32.mrf.mxu0  ;;  %v7664_v59 = vpop.f32.mrf.mxu3 }
 0x2a5   :  { %v1317_v19 = vadd.f32 %v1228_v56, %v1161_v8  ;;  %10718 = vst [vmem:[#allocation25_spill] sm:$0xff] %v7664_v59 }
 0x2a6   :  { %v7662_v9 = vpop.f32.mrf.mxu2 }
 0x2a7   :  { %v1251_v36 = vpop.f32.mrf.mxu1  ;;  %10717 = vst [vmem:[#allocation24_spill] sm:$0xff] %v7662_v9 }
 0x2a8   :  { %v1318_v29 = vadd.f32 %v1251_v36, %v1162_v27 }
 0x2ac   :  { %v1230_v60 = vpop.f32.mrf.mxu0  ;;  %v1297_v24 = vpop.f32.mrf.mxu3 }
 0x2ad   :  { %v1320_v25 = vadd.f32 %v1297_v24, %v1164_v61 }
 0x2ae   :  { %v1274_v7 = vpop.f32.mrf.mxu2 }
 0x2af   :  { %v1253_v23 = vpop.f32.mrf.mxu1  ;;  %v1319_v26 = vadd.f32 %v1274_v7, %v1163_v35 }
 0x2b4   :  { %v1374_v1 = vpop.f32.mrf.mxu0  ;;  %v1299_v0 = vpop.f32.mrf.mxu3 }
 0x2b6   :  { %v1276_v39 = vpop.f32.mrf.mxu2 }
 0x2b7   :  { %v1397_v57 = vpop.f32.mrf.mxu1 }
 0x2bc   :  { %v7666_v55 = vpop.f32.mrf.mxu0  ;;  %v1443_v27 = vpop.f32.mrf.mxu3 }
 0x2be   :  { %v1420_v8 = vpop.f32.mrf.mxu2 }
 0x2bf   :  { %v7668_v50 = vpop.f32.mrf.mxu1 }
 0x2c4   :  { %v1379_v58 = vpop.f32.mrf.mxu0  ;;  %v7672_v14 = vpop.f32.mrf.mxu3 }
 0x2c5   :  { %v1465_v13 = vadd.f32 %v1379_v58, %v1309_v40 }
 0x2c6   :  { %v7670_v46 = vpop.f32.mrf.mxu2 }
 0x2c7   :  { %v1402_v63 = vpop.f32.mrf.mxu1 }
 0x2c8   :  { %v1466_v38 = vadd.f32 %v1402_v63, %v1310_v32 }
 0x2cc   :  { %v7674_v35 = vpop.f32.mrf.mxu0  ;;  %v1448_v56 = vpop.f32.mrf.mxu3 }
 0x2cd   :  { %10719 = vst [vmem:[#allocation26_spill] sm:$0xff] %v7674_v35  ;;  %v7680_v60 = vadd.f32 %v1448_v56, %v1312_v52  ;;  %v1457_v52 = vadd.f32 %v1374_v1, %v7638_v51  ;;  %v1460_v51 = vadd.f32 %v1443_v27, %v7652_v28 }
 0x2ce   :  { %v1425_v43 = vpop.f32.mrf.mxu2 }
 0x2cf   :  { %v7676_v61 = vpop.f32.mrf.mxu1  ;;  %v7678_v36 = vadd.f32 %v1425_v43, %v1311_v54  ;;  %v1458_v43 = vadd.f32 %v1397_v57, %v7640_v30 }
 0x2d0   :  { %10720 = vst [vmem:[#allocation27_spill] sm:$0xff] %v7676_v61 }
 0x2d4   :  { %v1384_v23 = vpop.f32.mrf.mxu0  ;;  %v7688_v39 = vpop.f32.mrf.mxu3 }
 0x2d5   :  { %v7682_v24 = vadd.f32 %v1384_v23, %v1317_v19  ;;  %10722 = vst [vmem:[#allocation29_spill] sm:$0xff] %v7688_v39  ;;  %v1637_v19 = vpop.permute.xlu0 %1636 }
 0x2d6   :  { %v7686_v32 = vpop.f32.mrf.mxu2 }
 0x2d7   :  { %v1407_v7 = vpop.f32.mrf.mxu1  ;;  %10721 = vst [vmem:[#allocation28_spill] sm:$0xff] %v7686_v32 }
 0x2d8   :  { %v7684_v40 = vadd.f32 %v1407_v7, %v1318_v29 }
 0x2dc   :  { %v1386_v0 = vpop.f32.mrf.mxu0  ;;  %v1453_v61 = vpop.f32.mrf.mxu3 }
 0x2dd   :  { %v7692_v54 = vadd.f32 %v1453_v61, %v1320_v25  ;;  %v1459_v25 = vadd.f32 %v1420_v8, %v7650_v37 }
 0x2de   :  { %v1430_v63 = vpop.f32.mrf.mxu2 }
 0x2df   :  { %v1409_v58 = vpop.f32.mrf.mxu1  ;;  %v7690_v35 = vadd.f32 %v1430_v63, %v1319_v26 }
 0x2e4   :  { %v1530_v56 = vpop.f32.mrf.mxu0  ;;  %v1455_v7 = vpop.f32.mrf.mxu3 }
 0x2e5   :  { %v1613_v32 = vadd.f32 %v1530_v56, %v1457_v52 }
 0x2e6   :  { %v1432_v23 = vpop.f32.mrf.mxu2 }
 0x2e7   :  { %v1553_v29 = vpop.f32.mrf.mxu1  ;;  %v1639_v39 = vadd.f32 %v1637_v19, %v1613_v32 }
 0x2e8   :  { %v1614_v59 = vadd.f32 %v1553_v29, %v1458_v43 }
 0x2e9   :  { %v1643_v58 = vmul.f32 0.2, %v1639_v39 }
 0x2ea   :  { %v1640_v0 = vadd.f32 %v1637_v19, %v1614_v59 }
 0x2eb   :  { %v7696_v17 = vmax.f32 %v1639_v39, %v1643_v58 }
 0x2ec   :  { %v1644_v9 = vmul.f32 0.2, %v1640_v0  ;;  %v7702_v30 = vpop.f32.mrf.mxu0  ;;  %v1599_v61 = vpop.f32.mrf.mxu3 }
 0x2ed   :  { %v1654_v59 = vmul.f32 %v7696_v17, %v7696_v17  ;;  %v1616_v63 = vadd.f32 %v1599_v61, %v1460_v51 }
 0x2ee   :  { %v7698_v26 = vmax.f32 %v1640_v0, %v1644_v9  ;;  %v1576_v57 = vpop.f32.mrf.mxu2 }
 0x2ef   :  { %v7704_v1 = vpop.f32.mrf.mxu1  ;;  %v1615_v39 = vadd.f32 %v1576_v57, %v1459_v25  ;;  %v1642_v28 = vadd.f32 %v1637_v19, %v1616_v63 }
 0x2f0   :  { %v1651_v32 = vadd.f32 %v7698_v26, %v7696_v17  ;;  %v1655_v9 = vmul.f32 %v7698_v26, %v7698_v26 }
 0x2f1   :  { %v1641_v37 = vadd.f32 %v1637_v19, %v1615_v39  ;;  %v1646_v52 = vmul.f32 0.2, %v1642_v28 }
 0x2f2   :  { %1652 = vadd.xlane.f32.xlu1 %v1651_v32  ;;  %v1656_v8 = vadd.f32 %v1655_v9, %v1654_v59 }
 0x2f3   :  { %v1645_v27 = vmul.f32 0.2, %v1641_v37  ;;  %v7714_v56 = vmax.f32 %v1642_v28, %v1646_v52 }
 0x2f4   :  { %1657 = vadd.xlane.f32.xlu0 %v1656_v8  ;;  %v1535_v29 = vpop.f32.mrf.mxu0  ;;  %v7722_v25 = vpop.f32.mrf.mxu3 }
 0x2f5   :  { %v7712_v43 = vmax.f32 %v1641_v37, %v1645_v27  ;;  %v7716_v7 = vadd.f32 %v1535_v29, %v1465_v13  ;;  %v1682_v57 = vmul.f32 %v7714_v56, %v7714_v56 }
 0x2f6   :  { %v7720_v58 = vpop.f32.mrf.mxu2 }
 0x2f7   :  { %v1558_v23 = vpop.f32.mrf.mxu1  ;;  %10723 = vst [vmem:[#allocation30_spill] sm:$0xff] %v7716_v7  ;;  %v1678_v19 = vadd.f32 %v7714_v56, %v7712_v43  ;;  %v1681_v51 = vmul.f32 %v7712_v43, %v7712_v43 }
 0x2f8   :  { %v7718_v0 = vadd.f32 %v1558_v23, %v1466_v38 }
 0x2f9   :  { %1679 = vadd.xlane.f32.xlu2 %v1678_v19  ;;  %v1683_v63 = vadd.f32 %v1682_v57, %v1681_v51 }
 0x2fa   :  { %10724 = vst [vmem:[#allocation31_spill] sm:$0xff] %v7718_v0 }
 0x2fc   :  { %v7730_v61 = vpop.f32.mrf.mxu0  ;;  %v1604_v32 = vpop.f32.mrf.mxu3 }
 0x2fd   :  { %10725 = vst [vmem:[#allocation32_spill] sm:$0xff] %v7730_v61  ;;  %v7738_v39 = vadd.f32 %v1604_v32, %v7680_v60 }
 0x2fe   :  { %v1581_v38 = vpop.f32.mrf.mxu2 }
 0x2ff   :  { %v7732_v13 = vpop.f32.mrf.mxu1  ;;  %v7735_v59 = vadd.f32 %v1581_v38, %v7678_v36  ;;  %10728 = vst [vmem:[#allocation35_spill] sm:$0xff] %v7738_v39 }
 0x300   :  { %10726 = vst [vmem:[#allocation33_spill] sm:$0xff] %v7732_v13 }
 0x301   :  { %10727 = vst [vmem:[#allocation34_spill] sm:$0xff] %v7735_v59  ;;  %1684 = vadd.xlane.f32.xlu2 %v1683_v63 }
 0x304   :  { %v1540_v9 = vpop.f32.mrf.mxu0  ;;  %v7748_v52 = vpop.f32.mrf.mxu3 }
 0x305   :  { %v7741_v28 = vadd.f32 %v1540_v9, %v7682_v24  ;;  %10732 = vst [vmem:[#allocation39_spill] sm:$0xff] %v7748_v52 }
 0x306   :  { %v7746_v27 = vpop.f32.mrf.mxu2 }
 0x307   :  { %v1563_v37 = vpop.f32.mrf.mxu1  ;;  %10729 = vst [vmem:[#allocation36_spill] sm:$0xff] %v7741_v28 }
 0x308   :  { %v7744_v8 = vadd.f32 %v1563_v37, %v7684_v40  ;;  %10731 = vst [vmem:[#allocation38_spill] sm:$0xff] %v7746_v27 }
 0x30a   :  { %10730 = vst [vmem:[#allocation37_spill] sm:$0xff] %v7744_v8 }
 0x30c   :  { %v1542_v29 = vpop.f32.mrf.mxu0  ;;  %v1609_v19 = vpop.f32.mrf.mxu3 }
 0x30d   :  { %v7754_v51 = vadd.f32 %v1609_v19, %v7692_v54 }
 0x30e   :  { %v1586_v23 = vpop.f32.mrf.mxu2 }
 0x30f   :  { %v1565_v36 = vpop.f32.mrf.mxu1  ;;  %v7751_v60 = vadd.f32 %v1586_v23, %v7690_v35  ;;  %10734 = vst [vmem:[#allocation41_spill] sm:$0xff] %v7754_v51 }
 0x311   :  { %10733 = vst [vmem:[#allocation40_spill] sm:$0xff] %v7751_v60 }
 0x314   :  { %v1611_v24 = vpop.f32.mrf.mxu3 }
 0x316   :  { %v1588_v57 = vpop.f32.mrf.mxu2 }
 0x365   :  { %v1653_v38 = vpop.xlane.xlu1 %1652 }
 0x366   :  { %v1659_v32 = vmul.f32 0.00390625, %v1653_v38 }
 0x367   :  { %v1658_v40 = vpop.xlane.xlu0 %1657 }
 0x368   :  { %v1661_v63 = vmul.f32 %v1659_v32, %v1659_v32  ;;  %v1660_v9 = vmul.f32 0.00390625, %v1658_v40  ;;  %v1663_v40 = vsub.f32 %v7696_v17, %v1659_v32 }
 0x36a   :  { %v1662_v37 = vsub.f32 %v1660_v9, %v1661_v63  ;;  %v1664_v63 = vsub.f32 %v7698_v26, %v1659_v32 }
 0x36c   :  { %v1665_v8 = vadd.f32 1e-05, %v1662_v37  ;;  %v1680_v28 = vpop.xlane.xlu2 %1679 }
 0x36d   :  { %v1686_v29 = vmul.f32 0.00390625, %v1680_v28 }
 0x36e   :  { %6704 = vrsqrt.f32 %v1665_v8  ;;  %vm1672_vm7 = vweird.f32 %v1665_v8 }
 0x36f   :  { %v1688_v35 = vmul.f32 %v1686_v29, %v1686_v29  ;;  %v1690_v32 = vsub.f32 %v7712_v43, %v1686_v29 }
 0x374   :  { %v6705_v36 = vpop.eup %6704  ;;  %v1685_v27 = vpop.xlane.xlu2 %1684 }
 0x375   :  { %v1667_v52 = vmul.f32 %v6705_v36, %v1665_v8  ;;  %v1687_v23 = vmul.f32 0.00390625, %v1685_v27  ;;  %vm1673_vm3 = vweird.f32 %v6705_v36 }
 0x376   :  { %vm1674_vm10 = vmor %vm1672_vm7, %vm1673_vm3  ;;  %vm10737_vm3 = vnez %v10531_v31  ;;  %vm10477_vm7 = vcmask 1043456  }
 0x377   :  { %v1668_v60 = vmul.f32 %v6705_v36, %v1667_v52  ;;  %v1689_v54 = vsub.f32 %v1687_v23, %v1688_v35 }
 0x379   :  { %v1669_v19 = vmul.f32 0.5, %v1668_v60  ;;  %v1692_v57 = vadd.f32 1e-05, %v1689_v54 }
 0x37b   :  { %v1670_v24 = vsub.f32 1.5, %v1669_v19  ;;  %6706 = vrsqrt.f32 %v1692_v57  ;;  %vm1699_vm12 = vweird.f32 %v1692_v57 }
 0x37d   :  { %v1671_v38 = vmul.f32 %v6705_v36, %v1670_v24 }
 0x37f   :  { %v1675_v28 = vsel %vm1674_vm10, %v6705_v36, %v1671_v38  ;;  %v1691_v36 = vsub.f32 %v7714_v56, %v1686_v29  ;;  %vm10738_vm10 = vmmov %vm10736_vm2 }
 0x380   :  { %v7758_v9 = vmul.f32 %v1675_v28, %v1663_v40  ;;  %v7760_v37 = vmul.f32 %v1675_v28, %v1664_v63 }
 0x381   :  { %v6707_v27 = vpop.eup %6706 }
 0x382   :  { %v6222_v52 = vpack.i.bf16 %v7760_v37, %v7758_v9  ;;  %v1694_v60 = vmul.f32 %v6707_v27, %v1692_v57  ;;  %vm1700_vm13 = vweird.f32 %v6707_v27 }
 0x383   :  { %vm1701_vm4 = vmor %vm1699_vm12, %vm1700_vm13 }
 0x384   :  { %6223 = vrot.lane.b32.xlu0 %v6222_v52, %s6733_s2  ;;  %6213 = vrot.lane.b32.xlu1 %v6222_v52, %s6732_s13  ;;  %v1695_v8 = vmul.f32 %v6707_v27, %v1694_v60  ;;  %vm10739_vm13 = vmmov %vm10736_vm2 }
 0x385   :  { %vm10740_vm12 = vmmov %vm10736_vm2 }
 0x386   :  { %v1696_v35 = vmul.f32 0.5, %v1695_v8 }
 0x388   :  { %v1697_v17 = vsub.f32 1.5, %v1696_v35 }
 0x38a   :  { %v1698_v26 = vmul.f32 %v6707_v27, %v1697_v17 }
 0x38c   :  { %v1702_v23 = vsel %vm1701_vm4, %v6707_v27, %v1698_v26  ;;  %vm10741_vm4 = vmmov %vm10735_vm6 }
 0x38d   :  { %v7768_v54 = vmul.f32 %v1702_v23, %v1690_v32  ;;  %v7770_v19 = vmul.f32 %v1702_v23, %v1691_v36 }
 0x38f   :  { %v6217_v24 = vpack.i.bf16 %v7770_v19, %v7768_v54 }
 0x391   :  { %6218 = vrot.lane.b32.xlu2 %v6217_v24, %s6732_s13  ;;  %6228 = vrot.lane.b32.xlu1 %v6217_v24, %s6733_s2 }
 0x3eb   :  { %v6219_v38 = vpop.permute.xlu2 %6218 }
 0x3ec   :  { %v6221_v63 = vunpack.i.h.bf16 %v6219_v38  ;;  %v6220_v35 = vunpack.i.l.bf16 %v6219_v38 }
 0x3ee   :  { %v1932_v24 = vsel %vm10739_vm13, %v6220_v35, %v6221_v63 }
 0x3f6   :  { %v6224_v40 = vpop.permute.xlu0 %6223  ;;  %v6214_v57 = vpop.permute.xlu1 %6213 }
 0x3f7   :  { %v6226_v43 = vunpack.i.h.bf16 %v6224_v40  ;;  %v6225_v28 = vunpack.i.l.bf16 %v6224_v40  ;;  %v6215_v56 = vunpack.i.l.bf16 %v6214_v57  ;;  %v6216_v17 = vunpack.i.h.bf16 %v6214_v57 }
 0x3f9   :  { %v1946_v29 = vsel %vm10735_vm6, %v6225_v28, %v6226_v43  ;;  %v1935_v27 = vsel %vm10736_vm2, %v6221_v63, %v6215_v56  ;;  %v1933_v23 = vsel %vm10738_vm10, %v6216_v17, %v6220_v35  ;;  %v1934_v40 = vsel %vm10740_vm12, %v6215_v56, %v6216_v17  ;;  %vm10742_vm6 = vmmov %vm10741_vm4 }
 0x3fa   :  { %v1948_v52 = vsel %vm10737_vm3, %v1946_v29, %v1935_v27  ;;  %vm10743_vm2 = vmmov %vm10741_vm4  ;;  %vm10745_vm10 = vnez %v10536_v48  ;;  %vm10748_vm12 = vcmask 1043456  }
 0x3fb   :  { %v2059_v60 = vpack.c.bf16 %v1948_v52, %v1948_v52 }
 0x3fd   :  { %v2069_v8 = vsel %vm10477_vm7, %v2059_v60, 0  ;;  %vm10744_vm7 = vnez %v10538_v49 }
 0x3fe   :  { %2087 = vmatpush.bf16.msrb.mxu0 %v2069_v8 }
 0x403   :  { %v6229_v26 = vpop.permute.xlu1 %6228 }
 0x404   :  { %v6231_v32 = vunpack.i.h.bf16 %v6229_v26  ;;  %v6230_v36 = vunpack.i.l.bf16 %v6229_v26  ;;  %v10746_v26 = vld [vmem:[#allocation2_spill] sm:$0xff] }
 0x405   :  { %vm10747_vm13 = vnez %v10746_v26 }
 0x406   :  { %v1944_v51 = vsel %vm10741_vm4, %v6230_v36, %v6231_v32  ;;  %v1945_v60 = vsel %vm10742_vm6, %v6226_v43, %v6230_v36  ;;  %v1947_v38 = vsel %vm10743_vm2, %v6231_v32, %v6225_v28  ;;  %vm10749_vm4 = vmmov %vm10748_vm12  ;;  %v6247_v36 = vpack.i.bf16 %v7768_v54, %v7758_v9 }
 0x407   :  { %v1951_v57 = vsel %vm10744_vm7, %v1947_v38, %v1932_v24  ;;  %v1950_v8 = vsel %vm10745_vm10, %v1944_v51, %v1933_v23  ;;  %v1949_v63 = vsel %vm10747_vm13, %v1945_v60, %v1934_v40  ;;  %vm10750_vm6 = vmmov %vm10749_vm4  ;;  %vm10810_vm7 = vcmp.lt.s32.totalorder %v6829_v22, 1 }
 0x408   :  { %1962 = vrot.lane.b32.xlu1 %v1951_v57, %s6735_s0  ;;  %v2062_v56 = vpack.c.bf16 %v1951_v57, %v1951_v57  ;;  %v6237_v35 = vpack.i.bf16 %v1950_v8, %v1948_v52  ;;  %v6232_v17 = vpack.i.bf16 %v1950_v8, %v1949_v63  ;;  %v2060_v13 = vpack.c.bf16 %v1949_v63, %v1949_v63  ;;  %vm10811_vm3 = vmmov %vm10810_vm7 }
 0x409   :  { %v2061_v61 = vpack.c.bf16 %v1950_v8, %v1950_v8 }
 0x40a   :  { %6238 = vrot.lane.b32.xlu0 %v6237_v35, %s6736_s16  ;;  %6233 = vrot.lane.b32.xlu2 %v6232_v17, %s6735_s0  ;;  %v2072_v43 = vsel %vm10748_vm12, %v2060_v13, 0  ;;  %v2078_v28 = vsel %vm10749_vm4, %v2062_v56, 0  ;;  %v6242_v13 = vpack.i.bf16 %v7768_v54, %v7760_v37  ;;  %v10757_v35 = vld [vmem:[#allocation4_spill] sm:$0xff] }
 0x40b   :  { %2100 = vmatpush.bf16.msrb.mxu1 %v2072_v43  ;;  %v2075_v32 = vsel %vm10750_vm6, %v2061_v61, 0  ;;  %2126 = vmatpush.bf16.msrb.mxu3 %v2078_v28  ;;  %v10751_v61 = vld [vmem:[#allocation3_spill] sm:$0xff]  ;;  %vm10758_vm6 = vnez %v10757_v35 }
 0x40c   :  { %2113 = vmatpush.bf16.msrb.mxu2 %v2075_v32  ;;  %vm10752_vm2 = vnez %v10751_v61  ;;  %v7838_v17 = vsel %vm10758_vm6, %v1935_v27, %v1946_v29  ;;  %v5965_v29 = vld [vmem:[%s10426_s4 + $0x8] sm:$0xff]  ;;  %v5968_v27 = vld [vmem:[%s10427_s5 + $0x4] sm:$0xf]  ;;  %vm10478_vm6 = vcmask 64512  }
 0x40d   :  { %5969 = vmatmul.msk.bf16.vlgmr.msrb.gmra.mxu0 %vm10478_vm6, %v5968_v27 }
 0x40e   :  { %5972 = vmatmul.msk.bf16.vlgmr.msrb.gmra.mxu3 %vm10478_vm6, %v5968_v27  ;;  %5970 = vmatmul.msk.bf16.vlgmr.msrb.gmra.mxu1 %vm10478_vm6, %v5968_v27 }
 0x40f   :  { %5971 = vmatmul.msk.bf16.vlgmr.msrb.gmra.mxu2 %vm10478_vm6, %v5968_v27  ;;  %vm10761_vm6 = vcmp.lt.s32.totalorder %v6829_v22, 127 }
 0x410   :  { %1956 = vrot.lane.b32.xlu1 %v1948_v52, %s6735_s0  ;;  %v7826_v52 = vsel %vm10752_vm2, %v1933_v23, %v1944_v51  ;;  %vm10762_vm2 = vmmov %vm10761_vm6 }
 0x411   :  { %v6257_v43 = vpack.i.bf16 %v7826_v52, %v7838_v17 }
 0x412   :  { %1970 = vrot.lane.b32.xlu0 %v1949_v63, %s6736_s16  ;;  %1974 = vrot.lane.b32.xlu2 %v1951_v57, %s6736_s16  ;;  %v10753_v57 = vld [vmem:[#allocation5_spill] sm:$0xff]  ;;  %v10755_v63 = vld [vmem:[#allocation6_spill] sm:$0xff] }
 0x413   :  { %vm10754_vm12 = vnez %v10753_v57  ;;  %vm10756_vm4 = vnez %v10755_v63 }
 0x414   :  { %v7830_v8 = vsel %vm10754_vm12, %v1934_v40, %v1945_v60  ;;  %v7834_v56 = vsel %vm10756_vm4, %v1932_v24, %v1947_v38  ;;  %vm10759_vm4 = vcmp.lt.s32.totalorder %v6829_v22, 1 }
 0x415   :  { %v6252_v51 = vpack.i.bf16 %v7826_v52, %v7830_v8  ;;  %vm10760_vm12 = vmmov %vm10759_vm4 }
 0x418   :  { %1994 = vrot.lane.b32.xlu1 %v7770_v19, %s6735_s0 }
 0x41a   :  { %6248 = vrot.lane.b32.xlu0 %v6247_v36, %s6736_s16  ;;  %6243 = vrot.lane.b32.xlu2 %v6242_v13, %s6735_s0 }
 0x420   :  { %1988 = vrot.lane.b32.xlu1 %v7758_v9, %s6735_s0 }
 0x422   :  { %2002 = vrot.lane.b32.xlu0 %v7760_v37, %s6736_s16  ;;  %2006 = vrot.lane.b32.xlu2 %v7770_v19, %s6736_s16 }
 0x428   :  { %2026 = vrot.lane.b32.xlu1 %v7834_v56, %s6735_s0 }
 0x42a   :  { %6258 = vrot.lane.b32.xlu0 %v6257_v43, %s6736_s16  ;;  %6253 = vrot.lane.b32.xlu2 %v6252_v51, %s6735_s0 }
 0x430   :  { %2020 = vrot.lane.b32.xlu1 %v7838_v17, %s6735_s0 }
 0x432   :  { %2034 = vrot.lane.b32.xlu0 %v7830_v8, %s6736_s16  ;;  %2038 = vrot.lane.b32.xlu2 %v7834_v56, %s6736_s16 }
 0x43a   :  { %1709 = vperm.xlu2 %6262, %v5965_v29  }
 0x464   :  { %v6234_v23 = vpop.permute.xlu2 %6233 }
 0x465   :  { %v6236_v38 = vunpack.i.h.bf16 %v6234_v23  ;;  %v6235_v28 = vunpack.i.l.bf16 %v6234_v23 }
 0x467   :  { %v1965_v29 = vsel %vm10760_vm12, %v6235_v28, %v6236_v38  ;;  %vm10766_vm12 = vcmask 1043456  }
 0x46c   :  { %v1975_v24 = vpop.permute.xlu2 %1974 }
 0x474   :  { %v7864_v40 = vpop.permute.xlu2 %6243 }
 0x47a   :  { %v1963_v60 = vpop.permute.xlu1 %1962 }
 0x47b   :  { %v1964_v51 = vsel %vm10759_vm4, %v6236_v38, %v1963_v60 }
 0x47c   :  { %v6239_v32 = vpop.permute.xlu0 %6238  ;;  %v7866_v36 = vpop.permute.xlu2 %2006 }
 0x47d   :  { %v6241_v13 = vunpack.i.h.bf16 %v6239_v32  ;;  %v6240_v43 = vunpack.i.l.bf16 %v6239_v32 }
 0x47f   :  { %v1976_v27 = vsel %vm10761_vm6, %v6241_v13, %v1975_v24  ;;  %v1979_v20 = vsel %vm10762_vm2, %v1975_v24, %v6240_v43  ;;  %vm10767_vm2 = vmmov %vm10766_vm12 }
 0x480   :  { %v1982_v23 = vsel %vm6993_vm14, %v1976_v27, %v1965_v29  ;;  %v1983_v2 = vsel %vm7008_vm8, %v1979_v20, %v1964_v51  ;;  %v1986_v32 = vsel %vm7012_vm5, %v1965_v29, %v1976_v27  ;;  %v1987_v44 = vsel %vm7016_vm11, %v1964_v51, %v1979_v20  ;;  %vm10768_vm6 = vmmov %vm10767_vm2 }
 0x481   :  { %v2055_v18 = vpack.c.bf16 %v1982_v23, %v1982_v23  ;;  %v2056_v38 = vpack.c.bf16 %v1983_v2, %v1983_v2  ;;  %v2203_v21 = vpack.c.bf16 %v1986_v32, %v1986_v32  ;;  %v2204_v42 = vpack.c.bf16 %v1987_v44, %v1987_v44  ;;  %vm10769_vm13 = vmmov %vm10767_vm2  ;;  %v2052_v2 = vld [vmem:[%s10427_s5] sm:$0xf] }
 0x482   :  { %v1957_v39 = vpop.permute.xlu1 %1956 }
 0x483   :  { %v2142_v59 = vsel %vm10766_vm12, %v2055_v18, 0  ;;  %v2145_v24 = vsel %vm10767_vm2, %v2056_v38, 0  ;;  %v1966_v0 = vsel %vm10759_vm4, %v1957_v39, %v6235_v28  ;;  %v2215_v29 = vsel %vm10768_vm6, %v2203_v21, 0  ;;  %vm10770_vm12 = vmmov %vm10759_vm4 }
 0x484   :  { %v1971_v7 = vpop.permute.xlu0 %1970  ;;  %v7888_v35 = vpop.permute.xlu2 %6253  ;;  %2180 = vmatpush.bf16.msra.mxu2 %v2142_v59  ;;  %2193 = vmatpush.bf16.msra.mxu3 %v2145_v24  ;;  %v2218_v20 = vsel %vm10769_vm13, %v2204_v42, 0  ;;  %v1967_v18 = vsel %vm10770_vm12, %v1963_v60, %v1957_v39  ;;  %vm10771_vm2 = vcmp.lt.s32.totalorder %v6829_v22, 127  ;;  %vm10777_vm13 = vcmask 64512  }
 0x485   :  { %v1977_v44 = vsel %vm10771_vm2, %v1971_v7, %v6241_v13  ;;  %vm10772_vm4 = vmmov %vm10771_vm2  ;;  %vm10779_vm12 = vcmask 1043456  }
 0x486   :  { %v1978_v28 = vsel %vm10772_vm4, %v6240_v43, %v1971_v7  ;;  %v1981_v42 = vsel %vm6989_vm9, %v1977_v44, %v1966_v0  ;;  %v1985_v39 = vsel %vm7001_vm1, %v1966_v0, %v1977_v44  ;;  %vm10778_vm6 = vmmov %vm10777_vm13  ;;  %v6246_v0 = vunpack.i.h.bf16 %v7864_v40 }
 0x487   :  { %v1980_v21 = vsel %vm6985_vm0, %v1978_v28, %v1967_v18  ;;  %v1984_v23 = vsel %vm6997_vm15, %v1967_v18, %v1978_v28  ;;  %5975 = vmatmul.msk.bf16.vlgmr.msra.gmra.mxu2 %vm10777_vm13, %v2052_v2  ;;  %5976 = vmatmul.msk.bf16.vlgmr.msra.gmra.mxu3 %vm10778_vm6, %v2052_v2  ;;  %v2054_v7 = vpack.c.bf16 %v1981_v42, %v1981_v42  ;;  %vm10780_vm2 = vmmov %vm10779_vm12  ;;  %v6245_v44 = vunpack.i.l.bf16 %v7864_v40 }
 0x488   :  { %2253 = vmatpush.bf16.msrb.mxu2 %v2215_v29  ;;  %2266 = vmatpush.bf16.msrb.mxu3 %v2218_v20  ;;  %v2053_v60 = vpack.c.bf16 %v1980_v21, %v1980_v21  ;;  %v2201_v13 = vpack.c.bf16 %v1984_v23, %v1984_v23  ;;  %v2202_v43 = vpack.c.bf16 %v1985_v39, %v1985_v39  ;;  %vm10781_vm4 = vmmov %vm10780_vm2 }
 0x489   :  { %v2139_v24 = vsel %vm10780_vm2, %v2054_v7, 0  ;;  %vm10782_vm10 = vmmov %vm10780_vm2  ;;  %v1149_v28 = vadd.f32 %v7605_v11, %v7556_v47  ;;  %v1150_v21 = vadd.f32 %v7607_v5, %v7559_v45  ;;  %v1151_v42 = vadd.f32 %v7612_v10, %v7569_v62 }
 0x48a   :  { %v2136_v38 = vsel %vm10779_vm12, %v2053_v60, 0  ;;  %v1995_v29 = vpop.permute.xlu1 %1994  ;;  %2167 = vmatpush.bf16.msra.mxu1 %v2139_v24  ;;  %v2209_v20 = vsel %vm10781_vm4, %v2201_v13, 0  ;;  %v2212_v18 = vsel %vm10782_vm10, %v2202_v43, 0  ;;  %vm10783_vm10 = vmmov %vm10778_vm6  ;;  %v1152_v40 = vadd.f32 %v7614_v53, %v7572_v34 }
 0x48b   :  { %2154 = vmatpush.bf16.msra.mxu0 %v2136_v38  ;;  %vm10784_vm13 = vmmov %vm10778_vm6  ;;  %v1305_v47 = vadd.f32 %v7646_v4, %v1149_v28  ;;  %v1306_v11 = vadd.f32 %v7648_v3, %v1150_v21  ;;  %v1307_v45 = vadd.f32 %v7654_v15, %v1151_v42  ;;  %vm10785_vm6 = vcmp.lt.s32.totalorder %v6829_v22, 1  ;;  %v5977_v21 = vld [vmem:[%s10427_s5 + $0x8] sm:$0xf] }
 0x48c   :  { %v6249_v23 = vpop.permute.xlu0 %6248  ;;  %v7923_v39 = vpop.permute.xlu2 %2038  ;;  %v7934_v62 = vsel %vm10785_vm6, %v6245_v44, %v6246_v0  ;;  %vm10786_vm12 = vmmov %vm10785_vm6  ;;  %vm10787_vm2 = vcmp.lt.s32.totalorder %v6829_v22, 127  ;;  %v1308_v43 = vadd.f32 %v7656_v16, %v1152_v40 }
 0x48d   :  { %v6251_v60 = vunpack.i.h.bf16 %v6249_v23  ;;  %v6250_v7 = vunpack.i.l.bf16 %v6249_v23  ;;  %5974 = vmatmul.msk.bf16.vlgmr.msra.gmra.mxu1 %vm10784_vm13, %v2052_v2  ;;  %v7938_v5 = vsel %vm10786_vm12, %v6246_v0, %v1995_v29  ;;  %vm10788_vm4 = vmmov %vm10787_vm2  ;;  %v1461_v53 = vadd.f32 %v7666_v55, %v1305_v47 }
 0x48e   :  { %2240 = vmatpush.bf16.msrb.mxu1 %v2212_v18  ;;  %5973 = vmatmul.msk.bf16.vlgmr.msra.gmra.mxu0 %vm10783_vm10, %v2052_v2  ;;  %v1462_v4 = vadd.f32 %v7668_v50, %v1306_v11  ;;  %vm10789_vm10 = vcmask 1043456   ;;  %v2357_v18 = vpack.c.bf16 %v7768_v54, %v7768_v54  ;;  %v2358_v0 = vpack.c.bf16 %v7770_v19, %v7770_v19  ;;  %vm10791_vm12 = vmmov %vm10785_vm6 }
 0x48f   :  { %2227 = vmatpush.bf16.msrb.mxu0 %v2209_v20  ;;  %v7943_v10 = vsel %vm10787_vm2, %v6251_v60, %v7866_v36  ;;  %v7948_v34 = vsel %vm10788_vm4, %v7866_v36, %v6250_v7  ;;  %v1463_v36 = vadd.f32 %v7670_v46, %v1307_v45  ;;  %v1617_v55 = vadd.f32 %v7702_v30, %v1461_v53  ;;  %vm10790_vm13 = vmmov %vm10789_vm10 }
 0x490   :  { %v2014_v3 = vsel %vm6993_vm14, %v7943_v10, %v7934_v62  ;;  %v2015_v15 = vsel %vm7008_vm8, %v7948_v34, %v7938_v5  ;;  %v1618_v50 = vadd.f32 %v7704_v1, %v1462_v4  ;;  %v1464_v28 = vadd.f32 %v7672_v14, %v1308_v43  ;;  %vm10792_vm4 = vmmov %vm10787_vm2 }
 0x491   :  { %v2280_v2 = vpack.c.bf16 %v2014_v3, %v2014_v3  ;;  %v2281_v13 = vpack.c.bf16 %v2015_v15, %v2015_v15  ;;  %v2355_v15 = vpack.c.bf16 %v7758_v9, %v7758_v9 }
 0x492   :  { %v1989_v38 = vpop.permute.xlu1 %1988 }
 0x493   :  { %v2292_v24 = vsel %vm10789_vm10, %v2280_v2, 0  ;;  %v2295_v20 = vsel %vm10790_vm13, %v2281_v13, 0  ;;  %v1998_v16 = vsel %vm10785_vm6, %v1989_v38, %v6245_v44  ;;  %v1999_v46 = vsel %vm10791_vm12, %v1995_v29, %v1989_v38  ;;  %vm10794_vm6 = vmmov %vm10790_vm13 }
 0x494   :  { %v2003_v30 = vpop.permute.xlu0 %2002  ;;  %v1710_v1 = vpop.permute.xlu2 %1709  ;;  %2330 = vmatpush.bf16.msra.mxu2 %v2292_v24  ;;  %2343 = vmatpush.bf16.msra.mxu3 %v2295_v20  ;;  %v1619_v44 = vadd.f32 %v7720_v58, %v1463_v36  ;;  %v1620_v29 = vadd.f32 %v7722_v25, %v1464_v28  ;;  %vm10793_vm10 = vcmask 64512   ;;  %v2356_v2 = vpack.c.bf16 %v7760_v37, %v7760_v37 }
 0x495   :  { %v2009_v54 = vsel %vm10787_vm2, %v2003_v30, %v6251_v60  ;;  %v2010_v14 = vsel %vm10792_vm4, %v6250_v7, %v2003_v30  ;;  %v1712_v19 = vadd.f32 %v1710_v1, %v1617_v55  ;;  %v1713_v42 = vadd.f32 %v1710_v1, %v1618_v50  ;;  %vm10795_vm12 = vmmov %vm10793_vm10 }
 0x496   :  { %v2012_v23 = vsel %vm6985_vm0, %v2010_v14, %v1999_v46  ;;  %v2013_v40 = vsel %vm6989_vm9, %v2009_v54, %v1998_v16  ;;  %v2369_v60 = vsel %vm10790_vm13, %v2357_v18, 0  ;;  %v2372_v7 = vsel %vm10794_vm6, %v2358_v0, 0  ;;  %vm10796_vm2 = vmmov %vm10794_vm6 }
 0x497   :  { %v2278_v47 = vpack.c.bf16 %v2012_v23, %v2012_v23  ;;  %v2279_v11 = vpack.c.bf16 %v2013_v40, %v2013_v40  ;;  %5980 = vmatmul.msk.bf16.vlgmr.msrb.gmra.mxu2 %vm10793_vm10, %v5977_v21  ;;  %v1714_v45 = vadd.f32 %v1710_v1, %v1619_v44  ;;  %v1715_v53 = vadd.f32 %v1710_v1, %v1620_v29  ;;  %vm10797_vm4 = vmmov %vm10796_vm2  ;;  %v5982_v1 = vld [vmem:[%s10427_s5 + $0xc] sm:$0xf] }
 0x498   :  { %v1716_v4 = vmul.f32 0.2, %v1712_v19  ;;  %v1717_v58 = vmul.f32 0.2, %v1713_v42  ;;  %5981 = vmatmul.msk.bf16.vlgmr.msrb.gmra.mxu3 %vm10795_vm12, %v5977_v21  ;;  %2407 = vmatpush.bf16.msrb.mxu2 %v2369_v60  ;;  %vm10798_vm13 = vmmov %vm10793_vm10  ;;  %v2018_v18 = vsel %vm7012_vm5, %v7934_v62, %v7943_v10  ;;  %v2019_v0 = vsel %vm7016_vm11, %v7938_v5, %v7948_v34 }
 0x499   :  { %2420 = vmatpush.bf16.msrb.mxu3 %v2372_v7  ;;  %v2286_v25 = vsel %vm10796_vm2, %v2278_v47, 0  ;;  %v2289_v3 = vsel %vm10797_vm4, %v2279_v11, 0  ;;  %v1718_v13 = vmul.f32 0.2, %v1714_v45  ;;  %v1719_v43 = vmul.f32 0.2, %v1715_v53  ;;  %vm10799_vm6 = vmmov %vm10796_vm2 }
 0x49a   :  { %2304 = vmatpush.bf16.msra.mxu0 %v2286_v25  ;;  %2317 = vmatpush.bf16.msra.mxu1 %v2289_v3  ;;  %v7998_v36 = vmax.f32 %v1712_v19, %v1716_v4  ;;  %v8000_v55 = vmax.f32 %v1713_v42, %v1717_v58  ;;  %v2363_v9 = vsel %vm10799_vm6, %v2355_v15, 0  ;;  %vm10800_vm12 = vmmov %vm10796_vm2  ;;  %v2435_v19 = vpack.c.bf16 %v2019_v0, %v2019_v0  ;;  %v2027_v34 = vpop.permute.xlu1 %2026 }
 0x49b   :  { %v8002_v50 = vmax.f32 %v1714_v45, %v1718_v13  ;;  %v8004_v38 = vmax.f32 %v1715_v53, %v1719_v43  ;;  %v2366_v20 = vsel %vm10800_vm12, %v2356_v2, 0  ;;  %v2016_v62 = vsel %vm6997_vm15, %v1999_v46, %v2010_v14  ;;  %vm10801_vm2 = vmmov %vm10793_vm10  ;;  %v5987_v2 = vld [vmem:[%s10427_s5 + $0x10] sm:$0xf] }
 0x49c   :  { %v1724_v24 = vadd.f32 %v8000_v55, %v7998_v36  ;;  %v1727_v28 = vmul.f32 %v7998_v36, %v7998_v36  ;;  %v1728_v30 = vmul.f32 %v8000_v55, %v8000_v55  ;;  %v2017_v10 = vsel %vm7001_vm1, %v1998_v16, %v2009_v54  ;;  %v6259_v42 = vpop.permute.xlu0 %6258  ;;  %vm10802_vm4 = vmmov %vm10801_vm2 }
 0x49d   :  { %5979 = vmatmul.msk.bf16.vlgmr.msrb.gmra.mxu1 %vm10798_vm13, %v5977_v21  ;;  %v1751_v37 = vadd.f32 %v8004_v38, %v8002_v50  ;;  %vm10804_vm13 = vmmov %vm10799_vm6  ;;  %v2432_v23 = vpack.c.bf16 %v2016_v62, %v2016_v62  ;;  %v2433_v40 = vpack.c.bf16 %v2017_v10, %v2017_v10  ;;  %v6261_v47 = vunpack.i.h.bf16 %v6259_v42  ;;  %v5992_v62 = vld [vmem:[%s10427_s5 + $0x14] sm:$0xf] }
 0x49e   :  { %5978 = vmatmul.msk.bf16.vlgmr.msrb.gmra.mxu0 %vm10793_vm10, %v5977_v21  ;;  %1725 = vadd.xlane.f32.xlu0 %v1724_v24  ;;  %v2434_v21 = vpack.c.bf16 %v2018_v18, %v2018_v18  ;;  %v1729_v5 = vadd.f32 %v1728_v30, %v1727_v28  ;;  %vm10803_vm10 = vmmov %vm10799_vm6  ;;  %v2449_v29 = vsel %vm10804_vm13, %v2435_v19, 0  ;;  %v6260_v46 = vunpack.i.l.bf16 %v6259_v42 }
 0x49f   :  { %2381 = vmatpush.bf16.msrb.mxu0 %v2363_v9  ;;  %2394 = vmatpush.bf16.msrb.mxu1 %v2366_v20  ;;  %v6256_v16 = vunpack.i.h.bf16 %v7888_v35  ;;  %v6255_v54 = vunpack.i.l.bf16 %v7888_v35  ;;  %vm10805_vm6 = vcmp.lt.s32.totalorder %v6829_v22, 127  ;;  %vm10806_vm12 = vmmov %vm10801_vm2  ;;  %v2589_v19 = vpack.c.bf16 %v7834_v56, %v7834_v56 }
 0x4a0   :  { %1752 = vadd.xlane.f32.xlu2 %v1751_v37  ;;  %v2446_v44 = vsel %vm10803_vm10, %v2434_v21, 0  ;;  %v2040_v14 = vsel %vm10805_vm6, %v6261_v47, %v7923_v39  ;;  %vm10809_vm13 = vmmov %vm10805_vm6  ;;  %v2588_v21 = vpack.c.bf16 %v7826_v52, %v7826_v52  ;;  %v2586_v52 = vpack.c.bf16 %v7838_v17, %v7838_v17 }
 0x4a1   :  { %v2043_v7 = vsel %vm10809_vm13, %v7923_v39, %v6260_v46  ;;  %v2029_v35 = vsel %vm10810_vm7, %v6255_v54, %v6256_v16  ;;  %v2028_v45 = vsel %vm10811_vm3, %v6256_v16, %v2027_v34  ;;  %vm10813_vm7 = vmmov %vm10811_vm3  ;;  %v2587_v56 = vpack.c.bf16 %v7830_v8, %v7830_v8  ;;  %v5997_v8 = vld [vmem:[%s10427_s5 + $0x18] sm:$0xf] }
 0x4a2   :  { %v2046_v4 = vsel %vm6993_vm14, %v2040_v14, %v2029_v35  ;;  %v2047_v58 = vsel %vm7008_vm8, %v2043_v7, %v2028_v45  ;;  %v2021_v25 = vpop.permute.xlu1 %2020 }
 0x4a3   :  { %v2511_v15 = vpack.c.bf16 %v2046_v4, %v2046_v4  ;;  %v2512_v13 = vpack.c.bf16 %v2047_v58, %v2047_v58  ;;  %v2030_v43 = vsel %vm10811_vm3, %v2021_v25, %v6255_v54  ;;  %v2031_v24 = vsel %vm10813_vm7, %v2027_v34, %v2021_v25  ;;  %v2738_v25 = vld [vmem:[%s10428_s6] sm:$0xff] }
 0x4a4   :  { %v2035_v53 = vpop.permute.xlu0 %2034  ;;  %2741 = vperm.xlu1 %6263, %v2738_v25  }
 0x4a5   :  { %v2041_v3 = vsel %vm10805_vm6, %v2035_v53, %v6261_v47  ;;  %v2102_v47 = vpop.f32.mrf.mxu1 }
 0x4a6   :  { %v2045_v37 = vsel %vm6989_vm9, %v2041_v3, %v2030_v43  ;;  %v2049_v16 = vsel %vm7001_vm1, %v2030_v43, %v2041_v3 }
 0x4a7   :  { %5985 = vmatmul.msk.bf16.vlgmr.msra.gmra.mxu2 %vm10801_vm2, %v5982_v1  ;;  %v2510_v28 = vpack.c.bf16 %v2045_v37, %v2045_v37 }
 0x4a8   :  { %1730 = vadd.xlane.f32.xlu2 %v1729_v5  ;;  %5986 = vmatmul.msk.bf16.vlgmr.msra.gmra.mxu3 %vm10802_vm4, %v5982_v1  ;;  %vm10807_vm4 = vmmov %vm10803_vm10 }
 0x4a9   :  { %2484 = vmatpush.bf16.msra.mxu2 %v2446_v44  ;;  %2497 = vmatpush.bf16.msra.mxu3 %v2449_v29  ;;  %v2440_v11 = vsel %vm10807_vm4, %v2432_v23, 0  ;;  %vm10808_vm10 = vmmov %vm10807_vm4  ;;  %v2523_v20 = vsel %vm10807_vm4, %v2511_v15, 0  ;;  %v2050_v44 = vsel %vm7012_vm5, %v2029_v35, %v2040_v14  ;;  %v2051_v29 = vsel %vm7016_vm11, %v2028_v45, %v2043_v7  ;;  %v2115_v7 = vpop.f32.mrf.mxu2  ;;  %v2128_v35 = vpop.f32.mrf.mxu3  ;;  %v6002_v15 = vld [vmem:[%s10427_s5 + $0x1c] sm:$0xf] }
 0x4aa   :  { %v2443_v60 = vsel %vm10808_vm10, %v2433_v40, 0  ;;  %vm10814_vm10 = vmmov %vm10801_vm2  ;;  %v2665_v17 = vpack.c.bf16 %v2050_v44, %v2050_v44  ;;  %v2666_v23 = vpack.c.bf16 %v2051_v29, %v2051_v29  ;;  %v2089_v40 = vpop.f32.mrf.mxu0 }
 0x4ab   :  { %vm10815_vm13 = vmmov %vm10807_vm4 }
 0x4ac   :  { %v2526_v18 = vsel %vm10815_vm13, %v2512_v13, 0  ;;  %vm10818_vm3 = vmmov %vm10807_vm4 }
 0x4ad   :  { %5984 = vmatmul.msk.bf16.vlgmr.msra.gmra.mxu1 %vm10801_vm2, %v5982_v1  ;;  %vm10819_vm7 = vmmov %vm10818_vm3  ;;  %v2594_v5 = vsel %vm10818_vm3, %v2586_v52, 0  ;;  %v2104_v58 = vpop.f32.mrf.mxu1 }
 0x4ae   :  { %5983 = vmatmul.msk.bf16.vlgmr.msra.gmra.mxu0 %vm10806_vm12, %v5982_v1  ;;  %2471 = vmatpush.bf16.msra.mxu1 %v2443_v60  ;;  %vm10812_vm12 = vmmov %vm10805_vm6  ;;  %v2520_v1 = vsel %vm10819_vm7, %v2510_v28, 0  ;;  %v2664_v60 = vpack.c.bf16 %v2049_v16, %v2049_v16 }
 0x4af   :  { %2458 = vmatpush.bf16.msra.mxu0 %v2440_v11  ;;  %v2042_v39 = vsel %vm10812_vm12, %v6260_v46, %v2035_v53  ;;  %vm10816_vm6 = vmmov %vm10801_vm2 }
 0x4b0   :  { %v2044_v9 = vsel %vm6985_vm0, %v2042_v39, %v2031_v24  ;;  %vm10817_vm12 = vmmov %vm10801_vm2  ;;  %v2048_v46 = vsel %vm6997_vm15, %v2031_v24, %v2042_v39 }
 0x4b1   :  { %v2509_v0 = vpack.c.bf16 %v2044_v9, %v2044_v9  ;;  %vm10820_vm4 = vmmov %vm10818_vm3  ;;  %v2663_v11 = vpack.c.bf16 %v2048_v46, %v2048_v46  ;;  %v2117_v3 = vpop.f32.mrf.mxu2  ;;  %v2130_v39 = vpop.f32.mrf.mxu3 }
 0x4b2   :  { %v2600_v10 = vsel %vm10820_vm4, %v2588_v21, 0  ;;  %vm10822_vm13 = vmmov %vm10818_vm3  ;;  %v2091_v4 = vpop.f32.mrf.mxu0 }
 0x4b3   :  { %v2517_v30 = vsel %vm10818_vm3, %v2509_v0, 0  ;;  %v2603_v42 = vsel %vm10822_vm13, %v2589_v19, 0  ;;  %vm10825_vm7 = vmmov %vm10818_vm3  ;;  %v2671_v45 = vsel %vm10818_vm3, %v2663_v11, 0 }
 0x4b4   :  { %v2597_v34 = vsel %vm10825_vm7, %v2587_v56, 0  ;;  %vm10826_vm4 = vmmov %vm10818_vm3 }
 0x4b5   :  { %v2677_v54 = vsel %vm10826_vm4, %v2665_v17, 0  ;;  %vm10828_vm13 = vmmov %vm10818_vm3 }
 0x4b6   :  { %v2680_v14 = vsel %vm10828_vm13, %v2666_v23, 0  ;;  %vm10831_vm7 = vmmov %vm10818_vm3 }
 0x4b7   :  { %5990 = vmatmul.msk.bf16.vlgmr.msrb.gmra.mxu2 %vm10801_vm2, %v5987_v2  ;;  %v2674_v53 = vsel %vm10831_vm7, %v2664_v60, 0  ;;  %vm10832_vm4 = vmmov %vm10801_vm2 }
 0x4b8   :  { %5991 = vmatmul.msk.bf16.vlgmr.msrb.gmra.mxu3 %vm10814_vm10, %v5987_v2  ;;  %2561 = vmatpush.bf16.msrb.mxu2 %v2523_v20  ;;  %vm10821_vm10 = vmmov %vm10801_vm2 }
 0x4b9   :  { %2574 = vmatpush.bf16.msrb.mxu3 %v2526_v18  ;;  %vm10834_vm13 = vmmov %vm10801_vm2 }
 0x4ba   :  { %vm10837_vm3 = vmmov %vm10801_vm2 }
 0x4bb   :  { %vm10838_vm7 = vmmov %vm10801_vm2 }
 0x4bd   :  { %5989 = vmatmul.msk.bf16.vlgmr.msrb.gmra.mxu1 %vm10817_vm12, %v5987_v2  ;;  %vm10824_vm12 = vmmov %vm10801_vm2 }
 0x4be   :  { %5988 = vmatmul.msk.bf16.vlgmr.msrb.gmra.mxu0 %vm10816_vm6, %v5987_v2  ;;  %2548 = vmatpush.bf16.msrb.mxu1 %v2520_v1  ;;  %vm10823_vm6 = vmmov %vm10801_vm2  ;;  %v6007_v2 = vld [vmem:[%s10427_s5 + $0x20] sm:$0xf] }
 0x4bf   :  { %2535 = vmatpush.bf16.msrb.mxu0 %v2517_v30 }
 0x4c7   :  { %5995 = vmatmul.msk.bf16.vlgmr.msra.gmra.mxu2 %vm10801_vm2, %v5992_v62 }
 0x4c8   :  { %5996 = vmatmul.msk.bf16.vlgmr.msra.gmra.mxu3 %vm10821_vm10, %v5992_v62  ;;  %2638 = vmatpush.bf16.msra.mxu2 %v2600_v10  ;;  %vm10827_vm10 = vmmov %vm10801_vm2 }
 0x4c9   :  { %2651 = vmatpush.bf16.msra.mxu3 %v2603_v42 }
 0x4cd   :  { %5994 = vmatmul.msk.bf16.vlgmr.msra.gmra.mxu1 %vm10824_vm12, %v5992_v62  ;;  %vm10830_vm12 = vmmov %vm10801_vm2 }
 0x4ce   :  { %5993 = vmatmul.msk.bf16.vlgmr.msra.gmra.mxu0 %vm10823_vm6, %v5992_v62  ;;  %2625 = vmatpush.bf16.msra.mxu1 %v2597_v34  ;;  %vm10829_vm6 = vmmov %vm10801_vm2 }
 0x4cf   :  { %2612 = vmatpush.bf16.msra.mxu0 %v2594_v5 }
 0x4d7   :  { %6000 = vmatmul.msk.bf16.vlgmr.msrb.gmra.mxu2 %vm10801_vm2, %v5997_v8 }
 0x4d8   :  { %6001 = vmatmul.msk.bf16.vlgmr.msrb.gmra.mxu3 %vm10827_vm10, %v5997_v8  ;;  %2715 = vmatpush.bf16.msrb.mxu2 %v2677_v54  ;;  %vm10833_vm10 = vmmov %vm10801_vm2 }
 0x4d9   :  { %2728 = vmatpush.bf16.msrb.mxu3 %v2680_v14 }
 0x4dd   :  { %5999 = vmatmul.msk.bf16.vlgmr.msrb.gmra.mxu1 %vm10830_vm12, %v5997_v8  ;;  %vm10836_vm12 = vmmov %vm10801_vm2 }
 0x4de   :  { %5998 = vmatmul.msk.bf16.vlgmr.msrb.gmra.mxu0 %vm10829_vm6, %v5997_v8  ;;  %2702 = vmatpush.bf16.msrb.mxu1 %v2674_v53  ;;  %vm10835_vm6 = vmmov %vm10801_vm2 }
 0x4df   :  { %2689 = vmatpush.bf16.msrb.mxu0 %v2671_v45 }
 0x4e7   :  { %6005 = vmatmul.msk.bf16.vlgmr.msra.gmra.mxu2 %vm10801_vm2, %v6002_v15 }
 0x4e8   :  { %6006 = vmatmul.msk.bf16.vlgmr.msra.gmra.mxu3 %vm10832_vm4, %v6002_v15 }
 0x4ed   :  { %6004 = vmatmul.msk.bf16.vlgmr.msra.gmra.mxu1 %vm10834_vm13, %v6002_v15 }
 0x4ee   :  { %6003 = vmatmul.msk.bf16.vlgmr.msra.gmra.mxu0 %vm10833_vm10, %v6002_v15 }
 0x4f7   :  { %6010 = vmatmul.msk.bf16.vlgmr.msrb.gmra.mxu2 %vm10835_vm6, %v6007_v2 }
 0x4f8   :  { %6011 = vmatmul.msk.bf16.vlgmr.msrb.gmra.mxu3 %vm10836_vm12, %v6007_v2 }
 0x4fd   :  { %6009 = vmatmul.msk.bf16.vlgmr.msrb.gmra.mxu1 %vm10838_vm7, %v6007_v2 }
 0x4fe   :  { %6008 = vmatmul.msk.bf16.vlgmr.msrb.gmra.mxu0 %vm10837_vm3, %v6007_v2 }
 0x50a   :  { %v2169_v43 = vpop.f32.mrf.mxu1  ;;  %v2182_v37 = vpop.f32.mrf.mxu2 }
 0x50b   :  { %v2156_v13 = vpop.f32.mrf.mxu0  ;;  %v2170_v9 = vadd.f32 %v2169_v43, %v2102_v47  ;;  %v2195_v20 = vpop.f32.mrf.mxu3  ;;  %v2183_v18 = vadd.f32 %v2182_v37, %v2115_v7 }
 0x50c   :  { %v2157_v24 = vadd.f32 %v2156_v13, %v2089_v40  ;;  %v2196_v0 = vadd.f32 %v2195_v20, %v2128_v35 }
 0x512   :  { %v2171_v30 = vpop.f32.mrf.mxu1  ;;  %v2184_v1 = vpop.f32.mrf.mxu2 }
 0x513   :  { %v2158_v28 = vpop.f32.mrf.mxu0  ;;  %v2197_v21 = vpop.f32.mrf.mxu3 }
 0x51a   :  { %v2242_v62 = vpop.f32.mrf.mxu1  ;;  %v2255_v52 = vpop.f32.mrf.mxu2 }
 0x51b   :  { %v2229_v19 = vpop.f32.mrf.mxu0  ;;  %v2273_v42 = vadd.f32 %v2242_v62, %v2170_v9  ;;  %v2274_v56 = vadd.f32 %v2255_v52, %v2183_v18  ;;  %v2268_v5 = vpop.f32.mrf.mxu3 }
 0x51c   :  { %v2272_v10 = vadd.f32 %v2229_v19, %v2157_v24  ;;  %v2275_v34 = vadd.f32 %v2268_v5, %v2196_v0 }
 0x522   :  { %v2244_v29 = vpop.f32.mrf.mxu1  ;;  %v2257_v17 = vpop.f32.mrf.mxu2 }
 0x523   :  { %v2231_v44 = vpop.f32.mrf.mxu0  ;;  %v2270_v8 = vpop.f32.mrf.mxu3 }
 0x52a   :  { %v2319_v40 = vpop.f32.mrf.mxu1  ;;  %v2332_v16 = vpop.f32.mrf.mxu2 }
 0x52b   :  { %v2306_v23 = vpop.f32.mrf.mxu0  ;;  %v2350_v46 = vadd.f32 %v2319_v40, %v2273_v42  ;;  %v2351_v54 = vadd.f32 %v2332_v16, %v2274_v56  ;;  %v2345_v14 = vpop.f32.mrf.mxu3 }
 0x52c   :  { %v2349_v47 = vadd.f32 %v2306_v23, %v2272_v10  ;;  %v2352_v11 = vadd.f32 %v2345_v14, %v2275_v34 }
 0x532   :  { %v2321_v7 = vpop.f32.mrf.mxu1  ;;  %v2334_v35 = vpop.f32.mrf.mxu2 }
 0x533   :  { %v2308_v60 = vpop.f32.mrf.mxu0  ;;  %v2347_v45 = vpop.f32.mrf.mxu3 }
 0x53a   :  { %v2396_v4 = vpop.f32.mrf.mxu1  ;;  %v2409_v58 = vpop.f32.mrf.mxu2 }
 0x53b   :  { %v2383_v53 = vpop.f32.mrf.mxu0  ;;  %v2422_v25 = vpop.f32.mrf.mxu3  ;;  %v2427_v8 = vadd.f32 %v2396_v4, %v2350_v46  ;;  %v2428_v40 = vadd.f32 %v2409_v58, %v2351_v54 }
 0x53c   :  { %v2426_v17 = vadd.f32 %v2383_v53, %v2349_v47  ;;  %v2429_v14 = vadd.f32 %v2422_v25, %v2352_v11 }
 0x542   :  { %v2398_v39 = vpop.f32.mrf.mxu1  ;;  %v2411_v15 = vpop.f32.mrf.mxu2 }
 0x543   :  { %v2385_v3 = vpop.f32.mrf.mxu0  ;;  %v2424_v2 = vpop.f32.mrf.mxu3 }
 0x54a   :  { %v2473_v43 = vpop.f32.mrf.mxu1  ;;  %v2486_v24 = vpop.f32.mrf.mxu2 }
 0x54b   :  { %v2460_v13 = vpop.f32.mrf.mxu0  ;;  %v2499_v9 = vpop.f32.mrf.mxu3  ;;  %v2504_v7 = vadd.f32 %v2473_v43, %v2427_v8  ;;  %v2505_v35 = vadd.f32 %v2486_v24, %v2428_v40 }
 0x54c   :  { %v2503_v60 = vadd.f32 %v2460_v13, %v2426_v17  ;;  %v2506_v45 = vadd.f32 %v2499_v9, %v2429_v14  ;;  %v1755_v14 = vmul.f32 %v8004_v38, %v8004_v38 }
 0x552   :  { %v2475_v20 = vpop.f32.mrf.mxu1  ;;  %v2488_v18 = vpop.f32.mrf.mxu2 }
 0x553   :  { %v2462_v37 = vpop.f32.mrf.mxu0  ;;  %v2501_v0 = vpop.f32.mrf.mxu3 }
 0x554   :  { %v2742_v18 = vpop.permute.xlu1 %2741 }
 0x55a   :  { %v2550_v30 = vpop.f32.mrf.mxu1  ;;  %v2563_v1 = vpop.f32.mrf.mxu2 }
 0x55b   :  { %v2537_v28 = vpop.f32.mrf.mxu0  ;;  %v2576_v21 = vpop.f32.mrf.mxu3  ;;  %v2581_v39 = vadd.f32 %v2550_v30, %v2504_v7  ;;  %v2582_v15 = vadd.f32 %v2563_v1, %v2505_v35 }
 0x55c   :  { %v2580_v3 = vadd.f32 %v2537_v28, %v2503_v60  ;;  %v2583_v2 = vadd.f32 %v2576_v21, %v2506_v45 }
 0x562   :  { %v2552_v62 = vpop.f32.mrf.mxu1  ;;  %v2565_v10 = vpop.f32.mrf.mxu2 }
 0x563   :  { %v2539_v19 = vpop.f32.mrf.mxu0  ;;  %v2578_v42 = vpop.f32.mrf.mxu3 }
 0x56a   :  { %v2627_v56 = vpop.f32.mrf.mxu1  ;;  %v2640_v5 = vpop.f32.mrf.mxu2 }
 0x56b   :  { %v2614_v52 = vpop.f32.mrf.mxu0  ;;  %v2653_v34 = vpop.f32.mrf.mxu3  ;;  %v2658_v20 = vadd.f32 %v2627_v56, %v2581_v39  ;;  %v2659_v0 = vadd.f32 %v2640_v5, %v2582_v15 }
 0x56c   :  { %v2657_v37 = vadd.f32 %v2614_v52, %v2580_v3  ;;  %v2660_v47 = vadd.f32 %v2653_v34, %v2583_v2  ;;  %v1753_v3 = vpop.xlane.xlu2 %1752  ;;  %v1726_v39 = vpop.xlane.xlu0 %1725 }
 0x56d   :  { %v8159_v2 = vmul.f32 0.00390625, %v1726_v39 }
 0x572   :  { %v2629_v29 = vpop.f32.mrf.mxu1  ;;  %v2642_v23 = vpop.f32.mrf.mxu2 }
 0x573   :  { %v2616_v44 = vpop.f32.mrf.mxu0  ;;  %v2655_v16 = vpop.f32.mrf.mxu3 }
 0x574   :  { %v1754_v16 = vmul.f32 %v8002_v50, %v8002_v50  ;;  %v1731_v15 = vpop.xlane.xlu2 %1730 }
 0x576   :  { %v1756_v35 = vadd.f32 %v1755_v14, %v1754_v16 }
 0x57a   :  { %v2704_v62 = vpop.f32.mrf.mxu1  ;;  %v2717_v54 = vpop.f32.mrf.mxu2 }
 0x57b   :  { %v2691_v19 = vpop.f32.mrf.mxu0  ;;  %v2735_v53 = vadd.f32 %v2704_v62, %v2658_v20  ;;  %v2736_v4 = vadd.f32 %v2717_v54, %v2659_v0  ;;  %v2730_v11 = vpop.f32.mrf.mxu3  ;;  %v1734_v20 = vmul.f32 %v8159_v2, %v8159_v2 }
 0x57c   :  { %v2734_v46 = vadd.f32 %v2691_v19, %v2657_v37  ;;  %v2737_v58 = vadd.f32 %v2730_v11, %v2660_v47  ;;  %v1733_v37 = vmul.f32 0.00390625, %v1731_v15 }
 0x57d   :  { %v2745_v13 = vadd.f32 %v2742_v18, %v2735_v53  ;;  %v2746_v43 = vadd.f32 %v2742_v18, %v2736_v4  ;;  %v8165_v53 = vmul.f32 0.00390625, %v1753_v3 }
 0x57e   :  { %v2744_v25 = vadd.f32 %v2742_v18, %v2734_v46  ;;  %v2747_v24 = vadd.f32 %v2742_v18, %v2737_v58  ;;  %v1735_v18 = vsub.f32 %v1733_v37, %v1734_v20 }
 0x57f   :  { %v2749_v28 = vmul.f32 0.2, %v2745_v13  ;;  %v2750_v30 = vmul.f32 0.2, %v2746_v43 }
 0x580   :  { %v2748_v9 = vmul.f32 0.2, %v2744_v25  ;;  %v2751_v1 = vmul.f32 0.2, %v2747_v24  ;;  %v1738_v0 = vadd.f32 1e-05, %v1735_v18 }
 0x581   :  { %v8137_v10 = vmax.f32 %v2745_v13, %v2749_v28  ;;  %v8139_v42 = vmax.f32 %v2746_v43, %v2750_v30 }
 0x582   :  { %v8135_v21 = vmax.f32 %v2744_v25, %v2748_v9  ;;  %v2706_v56 = vpop.f32.mrf.mxu1  ;;  %v8141_v5 = vmax.f32 %v2747_v24, %v2751_v1  ;;  %v2719_v44 = vpop.f32.mrf.mxu2  ;;  %6708 = vrsqrt.f32 %v1738_v0  ;;  %v1761_v24 = vmul.f32 %v8165_v53, %v8165_v53 }
 0x583   :  { %v2693_v52 = vpop.f32.mrf.mxu0  ;;  %v2786_v29 = vmul.f32 %v8139_v42, %v8139_v42  ;;  %v2732_v17 = vpop.f32.mrf.mxu3  ;;  %v2760_v7 = vmul.f32 %v8137_v10, %v8137_v10  ;;  %vm1745_vm6 = vweird.f32 %v1738_v0 }
 0x584   :  { %v2756_v34 = vadd.f32 %v8137_v10, %v8135_v21  ;;  %v2783_v8 = vadd.f32 %v8141_v5, %v8139_v42  ;;  %v2787_v23 = vmul.f32 %v8141_v5, %v8141_v5  ;;  %v2759_v60 = vmul.f32 %v8135_v21, %v8135_v21 }
 0x586   :  { %2757 = vadd.xlane.f32.xlu1 %v2756_v34  ;;  %2784 = vadd.xlane.f32.xlu0 %v2783_v8  ;;  %v2788_v40 = vadd.f32 %v2787_v23, %v2786_v29  ;;  %v2761_v45 = vadd.f32 %v2760_v7, %v2759_v60 }
 0x588   :  { %2789 = vadd.xlane.f32.xlu2 %v2788_v40  ;;  %v6709_v11 = vpop.eup %6708 }
 0x589   :  { %v1740_v28 = vmul.f32 %v6709_v11, %v1738_v0  ;;  %vm1746_vm4 = vweird.f32 %v6709_v11 }
 0x58a   :  { %vm1747_vm7 = vmor %vm1745_vm6, %vm1746_vm4 }
 0x58b   :  { %v1741_v29 = vmul.f32 %v6709_v11, %v1740_v28 }
 0x58d   :  { %v1742_v40 = vmul.f32 0.5, %v1741_v29 }
 0x58e   :  { %1757 = vadd.xlane.f32.xlu1 %v1756_v35  ;;  %2762 = vadd.xlane.f32.xlu0 %v2761_v45 }
 0x58f   :  { %v1743_v45 = vsub.f32 1.5, %v1742_v40 }
 0x5f9   :  { %v2758_v19 = vpop.xlane.xlu1 %2757  ;;  %v2785_v62 = vpop.xlane.xlu0 %2784 }
 0x5fa   :  { %v8163_v47 = vmul.f32 0.00390625, %v2785_v62  ;;  %v8169_v58 = vmul.f32 0.00390625, %v2758_v19  ;;  %v1736_v19 = vsub.f32 %v7998_v36, %v8159_v2  ;;  %v1737_v62 = vsub.f32 %v8000_v55, %v8159_v2 }
 0x5fb   :  { %v2790_v46 = vpop.xlane.xlu2 %2789 }
 0x5fc   :  { %v2792_v54 = vmul.f32 0.00390625, %v2790_v46  ;;  %v2793_v4 = vmul.f32 %v8163_v47, %v8163_v47  ;;  %v2766_v52 = vmul.f32 %v8169_v58, %v8169_v58  ;;  %v1744_v46 = vmul.f32 %v6709_v11, %v1743_v45 }
 0x5fe   :  { %v2794_v25 = vsub.f32 %v2792_v54, %v2793_v4  ;;  %v1748_v2 = vsel %vm1747_vm7, %v6709_v11, %v1744_v46 }
 0x600   :  { %v2797_v43 = vadd.f32 1e-05, %v2794_v25  ;;  %v1763_v25 = vsub.f32 %v8002_v50, %v8165_v53  ;;  %v2768_v50 = vsub.f32 %v8135_v21, %v8169_v58 }
 0x601   :  { %v1758_v13 = vpop.xlane.xlu1 %1757  ;;  %v2763_v30 = vpop.xlane.xlu0 %2762 }
 0x602   :  { %v1760_v9 = vmul.f32 0.00390625, %v1758_v13  ;;  %6710 = vrsqrt.f32 %v2797_v43  ;;  %v2765_v1 = vmul.f32 0.00390625, %v2763_v30  ;;  %vm2804_vm10 = vweird.f32 %v2797_v43 }
 0x603   :  { %v1764_v13 = vsub.f32 %v8004_v38, %v8165_v53  ;;  %v2769_v38 = vsub.f32 %v8137_v10, %v8169_v58 }
 0x604   :  { %v1762_v56 = vsub.f32 %v1760_v9, %v1761_v24  ;;  %v2767_v34 = vsub.f32 %v2765_v1, %v2766_v52  ;;  %v2796_v9 = vsub.f32 %v8141_v5, %v8163_v47  ;;  %v1749_v1 = vmul.f32 %v1748_v2, %v1736_v19 }
 0x605   :  { %v1750_v5 = vmul.f32 %v1748_v2, %v1737_v62 }
 0x606   :  { %v1765_v44 = vadd.f32 1e-05, %v1762_v56  ;;  %v2770_v17 = vadd.f32 1e-05, %v2767_v34 }
 0x608   :  { %6712 = vrsqrt.f32 %v1765_v44  ;;  %v6711_v8 = vpop.eup %6710  ;;  %vm1772_vm3 = vweird.f32 %v1765_v44 }
 0x609   :  { %6714 = vrsqrt.f32 %v2770_v17  ;;  %v2799_v23 = vmul.f32 %v6711_v8, %v2797_v43  ;;  %vm2805_vm2 = vweird.f32 %v6711_v8  ;;  %v2795_v43 = vsub.f32 %v8139_v42, %v8163_v47 }
 0x60a   :  { %vm2806_vm12 = vmor %vm2804_vm10, %vm2805_vm2  ;;  %vm2777_vm2 = vweird.f32 %v2770_v17  ;;  %vm10844_vm10 = vnez %v10531_v31 }
 0x60b   :  { %v2800_v16 = vmul.f32 %v6711_v8, %v2799_v23 }
 0x60d   :  { %v2801_v60 = vmul.f32 0.5, %v2800_v16 }
 0x60e   :  { %v6713_v14 = vpop.eup %6712 }
 0x60f   :  { %v1767_v7 = vmul.f32 %v6713_v14, %v1765_v44  ;;  %v6715_v35 = vpop.eup %6714  ;;  %v2802_v3 = vsub.f32 1.5, %v2801_v60  ;;  %vm1773_vm13 = vweird.f32 %v6713_v14 }
 0x610   :  { %v2772_v39 = vmul.f32 %v6715_v35, %v2770_v17  ;;  %vm2778_vm11 = vweird.f32 %v6715_v35  ;;  %vm1774_vm5 = vmor %vm1772_vm3, %vm1773_vm13  ;;  %vm10845_vm13 = vcmask 1043456  }
 0x611   :  { %v1768_v15 = vmul.f32 %v6713_v14, %v1767_v7  ;;  %v2803_v37 = vmul.f32 %v6711_v8, %v2802_v3  ;;  %vm2779_vm4 = vmor %vm2777_vm2, %vm2778_vm11  ;;  %vm10843_vm11 = vcmp.lt.s32.totalorder %v6829_v22, 16 }
 0x612   :  { %v2773_v20 = vmul.f32 %v6715_v35, %v2772_v39  ;;  %vm10846_vm6 = vmmov %vm10843_vm11 }
 0x613   :  { %v1769_v18 = vmul.f32 0.5, %v1768_v15  ;;  %v2807_v36 = vsel %vm2806_vm12, %v6711_v8, %v2803_v37  ;;  %vm10847_vm12 = vmmov %vm10846_vm6 }
 0x614   :  { %v2774_v54 = vmul.f32 0.5, %v2773_v20  ;;  %v8192_v28 = vmul.f32 %v2807_v36, %v2795_v43  ;;  %v8194_v11 = vmul.f32 %v2807_v36, %v2796_v9  ;;  %vm10848_vm3 = vmmov %vm10846_vm6 }
 0x615   :  { %v1770_v4 = vsub.f32 1.5, %v1769_v18 }
 0x616   :  { %v2775_v24 = vsub.f32 1.5, %v2774_v54  ;;  %10839 = vst [vmem:[#allocation2_spill] sm:$0xff] %v8192_v28 }
 0x617   :  { %v1771_v55 = vmul.f32 %v6713_v14, %v1770_v4 }
 0x618   :  { %v2776_v0 = vmul.f32 %v6715_v35, %v2775_v24 }
 0x619   :  { %v1775_v53 = vsel %vm1774_vm5, %v6713_v14, %v1771_v55  ;;  %vm10842_vm5 = vcmp.lt.s32.totalorder %v6829_v22, 112 }
 0x61a   :  { %v1776_v42 = vmul.f32 %v1775_v53, %v1763_v25  ;;  %v1777_v30 = vmul.f32 %v1775_v53, %v1764_v13  ;;  %v2780_v47 = vsel %vm2779_vm4, %v6715_v35, %v2776_v0  ;;  %vm10849_vm7 = vmmov %vm10842_vm5 }
 0x61b   :  { %v8196_v52 = vmul.f32 %v2780_v47, %v2768_v50  ;;  %v8198_v21 = vmul.f32 %v2780_v47, %v2769_v38  ;;  %vm10850_vm2 = vmmov %vm10842_vm5 }
 0x61c   :  { %v8201_v56 = vadd.f32 %v8192_v28, %v1776_v42  ;;  %v8204_v10 = vadd.f32 %v8194_v11, %v1777_v30  ;;  %vm10851_vm4 = vmmov %vm10850_vm2 }
 0x61d   :  { %10840 = vst [vmem:[#allocation3_spill] sm:$0xff] %v8196_v52  ;;  %v8207_v58 = vadd.f32 %v8196_v52, %v1749_v1  ;;  %v8210_v34 = vadd.f32 %v8198_v21, %v1750_v5 }
 0x61e   :  { %10841 = vst [vmem:[#allocation5_spill] sm:$0xff] %v8198_v21  ;;  %v6274_v44 = vpack.i.bf16 %v8204_v10, %v8201_v56 }
 0x61f   :  { %v6269_v29 = vpack.i.bf16 %v8210_v34, %v8207_v58  ;;  %v6299_v30 = vpack.i.bf16 %v8201_v56, %v8207_v58  ;;  %v6294_v1 = vpack.i.bf16 %v8201_v56, %v8210_v34 }
 0x620   :  { %6275 = vrot.lane.b32.xlu0 %v6274_v44, %s6732_s13 }
 0x621   :  { %6270 = vrot.lane.b32.xlu2 %v6269_v29, %s6733_s2  ;;  %6265 = vrot.lane.b32.xlu1 %v6269_v29, %s6732_s13  ;;  %v10861_v29 = vld [vmem:[#allocation4_spill] sm:$0xff] }
 0x628   :  { %6280 = vrot.lane.b32.xlu0 %v6274_v44, %s6733_s2 }
 0x67b   :  { %v6271_v17 = vpop.permute.xlu2 %6270 }
 0x67c   :  { %v6273_v23 = vunpack.i.h.bf16 %v6271_v17  ;;  %v6272_v40 = vunpack.i.l.bf16 %v6271_v17 }
 0x67e   :  { %v2836_v7 = vsel %vm10842_vm5, %v6272_v40, %v6273_v23  ;;  %vm10852_vm5 = vnez %v10538_v49 }
 0x692   :  { %v6276_v8 = vpop.permute.xlu0 %6275 }
 0x693   :  { %v6278_v16 = vunpack.i.h.bf16 %v6276_v8  ;;  %v6266_v14 = vpop.permute.xlu1 %6265  ;;  %v6277_v45 = vunpack.i.l.bf16 %v6276_v8 }
 0x694   :  { %v6267_v60 = vunpack.i.l.bf16 %v6266_v14  ;;  %v6268_v3 = vunpack.i.h.bf16 %v6266_v14  ;;  %v6013_v14 = vld [vmem:[%s10427_s5 + $0x28] sm:$0xf] }
 0x695   :  { %v2822_v46 = vsel %vm10847_vm12, %v6277_v45, %v6278_v16 }
 0x696   :  { %v2825_v35 = vsel %vm10843_vm11, %v6278_v16, %v6267_v60  ;;  %v2823_v62 = vsel %vm10846_vm6, %v6268_v3, %v6277_v45  ;;  %v2824_v54 = vsel %vm10848_vm3, %v6267_v60, %v6268_v3  ;;  %vm10853_vm11 = vnez %v10536_v48  ;;  %v5966_v16 = vld [vmem:[%s10426_s4 + $0x10] sm:$0xff] }
 0x697   :  { %v2838_v39 = vsel %vm10844_vm10, %v2836_v7, %v2825_v35  ;;  %vm10855_vm6 = vcmask 1043456  }
 0x698   :  { %v2950_v15 = vpack.c.bf16 %v2838_v39, %v2838_v39  ;;  %vm10856_vm12 = vmmov %vm10855_vm6 }
 0x699   :  { %vm10857_vm3 = vmmov %vm10855_vm6 }
 0x69a   :  { %v6281_v37 = vpop.permute.xlu0 %6280  ;;  %v2958_v19 = vsel %vm10845_vm13, %v2950_v15, 0  ;;  %vm10854_vm13 = vnez %v10746_v26 }
 0x69b   :  { %v6283_v20 = vunpack.i.h.bf16 %v6281_v37  ;;  %v6282_v18 = vunpack.i.l.bf16 %v6281_v37  ;;  %2976 = vmatpush.bf16.msra.mxu0 %v2958_v19 }
 0x69d   :  { %v2834_v4 = vsel %vm10849_vm7, %v6282_v18, %v6283_v20  ;;  %v2835_v25 = vsel %vm10850_vm2, %v6273_v23, %v6282_v18  ;;  %v2837_v13 = vsel %vm10851_vm4, %v6283_v20, %v6272_v40  ;;  %vm10858_vm7 = vnez %v10751_v61  ;;  %v6057_v40 = vld [vmem:[%s10428_s6 + $0x8] sm:$0xff] }
 0x69e   :  { %v2841_v36 = vsel %vm10852_vm5, %v2837_v13, %v2822_v46  ;;  %v2840_v24 = vsel %vm10853_vm11, %v2834_v4, %v2823_v62  ;;  %v2839_v55 = vsel %vm10854_vm13, %v2835_v25, %v2824_v54  ;;  %v8270_v5 = vsel %vm10858_vm7, %v2823_v62, %v2834_v4 }
 0x69f   :  { %2852 = vrot.lane.b32.xlu2 %v2841_v36, %s6735_s0  ;;  %v2953_v2 = vpack.c.bf16 %v2841_v36, %v2841_v36  ;;  %v6289_v43 = vpack.i.bf16 %v2840_v24, %v2838_v39  ;;  %v6284_v9 = vpack.i.bf16 %v2840_v24, %v2839_v55  ;;  %v2951_v50 = vpack.c.bf16 %v2839_v55, %v2839_v55 }
 0x6a0   :  { %v2952_v38 = vpack.c.bf16 %v2840_v24, %v2840_v24  ;;  %vm10859_vm2 = vnez %v10753_v57  ;;  %vm10860_vm4 = vnez %v10755_v63  ;;  %vm10867_vm7 = vcmp.lt.s32.totalorder %v6829_v22, 1 }
 0x6a1   :  { %6290 = vrot.lane.b32.xlu0 %v6289_v43, %s6736_s16  ;;  %6285 = vrot.lane.b32.xlu1 %v6284_v9, %s6735_s0  ;;  %v2961_v0 = vsel %vm10855_vm6, %v2951_v50, 0  ;;  %v2967_v53 = vsel %vm10856_vm12, %v2953_v2, 0  ;;  %v8274_v47 = vsel %vm10859_vm2, %v2824_v54, %v2835_v25  ;;  %v8278_v44 = vsel %vm10860_vm4, %v2822_v46, %v2837_v13 }
 0x6a2   :  { %2989 = vmatpush.bf16.msra.mxu1 %v2961_v0  ;;  %v2964_v42 = vsel %vm10857_vm3, %v2952_v38, 0  ;;  %3015 = vmatpush.bf16.msra.mxu3 %v2967_v53  ;;  %vm10862_vm6 = vnez %v10861_v29  ;;  %v6304_v23 = vpack.i.bf16 %v8270_v5, %v8274_v47  ;;  %vm10863_vm12 = vcmask 64512  }
 0x6a3   :  { %3002 = vmatpush.bf16.msra.mxu2 %v2964_v42  ;;  %v8282_v17 = vsel %vm10862_vm6, %v2825_v35, %v2836_v7  ;;  %6014 = vmatmul.msk.bf16.vlgmr.msra.gmra.mxu0 %vm10863_vm12, %v6013_v14  ;;  %vm10864_vm3 = vmmov %vm10863_vm12 }
 0x6a4   :  { %v6309_v8 = vpack.i.bf16 %v8270_v5, %v8282_v17  ;;  %vm10865_vm6 = vmmov %vm10864_vm3 }
 0x6a5   :  { %6015 = vmatmul.msk.bf16.vlgmr.msra.gmra.mxu1 %vm10864_vm3, %v6013_v14  ;;  %vm10866_vm4 = vmmov %vm10864_vm3  ;;  %vm10871_vm3 = vcmp.lt.s32.totalorder %v6829_v22, 127 }
 0x6a6   :  { %6016 = vmatmul.msk.bf16.vlgmr.msra.gmra.mxu2 %vm10865_vm6, %v6013_v14  ;;  %6017 = vmatmul.msk.bf16.vlgmr.msra.gmra.mxu3 %vm10866_vm4, %v6013_v14  ;;  %vm10868_vm12 = vmmov %vm10867_vm7 }
 0x6a7   :  { %2846 = vrot.lane.b32.xlu2 %v2838_v39, %s6735_s0  ;;  %vm10869_vm6 = vmmov %vm10867_vm7 }
 0x6a8   :  { %vm10870_vm4 = vmmov %vm10869_vm6 }
 0x6a9   :  { %2860 = vrot.lane.b32.xlu0 %v2839_v55, %s6736_s16  ;;  %2864 = vrot.lane.b32.xlu1 %v2841_v36, %s6736_s16  ;;  %vm10872_vm2 = vmmov %vm10871_vm3 }
 0x6aa   :  { %vm10873_vm13 = vmmov %vm10872_vm2 }
 0x6af   :  { %2884 = vrot.lane.b32.xlu2 %v8204_v10, %s6735_s0 }
 0x6b1   :  { %6300 = vrot.lane.b32.xlu0 %v6299_v30, %s6736_s16  ;;  %6295 = vrot.lane.b32.xlu1 %v6294_v1, %s6735_s0 }
 0x6b7   :  { %2878 = vrot.lane.b32.xlu2 %v8207_v58, %s6735_s0 }
 0x6b9   :  { %2892 = vrot.lane.b32.xlu0 %v8210_v34, %s6736_s16  ;;  %2896 = vrot.lane.b32.xlu1 %v8204_v10, %s6736_s16 }
 0x6bf   :  { %2916 = vrot.lane.b32.xlu2 %v8278_v44, %s6735_s0 }
 0x6c1   :  { %6310 = vrot.lane.b32.xlu0 %v6309_v8, %s6736_s16  ;;  %6305 = vrot.lane.b32.xlu1 %v6304_v23, %s6735_s0 }
 0x6c7   :  { %2910 = vrot.lane.b32.xlu2 %v8282_v17, %s6735_s0 }
 0x6c9   :  { %2924 = vrot.lane.b32.xlu0 %v8274_v47, %s6736_s16  ;;  %2928 = vrot.lane.b32.xlu1 %v8278_v44, %s6736_s16 }
 0x6cf   :  { %3631 = vperm.xlu2 %6262, %v6057_v40  }
 0x6d1   :  { %1782 = vperm.xlu1 %6263, %v5966_v16  }
 0x6f9   :  { %v2853_v60 = vpop.permute.xlu2 %2852 }
 0x701   :  { %v2847_v45 = vpop.permute.xlu2 %2846 }
 0x702   :  { %v2857_v20 = vsel %vm10867_vm7, %v2853_v60, %v2847_v45  ;;  %vm10874_vm7 = vmmov %vm10872_vm2 }
 0x709   :  { %v2885_v9 = vpop.permute.xlu2 %2884 }
 0x713   :  { %v6291_v7 = vpop.permute.xlu0 %6290  ;;  %v6286_v35 = vpop.permute.xlu1 %6285 }
 0x714   :  { %v6288_v3 = vunpack.i.h.bf16 %v6286_v35  ;;  %v6287_v39 = vunpack.i.l.bf16 %v6286_v35  ;;  %v6293_v15 = vunpack.i.h.bf16 %v6291_v7  ;;  %v6292_v37 = vunpack.i.l.bf16 %v6291_v7 }
 0x716   :  { %v2856_v19 = vsel %vm10868_vm12, %v2847_v45, %v6287_v39  ;;  %v2854_v46 = vsel %vm10869_vm6, %v6288_v3, %v2853_v60  ;;  %v2855_v54 = vsel %vm10870_vm4, %v6287_v39, %v6288_v3  ;;  %vm10877_vm12 = vcmask 1043456  }
 0x717   :  { %vm10878_vm6 = vmmov %vm10877_vm12 }
 0x718   :  { %vm10879_vm4 = vmmov %vm10878_vm6 }
 0x71b   :  { %v2861_v18 = vpop.permute.xlu0 %2860  ;;  %v2865_v62 = vpop.permute.xlu1 %2864 }
 0x71c   :  { %v2867_v4 = vsel %vm10871_vm3, %v2861_v18, %v6293_v15  ;;  %v2868_v25 = vsel %vm10872_vm2, %v6292_v37, %v2861_v18  ;;  %v2866_v13 = vsel %vm10873_vm13, %v6293_v15, %v2865_v62  ;;  %v2869_v36 = vsel %vm10874_vm7, %v2865_v62, %v6292_v37  ;;  %vm10880_vm3 = vmmov %vm10879_vm4 }
 0x71d   :  { %v2870_v24 = vsel %vm6985_vm0, %v2868_v25, %v2857_v20  ;;  %v2871_v55 = vsel %vm6989_vm9, %v2867_v4, %v2856_v19  ;;  %v2874_v2 = vsel %vm6997_vm15, %v2857_v20, %v2868_v25  ;;  %v2875_v43 = vsel %vm7001_vm1, %v2856_v19, %v2867_v4  ;;  %vm10881_vm7 = vmmov %vm10880_vm3  ;;  %v6012_v19 = vld [vmem:[%s10427_s5 + $0x24] sm:$0xf] }
 0x71e   :  { %v2944_v50 = vpack.c.bf16 %v2870_v24, %v2870_v24  ;;  %v2945_v38 = vpack.c.bf16 %v2871_v55, %v2871_v55  ;;  %v3090_v0 = vpack.c.bf16 %v2874_v2, %v2874_v2  ;;  %v3091_v53 = vpack.c.bf16 %v2875_v43, %v2875_v43  ;;  %vm10882_vm11 = vmmov %vm10880_vm3 }
 0x71f   :  { %v2872_v42 = vsel %vm6993_vm14, %v2866_v13, %v2855_v54  ;;  %v2873_v30 = vsel %vm7008_vm8, %v2869_v36, %v2854_v46  ;;  %vm10875_vm13 = vnez %v10764_v41  ;;  %vm10876_vm2 = vnez %v10765_v33  ;;  %vm10883_vm5 = vmmov %vm10880_vm3 }
 0x720   :  { %v2876_v1 = vsel %vm10875_vm13, %v2855_v54, %v2866_v13  ;;  %v2877_v8 = vsel %vm10876_vm2, %v2854_v46, %v2869_v36  ;;  %v2946_v23 = vpack.c.bf16 %v2872_v42, %v2872_v42  ;;  %v2947_v40 = vpack.c.bf16 %v2873_v30, %v2873_v30  ;;  %vm10884_vm10 = vmmov %vm10880_vm3  ;;  %v2879_v46 = vpop.permute.xlu2 %2878 }
 0x721   :  { %v3092_v16 = vpack.c.bf16 %v2876_v1, %v2876_v1  ;;  %v3093_v14 = vpack.c.bf16 %v2877_v8, %v2877_v8  ;;  %v3025_v60 = vsel %vm10877_vm12, %v2944_v50, 0  ;;  %v3028_v7 = vsel %vm10878_vm6, %v2945_v38, 0 }
 0x722   :  { %v3098_v35 = vsel %vm10879_vm4, %v3090_v0, 0  ;;  %v3101_v45 = vsel %vm10880_vm3, %v3091_v53, 0  ;;  %3043 = vmatpush.bf16.msrb.mxu0 %v3025_v60  ;;  %3056 = vmatpush.bf16.msrb.mxu1 %v3028_v7  ;;  %v3031_v3 = vsel %vm10881_vm7, %v2946_v23, 0  ;;  %v3034_v39 = vsel %vm10882_vm11, %v2947_v40, 0 }
 0x723   :  { %v3104_v15 = vsel %vm10883_vm5, %v3092_v16, 0  ;;  %3069 = vmatpush.bf16.msrb.mxu2 %v3031_v3  ;;  %3082 = vmatpush.bf16.msrb.mxu3 %v3034_v39  ;;  %v3107_v37 = vsel %vm10884_vm10, %v3093_v14, 0  ;;  %v6301_v20 = vpop.permute.xlu0 %6300  ;;  %v6296_v18 = vpop.permute.xlu1 %6295  ;;  %vm10885_vm12 = vcmask 64512   ;;  %vm10889_vm10 = vcmp.lt.s32.totalorder %v6829_v22, 1  ;;  %v6022_v3 = vld [vmem:[%s10427_s5 + $0x2c] sm:$0xf] }
 0x724   :  { %vm10886_vm6 = vmmov %vm10885_vm12  ;;  %v6297_v62 = vunpack.i.l.bf16 %v6296_v18  ;;  %v6303_v54 = vunpack.i.h.bf16 %v6301_v20  ;;  %v6302_v4 = vunpack.i.l.bf16 %v6301_v20  ;;  %v6298_v25 = vunpack.i.h.bf16 %v6296_v18 }
 0x725   :  { %6018 = vmatmul.msk.bf16.vlgmr.msrb.gmra.mxu0 %vm10885_vm12, %v6012_v19  ;;  %6019 = vmatmul.msk.bf16.vlgmr.msrb.gmra.mxu1 %vm10886_vm6, %v6012_v19  ;;  %vm10887_vm5 = vmmov %vm10886_vm6  ;;  %v2889_v13 = vsel %vm10889_vm10, %v2885_v9, %v2879_v46  ;;  %vm10891_vm3 = vcmp.lt.s32.totalorder %v6829_v22, 127  ;;  %v3244_v39 = vpack.c.bf16 %v8207_v58, %v8207_v58  ;;  %v3247_v20 = vpack.c.bf16 %v8204_v10, %v8204_v10 }
 0x726   :  { %3116 = vmatpush.bf16.msra.mxu0 %v3098_v35  ;;  %3129 = vmatpush.bf16.msra.mxu1 %v3101_v45  ;;  %vm10888_vm11 = vmmov %vm10887_vm5 }
 0x727   :  { %3142 = vmatpush.bf16.msra.mxu2 %v3104_v15  ;;  %3155 = vmatpush.bf16.msra.mxu3 %v3107_v37  ;;  %vm10890_vm4 = vmmov %vm10889_vm10  ;;  %vm10897_vm10 = vcmask 1043456   ;;  %v3245_v15 = vpack.c.bf16 %v8210_v34, %v8210_v34  ;;  %v3246_v37 = vpack.c.bf16 %v8201_v56, %v8201_v56 }
 0x728   :  { %6020 = vmatmul.msk.bf16.vlgmr.msrb.gmra.mxu2 %vm10887_vm5, %v6012_v19  ;;  %6021 = vmatmul.msk.bf16.vlgmr.msrb.gmra.mxu3 %vm10888_vm11, %v6012_v19  ;;  %v2888_v24 = vsel %vm10890_vm4, %v2879_v46, %v6297_v62  ;;  %vm10892_vm7 = vmmov %vm10891_vm3 }
 0x729   :  { %vm10893_vm12 = vmmov %vm10891_vm3 }
 0x72a   :  { %vm10894_vm6 = vmmov %vm10891_vm3 }
 0x72b   :  { %v2893_v36 = vpop.permute.xlu0 %2892  ;;  %v2897_v55 = vpop.permute.xlu1 %2896  ;;  %vm10895_vm5 = vmmov %vm10890_vm4 }
 0x72c   :  { %v2899_v2 = vsel %vm10891_vm3, %v2893_v36, %v6303_v54  ;;  %v2900_v43 = vsel %vm10892_vm7, %v6302_v4, %v2893_v36  ;;  %v2898_v50 = vsel %vm10893_vm12, %v6303_v54, %v2897_v55  ;;  %v2901_v38 = vsel %vm10894_vm6, %v2897_v55, %v6302_v4  ;;  %vm10896_vm11 = vmmov %vm10890_vm4 }
 0x72d   :  { %v2902_v0 = vsel %vm6985_vm0, %v2900_v43, %v2889_v13  ;;  %v2903_v53 = vsel %vm6989_vm9, %v2899_v2, %v2888_v24  ;;  %v2886_v1 = vsel %vm10895_vm5, %v6298_v25, %v2885_v9  ;;  %v2887_v8 = vsel %vm10896_vm11, %v6297_v62, %v6298_v25  ;;  %vm10898_vm4 = vmmov %vm10897_vm10  ;;  %v2917_v25 = vpop.permute.xlu2 %2916 }
 0x72e   :  { %v3167_v42 = vpack.c.bf16 %v2902_v0, %v2902_v0  ;;  %v3168_v30 = vpack.c.bf16 %v2903_v53, %v2903_v53  ;;  %v2904_v23 = vsel %vm6993_vm14, %v2898_v50, %v2887_v8  ;;  %v2905_v40 = vsel %vm7008_vm8, %v2901_v38, %v2886_v1  ;;  %vm10899_vm3 = vmmov %vm10898_vm4 }
 0x72f   :  { %v3169_v16 = vpack.c.bf16 %v2904_v23, %v2904_v23  ;;  %v3170_v14 = vpack.c.bf16 %v2905_v40, %v2905_v40  ;;  %vm10900_vm7 = vmmov %vm10899_vm3  ;;  %vm10901_vm12 = vcmask 64512   ;;  %v3258_v34 = vsel %vm10899_vm3, %v3246_v37, 0  ;;  %v10909_v23 = vld [vmem:[#allocation31_spill] sm:$0xff] }
 0x730   :  { %v3175_v60 = vsel %vm10897_vm10, %v3167_v42, 0  ;;  %v3178_v7 = vsel %vm10898_vm4, %v3168_v30, 0  ;;  %vm10902_vm6 = vmmov %vm10901_vm12  ;;  %v2906_v62 = vsel %vm6997_vm15, %v2889_v13, %v2900_v43  ;;  %v2907_v46 = vsel %vm7001_vm1, %v2888_v24, %v2899_v2  ;;  %v6027_v30 = vld [vmem:[%s10427_s5 + $0x30] sm:$0xf]  ;;  %v10908_v13 = vld [vmem:[#allocation30_spill] sm:$0xff] }
 0x731   :  { %3193 = vmatpush.bf16.msrb.mxu0 %v3175_v60  ;;  %3206 = vmatpush.bf16.msrb.mxu1 %v3178_v7  ;;  %v3181_v35 = vsel %vm10899_vm3, %v3169_v16, 0  ;;  %v3184_v9 = vsel %vm10900_vm7, %v3170_v14, 0  ;;  %vm10903_vm5 = vmmov %vm10902_vm6  ;;  %v2908_v54 = vsel %vm10875_vm13, %v2887_v8, %v2898_v50  ;;  %v2909_v4 = vsel %vm10876_vm2, %v2886_v1, %v2901_v38  ;;  %v10910_v2 = vld [vmem:[#allocation34_spill] sm:$0xff]  ;;  %v10911_v50 = vld [vmem:[#allocation35_spill] sm:$0xff] }
 0x732   :  { %3219 = vmatpush.bf16.msrb.mxu2 %v3181_v35  ;;  %3232 = vmatpush.bf16.msrb.mxu3 %v3184_v9  ;;  %vm10904_vm11 = vmmov %vm10903_vm5  ;;  %v3321_v36 = vpack.c.bf16 %v2906_v62, %v2906_v62  ;;  %v3322_v55 = vpack.c.bf16 %v2907_v46, %v2907_v46  ;;  %v3323_v0 = vpack.c.bf16 %v2908_v54, %v2908_v54 }
 0x733   :  { %v8386_v45 = vpop.permute.xlu1 %6305  ;;  %vm10905_vm10 = vmmov %vm10899_vm3  ;;  %v6311_v19 = vpop.permute.xlu0 %6310  ;;  %v3324_v53 = vpack.c.bf16 %v2909_v4, %v2909_v4 }
 0x734   :  { %v3252_v18 = vsel %vm10905_vm10, %v3244_v39, 0  ;;  %vm10906_vm4 = vmmov %vm10899_vm3  ;;  %v3335_v35 = vsel %vm10899_vm3, %v3323_v0, 0  ;;  %v6307_v62 = vunpack.i.l.bf16 %v8386_v45  ;;  %v6308_v54 = vunpack.i.h.bf16 %v8386_v45 }
 0x735   :  { %6023 = vmatmul.msk.bf16.vlgmr.msra.gmra.mxu0 %vm10901_vm12, %v6022_v3  ;;  %6024 = vmatmul.msk.bf16.vlgmr.msra.gmra.mxu1 %vm10902_vm6, %v6022_v3  ;;  %v3255_v58 = vsel %vm10906_vm4, %v3245_v15, 0  ;;  %vm10907_vm7 = vmmov %vm10899_vm3 }
 0x736   :  { %3270 = vmatpush.bf16.msra.mxu0 %v3252_v18  ;;  %3283 = vmatpush.bf16.msra.mxu1 %v3255_v58  ;;  %v3261_v56 = vsel %vm10907_vm7, %v3247_v20, 0  ;;  %vm10912_vm12 = vmmov %vm10903_vm5  ;;  %v6312_v18 = vunpack.i.l.bf16 %v6311_v19 }
 0x737   :  { %vm10913_vm6 = vmmov %vm10903_vm5 }
 0x738   :  { %6025 = vmatmul.msk.bf16.vlgmr.msra.gmra.mxu2 %vm10903_vm5, %v6022_v3  ;;  %6026 = vmatmul.msk.bf16.vlgmr.msra.gmra.mxu3 %vm10904_vm11, %v6022_v3  ;;  %vm10914_vm11 = vmmov %vm10903_vm5 }
 0x739   :  { %3296 = vmatpush.bf16.msra.mxu2 %v3258_v34  ;;  %3309 = vmatpush.bf16.msra.mxu3 %v3261_v56  ;;  %vm10915_vm10 = vmmov %vm10899_vm3  ;;  %v2911_v34 = vpop.permute.xlu2 %2910  ;;  %v6313_v56 = vunpack.i.h.bf16 %v6311_v19 }
 0x73a   :  { %v3329_v60 = vsel %vm10915_vm10, %v3321_v36, 0  ;;  %vm10916_vm4 = vmmov %vm10899_vm3 }
 0x73b   :  { %v2929_v10 = vpop.permute.xlu1 %2928  ;;  %v3332_v7 = vsel %vm10916_vm4, %v3322_v55, 0  ;;  %vm10917_vm7 = vmmov %vm10899_vm3  ;;  %v2925_v37 = vpop.permute.xlu0 %2924 }
 0x73c   :  { %v3338_v9 = vsel %vm10917_vm7, %v3324_v53, 0 }
 0x743   :  { %v1783_v42 = vpop.permute.xlu1 %1782 }
 0x744   :  { %v1785_v43 = vadd.f32 %v1783_v42, %v10908_v13  ;;  %v1786_v24 = vadd.f32 %v1783_v42, %v10909_v23  ;;  %v1787_v40 = vadd.f32 %v1783_v42, %v10910_v2  ;;  %v1788_v8 = vadd.f32 %v1783_v42, %v10911_v50  ;;  %v6032_v50 = vld [vmem:[%s10427_s5 + $0x34] sm:$0xf] }
 0x745   :  { %6028 = vmatmul.msk.bf16.vlgmr.msrb.gmra.mxu0 %vm10912_vm12, %v6027_v30  ;;  %6029 = vmatmul.msk.bf16.vlgmr.msrb.gmra.mxu1 %vm10913_vm6, %v6027_v30  ;;  %vm10918_vm12 = vcmp.lt.s32.totalorder %v6829_v22, 127 }
 0x746   :  { %v1789_v16 = vmul.f32 0.2, %v1785_v43  ;;  %v1790_v38 = vmul.f32 0.2, %v1786_v24  ;;  %v1791_v1 = vmul.f32 0.2, %v1787_v40  ;;  %3347 = vmatpush.bf16.msrb.mxu0 %v3329_v60  ;;  %3360 = vmatpush.bf16.msrb.mxu1 %v3332_v7  ;;  %v2932_v4 = vsel %vm10918_vm12, %v6312_v18, %v2925_v37  ;;  %vm10919_vm6 = vmmov %vm10918_vm12 }
 0x747   :  { %v1792_v14 = vmul.f32 0.2, %v1788_v8  ;;  %v2931_v36 = vsel %vm10919_vm6, %v2925_v37, %v6313_v56  ;;  %vm10922_vm10 = vmmov %vm10919_vm6  ;;  %vm10926_vm12 = vcmask 64512   ;;  %v3475_v7 = vpack.c.bf16 %v8282_v17, %v8282_v17 }
 0x748   :  { %6030 = vmatmul.msk.bf16.vlgmr.msrb.gmra.mxu2 %vm10903_vm5, %v6027_v30  ;;  %6031 = vmatmul.msk.bf16.vlgmr.msrb.gmra.mxu3 %vm10914_vm11, %v6027_v30  ;;  %v8430_v3 = vmax.f32 %v1787_v40, %v1791_v1  ;;  %v8432_v39 = vmax.f32 %v1785_v43, %v1789_v16  ;;  %v8434_v15 = vmax.f32 %v1786_v24, %v1790_v38  ;;  %vm10920_vm5 = vcmp.lt.s32.totalorder %v6829_v22, 1  ;;  %vm10921_vm11 = vmmov %vm10919_vm6 }
 0x749   :  { %3373 = vmatpush.bf16.msrb.mxu2 %v3335_v35  ;;  %3386 = vmatpush.bf16.msrb.mxu3 %v3338_v9  ;;  %v8436_v20 = vmax.f32 %v1788_v8, %v1792_v14  ;;  %v2921_v55 = vsel %vm10920_vm5, %v2917_v25, %v2911_v34  ;;  %v2930_v19 = vsel %vm10921_vm11, %v6313_v56, %v2929_v10  ;;  %vm10923_vm4 = vmmov %vm10920_vm5  ;;  %vm10927_vm6 = vcmask 1043456   ;;  %v6037_v35 = vld [vmem:[%s10427_s5 + $0x38] sm:$0xf] }
 0x74a   :  { %v1797_v58 = vadd.f32 %v8434_v15, %v8432_v39  ;;  %v2933_v0 = vsel %vm10922_vm10, %v2929_v10, %v6312_v18  ;;  %v2920_v45 = vsel %vm10923_vm4, %v2911_v34, %v6307_v62  ;;  %v2934_v53 = vsel %vm6985_vm0, %v2932_v4, %v2921_v55  ;;  %vm10924_vm3 = vmmov %vm10923_vm4  ;;  %v2991_v34 = vpop.f32.mrf.mxu1 }
 0x74b   :  { %v1824_v46 = vadd.f32 %v8436_v20, %v8430_v3  ;;  %v1800_v42 = vmul.f32 %v8432_v39, %v8432_v39  ;;  %v1801_v30 = vmul.f32 %v8434_v15, %v8434_v15  ;;  %v2935_v13 = vsel %vm6989_vm9, %v2931_v36, %v2920_v45  ;;  %vm10925_vm7 = vmmov %vm10924_vm3 }
 0x74c   :  { %1798 = vadd.xlane.f32.xlu0 %v1797_v58  ;;  %v2918_v43 = vsel %vm10924_vm3, %v6308_v54, %v2917_v25  ;;  %v2919_v10 = vsel %vm10925_vm7, %v6307_v62, %v6308_v54  ;;  %v3398_v2 = vpack.c.bf16 %v2934_v53, %v2934_v53  ;;  %v3399_v40 = vpack.c.bf16 %v2935_v13, %v2935_v13  ;;  %vm10928_vm5 = vmmov %vm10926_vm12 }
 0x74d   :  { %1825 = vadd.xlane.f32.xlu1 %v1824_v46  ;;  %v2936_v23 = vsel %vm6993_vm14, %v2930_v19, %v2919_v10  ;;  %v2937_v24 = vsel %vm7008_vm8, %v2933_v0, %v2918_v43  ;;  %v1802_v8 = vadd.f32 %v1801_v30, %v1800_v42  ;;  %vm10929_vm11 = vmmov %vm10928_vm5  ;;  %v3476_v9 = vpack.c.bf16 %v8274_v47, %v8274_v47  ;;  %v6042_v30 = vld [vmem:[%s10427_s5 + $0x3c] sm:$0xf] }
 0x74e   :  { %v3400_v16 = vpack.c.bf16 %v2936_v23, %v2936_v23  ;;  %v3401_v38 = vpack.c.bf16 %v2937_v24, %v2937_v24  ;;  %v3406_v25 = vsel %vm10927_vm6, %v3398_v2, 0  ;;  %vm10930_vm10 = vmmov %vm10927_vm6  ;;  %v3478_v37 = vpack.c.bf16 %v8278_v44, %v8278_v44  ;;  %v3004_v24 = vpop.f32.mrf.mxu2  ;;  %v3017_v2 = vpop.f32.mrf.mxu3 }
 0x74f   :  { %v3409_v1 = vsel %vm10930_vm10, %v3399_v40, 0  ;;  %vm10931_vm4 = vmmov %vm10928_vm5  ;;  %v3477_v18 = vpack.c.bf16 %v8270_v5, %v8270_v5  ;;  %v2978_v5 = vpop.f32.mrf.mxu0  ;;  %v2938_v56 = vsel %vm6997_vm15, %v2921_v55, %v2932_v4  ;;  %v2939_v62 = vsel %vm7001_vm1, %v2920_v45, %v2931_v36  ;;  %v6047_v40 = vld [vmem:[%s10427_s5 + $0x40] sm:$0xf] }
 0x750   :  { %vm10932_vm3 = vmmov %vm10927_vm6  ;;  %v2940_v46 = vsel %vm10875_vm13, %v2919_v10, %v2930_v19  ;;  %v2941_v54 = vsel %vm10876_vm2, %v2918_v43, %v2933_v0  ;;  %v3552_v53 = vpack.c.bf16 %v2938_v56, %v2938_v56  ;;  %v3553_v42 = vpack.c.bf16 %v2939_v62, %v2939_v62 }
 0x751   :  { %v3412_v14 = vsel %vm10932_vm3, %v3400_v16, 0  ;;  %vm10933_vm7 = vmmov %vm10932_vm3  ;;  %v3489_v47 = vsel %vm10932_vm3, %v3477_v18, 0  ;;  %v3554_v13 = vpack.c.bf16 %v2940_v46, %v2940_v46  ;;  %v3555_v23 = vpack.c.bf16 %v2941_v54, %v2941_v54 }
 0x752   :  { %v3415_v60 = vsel %vm10933_vm7, %v3401_v38, 0  ;;  %vm10935_vm6 = vmmov %vm10931_vm4  ;;  %v2993_v55 = vpop.f32.mrf.mxu1 }
 0x753   :  { %vm10938_vm10 = vmmov %vm10932_vm3  ;;  %v3566_v0 = vsel %vm10932_vm3, %v3554_v13, 0 }
 0x754   :  { %v3486_v17 = vsel %vm10938_vm10, %v3476_v9, 0  ;;  %vm10939_vm7 = vmmov %vm10932_vm3 }
 0x755   :  { %1803 = vadd.xlane.f32.xlu1 %v1802_v8  ;;  %6033 = vmatmul.msk.bf16.vlgmr.msra.gmra.mxu0 %vm10926_vm12, %v6032_v50  ;;  %vm10934_vm12 = vmmov %vm10931_vm4  ;;  %v3492_v44 = vsel %vm10939_vm7, %v3478_v37, 0 }
 0x756   :  { %6034 = vmatmul.msk.bf16.vlgmr.msra.gmra.mxu1 %vm10928_vm5, %v6032_v50  ;;  %3424 = vmatpush.bf16.msra.mxu0 %v3406_v25  ;;  %vm10936_vm5 = vmmov %vm10932_vm3  ;;  %v3006_v43 = vpop.f32.mrf.mxu2  ;;  %v3019_v10 = vpop.f32.mrf.mxu3 }
 0x757   :  { %3437 = vmatpush.bf16.msra.mxu1 %v3409_v1  ;;  %v3483_v58 = vsel %vm10936_vm5, %v3475_v7, 0  ;;  %vm10942_vm5 = vmmov %vm10932_vm3  ;;  %v2980_v36 = vpop.f32.mrf.mxu0 }
 0x758   :  { %6035 = vmatmul.msk.bf16.vlgmr.msra.gmra.mxu2 %vm10929_vm11, %v6032_v50  ;;  %6036 = vmatmul.msk.bf16.vlgmr.msra.gmra.mxu3 %vm10931_vm4, %v6032_v50  ;;  %vm10937_vm11 = vmmov %vm10931_vm4  ;;  %v3560_v4 = vsel %vm10942_vm5, %v3552_v53, 0  ;;  %v6052_v50 = vld [vmem:[%s10427_s5 + $0x44] sm:$0xf] }
 0x759   :  { %3450 = vmatpush.bf16.msra.mxu2 %v3412_v14  ;;  %3463 = vmatpush.bf16.msra.mxu3 %v3415_v60  ;;  %vm10944_vm10 = vmmov %vm10932_vm3 }
 0x75a   :  { %v3563_v19 = vsel %vm10944_vm10, %v3553_v42, 0  ;;  %vm10945_vm7 = vmmov %vm10932_vm3 }
 0x75b   :  { %v3569_v45 = vsel %vm10945_vm7, %v3555_v23, 0  ;;  %vm10948_vm5 = vmmov %vm10931_vm4 }
 0x75c   :  { %vm10950_vm10 = vmmov %vm10931_vm4 }
 0x75d   :  { %vm10951_vm3 = vmmov %vm10931_vm4 }
 0x75e   :  { %vm10952_vm7 = vmmov %vm10951_vm3 }
 0x765   :  { %6038 = vmatmul.msk.bf16.vlgmr.msrb.gmra.mxu0 %vm10934_vm12, %v6037_v35  ;;  %vm10940_vm12 = vmmov %vm10931_vm4 }
 0x766   :  { %6039 = vmatmul.msk.bf16.vlgmr.msrb.gmra.mxu1 %vm10935_vm6, %v6037_v35  ;;  %3501 = vmatpush.bf16.msrb.mxu0 %v3483_v58  ;;  %vm10941_vm6 = vmmov %vm10931_vm4 }
 0x767   :  { %3514 = vmatpush.bf16.msrb.mxu1 %v3486_v17 }
 0x768   :  { %6040 = vmatmul.msk.bf16.vlgmr.msrb.gmra.mxu2 %vm10937_vm11, %v6037_v35  ;;  %6041 = vmatmul.msk.bf16.vlgmr.msrb.gmra.mxu3 %vm10931_vm4, %v6037_v35  ;;  %vm10943_vm11 = vmmov %vm10931_vm4 }
 0x769   :  { %3527 = vmatpush.bf16.msrb.mxu2 %v3489_v47  ;;  %3540 = vmatpush.bf16.msrb.mxu3 %v3492_v44 }
 0x775   :  { %6043 = vmatmul.msk.bf16.vlgmr.msra.gmra.mxu0 %vm10940_vm12, %v6042_v30  ;;  %vm10946_vm12 = vmmov %vm10931_vm4 }
 0x776   :  { %6044 = vmatmul.msk.bf16.vlgmr.msra.gmra.mxu1 %vm10941_vm6, %v6042_v30  ;;  %3578 = vmatpush.bf16.msra.mxu0 %v3560_v4  ;;  %vm10947_vm6 = vmmov %vm10931_vm4 }
 0x777   :  { %3591 = vmatpush.bf16.msra.mxu1 %v3563_v19 }
 0x778   :  { %6045 = vmatmul.msk.bf16.vlgmr.msra.gmra.mxu2 %vm10943_vm11, %v6042_v30  ;;  %6046 = vmatmul.msk.bf16.vlgmr.msra.gmra.mxu3 %vm10931_vm4, %v6042_v30  ;;  %vm10949_vm11 = vmmov %vm10931_vm4 }
 0x779   :  { %3604 = vmatpush.bf16.msra.mxu2 %v3566_v0  ;;  %3617 = vmatpush.bf16.msra.mxu3 %v3569_v45 }
 0x785   :  { %6048 = vmatmul.msk.bf16.vlgmr.msrb.gmra.mxu0 %vm10946_vm12, %v6047_v40 }
 0x786   :  { %6049 = vmatmul.msk.bf16.vlgmr.msrb.gmra.mxu1 %vm10947_vm6, %v6047_v40 }
 0x788   :  { %6050 = vmatmul.msk.bf16.vlgmr.msrb.gmra.mxu2 %vm10948_vm5, %v6047_v40  ;;  %6051 = vmatmul.msk.bf16.vlgmr.msrb.gmra.mxu3 %vm10949_vm11, %v6047_v40 }
 0x795   :  { %6053 = vmatmul.msk.bf16.vlgmr.msra.gmra.mxu0 %vm10950_vm10, %v6052_v50 }
 0x796   :  { %6054 = vmatmul.msk.bf16.vlgmr.msra.gmra.mxu1 %vm10931_vm4, %v6052_v50 }
 0x798   :  { %6055 = vmatmul.msk.bf16.vlgmr.msra.gmra.mxu2 %vm10951_vm3, %v6052_v50  ;;  %6056 = vmatmul.msk.bf16.vlgmr.msra.gmra.mxu3 %vm10952_vm7, %v6052_v50 }
 0x7a2   :  { %v3045_v8 = vpop.f32.mrf.mxu0  ;;  %v3058_v16 = vpop.f32.mrf.mxu1 }
 0x7a3   :  { %v3046_v38 = vadd.f32 %v3045_v8, %v2978_v5  ;;  %v3059_v25 = vadd.f32 %v3058_v16, %v2991_v34 }
 0x7aa   :  { %v3047_v35 = vpop.f32.mrf.mxu0  ;;  %v3060_v9 = vpop.f32.mrf.mxu1 }
 0x7ab   :  { %v3071_v1 = vpop.f32.mrf.mxu2  ;;  %v3084_v14 = vpop.f32.mrf.mxu3 }
 0x7ac   :  { %v3072_v60 = vadd.f32 %v3071_v1, %v3004_v24  ;;  %v3085_v7 = vadd.f32 %v3084_v14, %v3017_v2 }
 0x7b2   :  { %v3118_v58 = vpop.f32.mrf.mxu0  ;;  %v3131_v17 = vpop.f32.mrf.mxu1 }
 0x7b3   :  { %v3073_v37 = vpop.f32.mrf.mxu2  ;;  %v3086_v18 = vpop.f32.mrf.mxu3  ;;  %v3161_v47 = vadd.f32 %v3118_v58, %v3046_v38  ;;  %v3162_v44 = vadd.f32 %v3131_v17, %v3059_v25 }
 0x7ba   :  { %v3120_v53 = vpop.f32.mrf.mxu0  ;;  %v3133_v42 = vpop.f32.mrf.mxu1 }
 0x7bb   :  { %v3144_v56 = vpop.f32.mrf.mxu2  ;;  %v3157_v62 = vpop.f32.mrf.mxu3 }
 0x7bc   :  { %v3163_v46 = vadd.f32 %v3144_v56, %v3072_v60  ;;  %v3164_v54 = vadd.f32 %v3157_v62, %v3085_v7 }
 0x7c2   :  { %v3195_v30 = vpop.f32.mrf.mxu0  ;;  %v3208_v13 = vpop.f32.mrf.mxu1 }
 0x7c3   :  { %v3146_v5 = vpop.f32.mrf.mxu2  ;;  %v3159_v34 = vpop.f32.mrf.mxu3  ;;  %v3238_v23 = vadd.f32 %v3195_v30, %v3161_v47  ;;  %v3239_v24 = vadd.f32 %v3208_v13, %v3162_v44 }
 0x7ca   :  { %v3197_v19 = vpop.f32.mrf.mxu0  ;;  %v3210_v0 = vpop.f32.mrf.mxu1 }
 0x7cb   :  { %v3221_v2 = vpop.f32.mrf.mxu2  ;;  %v3234_v4 = vpop.f32.mrf.mxu3 }
 0x7cc   :  { %v3240_v36 = vadd.f32 %v3221_v2, %v3163_v46  ;;  %v3241_v55 = vadd.f32 %v3234_v4, %v3164_v54 }
 0x7d2   :  { %v3272_v10 = vpop.f32.mrf.mxu0 }
 0x7d3   :  { %v3223_v45 = vpop.f32.mrf.mxu2  ;;  %v3236_v43 = vpop.f32.mrf.mxu3  ;;  %v3315_v2 = vadd.f32 %v3272_v10, %v3238_v23 }
 0x7d4   :  { %v3285_v40 = vpop.f32.mrf.mxu1 }
 0x7d5   :  { %v3316_v19 = vadd.f32 %v3285_v40, %v3239_v24 }
 0x7da   :  { %v3274_v16 = vpop.f32.mrf.mxu0 }
 0x7db   :  { %v3298_v50 = vpop.f32.mrf.mxu2  ;;  %v3311_v8 = vpop.f32.mrf.mxu3 }
 0x7dc   :  { %v3287_v38 = vpop.f32.mrf.mxu1 }
 0x7e2   :  { %v3349_v14 = vpop.f32.mrf.mxu0 }
 0x7e3   :  { %v3300_v25 = vpop.f32.mrf.mxu2  ;;  %v3313_v1 = vpop.f32.mrf.mxu3  ;;  %v3392_v0 = vadd.f32 %v3349_v14, %v3315_v2 }
 0x7e4   :  { %v3362_v60 = vpop.f32.mrf.mxu1  ;;  %v3317_v1 = vadd.f32 %v3298_v50, %v3240_v36 }
 0x7e5   :  { %v3393_v45 = vadd.f32 %v3362_v60, %v3316_v19  ;;  %v1828_v19 = vmul.f32 %v8436_v20, %v8436_v20 }
 0x7ea   :  { %v3351_v9 = vpop.f32.mrf.mxu0 }
 0x7eb   :  { %v3375_v7 = vpop.f32.mrf.mxu2  ;;  %v3388_v35 = vpop.f32.mrf.mxu3 }
 0x7ec   :  { %v3364_v37 = vpop.f32.mrf.mxu1 }
 0x7f2   :  { %v3426_v17 = vpop.f32.mrf.mxu0 }
 0x7f3   :  { %v3377_v18 = vpop.f32.mrf.mxu2  ;;  %v3390_v58 = vpop.f32.mrf.mxu3  ;;  %v3469_v43 = vadd.f32 %v3426_v17, %v3392_v0 }
 0x7f4   :  { %v3439_v47 = vpop.f32.mrf.mxu1  ;;  %v3318_v58 = vadd.f32 %v3311_v8, %v3241_v55 }
 0x7f5   :  { %v3470_v16 = vadd.f32 %v3439_v47, %v3393_v45 }
 0x7fa   :  { %v3428_v62 = vpop.f32.mrf.mxu0 }
 0x7fb   :  { %v3452_v44 = vpop.f32.mrf.mxu2  ;;  %v3465_v56 = vpop.f32.mrf.mxu3 }
 0x7fc   :  { %v3441_v46 = vpop.f32.mrf.mxu1 }
 0x802   :  { %v3503_v42 = vpop.f32.mrf.mxu0 }
 0x803   :  { %v3454_v54 = vpop.f32.mrf.mxu2  ;;  %v3467_v53 = vpop.f32.mrf.mxu3  ;;  %v3546_v38 = vadd.f32 %v3503_v42, %v3469_v43 }
 0x804   :  { %v3516_v5 = vpop.f32.mrf.mxu1  ;;  %v3632_v54 = vpop.permute.xlu2 %3631  ;;  %v3394_v53 = vadd.f32 %v3375_v7, %v3317_v1 }
 0x805   :  { %v3547_v9 = vadd.f32 %v3516_v5, %v3470_v16 }
 0x806   :  { %v3471_v10 = vadd.f32 %v3452_v44, %v3394_v53 }
 0x80a   :  { %v3505_v13 = vpop.f32.mrf.mxu0 }
 0x80b   :  { %v3529_v34 = vpop.f32.mrf.mxu2  ;;  %v3542_v30 = vpop.f32.mrf.mxu3  ;;  %v3395_v13 = vadd.f32 %v3388_v35, %v3318_v58 }
 0x80c   :  { %v3518_v4 = vpop.f32.mrf.mxu1  ;;  %v3548_v60 = vadd.f32 %v3529_v34, %v3471_v10 }
 0x80d   :  { %v3472_v40 = vadd.f32 %v3465_v56, %v3395_v13 }
 0x80f   :  { %v3549_v47 = vadd.f32 %v3542_v30, %v3472_v40  ;;  %v1827_v30 = vmul.f32 %v8430_v3, %v8430_v3 }
 0x811   :  { %v1829_v1 = vadd.f32 %v1828_v19, %v1827_v30 }
 0x812   :  { %v3580_v18 = vpop.f32.mrf.mxu0 }
 0x813   :  { %v3531_v25 = vpop.f32.mrf.mxu2  ;;  %v3544_v37 = vpop.f32.mrf.mxu3  ;;  %v3623_v62 = vadd.f32 %v3580_v18, %v3546_v38 }
 0x814   :  { %v3593_v46 = vpop.f32.mrf.mxu1 }
 0x815   :  { %v3624_v28 = vadd.f32 %v3593_v46, %v3547_v9  ;;  %v3634_v23 = vadd.f32 %v3632_v54, %v3623_v62  ;;  %v1826_v62 = vpop.xlane.xlu1 %1825  ;;  %v1799_v46 = vpop.xlane.xlu0 %1798 }
 0x816   :  { %v8559_v53 = vmul.f32 0.00390625, %v1799_v46 }
 0x817   :  { %v3635_v24 = vadd.f32 %v3632_v54, %v3624_v28  ;;  %v3638_v14 = vmul.f32 0.2, %v3634_v23 }
 0x819   :  { %v3639_v17 = vmul.f32 0.2, %v3635_v24  ;;  %v8535_v42 = vmax.f32 %v3634_v23, %v3638_v14  ;;  %v1807_v23 = vmul.f32 %v8559_v53, %v8559_v53  ;;  %v1832_v14 = vmul.f32 0.00390625, %v1826_v62 }
 0x81a   :  { %v3582_v5 = vpop.f32.mrf.mxu0 }
 0x81b   :  { %v3606_v36 = vpop.f32.mrf.mxu2  ;;  %v8537_v50 = vmax.f32 %v3635_v24, %v3639_v17  ;;  %v3619_v8 = vpop.f32.mrf.mxu3  ;;  %v3649_v37 = vmul.f32 %v8535_v42, %v8535_v42 }
 0x81c   :  { %v3625_v55 = vadd.f32 %v3606_v36, %v3548_v60  ;;  %v3626_v2 = vadd.f32 %v3619_v8, %v3549_v47  ;;  %v3595_v7 = vpop.f32.mrf.mxu1 }
 0x81d   :  { %v3646_v35 = vadd.f32 %v8537_v50, %v8535_v42  ;;  %v3650_v18 = vmul.f32 %v8537_v50, %v8537_v50 }
 0x81e   :  { %v3636_v4 = vadd.f32 %v3632_v54, %v3625_v55  ;;  %v3637_v28 = vadd.f32 %v3632_v54, %v3626_v2  ;;  %v1804_v54 = vpop.xlane.xlu1 %1803  ;;  %v1834_v55 = vmul.f32 %v1832_v14, %v1832_v14 }
 0x81f   :  { %3647 = vadd.xlane.f32.xlu2 %v3646_v35  ;;  %v3651_v58 = vadd.f32 %v3650_v18, %v3649_v37  ;;  %v1806_v13 = vmul.f32 0.00390625, %v1804_v54 }
 0x820   :  { %v3640_v44 = vmul.f32 0.2, %v3636_v4  ;;  %v3641_v56 = vmul.f32 0.2, %v3637_v28 }
 0x821   :  { %v1808_v10 = vsub.f32 %v1806_v13, %v1807_v23 }
 0x822   :  { %v8541_v34 = vmax.f32 %v3636_v4, %v3640_v44  ;;  %v8547_v0 = vmax.f32 %v3637_v28, %v3641_v56 }
 0x823   :  { %v3608_v45 = vpop.f32.mrf.mxu2  ;;  %v3621_v16 = vpop.f32.mrf.mxu3  ;;  %v8563_v40 = vadd.f32 1e-05, %v1808_v10 }
 0x824   :  { %v3676_v43 = vmul.f32 %v8541_v34, %v8541_v34  ;;  %v3673_v38 = vadd.f32 %v8547_v0, %v8541_v34  ;;  %v3677_v25 = vmul.f32 %v8547_v0, %v8547_v0 }
 0x825   :  { %6716 = vrsqrt.f32 %v8563_v40  ;;  %vm1818_vm7 = vweird.f32 %v8563_v40 }
 0x826   :  { %3674 = vadd.xlane.f32.xlu0 %v3673_v38  ;;  %v3678_v9 = vadd.f32 %v3677_v25, %v3676_v43 }
 0x827   :  { %1830 = vadd.xlane.f32.xlu2 %v1829_v1 }
 0x828   :  { %3679 = vadd.xlane.f32.xlu1 %v3678_v9 }
 0x82b   :  { %v6717_v28 = vpop.eup %6716 }
 0x82c   :  { %v1813_v19 = vmul.f32 %v6717_v28, %v8563_v40  ;;  %vm1819_vm11 = vweird.f32 %v6717_v28 }
 0x82e   :  { %3652 = vadd.xlane.f32.xlu0 %v3651_v58  ;;  %v1814_v38 = vmul.f32 %v6717_v28, %v1813_v19 }
 0x830   :  { %v1815_v58 = vmul.f32 0.5, %v1814_v38 }
 0x832   :  { %v1816_v10 = vsub.f32 1.5, %v1815_v58 }
 0x892   :  { %v3648_v24 = vpop.xlane.xlu2 %3647 }
 0x893   :  { %v8566_v4 = vmul.f32 0.00390625, %v3648_v24 }
 0x895   :  { %v3656_v43 = vmul.f32 %v8566_v4, %v8566_v4  ;;  %v3658_v40 = vsub.f32 %v8535_v42, %v8566_v4 }
 0x899   :  { %v3675_v60 = vpop.xlane.xlu0 %3674 }
 0x89a   :  { %v3681_v17 = vmul.f32 0.00390625, %v3675_v60  ;;  %v1831_v47 = vpop.xlane.xlu2 %1830 }
 0x89b   :  { %v3680_v36 = vpop.xlane.xlu1 %3679  ;;  %v1833_v8 = vmul.f32 0.00390625, %v1831_v47 }
 0x89c   :  { %v3682_v5 = vmul.f32 0.00390625, %v3680_v36  ;;  %v3683_v2 = vmul.f32 %v3681_v17, %v3681_v17  ;;  %v1836_v36 = vsub.f32 %v8430_v3, %v1832_v14 }
 0x89d   :  { %v1835_v7 = vsub.f32 %v1833_v8, %v1834_v55  ;;  %v1837_v55 = vsub.f32 %v8436_v20, %v1832_v14 }
 0x89e   :  { %v3684_v35 = vsub.f32 %v3682_v5, %v3683_v2 }
 0x89f   :  { %v1838_v44 = vadd.f32 1e-05, %v1835_v7  ;;  %v1817_v7 = vmul.f32 %v6717_v28, %v1816_v10 }
 0x8a0   :  { %v3687_v56 = vadd.f32 1e-05, %v3684_v35  ;;  %v3685_v35 = vsub.f32 %v8541_v34, %v3681_v17 }
 0x8a1   :  { %6718 = vrsqrt.f32 %v1838_v44  ;;  %v3653_v30 = vpop.xlane.xlu0 %3652  ;;  %vm1845_vm5 = vweird.f32 %v1838_v44 }
 0x8a2   :  { %6720 = vrsqrt.f32 %v3687_v56  ;;  %v3655_v45 = vmul.f32 0.00390625, %v3653_v30  ;;  %vm3694_vm10 = vweird.f32 %v3687_v56  ;;  %v3686_v30 = vsub.f32 %v8547_v0, %v3681_v17 }
 0x8a3   :  { %v1809_v17 = vsub.f32 %v8432_v39, %v8559_v53 }
 0x8a4   :  { %v3657_v16 = vsub.f32 %v3655_v45, %v3656_v43 }
 0x8a6   :  { %v3660_v25 = vadd.f32 1e-05, %v3657_v16 }
 0x8a7   :  { %v6719_v1 = vpop.eup %6718 }
 0x8a8   :  { %v6721_v9 = vpop.eup %6720  ;;  %v1840_v37 = vmul.f32 %v6719_v1, %v1838_v44  ;;  %6722 = vrsqrt.f32 %v3660_v25  ;;  %vm1846_vm12 = vweird.f32 %v6719_v1 }
 0x8a9   :  { %v3689_v18 = vmul.f32 %v6721_v9, %v3687_v56  ;;  %vm3695_vm6 = vweird.f32 %v6721_v9  ;;  %vm1847_vm4 = vmor %vm1845_vm5, %vm1846_vm12 }
 0x8aa   :  { %v1841_v62 = vmul.f32 %v6719_v1, %v1840_v37  ;;  %vm3696_vm3 = vmor %vm3694_vm10, %vm3695_vm6  ;;  %vm3667_vm6 = vweird.f32 %v3660_v25  ;;  %vm10955_vm10 = vcmp.lt.s32.totalorder %v6829_v22, 16 }
 0x8ab   :  { %v3690_v46 = vmul.f32 %v6721_v9, %v3689_v18  ;;  %vm1820_vm5 = vmor %vm1818_vm7, %vm1819_vm11 }
 0x8ac   :  { %v1842_v54 = vmul.f32 0.5, %v1841_v62  ;;  %v1821_v44 = vsel %vm1820_vm5, %v6717_v28, %v1817_v7  ;;  %vm10960_vm5 = vnez %v10531_v31 }
 0x8ad   :  { %v3691_v13 = vmul.f32 0.5, %v3690_v46  ;;  %v1822_v58 = vmul.f32 %v1821_v44, %v1809_v17 }
 0x8ae   :  { %v6723_v23 = vpop.eup %6722  ;;  %v1843_v24 = vsub.f32 1.5, %v1842_v54 }
 0x8af   :  { %v3692_v60 = vsub.f32 1.5, %v3691_v13  ;;  %v3662_v47 = vmul.f32 %v6723_v23, %v3660_v25  ;;  %vm3668_vm12 = vweird.f32 %v6723_v23 }
 0x8b0   :  { %v1844_v8 = vmul.f32 %v6719_v1, %v1843_v24  ;;  %vm3669_vm11 = vmor %vm3667_vm6, %vm3668_vm12 }
 0x8b1   :  { %v3693_v5 = vmul.f32 %v6721_v9, %v3692_v60  ;;  %v3663_v2 = vmul.f32 %v6723_v23, %v3662_v47 }
 0x8b2   :  { %v1848_v19 = vsel %vm1847_vm4, %v6719_v1, %v1844_v8  ;;  %v1810_v1 = vsub.f32 %v8434_v15, %v8559_v53  ;;  %vm10956_vm4 = vcmp.lt.s32.totalorder %v6829_v22, 112 }
 0x8b3   :  { %v3697_v45 = vsel %vm3696_vm3, %v6721_v9, %v3693_v5  ;;  %v1849_v43 = vmul.f32 %v1848_v19, %v1836_v36  ;;  %v1850_v16 = vmul.f32 %v1848_v19, %v1837_v55  ;;  %v3664_v3 = vmul.f32 0.5, %v3663_v2  ;;  %vm10957_vm3 = vmmov %vm10955_vm10 }
 0x8b4   :  { %v8575_v38 = vmul.f32 %v3697_v45, %v3685_v35  ;;  %v8577_v20 = vmul.f32 %v3697_v45, %v3686_v30  ;;  %v3659_v9 = vsub.f32 %v8537_v50, %v8566_v4  ;;  %v1823_v62 = vmul.f32 %v1821_v44, %v1810_v1  ;;  %vm10958_vm7 = vmmov %vm10957_vm3 }
 0x8b5   :  { %v3665_v14 = vsub.f32 1.5, %v3664_v3  ;;  %vm10959_vm12 = vmmov %vm10957_vm3 }
 0x8b6   :  { %v8582_v34 = vadd.f32 %v8575_v38, %v1849_v43  ;;  %v8585_v0 = vadd.f32 %v8577_v20, %v1850_v16  ;;  %vm10961_vm6 = vmmov %vm10956_vm4 }
 0x8b7   :  { %v3666_v56 = vmul.f32 %v6723_v23, %v3665_v14 }
 0x8b8   :  { %v6324_v37 = vpack.i.bf16 %v8585_v0, %v8582_v34 }
 0x8b9   :  { %v3670_v18 = vsel %vm3669_vm11, %v6723_v23, %v3666_v56  ;;  %vm10962_vm11 = vmmov %vm10956_vm4 }
 0x8ba   :  { %v8597_v39 = vmul.f32 %v3670_v18, %v3658_v40  ;;  %v8599_v28 = vmul.f32 %v3670_v18, %v3659_v9  ;;  %6325 = vrot.lane.b32.xlu0 %v6324_v37, %s6732_s13 }
 0x8bc   :  { %10953 = vst [vmem:[#allocation6_spill] sm:$0xff] %v8597_v39  ;;  %v8603_v15 = vadd.f32 %v8597_v39, %v1822_v58  ;;  %v8606_v42 = vadd.f32 %v8599_v28, %v1823_v62 }
 0x8bd   :  { %10954 = vst [vmem:[#allocation11_spill] sm:$0xff] %v8599_v28 }
 0x8be   :  { %v6319_v50 = vpack.i.bf16 %v8606_v42, %v8603_v15  ;;  %v6349_v53 = vpack.i.bf16 %v8603_v15, %v8585_v0  ;;  %v6354_v4 = vpack.i.bf16 %v8582_v34, %v8603_v15  ;;  %v6344_v25 = vpack.i.bf16 %v8582_v34, %v8606_v42 }
 0x8bf   :  { %v6359_v46 = vpack.i.bf16 %v8606_v42, %v8585_v0 }
 0x8c0   :  { %6320 = vrot.lane.b32.xlu1 %v6319_v50, %s6733_s2  ;;  %6315 = vrot.lane.b32.xlu2 %v6319_v50, %s6732_s13 }
 0x8c2   :  { %6330 = vrot.lane.b32.xlu0 %v6324_v37, %s6733_s2 }
 0x91a   :  { %v6316_v13 = vpop.permute.xlu2 %6315 }
 0x91b   :  { %v6318_v10 = vunpack.i.h.bf16 %v6316_v13  ;;  %v6317_v24 = vunpack.i.l.bf16 %v6316_v13 }
 0x91d   :  { %v3714_v30 = vsel %vm10957_vm3, %v6317_v24, %v6318_v10  ;;  %vm10965_vm3 = vnez %v10536_v48 }
 0x92c   :  { %v6326_v54 = vpop.permute.xlu0 %6325 }
 0x92d   :  { %v6328_v23 = vunpack.i.h.bf16 %v6326_v54  ;;  %v6327_v60 = vunpack.i.l.bf16 %v6326_v54 }
 0x92f   :  { %v3715_v5 = vsel %vm10955_vm10, %v6328_v23, %v6317_v24  ;;  %v3713_v19 = vsel %vm10958_vm7, %v6318_v10, %v6327_v60  ;;  %v3712_v45 = vsel %vm10959_vm12, %v6327_v60, %v6328_v23  ;;  %vm10963_vm10 = vmmov %vm10956_vm4  ;;  %vm10966_vm7 = vnez %v10746_v26 }
 0x930   :  { %vm10967_vm12 = vcmask 1043456  }
 0x932   :  { %v6321_v47 = vpop.permute.xlu1 %6320 }
 0x933   :  { %v6323_v36 = vunpack.i.h.bf16 %v6321_v47  ;;  %v6322_v55 = vunpack.i.l.bf16 %v6321_v47  ;;  %v5967_v47 = vld [vmem:[%s10426_s4 + $0x18] sm:$0xff] }
 0x934   :  { %v6331_v8 = vpop.permute.xlu0 %6330 }
 0x935   :  { %v3726_v2 = vsel %vm10956_vm4, %v6322_v55, %v6323_v36  ;;  %v6333_v7 = vunpack.i.h.bf16 %v6331_v8  ;;  %v6332_v35 = vunpack.i.l.bf16 %v6331_v8  ;;  %vm10964_vm4 = vnez %v10538_v49 }
 0x936   :  { %v3728_v43 = vsel %vm10960_vm5, %v3726_v2, %v3715_v5  ;;  %vm11045_vm5 = vcmp.lt.s32.totalorder %v6829_v22, 1 }
 0x937   :  { %v3724_v16 = vsel %vm10961_vm6, %v6332_v35, %v6333_v7  ;;  %v3725_v3 = vsel %vm10962_vm11, %v6323_v36, %v6332_v35  ;;  %v3727_v14 = vsel %vm10963_vm10, %v6333_v7, %v6322_v55  ;;  %v3840_v17 = vpack.c.bf16 %v3728_v43, %v3728_v43  ;;  %vm10968_vm6 = vmmov %vm10967_vm12  ;;  %v6059_v55 = vld [vmem:[%s10427_s5 + $0x4c] sm:$0xf] }
 0x938   :  { %v3731_v44 = vsel %vm10964_vm4, %v3727_v14, %v3712_v45  ;;  %v3730_v56 = vsel %vm10965_vm3, %v3724_v16, %v3713_v19  ;;  %v3729_v1 = vsel %vm10966_vm7, %v3725_v3, %v3714_v30  ;;  %vm10969_vm11 = vmmov %vm10968_vm6  ;;  %vm10975_vm4 = vcmask 64512  }
 0x939   :  { %3742 = vrot.lane.b32.xlu1 %v3731_v44, %s6735_s0  ;;  %v3843_v40 = vpack.c.bf16 %v3731_v44, %v3731_v44  ;;  %v3848_v9 = vsel %vm10967_vm12, %v3840_v17, 0  ;;  %v6339_v37 = vpack.i.bf16 %v3730_v56, %v3728_v43  ;;  %v6334_v18 = vpack.i.bf16 %v3730_v56, %v3729_v1  ;;  %vm10970_vm10 = vmmov %vm10968_vm6 }
 0x93a   :  { %3866 = vmatpush.bf16.msrb.mxu0 %v3848_v9  ;;  %v3841_v58 = vpack.c.bf16 %v3729_v1, %v3729_v1  ;;  %v3842_v62 = vpack.c.bf16 %v3730_v56, %v3730_v56  ;;  %vm10971_vm12 = vnez %v10753_v57  ;;  %vm10976_vm3 = vmmov %vm10975_vm4  ;;  %vm10979_vm7 = vcmp.lt.s32.totalorder %v6829_v22, 1 }
 0x93b   :  { %6340 = vrot.lane.b32.xlu0 %v6339_v37, %s6736_s16  ;;  %6335 = vrot.lane.b32.xlu2 %v6334_v18, %s6735_s0  ;;  %v3857_v50 = vsel %vm10968_vm6, %v3843_v40, 0  ;;  %v8660_v23 = vsel %vm10971_vm12, %v3714_v30, %v3725_v3  ;;  %vm10972_vm6 = vnez %v10751_v61  ;;  %vm10980_vm12 = vmmov %vm10979_vm7 }
 0x93c   :  { %v3851_v54 = vsel %vm10969_vm11, %v3841_v58, 0  ;;  %v3854_v13 = vsel %vm10970_vm10, %v3842_v62, 0  ;;  %3905 = vmatpush.bf16.msrb.mxu3 %v3857_v50  ;;  %v8664_v10 = vsel %vm10972_vm6, %v3713_v19, %v3724_v16  ;;  %vm10973_vm11 = vnez %v10755_v63  ;;  %vm10978_vm6 = vmmov %vm10976_vm3 }
 0x93d   :  { %3879 = vmatpush.bf16.msrb.mxu1 %v3851_v54  ;;  %3892 = vmatpush.bf16.msrb.mxu2 %v3854_v13  ;;  %v8668_v24 = vsel %vm10973_vm11, %v3712_v45, %v3727_v14  ;;  %v6364_v60 = vpack.i.bf16 %v8664_v10, %v8660_v23  ;;  %vm10974_vm10 = vnez %v10861_v29  ;;  %vm10977_vm11 = vmmov %vm10976_vm3 }
 0x93e   :  { %6060 = vmatmul.msk.bf16.vlgmr.msrb.gmra.mxu0 %vm10977_vm11, %v6059_v55 }
 0x93f   :  { %6063 = vmatmul.msk.bf16.vlgmr.msrb.gmra.mxu3 %vm10976_vm3, %v6059_v55 }
 0x940   :  { %6062 = vmatmul.msk.bf16.vlgmr.msrb.gmra.mxu2 %vm10975_vm4, %v6059_v55  ;;  %6061 = vmatmul.msk.bf16.vlgmr.msrb.gmra.mxu1 %vm10978_vm6, %v6059_v55  ;;  %vm10981_vm4 = vcmp.lt.s32.totalorder %v6829_v22, 127  ;;  %vm10985_vm6 = vcmp.lt.s32.totalorder %v6829_v22, 1 }
 0x941   :  { %3736 = vrot.lane.b32.xlu1 %v3728_v43, %s6735_s0  ;;  %vm10982_vm3 = vmmov %vm10981_vm4 }
 0x943   :  { %3750 = vrot.lane.b32.xlu0 %v3729_v1, %s6736_s16  ;;  %3754 = vrot.lane.b32.xlu2 %v3731_v44, %s6736_s16 }
 0x949   :  { %6350 = vrot.lane.b32.xlu1 %v6349_v53, %s6735_s0  ;;  %v8674_v53 = vsel %vm10974_vm10, %v3715_v5, %v3726_v2 }
 0x94a   :  { %v6374_v36 = vpack.i.bf16 %v8664_v10, %v8674_v53 }
 0x94b   :  { %6355 = vrot.lane.b32.xlu0 %v6354_v4, %s6736_s16  ;;  %6345 = vrot.lane.b32.xlu2 %v6344_v25, %s6735_s0  ;;  %v6369_v4 = vpack.i.bf16 %v8674_v53, %v8668_v24  ;;  %v6379_v25 = vpack.i.bf16 %v8660_v23, %v8668_v24 }
 0x951   :  { %6365 = vrot.lane.b32.xlu1 %v6364_v60, %s6735_s0 }
 0x953   :  { %6370 = vrot.lane.b32.xlu0 %v6369_v4, %s6735_s0  ;;  %6360 = vrot.lane.b32.xlu2 %v6359_v46, %s6736_s16 }
 0x959   :  { %6380 = vrot.lane.b32.xlu1 %v6379_v25, %s6736_s16  ;;  %v6058_v25 = vld [vmem:[%s10427_s5 + $0x48] sm:$0xf] }
 0x95b   :  { %1855 = vperm.xlu0 %6211, %v5967_v47   ;;  %6375 = vrot.lane.b32.xlu2 %v6374_v36, %s6736_s16 }
 0x995   :  { %v6336_v46 = vpop.permute.xlu2 %6335 }
 0x996   :  { %v6338_v2 = vunpack.i.h.bf16 %v6336_v46  ;;  %v6337_v7 = vunpack.i.l.bf16 %v6336_v46 }
 0x998   :  { %v3745_v45 = vsel %vm10979_vm7, %v6337_v7, %v6338_v2  ;;  %vm10983_vm7 = vcmask 1043456  }
 0x999   :  { %vm10986_vm11 = vmmov %vm10983_vm7 }
 0x99d   :  { %v3755_v8 = vpop.permute.xlu2 %3754 }
 0x9a5   :  { %v6346_v14 = vpop.permute.xlu2 %6345 }
 0x9ab   :  { %v3743_v5 = vpop.permute.xlu1 %3742 }
 0x9ac   :  { %v3744_v43 = vsel %vm10980_vm12, %v6338_v2, %v3743_v5  ;;  %vm10984_vm12 = vmmov %vm10983_vm7 }
 0x9ad   :  { %v6341_v35 = vpop.permute.xlu0 %6340 }
 0x9ae   :  { %v6343_v30 = vunpack.i.h.bf16 %v6341_v35  ;;  %v6342_v19 = vunpack.i.l.bf16 %v6341_v35 }
 0x9b0   :  { %v3756_v16 = vsel %vm10981_vm4, %v6343_v30, %v3755_v8  ;;  %v3759_v3 = vsel %vm10982_vm3, %v3755_v8, %v6342_v19  ;;  %vm10987_vm4 = vmmov %vm10983_vm7 }
 0x9b1   :  { %v3762_v17 = vsel %vm6993_vm14, %v3756_v16, %v3745_v45  ;;  %v3763_v44 = vsel %vm7008_vm8, %v3759_v3, %v3744_v43  ;;  %v3766_v56 = vsel %vm10875_vm13, %v3745_v45, %v3756_v16  ;;  %v3767_v1 = vsel %vm10876_vm2, %v3744_v43, %v3759_v3  ;;  %vm10988_vm3 = vmmov %vm10985_vm6 }
 0x9b2   :  { %v3836_v40 = vpack.c.bf16 %v3762_v17, %v3762_v17  ;;  %v3837_v9 = vpack.c.bf16 %v3763_v44, %v3763_v44  ;;  %v3982_v37 = vpack.c.bf16 %v3766_v56, %v3766_v56  ;;  %v3983_v18 = vpack.c.bf16 %v3767_v1, %v3767_v1  ;;  %v6361_v56 = vpop.permute.xlu2 %6360 }
 0x9b3   :  { %v3737_v58 = vpop.permute.xlu1 %3736  ;;  %v6348_v17 = vunpack.i.h.bf16 %v6346_v14  ;;  %v6347_v44 = vunpack.i.l.bf16 %v6346_v14 }
 0x9b4   :  { %v3921_v62 = vsel %vm10983_vm7, %v3836_v40, 0  ;;  %v3924_v50 = vsel %vm10984_vm12, %v3837_v9, 0  ;;  %v3746_v54 = vsel %vm10985_vm6, %v3737_v58, %v6337_v7  ;;  %v3994_v60 = vsel %vm10986_vm11, %v3982_v37, 0 }
 0x9b5   :  { %v3751_v13 = vpop.permute.xlu0 %3750  ;;  %3959 = vmatpush.bf16.msra.mxu2 %v3921_v62  ;;  %3972 = vmatpush.bf16.msra.mxu3 %v3924_v50  ;;  %v3997_v4 = vsel %vm10987_vm4, %v3983_v18, 0  ;;  %v3747_v47 = vsel %vm10988_vm3, %v3743_v5, %v3737_v58  ;;  %vm10989_vm7 = vcmp.lt.s32.totalorder %v6829_v22, 127  ;;  %vm10991_vm6 = vcmask 64512   ;;  %vm10993_vm3 = vmmov %vm10987_vm4 }
 0x9b6   :  { %v3757_v36 = vsel %vm10989_vm7, %v3751_v13, %v6343_v30  ;;  %vm10990_vm12 = vmmov %vm10989_vm7  ;;  %v6363_v18 = vunpack.i.h.bf16 %v6361_v56  ;;  %v6362_v58 = vunpack.i.l.bf16 %v6361_v56  ;;  %v4137_v56 = vpack.c.bf16 %v8585_v0, %v8585_v0 }
 0x9b7   :  { %v3758_v55 = vsel %vm10990_vm12, %v6342_v19, %v3751_v13  ;;  %v3761_v8 = vsel %vm6989_vm9, %v3757_v36, %v3746_v54  ;;  %v3765_v5 = vsel %vm7001_vm1, %v3746_v54, %v3757_v36  ;;  %vm10992_vm11 = vmmov %vm10991_vm6 }
 0x9b8   :  { %v3760_v46 = vsel %vm6985_vm0, %v3758_v55, %v3747_v47  ;;  %v3764_v2 = vsel %vm6997_vm15, %v3747_v47, %v3758_v55  ;;  %v3835_v35 = vpack.c.bf16 %v3761_v8, %v3761_v8  ;;  %v3981_v45 = vpack.c.bf16 %v3765_v5, %v3765_v5  ;;  %6066 = vmatmul.msk.bf16.vlgmr.msra.gmra.mxu2 %vm10991_vm6, %v6058_v25  ;;  %vm10994_vm7 = vmmov %vm10993_vm3 }
 0x9b9   :  { %4032 = vmatpush.bf16.msrb.mxu2 %v3994_v60  ;;  %4045 = vmatpush.bf16.msrb.mxu3 %v3997_v4  ;;  %v3834_v7 = vpack.c.bf16 %v3760_v46, %v3760_v46  ;;  %v3980_v30 = vpack.c.bf16 %v3764_v2, %v3764_v2  ;;  %vm10995_vm12 = vmmov %vm10993_vm3 }
 0x9ba   :  { %6067 = vmatmul.msk.bf16.vlgmr.msra.gmra.mxu3 %vm10992_vm11, %v6058_v25  ;;  %v3918_v43 = vsel %vm10993_vm3, %v3835_v35, 0  ;;  %v3991_v3 = vsel %vm10995_vm12, %v3981_v45, 0  ;;  %vm10996_vm11 = vmmov %vm10991_vm6 }
 0x9bb   :  { %v3915_v19 = vsel %vm10987_vm4, %v3834_v7, 0  ;;  %v3988_v16 = vsel %vm10994_vm7, %v3980_v30, 0  ;;  %v6351_v1 = vpop.permute.xlu1 %6350  ;;  %3946 = vmatpush.bf16.msra.mxu1 %v3918_v43  ;;  %vm10997_vm4 = vcmp.lt.s32.totalorder %v6829_v22, 1  ;;  %v4136_v43 = vpack.c.bf16 %v8582_v34, %v8582_v34  ;;  %v11011_v34 = vld [vmem:[#allocation15_spill] sm:$0xff] }
 0x9bc   :  { %3933 = vmatpush.bf16.msra.mxu0 %v3915_v19  ;;  %v6353_v40 = vunpack.i.h.bf16 %v6351_v1  ;;  %v6352_v9 = vunpack.i.l.bf16 %v6351_v1  ;;  %v8746_v50 = vsel %vm10997_vm4, %v6347_v44, %v6348_v17  ;;  %vm10998_vm3 = vmmov %vm10997_vm4  ;;  %v11009_v1 = vld [vmem:[#allocation14_spill] sm:$0xff] }
 0x9bd   :  { %v6356_v37 = vpop.permute.xlu0 %6355  ;;  %vm10999_vm7 = vmmov %vm10998_vm3 }
 0x9be   :  { %v6358_v62 = vunpack.i.h.bf16 %v6356_v37  ;;  %6065 = vmatmul.msk.bf16.vlgmr.msra.gmra.mxu1 %vm10996_vm11, %v6058_v25  ;;  %v8750_v14 = vsel %vm10998_vm3, %v6348_v17, %v6352_v9  ;;  %v6357_v54 = vunpack.i.l.bf16 %v6356_v37  ;;  %v8754_v13 = vsel %vm10999_vm7, %v6353_v40, %v6347_v44  ;;  %vm11000_vm12 = vmmov %vm10998_vm3  ;;  %v6068_v44 = vld [vmem:[%s10427_s5 + $0x50] sm:$0xf] }
 0x9bf   :  { %4019 = vmatpush.bf16.msrb.mxu1 %v3991_v3  ;;  %6064 = vmatmul.msk.bf16.vlgmr.msra.gmra.mxu0 %vm10991_vm6, %v6058_v25  ;;  %v8758_v60 = vsel %vm11000_vm12, %v6352_v9, %v6353_v40  ;;  %vm11001_vm6 = vcmp.lt.s32.totalorder %v6829_v22, 127  ;;  %vm11005_vm7 = vcmask 1043456   ;;  %v11010_v40 = vld [vmem:[#allocation18_spill] sm:$0xff]  ;;  %v11012_v37 = vld [vmem:[#allocation19_spill] sm:$0xff] }
 0x9c0   :  { %4006 = vmatpush.bf16.msrb.mxu0 %v3988_v16  ;;  %v8762_v4 = vsel %vm11001_vm6, %v6358_v62, %v6362_v58  ;;  %vm11002_vm11 = vmmov %vm11001_vm6  ;;  %v1157_v9 = vadd.f32 %v11010_v40, %v11009_v1  ;;  %v4134_v1 = vpack.c.bf16 %v8603_v15, %v8603_v15  ;;  %v4135_v40 = vpack.c.bf16 %v8606_v42, %v8606_v42 }
 0x9c1   :  { %v8766_v25 = vsel %vm11002_vm11, %v6363_v18, %v6358_v62  ;;  %vm11003_vm4 = vmmov %vm11001_vm6  ;;  %v3794_v46 = vsel %vm6993_vm14, %v8762_v4, %v8746_v50  ;;  %v11014_v62 = vld [vmem:[#allocation20_spill] sm:$0xff] }
 0x9c2   :  { %v8770_v47 = vsel %vm11003_vm4, %v6357_v54, %v6363_v18  ;;  %vm11004_vm3 = vmmov %vm11003_vm4  ;;  %v3793_v55 = vsel %vm6989_vm9, %v8766_v25, %v8754_v13  ;;  %v4059_v5 = vpack.c.bf16 %v3794_v46, %v3794_v46  ;;  %v1158_v18 = vadd.f32 %v11012_v37, %v11011_v34  ;;  %v11016_v46 = vld [vmem:[#allocation21_spill] sm:$0xff]  ;;  %v11026_v34 = vld [vmem:[#allocation27_spill] sm:$0xff] }
 0x9c3   :  { %v8774_v36 = vsel %vm11004_vm3, %v6362_v58, %v6357_v54  ;;  %v3792_v8 = vsel %vm6985_vm0, %v8770_v47, %v8758_v60  ;;  %v4058_v2 = vpack.c.bf16 %v3793_v55, %v3793_v55  ;;  %vm11006_vm12 = vmmov %vm11005_vm7  ;;  %v11013_v58 = vld [vmem:[#allocation16_spill] sm:$0xff]  ;;  %v11015_v55 = vld [vmem:[#allocation17_spill] sm:$0xff]  ;;  %vm11018_vm4 = vcmask 64512   ;;  %v8833_v15 = vpop.permute.xlu1 %6365 }
 0x9c4   :  { %v3795_v7 = vsel %vm7008_vm8, %v8774_v36, %v8750_v14  ;;  %v4057_v35 = vpack.c.bf16 %v3792_v8, %v3792_v8  ;;  %v4071_v19 = vsel %vm11006_vm12, %v4059_v5, 0  ;;  %vm11007_vm6 = vmmov %vm11005_vm7  ;;  %v1159_v54 = vadd.f32 %v11014_v62, %v11013_v58  ;;  %v11028_v62 = vld [vmem:[#allocation29_spill] sm:$0xff] }
 0x9c5   :  { %v4060_v30 = vpack.c.bf16 %v3795_v7, %v3795_v7  ;;  %v4068_v45 = vsel %vm11005_vm7, %v4058_v2, 0  ;;  %v8796_v16 = vpop.permute.xlu0 %6370  ;;  %4109 = vmatpush.bf16.msra.mxu2 %v4071_v19  ;;  %vm11008_vm11 = vmmov %vm11007_vm6  ;;  %v1160_v8 = vadd.f32 %v11016_v46, %v11015_v55  ;;  %v11017_v2 = vld [vmem:[#allocation22_spill] sm:$0xff]  ;;  %v11020_v7 = vld [vmem:[#allocation23_spill] sm:$0xff] }
 0x9c6   :  { %v4065_v3 = vsel %vm11007_vm6, %v4057_v35, 0  ;;  %4096 = vmatpush.bf16.msra.mxu1 %v4068_v45  ;;  %v1313_v5 = vadd.f32 %v11017_v2, %v1157_v9  ;;  %vm11019_vm3 = vmmov %vm11007_vm6  ;;  %v1314_v35 = vadd.f32 %v11020_v7, %v1158_v18  ;;  %v11022_v19 = vld [vmem:[#allocation25_spill] sm:$0xff]  ;;  %v11025_v9 = vld [vmem:[#allocation26_spill] sm:$0xff] }
 0x9c7   :  { %v4074_v17 = vsel %vm11008_vm11, %v4060_v30, 0  ;;  %4083 = vmatpush.bf16.msra.mxu0 %v4065_v3  ;;  %v4148_v0 = vsel %vm11019_vm3, %v4136_v43, 0  ;;  %v11021_v30 = vld [vmem:[#allocation24_spill] sm:$0xff]  ;;  %v1316_v3 = vadd.f32 %v11022_v19, %v1160_v8  ;;  %vm11023_vm7 = vmmov %vm11018_vm4  ;;  %v11030_v8 = vld [vmem:[#allocation33_spill] sm:$0xff] }
 0x9c8   :  { %4122 = vmatpush.bf16.msra.mxu3 %v4074_v17  ;;  %6071 = vmatmul.msk.bf16.vlgmr.msrb.gmra.mxu2 %vm11018_vm4, %v6068_v44  ;;  %v1315_v45 = vadd.f32 %v11021_v30, %v1159_v54  ;;  %vm11024_vm12 = vmmov %vm11019_vm3  ;;  %v1469_v43 = vadd.f32 %v11025_v9, %v1313_v5  ;;  %v1470_v37 = vadd.f32 %v11026_v34, %v1314_v35  ;;  %v11027_v18 = vld [vmem:[#allocation28_spill] sm:$0xff]  ;;  %v11032_v7 = vld [vmem:[#allocation39_spill] sm:$0xff] }
 0x9c9   :  { %4186 = vmatpush.bf16.msrb.mxu2 %v4148_v0  ;;  %v4151_v17 = vsel %vm11024_vm12, %v4137_v56, 0  ;;  %v1472_v54 = vadd.f32 %v11028_v62, %v1316_v3  ;;  %v11029_v55 = vld [vmem:[#allocation32_spill] sm:$0xff]  ;;  %v11031_v56 = vld [vmem:[#allocation38_spill] sm:$0xff]  ;;  %vm11033_vm6 = vmmov %vm11018_vm4 }
 0x9ca   :  { %6072 = vmatmul.msk.bf16.vlgmr.msrb.gmra.mxu3 %vm11023_vm7, %v6068_v44  ;;  %v1471_v58 = vadd.f32 %v11027_v18, %v1315_v45  ;;  %v1625_v46 = vadd.f32 %v11029_v55, %v1469_v43  ;;  %v1626_v2 = vadd.f32 %v11030_v8, %v1470_v37  ;;  %vm11034_vm11 = vmmov %vm11019_vm3  ;;  %v3798_v37 = vsel %vm10875_vm13, %v8746_v50, %v8762_v4 }
 0x9cb   :  { %v1628_v30 = vadd.f32 %v11032_v7, %v1472_v54  ;;  %v4142_v42 = vsel %vm11034_vm11, %v4134_v1, 0  ;;  %vm11035_vm4 = vmmov %vm11019_vm3  ;;  %v3799_v1 = vsel %vm10876_vm2, %v8750_v14, %v8774_v36  ;;  %v4213_v54 = vpack.c.bf16 %v3798_v37, %v3798_v37  ;;  %v6073_v14 = vld [vmem:[%s10427_s5 + $0x54] sm:$0xf]  ;;  %v6381_v8 = vpop.permute.xlu1 %6380  ;;  %v6376_v7 = vpop.permute.xlu2 %6375 }
 0x9cc   :  { %4199 = vmatpush.bf16.msrb.mxu3 %v4151_v17  ;;  %v1627_v0 = vadd.f32 %v11031_v56, %v1471_v58  ;;  %v4145_v5 = vsel %vm11035_vm4, %v4135_v40, 0  ;;  %vm11036_vm3 = vmmov %vm11033_vm6  ;;  %v4214_v36 = vpack.c.bf16 %v3799_v1, %v3799_v1  ;;  %v3796_v56 = vsel %vm6997_vm15, %v8758_v60, %v8770_v47 }
 0x9cd   :  { %v1856_v19 = vpop.permute.xlu0 %1855  ;;  %vm11037_vm7 = vmmov %vm11036_vm3  ;;  %v6382_v60 = vunpack.i.l.bf16 %v6381_v8  ;;  %v4211_v47 = vpack.c.bf16 %v3796_v56, %v3796_v56  ;;  %v6383_v1 = vunpack.i.h.bf16 %v6381_v8  ;;  %v6078_v8 = vld [vmem:[%s10427_s5 + $0x58] sm:$0xf] }
 0x9ce   :  { %v1858_v35 = vadd.f32 %v1856_v19, %v1625_v46  ;;  %v1859_v45 = vadd.f32 %v1856_v19, %v1626_v2  ;;  %v1860_v3 = vadd.f32 %v1856_v19, %v1627_v0  ;;  %v1861_v17 = vadd.f32 %v1856_v19, %v1628_v30  ;;  %6070 = vmatmul.msk.bf16.vlgmr.msrb.gmra.mxu1 %vm11036_vm3, %v6068_v44  ;;  %vm11038_vm12 = vmmov %vm11036_vm3 }
 0x9cf   :  { %6069 = vmatmul.msk.bf16.vlgmr.msrb.gmra.mxu0 %vm11033_vm6, %v6068_v44  ;;  %4173 = vmatpush.bf16.msrb.mxu1 %v4145_v5  ;;  %v3797_v0 = vsel %vm7001_vm1, %v8754_v13, %v8766_v25  ;;  %vm11039_vm6 = vmmov %vm11035_vm4  ;;  %v6378_v13 = vunpack.i.h.bf16 %v6376_v7  ;;  %v6368_v25 = vunpack.i.h.bf16 %v8833_v15 }
 0x9d0   :  { %4160 = vmatpush.bf16.msrb.mxu0 %v4142_v42  ;;  %v1862_v9 = vmul.f32 0.2, %v1858_v35  ;;  %v1863_v43 = vmul.f32 0.2, %v1859_v45  ;;  %v1864_v34 = vmul.f32 0.2, %v1860_v3  ;;  %vm11040_vm11 = vmmov %vm11035_vm4 }
 0x9d1   :  { %v1865_v18 = vmul.f32 0.2, %v1861_v17  ;;  %v4225_v30 = vsel %vm11039_vm6, %v4213_v54, 0  ;;  %v4228_v19 = vsel %vm11040_vm11, %v4214_v36, 0  ;;  %vm11041_vm4 = vcmp.lt.s32.totalorder %v6829_v22, 127  ;;  %vm11044_vm11 = vmmov %vm11039_vm6 }
 0x9d2   :  { %v8847_v40 = vmax.f32 %v1860_v3, %v1864_v34  ;;  %v8849_v58 = vmax.f32 %v1858_v35, %v1862_v9  ;;  %v8851_v44 = vmax.f32 %v1859_v45, %v1863_v43  ;;  %v4212_v35 = vpack.c.bf16 %v3797_v0, %v3797_v0 }
 0x9d3   :  { %v8853_v62 = vmax.f32 %v1861_v17, %v1865_v18  ;;  %v6367_v45 = vunpack.i.l.bf16 %v8833_v15  ;;  %v6377_v3 = vunpack.i.l.bf16 %v6376_v7  ;;  %v6372_v17 = vunpack.i.l.bf16 %v8796_v16 }
 0x9d4   :  { %v1870_v55 = vadd.f32 %v8851_v44, %v8849_v58  ;;  %v1873_v50 = vmul.f32 %v8849_v58, %v8849_v58  ;;  %v1874_v4 = vmul.f32 %v8851_v44, %v8851_v44  ;;  %v1900_v42 = vmul.f32 %v8847_v40, %v8847_v40 }
 0x9d5   :  { %v1897_v46 = vadd.f32 %v8853_v62, %v8847_v40  ;;  %v1901_v5 = vmul.f32 %v8853_v62, %v8853_v62  ;;  %v3820_v43 = vsel %vm11041_vm4, %v6378_v13, %v6382_v60  ;;  %v4219_v37 = vsel %vm11039_vm6, %v4211_v47, 0 }
 0x9d6   :  { %1871 = vadd.xlane.f32.xlu2 %v1870_v55  ;;  %v1875_v2 = vadd.f32 %v1874_v4, %v1873_v50  ;;  %v4222_v18 = vsel %vm11044_vm11, %v4212_v35, 0  ;;  %v3809_v15 = vsel %vm11045_vm5, %v6367_v45, %v6368_v25  ;;  %v6373_v50 = vunpack.i.h.bf16 %v8796_v16 }
 0x9d7   :  { %1898 = vadd.xlane.f32.xlu0 %v1897_v46  ;;  %v1902_v9 = vadd.f32 %v1901_v5, %v1900_v42  ;;  %v3826_v55 = vsel %vm6993_vm14, %v3820_v43, %v3809_v15  ;;  %vm11051_vm6 = vcmask 64512   ;;  %v8923_v42 = vpack.i.bf16 %v8597_v39, %v8196_v52 }
 0x9d8   :  { %6076 = vmatmul.msk.bf16.vlgmr.msra.gmra.mxu2 %vm11037_vm7, %v6073_v14  ;;  %1876 = vadd.xlane.f32.xlu1 %v1875_v2  ;;  %vm11042_vm7 = vmmov %vm11041_vm4  ;;  %v4290_v36 = vpack.c.bf16 %v3826_v55, %v3826_v55  ;;  %v3830_v55 = vsel %vm10875_vm13, %v3809_v15, %v3820_v43  ;;  %v3868_v15 = vpop.f32.mrf.mxu0 }
 0x9d9   :  { %4263 = vmatpush.bf16.msra.mxu2 %v4225_v30  ;;  %v3823_v34 = vsel %vm11042_vm7, %v6382_v60, %v6377_v3  ;;  %vm11046_vm4 = vmmov %vm11045_vm5 }
 0x9da   :  { %6077 = vmatmul.msk.bf16.vlgmr.msra.gmra.mxu3 %vm11038_vm12, %v6073_v14  ;;  %vm11043_vm12 = vmmov %vm11036_vm3  ;;  %v3808_v54 = vsel %vm11046_vm4, %v6368_v25, %v6372_v17  ;;  %v4302_v7 = vsel %vm11044_vm11, %v4290_v36, 0  ;;  %v4367_v25 = vpack.c.bf16 %v8664_v10, %v8664_v10 }
 0x9db   :  { %4276 = vmatpush.bf16.msra.mxu3 %v4228_v19  ;;  %v3827_v4 = vsel %vm7008_vm8, %v3823_v34, %v3808_v54 }
 0x9dc   :  { %v4291_v2 = vpack.c.bf16 %v3827_v4, %v3827_v4 }
 0x9de   :  { %1903 = vadd.xlane.f32.xlu2 %v1902_v9  ;;  %6075 = vmatmul.msk.bf16.vlgmr.msra.gmra.mxu1 %vm11043_vm12, %v6073_v14  ;;  %vm11050_vm12 = vmmov %vm11046_vm4  ;;  %v8945_v9 = vpack.i.bf16 %v8599_v28, %v8198_v21 }
 0x9df   :  { %6074 = vmatmul.msk.bf16.vlgmr.msra.gmra.mxu0 %vm11036_vm3, %v6073_v14  ;;  %4250 = vmatpush.bf16.msra.mxu1 %v4222_v18  ;;  %vm11047_vm3 = vmmov %vm11042_vm7  ;;  %v3810_v16 = vsel %vm11050_vm12, %v6373_v50, %v6367_v45  ;;  %v6083_v45 = vld [vmem:[%s10427_s5 + $0x5c] sm:$0xf] }
 0x9e0   :  { %4237 = vmatpush.bf16.msra.mxu0 %v4219_v37  ;;  %v3822_v14 = vsel %vm11047_vm3, %v6377_v3, %v6383_v1  ;;  %vm11048_vm5 = vmmov %vm11047_vm3  ;;  %v4368_v3 = vpack.c.bf16 %v8668_v24, %v8668_v24  ;;  %v4365_v24 = vpack.c.bf16 %v8674_v53, %v8674_v53  ;;  %v4366_v37 = vpack.c.bf16 %v8660_v23, %v8660_v23 }
 0x9e1   :  { %v3821_v46 = vsel %vm11048_vm5, %v6383_v1, %v6378_v13  ;;  %vm11049_vm7 = vmmov %vm11046_vm4  ;;  %v6103_v13 = vld [vmem:[%s10428_s6 + $0x10] sm:$0xff]  ;;  %v3831_v53 = vsel %vm10876_vm2, %v3808_v54, %v3823_v34  ;;  %v4444_v23 = vpack.c.bf16 %v3830_v55, %v3830_v55  ;;  %v3881_v54 = vpop.f32.mrf.mxu1 }
 0x9e2   :  { %v3811_v56 = vsel %vm11049_vm7, %v6372_v17, %v6373_v50  ;;  %v3825_v30 = vsel %vm6989_vm9, %v3821_v46, %v3810_v16  ;;  %vm11052_vm4 = vmmov %vm11051_vm6  ;;  %v6088_v50 = vld [vmem:[%s10427_s5 + $0x60] sm:$0xf]  ;;  %v4445_v4 = vpack.c.bf16 %v3831_v53, %v3831_v53  ;;  %v3829_v43 = vsel %vm7001_vm1, %v3810_v16, %v3821_v46 }
 0x9e3   :  { %v3824_v0 = vsel %vm6985_vm0, %v3822_v14, %v3811_v56  ;;  %vm11053_vm3 = vmmov %vm11044_vm11  ;;  %v4289_v60 = vpack.c.bf16 %v3825_v30, %v3825_v30  ;;  %v3828_v36 = vsel %vm6997_vm15, %v3811_v56, %v3822_v14  ;;  %v3907_v30 = vpop.f32.mrf.mxu3  ;;  %v3870_v56 = vpop.f32.mrf.mxu0  ;;  %vm11112_vm1 = vnez %v10755_v63 }
 0x9e4   :  { %v4305_v19 = vsel %vm11053_vm3, %v4291_v2, 0  ;;  %v4288_v5 = vpack.c.bf16 %v3824_v0, %v3824_v0  ;;  %vm11054_vm5 = vmmov %vm11052_vm4  ;;  %v4442_v2 = vpack.c.bf16 %v3828_v36, %v3828_v36  ;;  %v4443_v0 = vpack.c.bf16 %v3829_v43, %v3829_v43 }
 0x9e5   :  { %vm11055_vm7 = vmmov %vm11053_vm3 }
 0x9e6   :  { %v4296_v47 = vsel %vm11055_vm7, %v4288_v5, 0  ;;  %vm11056_vm12 = vmmov %vm11052_vm4 }
 0x9e7   :  { %vm11058_vm11 = vmmov %vm11052_vm4 }
 0x9e8   :  { %6081 = vmatmul.msk.bf16.vlgmr.msrb.gmra.mxu2 %vm11051_vm6, %v6078_v8  ;;  %vm11057_vm6 = vmmov %vm11053_vm3 }
 0x9e9   :  { %4340 = vmatpush.bf16.msrb.mxu2 %v4302_v7  ;;  %v4299_v35 = vsel %vm11057_vm6, %v4289_v60, 0  ;;  %v3894_v7 = vpop.f32.mrf.mxu2  ;;  %v3883_v16 = vpop.f32.mrf.mxu1  ;;  %v6093_v60 = vld [vmem:[%s10427_s5 + $0x64] sm:$0xf] }
 0x9ea   :  { %6082 = vmatmul.msk.bf16.vlgmr.msrb.gmra.mxu3 %vm11052_vm4, %v6078_v8  ;;  %vm11059_vm4 = vmmov %vm11053_vm3 }
 0x9eb   :  { %4353 = vmatpush.bf16.msrb.mxu3 %v4305_v19  ;;  %6385 = vrot.lane.b32.xlu0 %v8923_v42, %s6732_s13  ;;  %v4379_v17 = vsel %vm11059_vm4, %v4367_v25, 0  ;;  %vm11060_vm3 = vmmov %vm11054_vm5  ;;  %v3909_v5 = vpop.f32.mrf.mxu3 }
 0x9ec   :  { %vm11062_vm7 = vmmov %vm11060_vm3 }
 0x9ed   :  { %vm11064_vm6 = vmmov %vm11060_vm3 }
 0x9ee   :  { %6080 = vmatmul.msk.bf16.vlgmr.msrb.gmra.mxu1 %vm11056_vm12, %v6078_v8  ;;  %vm11063_vm12 = vmmov %vm11059_vm4 }
 0x9ef   :  { %6079 = vmatmul.msk.bf16.vlgmr.msrb.gmra.mxu0 %vm11054_vm5, %v6078_v8  ;;  %4327 = vmatpush.bf16.msrb.mxu1 %v4299_v35  ;;  %vm11061_vm5 = vmmov %vm11059_vm4  ;;  %v4373_v18 = vsel %vm11063_vm12, %v4365_v24, 0 }
 0x9f0   :  { %4314 = vmatpush.bf16.msrb.mxu0 %v4296_v47  ;;  %v4382_v10 = vsel %vm11061_vm5, %v4368_v3, 0  ;;  %v6098_v47 = vld [vmem:[%s10427_s5 + $0x68] sm:$0xf] }
 0x9f1   :  { %4521 = vperm.xlu1 %6263, %v6103_v13   ;;  %v3896_v19 = vpop.f32.mrf.mxu2 }
 0x9f8   :  { %6086 = vmatmul.msk.bf16.vlgmr.msra.gmra.mxu2 %vm11058_vm11, %v6083_v45  ;;  %vm11065_vm11 = vmmov %vm11059_vm4 }
 0x9f9   :  { %4417 = vmatpush.bf16.msra.mxu2 %v4379_v17  ;;  %6390 = vrot.lane.b32.xlu1 %v8945_v9, %s6732_s13  ;;  %v4376_v1 = vsel %vm11065_vm11, %v4366_v37, 0  ;;  %vm11066_vm4 = vmmov %vm11060_vm3 }
 0x9fa   :  { %6087 = vmatmul.msk.bf16.vlgmr.msra.gmra.mxu3 %vm11060_vm3, %v6083_v45  ;;  %vm11067_vm3 = vmmov %vm11061_vm5 }
 0x9fb   :  { %4430 = vmatpush.bf16.msra.mxu3 %v4382_v10  ;;  %v4456_v8 = vsel %vm11067_vm3, %v4444_v23, 0  ;;  %vm11068_vm5 = vmmov %vm11066_vm4 }
 0x9fc   :  { %vm11070_vm12 = vmmov %vm11066_vm4 }
 0x9fd   :  { %vm11072_vm11 = vmmov %vm11066_vm4 }
 0x9fe   :  { %6085 = vmatmul.msk.bf16.vlgmr.msra.gmra.mxu1 %vm11064_vm6, %v6083_v45  ;;  %vm11071_vm6 = vmmov %vm11067_vm3 }
 0x9ff   :  { %6084 = vmatmul.msk.bf16.vlgmr.msra.gmra.mxu0 %vm11062_vm7, %v6083_v45  ;;  %4404 = vmatpush.bf16.msra.mxu1 %v4376_v1  ;;  %vm11069_vm7 = vmmov %vm11067_vm3  ;;  %v4450_v14 = vsel %vm11071_vm6, %v4442_v2, 0 }
 0xa00   :  { %4391 = vmatpush.bf16.msra.mxu0 %v4373_v18  ;;  %v4459_v34 = vsel %vm11069_vm7, %v4445_v4, 0 }
 0xa01   :  { %6405 = vrot.lane.b32.xlu1 %v8923_v42, %s6733_s2 }
 0xa08   :  { %6091 = vmatmul.msk.bf16.vlgmr.msrb.gmra.mxu2 %vm11066_vm4, %v6088_v50  ;;  %vm11073_vm4 = vmmov %vm11067_vm3 }
 0xa09   :  { %4494 = vmatpush.bf16.msrb.mxu2 %v4456_v8  ;;  %v4453_v46 = vsel %vm11073_vm4, %v4443_v0, 0  ;;  %vm11074_vm3 = vmmov %vm11068_vm5 }
 0xa0a   :  { %6092 = vmatmul.msk.bf16.vlgmr.msrb.gmra.mxu3 %vm11068_vm5, %v6088_v50  ;;  %vm11075_vm5 = vmmov %vm11074_vm3 }
 0xa0b   :  { %4507 = vmatpush.bf16.msrb.mxu3 %v4459_v34  ;;  %vm11076_vm7 = vmmov %vm11074_vm3 }
 0xa0c   :  { %vm11078_vm6 = vmmov %vm11074_vm3 }
 0xa0d   :  { %vm11080_vm4 = vmmov %vm11074_vm3 }
 0xa0e   :  { %6090 = vmatmul.msk.bf16.vlgmr.msrb.gmra.mxu1 %vm11072_vm11, %v6088_v50  ;;  %vm11079_vm11 = vmmov %vm11074_vm3 }
 0xa0f   :  { %6089 = vmatmul.msk.bf16.vlgmr.msrb.gmra.mxu0 %vm11070_vm12, %v6088_v50  ;;  %4481 = vmatpush.bf16.msrb.mxu1 %v4453_v46  ;;  %vm11077_vm12 = vmmov %vm11074_vm3 }
 0xa10   :  { %4468 = vmatpush.bf16.msrb.mxu0 %v4450_v14  ;;  %vm11081_vm15 = vmmov %vm11074_vm3 }
 0xa18   :  { %6096 = vmatmul.msk.bf16.vlgmr.msra.gmra.mxu2 %vm11074_vm3, %v6093_v60 }
 0xa1a   :  { %6097 = vmatmul.msk.bf16.vlgmr.msra.gmra.mxu3 %vm11075_vm5, %v6093_v60 }
 0xa1e   :  { %6095 = vmatmul.msk.bf16.vlgmr.msra.gmra.mxu1 %vm11077_vm12, %v6093_v60 }
 0xa1f   :  { %6094 = vmatmul.msk.bf16.vlgmr.msra.gmra.mxu0 %vm11076_vm7, %v6093_v60 }
 0xa28   :  { %6101 = vmatmul.msk.bf16.vlgmr.msrb.gmra.mxu2 %vm11078_vm6, %v6098_v47 }
 0xa2a   :  { %6102 = vmatmul.msk.bf16.vlgmr.msrb.gmra.mxu3 %vm11079_vm11, %v6098_v47  ;;  %vm11087_vm11 = vcmp.lt.s32.totalorder %v6829_v22, 16 }
 0xa2e   :  { %6100 = vmatmul.msk.bf16.vlgmr.msrb.gmra.mxu1 %vm11081_vm15, %v6098_v47 }
 0xa2f   :  { %6099 = vmatmul.msk.bf16.vlgmr.msrb.gmra.mxu0 %vm11080_vm4, %v6098_v47  ;;  %vm11088_vm4 = vmmov %vm11087_vm11 }
 0xa3b   :  { %v3948_v13 = vpop.f32.mrf.mxu1  ;;  %v3961_v3 = vpop.f32.mrf.mxu2 }
 0xa3c   :  { %v3935_v35 = vpop.f32.mrf.mxu0  ;;  %v3949_v45 = vadd.f32 %v3948_v13, %v3881_v54  ;;  %v3962_v10 = vadd.f32 %v3961_v3, %v3894_v7 }
 0xa3d   :  { %v3936_v25 = vadd.f32 %v3935_v35, %v3868_v15  ;;  %v3974_v17 = vpop.f32.mrf.mxu3 }
 0xa3e   :  { %v3975_v24 = vadd.f32 %v3974_v17, %v3907_v30 }
 0xa43   :  { %v3950_v18 = vpop.f32.mrf.mxu1  ;;  %v3963_v1 = vpop.f32.mrf.mxu2 }
 0xa44   :  { %v3937_v37 = vpop.f32.mrf.mxu0 }
 0xa45   :  { %v3976_v55 = vpop.f32.mrf.mxu3 }
 0xa4b   :  { %v4021_v50 = vpop.f32.mrf.mxu1  ;;  %v4034_v4 = vpop.f32.mrf.mxu2 }
 0xa4c   :  { %v4008_v53 = vpop.f32.mrf.mxu0  ;;  %v4052_v8 = vadd.f32 %v4021_v50, %v3949_v45  ;;  %v4053_v43 = vadd.f32 %v4034_v4, %v3962_v10 }
 0xa4d   :  { %v4051_v23 = vadd.f32 %v4008_v53, %v3936_v25  ;;  %v4047_v36 = vpop.f32.mrf.mxu3 }
 0xa4e   :  { %v4054_v34 = vadd.f32 %v4047_v36, %v3975_v24 }
 0xa53   :  { %v4023_v0 = vpop.f32.mrf.mxu1  ;;  %v4036_v15 = vpop.f32.mrf.mxu2 }
 0xa54   :  { %v4010_v2 = vpop.f32.mrf.mxu0 }
 0xa55   :  { %v4049_v54 = vpop.f32.mrf.mxu3 }
 0xa5b   :  { %v4098_v7 = vpop.f32.mrf.mxu1  ;;  %v4111_v56 = vpop.f32.mrf.mxu2 }
 0xa5c   :  { %v4085_v14 = vpop.f32.mrf.mxu0  ;;  %v4129_v30 = vadd.f32 %v4098_v7, %v4052_v8  ;;  %v4130_v19 = vadd.f32 %v4111_v56, %v4053_v43 }
 0xa5d   :  { %v4128_v46 = vadd.f32 %v4085_v14, %v4051_v23  ;;  %v4124_v16 = vpop.f32.mrf.mxu3 }
 0xa5e   :  { %v4131_v5 = vadd.f32 %v4124_v16, %v4054_v34 }
 0xa63   :  { %v4100_v47 = vpop.f32.mrf.mxu1  ;;  %v4113_v35 = vpop.f32.mrf.mxu2 }
 0xa64   :  { %v4087_v60 = vpop.f32.mrf.mxu0 }
 0xa65   :  { %v4126_v13 = vpop.f32.mrf.mxu3 }
 0xa66   :  { %v8994_v13 = vpop.xlane.xlu1 %1876 }
 0xa6b   :  { %v4175_v45 = vpop.f32.mrf.mxu1  ;;  %v4188_v3 = vpop.f32.mrf.mxu2 }
 0xa6c   :  { %v4162_v25 = vpop.f32.mrf.mxu0 }
 0xa6d   :  { %v4201_v17 = vpop.f32.mrf.mxu3 }
 0xa6e   :  { %v4522_v32 = vpop.permute.xlu1 %4521 }
 0xa73   :  { %v4177_v24 = vpop.f32.mrf.mxu1  ;;  %v4190_v37 = vpop.f32.mrf.mxu2 }
 0xa74   :  { %v4164_v10 = vpop.f32.mrf.mxu0  ;;  %v4206_v37 = vadd.f32 %v4175_v45, %v4129_v30 }
 0xa75   :  { %v4203_v18 = vpop.f32.mrf.mxu3  ;;  %v4205_v10 = vadd.f32 %v4162_v25, %v4128_v46 }
 0xa7b   :  { %v4252_v55 = vpop.f32.mrf.mxu1  ;;  %v4265_v53 = vpop.f32.mrf.mxu2 }
 0xa7c   :  { %v4239_v1 = vpop.f32.mrf.mxu0  ;;  %v4283_v28 = vadd.f32 %v4252_v55, %v4206_v37  ;;  %v9014_v37 = vpack.i.bf16 %v8577_v20, %v8194_v11 }
 0xa7d   :  { %v4278_v23 = vpop.f32.mrf.mxu3 }
 0xa83   :  { %v4254_v4 = vpop.f32.mrf.mxu1  ;;  %v4267_v36 = vpop.f32.mrf.mxu2 }
 0xa84   :  { %v4241_v50 = vpop.f32.mrf.mxu0  ;;  %v4207_v4 = vadd.f32 %v4188_v3, %v4130_v19  ;;  %v4208_v36 = vadd.f32 %v4201_v17, %v4131_v5 }
 0xa85   :  { %v4280_v8 = vpop.f32.mrf.mxu3 }
 0xa86   :  { %v4282_v8 = vadd.f32 %v4239_v1, %v4205_v10 }
 0xa8b   :  { %v4329_v34 = vpop.f32.mrf.mxu1  ;;  %v4342_v2 = vpop.f32.mrf.mxu2 }
 0xa8c   :  { %v4316_v43 = vpop.f32.mrf.mxu0 }
 0xa8d   :  { %v4355_v0 = vpop.f32.mrf.mxu3 }
 0xa93   :  { %v4331_v54 = vpop.f32.mrf.mxu1  ;;  %v4344_v14 = vpop.f32.mrf.mxu2 }
 0xa94   :  { %v4318_v15 = vpop.f32.mrf.mxu0  ;;  %v4285_v54 = vadd.f32 %v4278_v23, %v4208_v36  ;;  %v4359_v14 = vadd.f32 %v4316_v43, %v4282_v8 }
 0xa95   :  { %v4357_v7 = vpop.f32.mrf.mxu3  ;;  %v4284_v15 = vadd.f32 %v4265_v53, %v4207_v4 }
 0xa96   :  { %v4360_v7 = vadd.f32 %v4329_v34, %v4283_v28  ;;  %v4362_v39 = vadd.f32 %v4355_v0, %v4285_v54 }
 0xa97   :  { %v4361_v21 = vadd.f32 %v4342_v2, %v4284_v15  ;;  %v1872_v15 = vpop.xlane.xlu2 %1871 }
 0xa98   :  { %v1878_v54 = vmul.f32 0.00390625, %v1872_v15 }
 0xa9b   :  { %v4406_v16 = vpop.f32.mrf.mxu1  ;;  %v4419_v60 = vpop.f32.mrf.mxu2 }
 0xa9c   :  { %v4393_v56 = vpop.f32.mrf.mxu0  ;;  %v4437_v27 = vadd.f32 %v4406_v16, %v4360_v7  ;;  %v4438_v33 = vadd.f32 %v4419_v60, %v4361_v21  ;;  %v1880_v7 = vmul.f32 %v1878_v54, %v1878_v54 }
 0xa9d   :  { %v4432_v47 = vpop.f32.mrf.mxu3  ;;  %v4436_v52 = vadd.f32 %v4393_v56, %v4359_v14  ;;  %v1879_v14 = vmul.f32 0.00390625, %v8994_v13 }
 0xa9e   :  { %v4439_v46 = vadd.f32 %v4432_v47, %v4362_v39 }
 0xaa3   :  { %v4408_v24 = vpop.f32.mrf.mxu1  ;;  %v4421_v18 = vpop.f32.mrf.mxu2 }
 0xaa4   :  { %v4395_v35 = vpop.f32.mrf.mxu0  ;;  %v11082_v18 = vld [vmem:[#allocation2_spill] sm:$0xff] }
 0xaa5   :  { %v4434_v50 = vpop.f32.mrf.mxu3 }
 0xaa6   :  { %v9020_v50 = vpack.i.bf16 %v8575_v38, %v11082_v18 }
 0xaab   :  { %v4483_v30 = vpop.f32.mrf.mxu1  ;;  %v4496_v24 = vpop.f32.mrf.mxu2 }
 0xaac   :  { %v4470_v35 = vpop.f32.mrf.mxu0  ;;  %v4514_v45 = vadd.f32 %v4483_v30, %v4437_v27  ;;  %v4515_v3 = vadd.f32 %v4496_v24, %v4438_v33 }
 0xaad   :  { %v4513_v25 = vadd.f32 %v4470_v35, %v4436_v52  ;;  %v4509_v19 = vpop.f32.mrf.mxu3  ;;  %v1899_v35 = vpop.xlane.xlu0 %1898 }
 0xaae   :  { %v4516_v17 = vadd.f32 %v4509_v19, %v4439_v46  ;;  %v4525_v1 = vadd.f32 %v4522_v32, %v4514_v45  ;;  %v4526_v28 = vadd.f32 %v4522_v32, %v4515_v3  ;;  %v1881_v46 = vsub.f32 %v1879_v14, %v1880_v7  ;;  %v1904_v45 = vpop.xlane.xlu2 %1903 }
 0xaaf   :  { %v4524_v5 = vadd.f32 %v4522_v32, %v4513_v25 }
 0xab0   :  { %v4529_v53 = vmul.f32 0.2, %v4525_v1  ;;  %v4527_v23 = vadd.f32 %v4522_v32, %v4516_v17  ;;  %v4530_v27 = vmul.f32 0.2, %v4526_v28  ;;  %v1884_v25 = vadd.f32 1e-05, %v1881_v46 }
 0xab1   :  { %v4528_v55 = vmul.f32 0.2, %v4524_v5 }
 0xab2   :  { %v8998_v34 = vmax.f32 %v4525_v1, %v4529_v53  ;;  %v4531_v39 = vmul.f32 0.2, %v4527_v23  ;;  %v9006_v60 = vmax.f32 %v4526_v28, %v4530_v27  ;;  %6724 = vrsqrt.f32 %v1884_v25 }
 0xab3   :  { %v8996_v43 = vmax.f32 %v4524_v5, %v4528_v55  ;;  %v4485_v21 = vpop.f32.mrf.mxu1  ;;  %v4498_v56 = vpop.f32.mrf.mxu2  ;;  %vm1891_vm3 = vweird.f32 %v1884_v25 }
 0xab4   :  { %v4472_v2 = vpop.f32.mrf.mxu0  ;;  %v4540_v0 = vmul.f32 %v8998_v34, %v8998_v34  ;;  %v9008_v47 = vmax.f32 %v4527_v23, %v4531_v39  ;;  %v4566_v4 = vmul.f32 %v9006_v60, %v9006_v60 }
 0xab5   :  { %v4539_v52 = vmul.f32 %v8996_v43, %v8996_v43  ;;  %v4536_v33 = vadd.f32 %v8998_v34, %v8996_v43  ;;  %v4511_v16 = vpop.f32.mrf.mxu3  ;;  %v9035_v30 = vpop.permute.xlu0 %6385 }
 0xab6   :  { %v4563_v10 = vadd.f32 %v9008_v47, %v9006_v60  ;;  %v4567_v36 = vmul.f32 %v9008_v47, %v9008_v47  ;;  %v9037_v16 = vpop.permute.xlu1 %6390 }
 0xab7   :  { %4537 = vadd.xlane.f32.xlu0 %v4536_v33  ;;  %v4541_v32 = vadd.f32 %v4540_v0, %v4539_v52 }
 0xab8   :  { %v4568_v8 = vadd.f32 %v4567_v36, %v4566_v4  ;;  %v6725_v19 = vpop.eup %6724  ;;  %v1882_v4 = vsub.f32 %v8849_v58, %v1878_v54  ;;  %v1883_v36 = vsub.f32 %v8851_v44, %v1878_v54 }
 0xab9   :  { %4542 = vadd.xlane.f32.xlu2 %v4541_v32  ;;  %v1886_v55 = vmul.f32 %v6725_v19, %v1884_v25  ;;  %vm1892_vm15 = vweird.f32 %v6725_v19 }
 0xaba   :  { %vm1893_vm7 = vmor %vm1891_vm3, %vm1892_vm15  ;;  %vm11089_vm15 = vcmp.lt.s32.totalorder %v6829_v22, 112 }
 0xabb   :  { %v1887_v28 = vmul.f32 %v6725_v19, %v1886_v55  ;;  %vm11090_vm3 = vmmov %vm11089_vm15 }
 0xabd   :  { %v1888_v23 = vmul.f32 0.5, %v1887_v28 }
 0xabf   :  { %4564 = vadd.xlane.f32.xlu0 %v4563_v10  ;;  %v1889_v52 = vsub.f32 1.5, %v1888_v23 }
 0xac1   :  { %v1890_v33 = vmul.f32 %v6725_v19, %v1889_v52 }
 0xac3   :  { %v1894_v32 = vsel %vm1893_vm7, %v6725_v19, %v1890_v33 }
 0xac4   :  { %v9043_v7 = vmul.f32 %v1894_v32, %v1882_v4  ;;  %v9045_v46 = vmul.f32 %v1894_v32, %v1883_v36 }
 0xac6   :  { %11083 = vst [vmem:[#allocation12_spill] sm:$0xff] %v9043_v7 }
 0xac7   :  { %11084 = vst [vmem:[#allocation7_spill] sm:$0xff] %v9045_v46 }
 0xad1   :  { %6400 = vrot.lane.b32.xlu2 %v9014_v37, %s6732_s13 }
 0xad3   :  { %6395 = vrot.lane.b32.xlu0 %v9020_v50, %s6732_s13 }
 0xadb   :  { %6410 = vrot.lane.b32.xlu0 %v8945_v9, %s6733_s2 }
 0xafa   :  { %4569 = vadd.xlane.f32.xlu2 %v4568_v8 }
 0xb12   :  { %6415 = vrot.lane.b32.xlu2 %v9020_v50, %s6733_s2 }
 0xb1a   :  { %6420 = vrot.lane.b32.xlu2 %v9014_v37, %s6733_s2 }
 0xb2a   :  { %v4538_v24 = vpop.xlane.xlu0 %4537 }
 0xb2b   :  { %v4544_v5 = vmul.f32 0.00390625, %v4538_v24 }
 0xb2c   :  { %v4543_v3 = vpop.xlane.xlu2 %4542 }
 0xb2d   :  { %v4545_v17 = vmul.f32 0.00390625, %v4543_v3  ;;  %v4546_v1 = vmul.f32 %v4544_v5, %v4544_v5  ;;  %v4548_v8 = vsub.f32 %v8996_v43, %v4544_v5  ;;  %v4549_v15 = vsub.f32 %v8998_v34, %v4544_v5 }
 0xb2e   :  { %v9061_v43 = vmul.f32 0.00390625, %v1899_v35  ;;  %v1906_v3 = vmul.f32 0.00390625, %v1904_v45 }
 0xb2f   :  { %v4547_v53 = vsub.f32 %v4545_v17, %v4546_v1  ;;  %v9073_v17 = vpop.permute.xlu1 %6405 }
 0xb30   :  { %v1907_v55 = vmul.f32 %v9061_v43, %v9061_v43  ;;  %v10495_v23 = vunpack.i.h.bf16 %v9073_v17 }
 0xb31   :  { %v4550_v13 = vadd.f32 1e-05, %v4547_v53  ;;  %v6388_v53 = vunpack.i.h.bf16 %v9035_v30 }
 0xb32   :  { %v4565_v39 = vpop.xlane.xlu0 %4564 }
 0xb33   :  { %6726 = vrsqrt.f32 %v4550_v13  ;;  %vm4557_vm12 = vweird.f32 %v4550_v13 }
 0xb34   :  { %v9063_v34 = vpop.permute.xlu2 %6400 }
 0xb35   :  { %v6403_v35 = vunpack.i.h.bf16 %v9063_v34  ;;  %v10496_v1 = vunpack.i.l.bf16 %v9063_v34 }
 0xb39   :  { %v6727_v2 = vpop.eup %6726 }
 0xb3a   :  { %v4552_v21 = vmul.f32 %v6727_v2, %v4550_v13  ;;  %vm4558_vm5 = vweird.f32 %v6727_v2  ;;  %v6387_v13 = vunpack.i.l.bf16 %v9035_v30 }
 0xb3b   :  { %vm4559_vm6 = vmor %vm4557_vm12, %vm4558_vm5  ;;  %vm11093_vm5 = vnez %v10531_v31 }
 0xb3c   :  { %v4553_v27 = vmul.f32 %v6727_v2, %v4552_v21  ;;  %v1908_v21 = vsub.f32 %v1906_v3, %v1907_v55  ;;  %v4634_v33 = vsel %vm11088_vm4, %v10496_v1, %v6387_v13 }
 0xb3e   :  { %v4554_v0 = vmul.f32 0.5, %v4553_v27  ;;  %v4635_v27 = vsel %vm11087_vm11, %v6403_v35, %v6388_v53  ;;  %vm11094_vm11 = vmmov %vm11088_vm4 }
 0xb40   :  { %v4555_v56 = vsub.f32 1.5, %v4554_v0 }
 0xb42   :  { %v4556_v10 = vmul.f32 %v6727_v2, %v4555_v56 }
 0xb44   :  { %v4560_v14 = vsel %vm4559_vm6, %v6727_v2, %v4556_v10  ;;  %v10494_v2 = vunpack.i.l.bf16 %v9073_v17 }
 0xb45   :  { %v9047_v25 = vmul.f32 %v4560_v14, %v4548_v8  ;;  %v9049_v24 = vmul.f32 %v4560_v14, %v4549_v15  ;;  %v9051_v19 = vpop.permute.xlu0 %6395  ;;  %v1911_v14 = vadd.f32 1e-05, %v1908_v21  ;;  %v6393_v15 = vunpack.i.h.bf16 %v9037_v16 }
 0xb46   :  { %v6392_v21 = vunpack.i.l.bf16 %v9037_v16 }
 0xb47   :  { %11085 = vst [vmem:[#allocation8_spill] sm:$0xff] %v9047_v25  ;;  %v9055_v58 = vpack.i.bf16 %v9045_v46, %v9049_v24  ;;  %v9059_v44 = vpack.i.bf16 %v9043_v7, %v9047_v25  ;;  %6728 = vrsqrt.f32 %v1911_v14  ;;  %vm1918_vm12 = vweird.f32 %v1911_v14 }
 0xb48   :  { %11086 = vst [vmem:[#allocation4_spill] sm:$0xff] %v9049_v24 }
 0xb49   :  { %6430 = vrot.lane.b32.xlu1 %v9055_v58, %s6732_s13  ;;  %6425 = vrot.lane.b32.xlu2 %v9059_v44, %s6732_s13 }
 0xb4d   :  { %v6411_v28 = vpop.permute.xlu0 %6410  ;;  %v6729_v3 = vpop.eup %6728 }
 0xb4e   :  { %v6413_v52 = vunpack.i.h.bf16 %v6411_v28  ;;  %v6412_v45 = vunpack.i.l.bf16 %v6411_v28  ;;  %v1913_v55 = vmul.f32 %v6729_v3, %v1911_v14  ;;  %vm1919_vm7 = vweird.f32 %v6729_v3 }
 0xb4f   :  { %vm1920_vm6 = vmor %vm1918_vm12, %vm1919_vm7  ;;  %vm11096_vm7 = vnez %v10753_v57  ;;  %vm11099_vm12 = vnez %v10746_v26 }
 0xb50   :  { %v4679_v30 = vsel %vm11089_vm15, %v10495_v23, %v6413_v52  ;;  %v4678_v0 = vsel %vm11090_vm3, %v10494_v2, %v6412_v45  ;;  %v1914_v28 = vmul.f32 %v6729_v3, %v1913_v55  ;;  %vm11095_vm15 = vmmov %vm11090_vm3 }
 0xb51   :  { %v9101_v56 = vsel %vm10974_vm10, %v4635_v27, %v4679_v30  ;;  %v9105_v32 = vsel %vm10974_vm10, %v4634_v33, %v4678_v0  ;;  %6440 = vrot.lane.b32.xlu1 %v9055_v58, %s6733_s2  ;;  %6435 = vrot.lane.b32.xlu2 %v9059_v44, %s6733_s2  ;;  %v9113_v10 = vsel %vm11093_vm5, %v4678_v0, %v4634_v33  ;;  %v9127_v33 = vmul.f32 0.00390625, %v4565_v39 }
 0xb52   :  { %11091 = vst [vmem:[#allocation30_spill] sm:$0xff] %v9101_v56  ;;  %v9117_v4 = vsel %vm11093_vm5, %v4679_v30, %v4635_v27  ;;  %v9121_v36 = vpack.i.bf16 %v9101_v56, %v9105_v32  ;;  %v1915_v0 = vmul.f32 0.5, %v1914_v28 }
 0xb53   :  { %11092 = vst [vmem:[#allocation31_spill] sm:$0xff] %v9105_v32  ;;  %v4573_v5 = vmul.f32 %v9127_v33, %v9127_v33 }
 0xb54   :  { %v1916_v54 = vsub.f32 1.5, %v1915_v0 }
 0xb56   :  { %v1917_v8 = vmul.f32 %v6729_v3, %v1916_v54  ;;  %v6398_v54 = vunpack.i.h.bf16 %v9051_v19 }
 0xb58   :  { %v1921_v1 = vsel %vm1920_vm6, %v6729_v3, %v1917_v8  ;;  %vm11100_vm6 = vmmov %vm11088_vm4 }
 0xb6d   :  { %v4570_v27 = vpop.xlane.xlu2 %4569 }
 0xb6e   :  { %v4572_v30 = vmul.f32 0.00390625, %v4570_v27  ;;  %v4631_v27 = vsel %vm11094_vm11, %v6388_v53, %v6393_v15  ;;  %vm11101_vm11 = vmmov %vm11088_vm4 }
 0xb70   :  { %v4574_v2 = vsub.f32 %v4572_v30, %v4573_v5  ;;  %v4630_v5 = vsel %vm11088_vm4, %v6387_v13, %v6392_v21  ;;  %v1909_v30 = vsub.f32 %v8847_v40, %v9061_v43  ;;  %v4627_v40 = vsel %vm11101_vm11, %v6393_v15, %v6398_v54  ;;  %vm11106_vm11 = vmmov %vm11090_vm3 }
 0xb72   :  { %v4577_v23 = vadd.f32 1e-05, %v4574_v2  ;;  %v6397_v2 = vunpack.i.l.bf16 %v9051_v19 }
 0xb74   :  { %6730 = vrsqrt.f32 %v4577_v23 }
 0xb75   :  { %v6416_v55 = vpop.permute.xlu2 %6415 }
 0xb76   :  { %v6418_v39 = vunpack.i.h.bf16 %v6416_v55  ;;  %v6417_v28 = vunpack.i.l.bf16 %v6416_v55 }
 0xb78   :  { %v4674_v16 = vsel %vm11095_vm15, %v6412_v45, %v6417_v28  ;;  %v4675_v14 = vsel %vm11090_vm3, %v6413_v52, %v6418_v39  ;;  %vm11103_vm15 = vmmov %vm11088_vm4 }
 0xb79   :  { %v9145_v0 = vsel %vm11096_vm7, %v4630_v5, %v4674_v16  ;;  %v9149_v53 = vsel %vm11096_vm7, %v4631_v27, %v4675_v14  ;;  %v9153_v13 = vsel %vm11099_vm12, %v4674_v16, %v4630_v5  ;;  %v9157_v19 = vsel %vm11099_vm12, %v4675_v14, %v4631_v27 }
 0xb7a   :  { %11097 = vst [vmem:[#allocation34_spill] sm:$0xff] %v9145_v0  ;;  %v6731_v45 = vpop.eup %6730  ;;  %v9161_v52 = vpack.i.bf16 %v9157_v19, %v9153_v13  ;;  %v9167_v3 = vpack.i.bf16 %v9149_v53, %v9145_v0  ;;  %v1910_v5 = vsub.f32 %v8853_v62, %v9061_v43  ;;  %v9177_v16 = vmul.f32 %v1921_v1, %v1909_v30 }
 0xb7b   :  { %11098 = vst [vmem:[#allocation35_spill] sm:$0xff] %v9149_v53  ;;  %v4579_v55 = vmul.f32 %v6731_v45, %v4577_v23  ;;  %v4623_v14 = vsel %vm11100_vm6, %v6398_v54, %v6403_v35  ;;  %v11102_v27 = vunpack.i.l.bf16 %v9063_v34  ;;  %v4626_v62 = vsel %vm11103_vm15, %v6392_v21, %v6397_v2  ;;  %vm11105_vm6 = vmmov %vm11090_vm3 }
 0xb7c   :  { %6465 = vrot.lane.b32.xlu2 %v9161_v52, %s6735_s0  ;;  %v6484_v35 = vpack.i.bf16 %v9117_v4, %v9113_v10  ;;  %v11104_v30 = vunpack.i.h.bf16 %v9073_v17  ;;  %vm11109_vm15 = vmmov %vm11090_vm3 }
 0xb7d   :  { %v4580_v8 = vmul.f32 %v6731_v45, %v4579_v55  ;;  %v6421_v32 = vpop.permute.xlu2 %6420  ;;  %v4622_v0 = vsel %vm11088_vm4, %v6397_v2, %v11102_v27  ;;  %vm11107_vm4 = vmmov %vm11090_vm3  ;;  %vm11110_vm3 = vnez %v10751_v61  ;;  %v9233_v27 = vmul.f32 %v1921_v1, %v1910_v5 }
 0xb7e   :  { %v6423_v53 = vunpack.i.h.bf16 %v6421_v32  ;;  %v6422_v56 = vunpack.i.l.bf16 %v6421_v32  ;;  %v11108_v32 = vunpack.i.l.bf16 %v9073_v17 }
 0xb7f   :  { %v4581_v43 = vmul.f32 0.5, %v4580_v8  ;;  %11118 = vst [vmem:[#allocation16_spill] sm:$0xff] %v9233_v27 }
 0xb80   :  { %v4683_v15 = vsel %vm11105_vm6, %v6423_v53, %v11104_v30  ;;  %v4670_v34 = vsel %vm11106_vm11, %v6417_v28, %v6422_v56  ;;  %v4671_v54 = vsel %vm11107_vm4, %v6418_v39, %v6423_v53  ;;  %v4682_v21 = vsel %vm11109_vm15, %v6422_v56, %v11108_v32 }
 0xb81   :  { %v4582_v2 = vsub.f32 1.5, %v4581_v43  ;;  %v9207_v8 = vsel %vm11110_vm3, %v4626_v62, %v4670_v34  ;;  %v9211_v55 = vsel %vm11112_vm1, %v4622_v0, %v4682_v21  ;;  %v9215_v28 = vsel %vm11110_vm3, %v4627_v40, %v4671_v54 }
 0xb82   :  { %11111 = vst [vmem:[#allocation14_spill] sm:$0xff] %v9207_v8  ;;  %v9219_v39 = vsel %vm11112_vm1, %v4623_v14, %v4683_v15  ;;  %vm11116_vm6 = vnez %v10536_v48  ;;  %vm11117_vm11 = vnez %v10538_v49  ;;  %vm4584_vm4 = vweird.f32 %v4577_v23 }
 0xb83   :  { %11113 = vst [vmem:[#allocation18_spill] sm:$0xff] %v9211_v55  ;;  %v9223_v17 = vsel %vm11116_vm6, %v4670_v34, %v4626_v62  ;;  %v9227_v56 = vsel %vm11116_vm6, %v4671_v54, %v4627_v40  ;;  %v9231_v53 = vsel %vm11117_vm11, %v4682_v21, %v4622_v0  ;;  %v4583_v43 = vmul.f32 %v6731_v45, %v4582_v2 }
 0xb84   :  { %11114 = vst [vmem:[#allocation15_spill] sm:$0xff] %v9215_v28  ;;  %v9237_v30 = vsel %vm11117_vm11, %v4683_v15, %v4623_v14  ;;  %v4575_v62 = vsub.f32 %v9006_v60, %v9127_v33  ;;  %v4576_v34 = vsub.f32 %v9008_v47, %v9127_v33  ;;  %vm11119_vm15 = vweird.f32 %v6731_v45  ;;  %6485 = vrot.lane.b32.xlu2 %v6484_v35, %s6736_s16 }
 0xb85   :  { %11115 = vst [vmem:[#allocation19_spill] sm:$0xff] %v9219_v39  ;;  %vm4586_vm2 = vmor %vm4584_vm4, %vm11119_vm15  ;;  %v9251_v5 = vpack.i.bf16 %v9219_v39, %v9211_v55  ;;  %v9255_v60 = vpack.i.bf16 %v9215_v28, %v9207_v8  ;;  %v6474_v21 = vpack.i.bf16 %v9227_v56, %v9223_v17  ;;  %v6479_v2 = vpack.i.bf16 %v9237_v30, %v9231_v53 }
 0xb86   :  { %v4587_v0 = vsel %vm4586_vm2, %v6731_v45, %v4583_v43  ;;  %vm11122_vm2 = vcmp.lt.s32.totalorder %v6829_v22, 112  ;;  %vm11123_vm4 = vcmp.lt.s32.totalorder %v6829_v22, 16  ;;  %v11145_v48 = vpack.c.bf16 %v9237_v30, %v9231_v53 }
 0xb87   :  { %v9257_v47 = vmul.f32 %v4587_v0, %v4575_v62  ;;  %v9259_v33 = vmul.f32 %v4587_v0, %v4576_v34  ;;  %vm11124_vm15 = vmmov %vm11122_vm2  ;;  %v11147_v53 = vpack.c.bf16 %v9227_v56, %v9223_v17 }
 0xb88   :  { %vm11126_vm13 = vmmov %vm11123_vm4 }
 0xb89   :  { %11120 = vst [vmem:[#allocation20_spill] sm:$0xff] %v9257_v47  ;;  %v9267_v45 = vpack.i.bf16 %v9233_v27, %v9259_v33  ;;  %v9271_v15 = vpack.i.bf16 %v9177_v16, %v9257_v47 }
 0xb8a   :  { %11121 = vst [vmem:[#allocation17_spill] sm:$0xff] %v9259_v33 }
 0xb8b   :  { %6450 = vrot.lane.b32.xlu0 %v9267_v45, %s6732_s13  ;;  %6445 = vrot.lane.b32.xlu1 %v9271_v15, %s6732_s13 }
 0xb93   :  { %6455 = vrot.lane.b32.xlu0 %v9271_v15, %s6733_s2  ;;  %6470 = vrot.lane.b32.xlu1 %v9267_v45, %s6733_s2 }
 0xb9b   :  { %6460 = vrot.lane.b32.xlu0 %v6484_v35, %s6735_s0  ;;  %6475 = vrot.lane.b32.xlu1 %v6474_v21, %s6735_s0 }
 0xba3   :  { %6490 = vrot.lane.b32.xlu0 %v6474_v21, %s6736_s16  ;;  %6480 = vrot.lane.b32.xlu1 %v6479_v2, %s6735_s0  ;;  %v6426_v62 = vpop.permute.xlu2 %6425 }
 0xba4   :  { %v6428_v35 = vunpack.i.h.bf16 %v6426_v62  ;;  %v6427_v28 = vunpack.i.l.bf16 %v6426_v62 }
 0xbab   :  { %6495 = vrot.lane.b32.xlu1 %v6479_v2, %s6736_s16  ;;  %v6436_v0 = vpop.permute.xlu2 %6435 }
 0xbac   :  { %v6438_v1 = vunpack.i.h.bf16 %v6436_v0  ;;  %v6437_v55 = vunpack.i.l.bf16 %v6436_v0 }
 0xbbb   :  { %v6431_v43 = vpop.permute.xlu1 %6430 }
 0xbbc   :  { %v6433_v39 = vunpack.i.h.bf16 %v6431_v43  ;;  %v6432_v21 = vunpack.i.l.bf16 %v6431_v43 }
 0xbc3   :  { %v6441_v34 = vpop.permute.xlu1 %6440 }
 0xbc4   :  { %v6443_v40 = vunpack.i.h.bf16 %v6441_v34  ;;  %v6442_v14 = vunpack.i.l.bf16 %v6441_v34 }
 0xbc6   :  { %v4681_v24 = vsel %vm11122_vm2, %v6438_v1, %v6443_v40  ;;  %v4680_v46 = vsel %vm11124_vm15, %v6437_v55, %v6442_v14  ;;  %vm11129_vm2 = vmmov %vm11123_vm4 }
 0xbc7   :  { %v4633_v31 = vsel %vm11129_vm2, %v6428_v35, %v6433_v39  ;;  %vm11133_vm15 = vmmov %vm11129_vm2 }
 0xbfd   :  { %v6446_v32 = vpop.permute.xlu1 %6445  ;;  %v6451_v54 = vpop.permute.xlu0 %6450 }
 0xbfe   :  { %v6453_v23 = vunpack.i.h.bf16 %v6451_v54  ;;  %v6452_v8 = vunpack.i.l.bf16 %v6451_v54  ;;  %v6448_v43 = vunpack.i.h.bf16 %v6446_v32  ;;  %v6447_v7 = vunpack.i.l.bf16 %v6446_v32 }
 0xc00   :  { %v4637_v2 = vsel %vm11123_vm4, %v6453_v23, %v6428_v35  ;;  %v4636_v54 = vsel %vm11126_vm13, %v6452_v8, %v6427_v28  ;;  %vm11128_vm13 = vmmov %vm11123_vm4  ;;  %v4624_v35 = vsel %vm11133_vm15, %v6447_v7, %v6452_v8 }
 0xc01   :  { %v4698_v34 = vsel %vm11093_vm5, %v4681_v24, %v4637_v2  ;;  %v9304_v25 = vsel %vm10974_vm10, %v4637_v2, %v4681_v24  ;;  %v4694_v62 = vsel %vm11093_vm5, %v4680_v46, %v4636_v54  ;;  %v9312_v0 = vsel %vm10974_vm10, %v4636_v54, %v4680_v46  ;;  %vm11130_vm10 = vmmov %vm11129_vm2 }
 0xc02   :  { %11125 = vst [vmem:[#allocation21_spill] sm:$0xff] %v9304_v25  ;;  %v5117_v33 = vpack.c.bf16 %v4698_v34, %v4694_v62  ;;  %v6499_v27 = vpack.i.bf16 %v4698_v34, %v4694_v62  ;;  %v9316_v47 = vpack.i.bf16 %v9304_v25, %v9312_v0  ;;  %v4632_v2 = vsel %vm11128_vm13, %v6427_v28, %v6432_v21  ;;  %vm11131_vm5 = vmmov %vm11129_vm2 }
 0xc03   :  { %11127 = vst [vmem:[#allocation22_spill] sm:$0xff] %v9312_v0  ;;  %v4629_v32 = vsel %vm11130_vm10, %v6433_v39, %v6448_v43  ;;  %v4628_v24 = vsel %vm11131_vm5, %v6432_v21, %v6447_v7  ;;  %vm11132_vm4 = vmmov %vm11129_vm2  ;;  %vm11134_vm13 = vcmp.lt.s32.totalorder %v6829_v22, 112 }
 0xc04   :  { %5131 = vmatpush.bf16.msra.mxu0 %v5117_v33  ;;  %6500 = vrot.lane.b32.xlu1 %v6499_v27, %s6735_s0  ;;  %v4625_v28 = vsel %vm11132_vm4, %v6448_v43, %v6453_v23  ;;  %vm11135_vm2 = vmmov %vm11134_vm13 }
 0xc05   :  { %v6471_v29 = vpop.permute.xlu1 %6470  ;;  %v6456_v46 = vpop.permute.xlu0 %6455  ;;  %vm11136_vm10 = vmmov %vm11135_vm2 }
 0xc06   :  { %v6473_v34 = vunpack.i.h.bf16 %v6471_v29  ;;  %v6472_v54 = vunpack.i.l.bf16 %v6471_v29  ;;  %v6458_v62 = vunpack.i.h.bf16 %v6456_v46  ;;  %v6457_v33 = vunpack.i.l.bf16 %v6456_v46  ;;  %vm11137_vm8 = vmmov %vm11135_vm2 }
 0xc08   :  { %v4685_v0 = vsel %vm11134_vm13, %v6473_v34, %v6438_v1  ;;  %v4684_v25 = vsel %vm11135_vm2, %v6472_v54, %v6437_v55  ;;  %v4673_v39 = vsel %vm11136_vm10, %v6458_v62, %v6473_v34  ;;  %v4677_v29 = vsel %vm11137_vm8, %v6443_v40, %v6458_v62 }
 0xc09   :  { %v4697_v21 = vsel %vm11117_vm11, %v4684_v25, %v4624_v35  ;;  %v4701_v23 = vsel %vm11117_vm11, %v4685_v0, %v4625_v28  ;;  %v9347_v7 = vsel %vm11112_vm1, %v4624_v35, %v4684_v25  ;;  %v9351_v8 = vsel %vm11112_vm1, %v4625_v28, %v4685_v0  ;;  %vm11141_vm1 = vmmov %vm11135_vm2 }
 0xc0a   :  { %v11138_v55 = vpack.c.bf16 %v9117_v4, %v9113_v10  ;;  %v4699_v1 = vsel %vm11099_vm12, %v4677_v29, %v4633_v31  ;;  %v4700_v40 = vsel %vm11116_vm6, %v4673_v39, %v4629_v32  ;;  %v9362_v49 = vsel %vm11096_vm7, %v4633_v31, %v4677_v29  ;;  %vm11142_vm8 = vmmov %vm11141_vm1 }
 0xc0b   :  { %11139 = vst [vmem:[#allocation23_spill] sm:$0xff] %v9362_v49  ;;  %v9366_v25 = vsel %vm11110_vm3, %v4629_v32, %v4673_v39  ;;  %v4672_v63 = vsel %vm11141_vm1, %v6457_v33, %v6472_v54  ;;  %v4676_v10 = vsel %vm11142_vm8, %v6442_v14, %v6457_v33  ;;  %v5120_v4 = vpack.c.bf16 %v4701_v23, %v4697_v21 }
 0xc0c   :  { %5132 = vmatpush.bf16.msra.mxu0 %v11138_v55  ;;  %11140 = vst [vmem:[#allocation24_spill] sm:$0xff] %v9366_v25  ;;  %v4695_v43 = vsel %vm11099_vm12, %v4676_v10, %v4632_v2  ;;  %v4696_v0 = vsel %vm11116_vm6, %v4672_v63, %v4628_v24  ;;  %v9378_v31 = vsel %vm11096_vm7, %v4632_v2, %v4676_v10  ;;  %vm5121_vm7 = vcmask 261120  }
 0xc0d   :  { %11143 = vst [vmem:[#allocation25_spill] sm:$0xff] %v9378_v31  ;;  %v9382_v46 = vsel %vm11110_vm3, %v4628_v24, %v4672_v63  ;;  %v5118_v32 = vpack.c.bf16 %v4699_v1, %v4695_v43  ;;  %v5119_v34 = vpack.c.bf16 %v4700_v40, %v4696_v0  ;;  %5170 = vmatpush.bf16.msra.mxu3 %v5120_v4  ;;  %vm11148_vm12 = vcmp.lt.s32.totalorder %v6829_v22, 127 }
 0xc0e   :  { %11144 = vst [vmem:[#allocation26_spill] sm:$0xff] %v9382_v46  ;;  %v6509_v54 = vpack.i.bf16 %v4700_v40, %v4696_v0  ;;  %v6504_v14 = vpack.i.bf16 %v4699_v1, %v4695_v43  ;;  %6520 = vrot.lane.b32.xlu1 %v6499_v27, %s6736_s16  ;;  %v6659_v26 = vpack.i.bf16 %v9351_v8, %v9347_v7  ;;  %vm11149_vm3 = vmmov %vm11148_vm12  ;;  %vm11150_vm6 = vcmp.lt.s32.totalorder %v6829_v22, 1 }
 0xc0f   :  { %5144 = vmatpush.bf16.msra.mxu1 %v5118_v32  ;;  %5157 = vmatpush.bf16.msra.mxu2 %v5119_v34  ;;  %v6649_v61 = vpack.i.bf16 %v9362_v49, %v9378_v31  ;;  %v6654_v57 = vpack.i.bf16 %v9366_v25, %v9382_v46  ;;  %v11146_v24 = vpack.c.bf16 %v9157_v19, %v9153_v13  ;;  %v9478_v13 = vpop.permute.xlu0 %6460  ;;  %vm11151_vm11 = vmmov %vm11150_vm6 }
 0xc10   :  { %6510 = vrot.lane.b32.xlu2 %v6509_v54, %s6735_s0  ;;  %6505 = vrot.lane.b32.xlu0 %v6504_v14, %s6735_s0  ;;  %v6514_v62 = vpack.i.bf16 %v4701_v23, %v4697_v21  ;;  %vm11152_vm5 = vmmov %vm11149_vm3 }
 0xc11   :  { %5171 = vmatpush.bf16.msra.mxu3 %v11145_v48  ;;  %vm11153_vm4 = vmmov %vm11149_vm3 }
 0xc12   :  { %vm11154_vm15 = vmmov %vm11150_vm6 }
 0xc13   :  { %5145 = vmatpush.bf16.msra.mxu1 %v11146_v24  ;;  %5158 = vmatpush.bf16.msra.mxu2 %v11147_v53  ;;  %vm11155_vm13 = vmmov %vm11150_vm6 }
 0xc14   :  { %vm11156_vm2 = vmmov %vm11150_vm6 }
 0xc15   :  { %vm11157_vm10 = vmmov %vm11149_vm3 }
 0xc16   :  { %6540 = vrot.lane.b32.xlu1 %v9055_v58, %s6735_s0  ;;  %vm11158_vm1 = vmmov %vm11149_vm3 }
 0xc17   :  { %v9495_v17 = vpop.permute.xlu0 %6490  ;;  %vm11159_vm8 = vmmov %vm11156_vm2 }
 0xc18   :  { %6525 = vrot.lane.b32.xlu2 %v6509_v54, %s6736_s16  ;;  %6515 = vrot.lane.b32.xlu0 %v6514_v62, %s6735_s0  ;;  %v10522_v54 = vunpack.i.l.bf16 %v9478_v13 }
 0xc1e   :  { %6555 = vrot.lane.b32.xlu1 %v9059_v44, %s6736_s16 }
 0xc20   :  { %6545 = vrot.lane.b32.xlu2 %v9271_v15, %s6735_s0  ;;  %6530 = vrot.lane.b32.xlu0 %v6514_v62, %s6736_s16 }
 0xc26   :  { %6575 = vrot.lane.b32.xlu1 %v8945_v9, %s6735_s0 }
 0xc28   :  { %6560 = vrot.lane.b32.xlu2 %v6504_v14, %s6736_s16  ;;  %6535 = vrot.lane.b32.xlu0 %v9161_v52, %s6736_s16 }
 0xc2e   :  { %6590 = vrot.lane.b32.xlu1 %v8923_v42, %s6736_s16 }
 0xc30   :  { %6565 = vrot.lane.b32.xlu2 %v9271_v15, %s6736_s16  ;;  %6550 = vrot.lane.b32.xlu0 %v9267_v45, %s6735_s0 }
 0xc36   :  { %6605 = vrot.lane.b32.xlu1 %v9059_v44, %s6735_s0 }
 0xc38   :  { %6580 = vrot.lane.b32.xlu2 %v9020_v50, %s6735_s0  ;;  %6570 = vrot.lane.b32.xlu0 %v9267_v45, %s6736_s16 }
 0xc3e   :  { %6620 = vrot.lane.b32.xlu1 %v8945_v9, %s6736_s16  ;;  %v9452_v9 = vpop.permute.xlu2 %6465 }
 0xc3f   :  { %v6467_v34 = vunpack.i.l.bf16 %v9452_v9 }
 0xc40   :  { %6595 = vrot.lane.b32.xlu2 %v9020_v50, %s6736_s16  ;;  %6585 = vrot.lane.b32.xlu0 %v9014_v37, %s6735_s0  ;;  %v9458_v50 = vpop.permute.xlu1 %6475 }
 0xc46   :  { %6635 = vrot.lane.b32.xlu1 %v9251_v5, %s6735_s0 }
 0xc48   :  { %6610 = vrot.lane.b32.xlu2 %v9055_v58, %s6736_s16  ;;  %6600 = vrot.lane.b32.xlu0 %v9014_v37, %s6736_s16  ;;  %v9467_v37 = vpop.permute.xlu1 %6480 }
 0xc49   :  { %v6483_v53 = vunpack.i.h.bf16 %v9467_v37  ;;  %v6482_v62 = vunpack.i.l.bf16 %v9467_v37  ;;  %v10520_v37 = vunpack.i.h.bf16 %v9495_v17 }
 0xc4e   :  { %6660 = vrot.lane.b32.xlu1 %v6659_v26, %s6735_s0 }
 0xc50   :  { %6625 = vrot.lane.b32.xlu2 %v9167_v3, %s6735_s0  ;;  %6615 = vrot.lane.b32.xlu0 %v8923_v42, %s6735_s0  ;;  %v9465_v42 = vpop.permute.xlu2 %6485  ;;  %v9476_v44 = vpop.permute.xlu1 %6495 }
 0xc56   :  { %6675 = vrot.lane.b32.xlu1 %v6659_v26, %s6736_s16  ;;  %v6478_v26 = vunpack.i.h.bf16 %v9458_v50 }
 0xc58   :  { %6640 = vrot.lane.b32.xlu2 %v9121_v36, %s6736_s16  ;;  %6630 = vrot.lane.b32.xlu0 %v9255_v60, %s6735_s0 }
 0xc5e   :  { %6680 = vrot.lane.b32.xlu1 %v9251_v5, %s6736_s16  ;;  %v5719_v5 = vld [vmem:[%s10430_s8] sm:$0xff] }
 0xc60   :  { %6650 = vrot.lane.b32.xlu2 %v6649_v61, %s6735_s0  ;;  %6645 = vrot.lane.b32.xlu0 %v9255_v60, %s6736_s16 }
 0xc66   :  { %6695 = vrot.lane.b32.xlu1 %v9121_v36, %s6735_s0  ;;  %v6104_v36 = vld [vmem:[%s10429_s7 + $0x4] sm:$0xf] }
 0xc67   :  { %6107 = vmatmul.msk.bf16.vlgmr.msra.gmra.mxu2 %vm5121_vm7, %v6104_v36  ;;  %6108 = vmatmul.msk.bf16.vlgmr.msra.gmra.mxu3 %vm5121_vm7, %v6104_v36 }
 0xc68   :  { %6665 = vrot.lane.b32.xlu2 %v9316_v47, %s6736_s16  ;;  %6655 = vrot.lane.b32.xlu0 %v6654_v57, %s6735_s0 }
 0xc69   :  { %6105 = vmatmul.msk.bf16.vlgmr.msra.gmra.mxu0 %vm5121_vm7, %v6104_v36  ;;  %6106 = vmatmul.msk.bf16.vlgmr.msra.gmra.mxu1 %vm5121_vm7, %v6104_v36  ;;  %v6498_v36 = vunpack.i.h.bf16 %v9476_v44 }
 0xc6a   :  { %v9474_v58 = vpop.permute.xlu2 %6510 }
 0xc70   :  { %6685 = vrot.lane.b32.xlu2 %v9316_v47, %s6735_s0  ;;  %6670 = vrot.lane.b32.xlu0 %v6654_v57, %s6736_s16 }
 0xc72   :  { %v9483_v19 = vpop.permute.xlu2 %6525 }
 0xc73   :  { %v6528_v47 = vunpack.i.h.bf16 %v9483_v19  ;;  %v10523_v45 = vunpack.i.l.bf16 %v9483_v19  ;;  %v11169_v49 = vunpack.i.l.bf16 %v9483_v19 }
 0xc76   :  { %v6501_v52 = vpop.permute.xlu1 %6500 }
 0xc77   :  { %v6503_v29 = vunpack.i.h.bf16 %v6501_v52  ;;  %v6502_v21 = vunpack.i.l.bf16 %v6501_v52  ;;  %v6497_v52 = vunpack.i.l.bf16 %v9476_v44  ;;  %v10521_v44 = vunpack.i.l.bf16 %v9495_v17 }
 0xc78   :  { %6700 = vrot.lane.b32.xlu2 %v9167_v3, %s6736_s16  ;;  %6690 = vrot.lane.b32.xlu0 %v6649_v61, %s6736_s16  ;;  %v6477_v61 = vunpack.i.l.bf16 %v9458_v50 }
 0xc7a   :  { %v9497_v56 = vpop.permute.xlu2 %6545 }
 0xc80   :  { %5722 = vperm.xlu0 %6211, %v5719_v5   ;;  %v9502_v60 = vpop.permute.xlu1 %6520 }
 0xc81   :  { %v6523_v0 = vunpack.i.h.bf16 %v9502_v60  ;;  %v6522_v32 = vunpack.i.l.bf16 %v9502_v60 }
 0xc82   :  { %v6561_v15 = vpop.permute.xlu2 %6560  ;;  %v9506_v28 = vpop.permute.xlu0 %6505 }
 0xc83   :  { %v6563_v3 = vunpack.i.h.bf16 %v6561_v15  ;;  %v6562_v35 = vunpack.i.l.bf16 %v6561_v15  ;;  %v6508_v33 = vunpack.i.h.bf16 %v9506_v28  ;;  %v6507_v39 = vunpack.i.l.bf16 %v9506_v28 }
 0xc85   :  { %v9514_v23 = vsel %vm11148_vm12, %v6562_v35, %v10523_v45  ;;  %v9520_v55 = vsel %vm11149_vm3, %v6563_v3, %v6528_v47  ;;  %v9524_v1 = vsel %vm11150_vm6, %v6502_v21, %v6507_v39  ;;  %v9528_v40 = vsel %vm11151_vm11, %v6503_v29, %v6508_v33  ;;  %vm11160_vm12 = vmmov %vm11156_vm2 }
 0xc86   :  { %v4823_v63 = vsel %vm6989_vm9, %v9514_v23, %v9524_v1  ;;  %v4827_v10 = vsel %vm6989_vm9, %v9520_v55, %v9528_v40  ;;  %v9554_v5 = vsel %vm11152_vm5, %v6523_v0, %v6563_v3  ;;  %v9558_v60 = vsel %vm11153_vm4, %v6522_v32, %v6562_v35  ;;  %vm11161_vm3 = vmmov %vm11156_vm2 }
 0xc87   :  { %v5108_v4 = vpack.c.bf16 %v4827_v10, %v4823_v63  ;;  %v6468_v35 = vunpack.i.h.bf16 %v9452_v9  ;;  %v6463_v10 = vunpack.i.h.bf16 %v9478_v13  ;;  %v9598_v9 = vsel %vm11158_vm1, %v10521_v44, %v6497_v52  ;;  %vm11162_vm6 = vmmov %vm11156_vm2 }
 0xc88   :  { %v9538_v43 = vpop.permute.xlu1 %6540  ;;  %v9608_v2 = vsel %vm11160_vm12, %v6467_v34, %v6477_v61  ;;  %v9612_v30 = vsel %vm11161_vm3, %v6478_v26, %v6483_v53  ;;  %v9616_v27 = vsel %vm11162_vm6, %v6477_v61, %v6482_v62  ;;  %vm11163_vm11 = vmmov %vm11158_vm1  ;;  %v6512_v44 = vunpack.i.l.bf16 %v9474_v58 }
 0xc89   :  { %5199 = vmatpush.bf16.msrb.mxu1 %v5108_v4  ;;  %v9586_v4 = vsel %vm11156_vm2, %v10522_v54, %v6467_v34  ;;  %vm11164_vm5 = vmmov %vm11158_vm1  ;;  %vm11172_vm3 = vnez %v10763_v6 }
 0xc8a   :  { %v9544_v14 = vpop.permute.xlu2 %6565  ;;  %v6516_v48 = vpop.permute.xlu0 %6515  ;;  %vm11165_vm4 = vmmov %vm11156_vm2 }
 0xc8b   :  { %v6518_v57 = vunpack.i.h.bf16 %v6516_v48  ;;  %v6517_v24 = vunpack.i.l.bf16 %v6516_v48  ;;  %v9592_v48 = vsel %vm11157_vm10, %v10520_v37, %v6498_v36  ;;  %vm11168_vm10 = vmmov %vm11158_vm1 }
 0xc8c   :  { %vm11171_vm12 = vmmov %vm11158_vm1 }
 0xc8d   :  { %v9562_v50 = vsel %vm11154_vm15, %v6517_v24, %v6502_v21  ;;  %v9566_v15 = vsel %vm11155_vm13, %v6518_v57, %v6503_v29  ;;  %v10525_v21 = vunpack.i.h.bf16 %v9465_v42  ;;  %v10524_v29 = vunpack.i.l.bf16 %v9465_v42  ;;  %vm11166_vm15 = vmmov %vm11156_vm2 }
 0xc8e   :  { %v4822_v28 = vsel %vm6985_vm0, %v9558_v60, %v9562_v50  ;;  %v4826_v3 = vsel %vm6985_vm0, %v9554_v5, %v9566_v15  ;;  %vm11167_vm13 = vmmov %vm11156_vm2 }
 0xc8f   :  { %v5107_v63 = vpack.c.bf16 %v4826_v3, %v4822_v28  ;;  %v9604_v3 = vsel %vm11159_vm8, %v6468_v35, %v6478_v26  ;;  %v9622_v37 = vsel %vm11163_vm11, %v6498_v36, %v10525_v21  ;;  %v9628_v34 = vsel %vm11164_vm5, %v6497_v52, %v10524_v29  ;;  %vm11170_vm8 = vmmov %vm11158_vm1 }
 0xc90   :  { %v9600_v28 = vpop.permute.xlu1 %6555  ;;  %v6513_v26 = vunpack.i.h.bf16 %v9474_v58  ;;  %v4816_v36 = vsel %vm6993_vm14, %v9598_v9, %v9608_v2  ;;  %v4820_v52 = vsel %vm6993_vm14, %v9592_v48, %v9604_v3  ;;  %v4756_v58 = vsel %vm11166_vm15, %v6507_v39, %v6512_v44  ;;  %vm11173_vm6 = vmmov %vm11156_vm2 }
 0xc91   :  { %5186 = vmatpush.bf16.msrb.mxu0 %v5107_v63  ;;  %vm11174_vm11 = vmmov %vm11156_vm2 }
 0xc92   :  { %v9632_v54 = vpop.permute.xlu2 %6580  ;;  %v6531_v61 = vpop.permute.xlu0 %6530  ;;  %v4757_v29 = vsel %vm11165_vm4, %v6508_v33, %v6513_v26  ;;  %v4753_v21 = vsel %vm11167_vm13, %v6513_v26, %v6518_v57  ;;  %v4763_v26 = vsel %vm11174_vm11, %v6483_v53, %v6463_v10  ;;  %vm11176_vm5 = vmmov %vm11156_vm2  ;;  %vm11177_vm4 = vnez %v10764_v41 }
 0xc93   :  { %v6533_v63 = vunpack.i.h.bf16 %v6531_v61  ;;  %v6532_v45 = vunpack.i.l.bf16 %v6531_v61  ;;  %v4752_v61 = vsel %vm11156_vm2, %v6512_v44, %v6517_v24  ;;  %vm11192_vm11 = vmmov %vm11176_vm5 }
 0xc95   :  { %v4801_v31 = vsel %vm11168_vm10, %v6528_v47, %v6533_v63  ;;  %v4800_v46 = vsel %vm11158_vm1, %v11169_v49, %v6532_v45  ;;  %v4812_v33 = vsel %vm11170_vm8, %v6532_v45, %v6522_v32  ;;  %v4813_v39 = vsel %vm11171_vm12, %v6533_v63, %v6523_v0  ;;  %vm11185_vm10 = vmmov %vm11158_vm1 }
 0xc96   :  { %v4824_v57 = vsel %vm6993_vm14, %v4800_v46, %v4756_v58  ;;  %v4828_v24 = vsel %vm6993_vm14, %v4801_v31, %v4757_v29  ;;  %v4825_v47 = vsel %vm11172_vm3, %v4812_v33, %v4752_v61  ;;  %v4829_v19 = vsel %vm11172_vm3, %v4813_v39, %v4753_v21  ;;  %vm11188_vm8 = vmmov %vm11158_vm1 }
 0xc97   :  { %v5109_v44 = vpack.c.bf16 %v4828_v24, %v4824_v57  ;;  %v5110_v49 = vpack.c.bf16 %v4829_v19, %v4825_v47  ;;  %v4817_v45 = vsel %vm11172_vm3, %v9628_v34, %v9616_v27  ;;  %v4821_v0 = vsel %vm11172_vm3, %v9622_v37, %v9612_v30  ;;  %vm11190_vm12 = vmmov %vm11158_vm1 }
 0xc98   :  { %v9680_v32 = vsel %vm11173_vm6, %v6463_v10, %v6468_v35  ;;  %v11175_v63 = vunpack.i.l.bf16 %v9478_v13  ;;  %v9688_v24 = vpop.permute.xlu1 %6575  ;;  %v4840_v47 = vsel %vm11177_vm4, %v4756_v58, %v4800_v46  ;;  %v4844_v19 = vsel %vm11177_vm4, %v4757_v29, %v4801_v31  ;;  %v11178_v35 = vld [vmem:[#allocation13_spill] sm:$0xff]  ;;  %vm11191_vm6 = vmmov %vm11176_vm5 }
 0xc99   :  { %5212 = vmatpush.bf16.msrb.mxu2 %v5109_v44  ;;  %5225 = vmatpush.bf16.msrb.mxu3 %v5110_v49  ;;  %vm11179_vm15 = vnez %v11178_v35  ;;  %v4832_v46 = vsel %vm11177_vm4, %v9608_v2, %v9598_v9  ;;  %v4836_v31 = vsel %vm11177_vm4, %v9604_v3, %v9592_v48  ;;  %v11182_v2 = vld [vmem:[#allocation9_spill] sm:$0xff]  ;;  %v11184_v3 = vunpack.i.h.bf16 %v9465_v42 }
 0xc9a   :  { %v4762_v57 = vsel %vm11176_vm5, %v6482_v62, %v11175_v63  ;;  %v4841_v25 = vsel %vm11179_vm15, %v4752_v61, %v4812_v33  ;;  %v4845_v53 = vsel %vm11179_vm15, %v4753_v21, %v4813_v39  ;;  %v9698_v13 = vpop.permute.xlu2 %6595  ;;  %v6536_v10 = vpop.permute.xlu0 %6535  ;;  %v5105_v62 = vpack.c.bf16 %v4820_v52, %v4816_v36  ;;  %v11180_v21 = vld [vmem:[#allocation10_spill] sm:$0xff]  ;;  %vm11193_vm5 = vmmov %vm11158_vm1 }
 0xc9b   :  { %v5106_v63 = vpack.c.bf16 %v4821_v0, %v4817_v45  ;;  %v6538_v29 = vunpack.i.h.bf16 %v6536_v10  ;;  %v6537_v58 = vunpack.i.l.bf16 %v6536_v10  ;;  %vm11181_vm13 = vnez %v11180_v21  ;;  %v6143_v21 = vld [vmem:[%s10429_s7 + $0x20] sm:$0xf] }
 0xc9c   :  { %v4839_v61 = vsel %vm11181_vm13, %v9524_v1, %v9514_v23  ;;  %v4843_v36 = vsel %vm11181_vm13, %v9528_v40, %v9520_v55  ;;  %v5240_v52 = vpack.c.bf16 %v4844_v19, %v4840_v47  ;;  %v5241_v33 = vpack.c.bf16 %v4845_v53, %v4841_v25 }
 0xc9d   :  { %vm11183_vm2 = vnez %v11182_v2  ;;  %v4807_v23 = vsel %vm11185_vm10, %v11184_v3, %v6538_v29  ;;  %v11186_v1 = vunpack.i.l.bf16 %v9495_v17  ;;  %v11187_v55 = vunpack.i.h.bf16 %v9495_v17  ;;  %5213 = vmatpush.bf16.msrb.mxu2 %v5105_v62  ;;  %5226 = vmatpush.bf16.msrb.mxu3 %v5106_v63  ;;  %vm11194_vm10 = vmmov %vm11158_vm1 }
 0xc9e   :  { %v4838_v9 = vsel %vm11183_vm2, %v9562_v50, %v9558_v60  ;;  %v4842_v48 = vsel %vm11183_vm2, %v9566_v15, %v9554_v5  ;;  %v11189_v60 = vunpack.i.l.bf16 %v9465_v42  ;;  %v5102_v50 = vld [vmem:[%s10429_s7] sm:$0xf]  ;;  %v4818_v17 = vsel %vm6985_vm0, %v4807_v23, %v4763_v26 }
 0xc9f   :  { %v4802_v25 = vsel %vm11158_vm1, %v6537_v58, %v11186_v1  ;;  %v4803_v40 = vsel %vm11188_vm8, %v6538_v29, %v11187_v55  ;;  %v4833_v49 = vsel %vm11179_vm15, %v9616_v27, %v9628_v34  ;;  %v4837_v45 = vsel %vm11179_vm15, %v9612_v30, %v9622_v37  ;;  %vm11195_vm8 = vmmov %vm11158_vm1 }
 0xca0   :  { %v4806_v5 = vsel %vm11190_vm12, %v11189_v60, %v6537_v58  ;;  %v4815_v42 = vsel %vm6989_vm9, %v4802_v25, %v9586_v4  ;;  %v4819_v44 = vsel %vm6989_vm9, %v4803_v40, %v9680_v32  ;;  %v9761_v47 = vpop.permute.xlu1 %6590  ;;  %v5238_v19 = vpack.c.bf16 %v4842_v48, %v4838_v9  ;;  %6111 = vmatmul.msk.bf16.vlgmr.msrb.gmra.mxu2 %vm5121_vm7, %v5102_v50  ;;  %vm11196_vm12 = vmmov %vm11191_vm6 }
 0xca1   :  { %5277 = vmatpush.bf16.msra.mxu2 %v5240_v52  ;;  %v4814_v15 = vsel %vm6985_vm0, %v4806_v5, %v4762_v57  ;;  %5290 = vmatpush.bf16.msra.mxu3 %v5241_v33  ;;  %v5104_v0 = vpack.c.bf16 %v4819_v44, %v4815_v42  ;;  %v5236_v53 = vpack.c.bf16 %v4836_v31, %v4832_v46  ;;  %v6542_v31 = vunpack.i.l.bf16 %v9538_v43 }
 0xca2   :  { %v5103_v39 = vpack.c.bf16 %v4818_v17, %v4814_v15  ;;  %v5239_v10 = vpack.c.bf16 %v4843_v36, %v4839_v61  ;;  %6112 = vmatmul.msk.bf16.vlgmr.msrb.gmra.mxu3 %vm5121_vm7, %v5102_v50  ;;  %v4830_v62 = vsel %vm11183_vm2, %v4762_v57, %v4806_v5  ;;  %v4834_v27 = vsel %vm11183_vm2, %v4763_v26, %v4807_v23  ;;  %v6551_v34 = vpop.permute.xlu0 %6550  ;;  %v6611_v46 = vpop.permute.xlu2 %6610 }
 0xca3   :  { %5200 = vmatpush.bf16.msrb.mxu1 %v5104_v0  ;;  %v5237_v30 = vpack.c.bf16 %v4837_v45, %v4833_v49  ;;  %v4831_v37 = vsel %vm11181_vm13, %v9586_v4, %v4802_v25  ;;  %v4835_v63 = vsel %vm11181_vm13, %v9680_v32, %v4803_v40  ;;  %v5234_v57 = vpack.c.bf16 %v4834_v27, %v4830_v62 }
 0xca4   :  { %5187 = vmatpush.bf16.msrb.mxu0 %v5103_v39  ;;  %v6543_v26 = vunpack.i.h.bf16 %v9538_v43  ;;  %v5235_v29 = vpack.c.bf16 %v4835_v63, %v4831_v37  ;;  %v6613_v58 = vunpack.i.h.bf16 %v6611_v46  ;;  %v6612_v4 = vunpack.i.l.bf16 %v6611_v46 }
 0xca5   :  { %5278 = vmatpush.bf16.msra.mxu2 %v5236_v53  ;;  %5291 = vmatpush.bf16.msra.mxu3 %v5237_v30  ;;  %v6548_v61 = vunpack.i.h.bf16 %v9497_v56  ;;  %v6547_v32 = vunpack.i.l.bf16 %v9497_v56  ;;  %v6553_v36 = vunpack.i.h.bf16 %v6551_v34  ;;  %v6552_v52 = vunpack.i.l.bf16 %v6551_v34 }
 0xca6   :  { %6110 = vmatmul.msk.bf16.vlgmr.msrb.gmra.mxu1 %vm5121_vm7, %v5102_v50  ;;  %v6568_v33 = vunpack.i.h.bf16 %v9544_v14  ;;  %v6567_v9 = vunpack.i.l.bf16 %v9544_v14  ;;  %v6558_v48 = vunpack.i.h.bf16 %v9600_v28  ;;  %v6557_v43 = vunpack.i.l.bf16 %v9600_v28 }
 0xca7   :  { %5264 = vmatpush.bf16.msra.mxu1 %v5239_v10  ;;  %6109 = vmatmul.msk.bf16.vlgmr.msrb.gmra.mxu0 %vm5121_vm7, %v5102_v50  ;;  %v9787_v23 = vsel %vm11191_vm6, %v6543_v26, %v6548_v61  ;;  %v9791_v1 = vsel %vm11192_vm11, %v6542_v31, %v6547_v32  ;;  %v9811_v5 = vsel %vm11196_vm12, %v6548_v61, %v6553_v36  ;;  %vm11197_vm11 = vmmov %vm11191_vm6  ;;  %v6113_v10 = vld [vmem:[%s10429_s7 + $0x8] sm:$0xf] }
 0xca8   :  { %5251 = vmatpush.bf16.msra.mxu0 %v5238_v19  ;;  %v6606_v3 = vpop.permute.xlu1 %6605  ;;  %v9795_v55 = vsel %vm11193_vm5, %v6612_v4, %v6567_v9  ;;  %v9799_v14 = vsel %vm11194_vm10, %v6613_v58, %v6568_v33  ;;  %v9803_v28 = vsel %vm11158_vm1, %v6557_v43, %v6612_v4  ;;  %v9807_v40 = vsel %vm11195_vm8, %v6558_v48, %v6613_v58  ;;  %vm11198_vm5 = vmmov %vm11191_vm6 }
 0xca9   :  { %v6608_v56 = vunpack.i.h.bf16 %v6606_v3  ;;  %v6607_v25 = vunpack.i.l.bf16 %v6606_v3  ;;  %v9815_v50 = vsel %vm11191_vm6, %v6547_v32, %v6552_v52  ;;  %vm11199_vm10 = vmmov %vm11198_vm5  ;;  %v6598_v3 = vunpack.i.h.bf16 %v9698_v13 }
 0xcaa   :  { %v6571_v60 = vpop.permute.xlu0 %6570  ;;  %vm11200_vm1 = vmmov %vm11198_vm5  ;;  %v9885_v61 = vpop.permute.xlu2 %6625 }
 0xcab   :  { %5265 = vmatpush.bf16.msra.mxu1 %v5235_v29  ;;  %v6573_v15 = vunpack.i.h.bf16 %v6571_v60  ;;  %v6572_v17 = vunpack.i.l.bf16 %v6571_v60  ;;  %v9819_v42 = vsel %vm11197_vm11, %v6553_v36, %v6608_v56  ;;  %v9823_v39 = vsel %vm11198_vm5, %v6607_v25, %v6542_v31  ;;  %vm11201_vm12 = vmmov %vm11195_vm8 }
 0xcac   :  { %5252 = vmatpush.bf16.msra.mxu0 %v5234_v57  ;;  %v9827_v44 = vsel %vm11199_vm10, %v6608_v56, %v6543_v26  ;;  %v9831_v49 = vsel %vm11200_vm1, %v6552_v52, %v6607_v25  ;;  %vm11202_vm6 = vmmov %vm11195_vm8  ;;  %v4954_v27 = vsel %vm6985_vm0, %v9807_v40, %v9819_v42  ;;  %v4951_v34 = vsel %vm6989_vm9, %v9795_v55, %v9823_v39 }
 0xcad   :  { %v9835_v45 = vsel %vm11195_vm8, %v6568_v33, %v6573_v15  ;;  %v9839_v0 = vsel %vm11201_vm12, %v6567_v9, %v6572_v17  ;;  %v9843_v19 = vsel %vm11202_vm6, %v6572_v17, %v6557_v43  ;;  %vm11203_vm11 = vmmov %vm11202_vm6  ;;  %v4950_v62 = vsel %vm6985_vm0, %v9803_v28, %v9831_v49 }
 0xcae   :  { %v9847_v53 = vsel %vm11203_vm11, %v6573_v15, %v6558_v48  ;;  %v4955_v30 = vsel %vm6989_vm9, %v9799_v14, %v9827_v44  ;;  %v5307_v37 = vpack.c.bf16 %v4954_v27, %v4950_v62  ;;  %v4952_v46 = vsel %vm6993_vm14, %v9839_v0, %v9791_v1  ;;  %vm11204_vm5 = vmmov %vm11200_vm1 }
 0xcaf   :  { %v5308_v63 = vpack.c.bf16 %v4955_v30, %v4951_v34  ;;  %v4956_v57 = vsel %vm6993_vm14, %v9835_v45, %v9787_v23  ;;  %v4953_v31 = vsel %vm11172_vm3, %v9843_v19, %v9815_v50  ;;  %v4957_v29 = vsel %vm11172_vm3, %v9847_v53, %v9811_v5  ;;  %vm11205_vm10 = vmmov %vm11200_vm1 }
 0xcb0   :  { %v5309_v26 = vpack.c.bf16 %v4956_v57, %v4952_v46  ;;  %v6621_v58 = vpop.permute.xlu1 %6620  ;;  %6116 = vmatmul.msk.bf16.vlgmr.msra.gmra.mxu2 %vm5121_vm7, %v6113_v10  ;;  %5320 = vmatpush.bf16.msrb.mxu0 %v5307_v37  ;;  %v5310_v4 = vpack.c.bf16 %v4957_v29, %v4953_v31  ;;  %v6578_v36 = vunpack.i.h.bf16 %v9688_v24  ;;  %v6577_v52 = vunpack.i.l.bf16 %v9688_v24  ;;  %vm11206_vm8 = vmmov %vm11200_vm1 }
 0xcb1   :  { %5333 = vmatpush.bf16.msrb.mxu1 %v5308_v63  ;;  %v6583_v33 = vunpack.i.h.bf16 %v9632_v54  ;;  %v6582_v9 = vunpack.i.l.bf16 %v9632_v54  ;;  %v6597_v56 = vunpack.i.l.bf16 %v9698_v13  ;;  %v6593_v54 = vunpack.i.h.bf16 %v9761_v47  ;;  %vm11207_vm12 = vmmov %vm11202_vm6 }
 0xcb2   :  { %5346 = vmatpush.bf16.msrb.mxu2 %v5309_v26  ;;  %v9887_v32 = vpop.permute.xlu0 %6585  ;;  %6117 = vmatmul.msk.bf16.vlgmr.msra.gmra.mxu3 %vm5121_vm7, %v6113_v10  ;;  %v6592_v15 = vunpack.i.l.bf16 %v9761_v47  ;;  %v4968_v13 = vsel %vm11177_vm4, %v9791_v1, %v9839_v0  ;;  %v9916_v34 = vpop.permute.xlu2 %6640  ;;  %v6622_v63 = vunpack.i.l.bf16 %v6621_v58  ;;  %v4972_v47 = vsel %vm11177_vm4, %v9787_v23, %v9835_v45  ;;  %vm11208_vm11 = vmmov %vm11202_vm6 }
 0xcb3   :  { %5359 = vmatpush.bf16.msrb.mxu3 %v5310_v4  ;;  %v6588_v48 = vunpack.i.h.bf16 %v9887_v32  ;;  %v6587_v43 = vunpack.i.l.bf16 %v9887_v32  ;;  %v9904_v60 = vsel %vm11204_vm5, %v6578_v36, %v6583_v33  ;;  %v9908_v24 = vsel %vm11205_vm10, %v6577_v52, %v6582_v9  ;;  %vm11209_vm5 = vmmov %vm11202_vm6 }
 0xcb4   :  { %v4969_v4 = vsel %vm11179_vm15, %v9815_v50, %v9843_v19  ;;  %v4973_v32 = vsel %vm11179_vm15, %v9811_v5, %v9847_v53  ;;  %vm11210_vm10 = vmmov %vm11209_vm5 }
 0xcb5   :  { %v4879_v30 = vsel %vm11200_vm1, %v6583_v33, %v6588_v48  ;;  %v4878_v37 = vsel %vm11206_vm8, %v6582_v9, %v6587_v43  ;;  %v6118_v33 = vld [vmem:[%s10429_s7 + $0xc] sm:$0xf]  ;;  %v5374_v9 = vpack.c.bf16 %v8575_v38, %v11082_v18  ;;  %vm11211_vm1 = vmmov %vm11209_vm5  ;;  %v11215_v38 = vld [vmem:[#allocation16_spill] sm:$0xff] }
 0xcb6   :  { %6115 = vmatmul.msk.bf16.vlgmr.msra.gmra.mxu1 %vm5121_vm7, %v6113_v10  ;;  %v9965_v5 = vsel %vm11211_vm1, %v6622_v63, %v6597_v56  ;;  %vm11212_vm8 = vmmov %vm11211_vm1  ;;  %v11216_v18 = vld [vmem:[#allocation17_spill] sm:$0xff] }
 0xcb7   :  { %6114 = vmatmul.msk.bf16.vlgmr.msra.gmra.mxu0 %vm5121_vm7, %v6113_v10  ;;  %v6623_v10 = vunpack.i.h.bf16 %v6621_v58  ;;  %v4934_v19 = vsel %vm11212_vm8, %v6592_v15, %v6622_v63  ;;  %vm11233_vm8 = vmmov %vm11211_vm1 }
 0xcb8   :  { %v9900_v25 = vpop.permute.xlu1 %6635 }
 0xcb9   :  { %v9961_v50 = vsel %vm11210_vm10, %v6623_v10, %v6598_v3 }
 0xcba   :  { %v6601_v17 = vpop.permute.xlu0 %6600 }
 0xcbb   :  { %v6603_v62 = vunpack.i.h.bf16 %v6601_v17  ;;  %v6602_v27 = vunpack.i.l.bf16 %v6601_v17  ;;  %v5375_v17 = vpack.c.bf16 %v8577_v20, %v8194_v11  ;;  %v11217_v11 = vpack.c.bf16 %v11215_v38, %v11216_v18 }
 0xcbd   :  { %v4927_v46 = vsel %vm11207_vm12, %v6598_v3, %v6603_v62  ;;  %v4926_v1 = vsel %vm11202_vm6, %v6597_v56, %v6602_v27  ;;  %v4938_v0 = vsel %vm11208_vm11, %v6602_v27, %v6592_v15  ;;  %v4939_v57 = vsel %vm11209_vm5, %v6603_v62, %v6593_v54  ;;  %v11213_v27 = vld [vmem:[#allocation20_spill] sm:$0xff]  ;;  %vm11218_vm12 = vmmov %vm11211_vm1 }
 0xcbe   :  { %v4944_v26 = vsel %vm6993_vm14, %v4926_v1, %v9908_v24  ;;  %v4948_v23 = vsel %vm6993_vm14, %v4927_v46, %v9904_v60  ;;  %v4945_v45 = vsel %vm11172_vm3, %v4938_v0, %v4878_v37  ;;  %v4949_v31 = vsel %vm11172_vm3, %v4939_v57, %v4879_v30 }
 0xcbf   :  { %v5305_v29 = vpack.c.bf16 %v4948_v23, %v4944_v26  ;;  %v5306_v58 = vpack.c.bf16 %v4949_v31, %v4945_v45  ;;  %v5447_v62 = vpack.c.bf16 %v4972_v47, %v4968_v13  ;;  %v11214_v26 = vpack.c.bf16 %v9177_v16, %v11213_v27  ;;  %v11223_v31 = vld [vmem:[#allocation12_spill] sm:$0xff]  ;;  %v11231_v27 = vld [vmem:[#allocation5_spill] sm:$0xff] }
 0xcc0   :  { %v4935_v20 = vsel %vm11218_vm12, %v6593_v54, %v6623_v10  ;;  %v9977_v47 = vpop.permute.xlu1 %6660  ;;  %v5448_v56 = vpack.c.bf16 %v4973_v32, %v4969_v4  ;;  %v4960_v16 = vsel %vm11177_vm4, %v9908_v24, %v4926_v1  ;;  %v4964_v15 = vsel %vm11177_vm4, %v9904_v60, %v4927_v46  ;;  %v9997_v24 = vpop.permute.xlu2 %6650 }
 0xcc1   :  { %5347 = vmatpush.bf16.msrb.mxu2 %v5305_v29  ;;  %5360 = vmatpush.bf16.msrb.mxu3 %v5306_v58  ;;  %v4961_v54 = vsel %vm11179_vm15, %v4878_v37, %v4938_v0  ;;  %vm11219_vm6 = vcmp.lt.s32.totalorder %v6829_v22, 1  ;;  %v5443_v1 = vpack.c.bf16 %v4964_v15, %v4960_v16  ;;  %v11224_v29 = vld [vmem:[#allocation8_spill] sm:$0xff]  ;;  %v4966_v32 = vsel %vm11183_vm2, %v9831_v49, %v9803_v28  ;;  %v11229_v49 = vld [vmem:[#allocation3_spill] sm:$0xff] }
 0xcc2   :  { %v6616_v53 = vpop.permute.xlu0 %6615  ;;  %vm11220_vm11 = vmmov %vm11219_vm6  ;;  %v11225_v58 = vpack.c.bf16 %v11223_v31, %v11224_v29  ;;  %v4971_v28 = vsel %vm11181_vm13, %v9827_v44, %v9799_v14  ;;  %v6133_v22 = vld [vmem:[%s10429_s7 + $0x18] sm:$0xf] }
 0xcc3   :  { %v6618_v3 = vunpack.i.h.bf16 %v6616_v53  ;;  %v6617_v13 = vunpack.i.l.bf16 %v6616_v53  ;;  %vm11221_vm5 = vmmov %vm11219_vm6 }
 0xcc4   :  { %6121 = vmatmul.msk.bf16.vlgmr.msrb.gmra.mxu2 %vm5121_vm7, %v6118_v33  ;;  %6122 = vmatmul.msk.bf16.vlgmr.msrb.gmra.mxu3 %vm5121_vm7, %v6118_v33  ;;  %vm11222_vm10 = vmmov %vm11221_vm5 }
 0xcc5   :  { %5415 = vmatpush.bf16.msra.mxu2 %v11214_v26  ;;  %5428 = vmatpush.bf16.msra.mxu3 %v11217_v11  ;;  %v4886_v10 = vsel %vm11219_vm6, %v6617_v13, %v6577_v52  ;;  %v4887_v63 = vsel %vm11220_vm11, %v6618_v3, %v6578_v36  ;;  %v4890_v23 = vsel %vm11221_vm5, %v6587_v43, %v6617_v13  ;;  %v11232_v26 = vld [vmem:[#allocation11_spill] sm:$0xff]  ;;  %vm11234_vm12 = vmmov %vm11221_vm5 }
 0xcc6   :  { %v4891_v45 = vsel %vm11222_vm10, %v6588_v48, %v6618_v3  ;;  %v4942_v60 = vsel %vm6985_vm0, %v4934_v19, %v4890_v23  ;;  %v4943_v36 = vsel %vm6989_vm9, %v9965_v5, %v4886_v10  ;;  %v4947_v48 = vsel %vm6989_vm9, %v9961_v50, %v4887_v63  ;;  %vm11235_vm6 = vmmov %vm11221_vm5 }
 0xcc7   :  { %v4946_v37 = vsel %vm6985_vm0, %v4935_v20, %v4891_v45  ;;  %v4965_v43 = vsel %vm11179_vm15, %v4879_v30, %v4939_v57  ;;  %v5304_v46 = vpack.c.bf16 %v4947_v48, %v4943_v36  ;;  %v4970_v30 = vsel %vm11183_vm2, %v9819_v42, %v9807_v40  ;;  %v11226_v57 = vld [vmem:[#allocation7_spill] sm:$0xff]  ;;  %v11230_v40 = vld [vmem:[#allocation6_spill] sm:$0xff]  ;;  %vm11236_vm11 = vmmov %vm11211_vm1 }
 0xcc8   :  { %v5303_v52 = vpack.c.bf16 %v4946_v37, %v4942_v60  ;;  %v5444_v4 = vpack.c.bf16 %v4965_v43, %v4961_v54  ;;  %v5372_v42 = vpack.c.bf16 %v11230_v40, %v11229_v49  ;;  %v10038_v53 = vpop.permute.xlu1 %6675  ;;  %v5373_v38 = vpack.c.bf16 %v11232_v26, %v11231_v27  ;;  %v10053_v11 = vpop.permute.xlu2 %6665  ;;  %vm11237_vm5 = vmmov %vm11211_vm1  ;;  %v6128_v49 = vld [vmem:[%s10429_s7 + $0x14] sm:$0xf] }
 0xcc9   :  { %5416 = vmatpush.bf16.msra.mxu2 %v5374_v9  ;;  %5429 = vmatpush.bf16.msra.mxu3 %v5375_v17  ;;  %v11227_v9 = vld [vmem:[#allocation4_spill] sm:$0xff]  ;;  %v5445_v18 = vpack.c.bf16 %v4970_v30, %v4966_v32  ;;  %v4962_v14 = vsel %vm11183_vm2, %v4891_v45, %v4935_v20  ;;  %v4959_v44 = vsel %vm11181_vm13, %v4886_v10, %v9965_v5  ;;  %v6678_v16 = vunpack.i.h.bf16 %v10038_v53  ;;  %vm11238_vm10 = vmmov %vm11235_vm6 }
 0xcca   :  { %5321 = vmatpush.bf16.msrb.mxu0 %v5303_v52  ;;  %5334 = vmatpush.bf16.msrb.mxu1 %v5304_v46  ;;  %v10011_v0 = vpop.permute.xlu0 %6630  ;;  %v11228_v17 = vpack.c.bf16 %v11226_v57, %v11227_v9  ;;  %v6677_v15 = vunpack.i.l.bf16 %v10038_v53  ;;  %v6663_v54 = vunpack.i.h.bf16 %v9977_v47  ;;  %v6662_v10 = vunpack.i.l.bf16 %v9977_v47  ;;  %v11253_v47 = vld [vmem:[#allocation19_spill] sm:$0xff] }
 0xccb   :  { %v6668_v37 = vunpack.i.h.bf16 %v10053_v11  ;;  %v6667_v36 = vunpack.i.l.bf16 %v10053_v11  ;;  %v6638_v43 = vunpack.i.h.bf16 %v9900_v25  ;;  %v6637_v46 = vunpack.i.l.bf16 %v9900_v25 }
 0xccc   :  { %v6632_v31 = vunpack.i.l.bf16 %v10011_v0  ;;  %v6628_v53 = vunpack.i.h.bf16 %v9885_v61 }
 0xccd   :  { %5484 = vmatpush.bf16.msrb.mxu2 %v5447_v62  ;;  %5497 = vmatpush.bf16.msrb.mxu3 %v5448_v56  ;;  %v4967_v62 = vsel %vm11181_vm13, %v9823_v39, %v9795_v55  ;;  %v4958_v39 = vsel %vm11183_vm2, %v4890_v23, %v4934_v19  ;;  %v6123_v19 = vld [vmem:[%s10429_s7 + $0x10] sm:$0xf]  ;;  %v6642_v56 = vunpack.i.l.bf16 %v9916_v34  ;;  %v10081_v29 = vsel %vm11211_vm1, %v6678_v16, %v6668_v37  ;;  %vm11239_vm1 = vmmov %vm11235_vm6 }
 0xcce   :  { %5389 = vmatpush.bf16.msra.mxu0 %v11225_v58  ;;  %5402 = vmatpush.bf16.msra.mxu1 %v11228_v17  ;;  %v5446_v55 = vpack.c.bf16 %v4971_v28, %v4967_v62  ;;  %v5441_v3 = vpack.c.bf16 %v4962_v14, %v4958_v39  ;;  %v10087_v58 = vsel %vm11233_vm8, %v6677_v15, %v6667_v36  ;;  %vm11241_vm8 = vmmov %vm11239_vm1 }
 0xccf   :  { %6119 = vmatmul.msk.bf16.vlgmr.msrb.gmra.mxu0 %vm5121_vm7, %v6118_v33  ;;  %6120 = vmatmul.msk.bf16.vlgmr.msrb.gmra.mxu1 %vm5121_vm7, %v6118_v33  ;;  %v4963_v33 = vsel %vm11181_vm13, %v4887_v63, %v9961_v50  ;;  %v6643_v50 = vunpack.i.h.bf16 %v9916_v34  ;;  %v10126_v62 = vsel %vm11238_vm10, %v6632_v31, %v6637_v46  ;;  %vm11246_vm10 = vmmov %vm11239_vm1 }
 0xcd0   :  { %v5442_v20 = vpack.c.bf16 %v4963_v33, %v4959_v44  ;;  %v6681_v5 = vpop.permute.xlu1 %6680  ;;  %v10068_v63 = vpop.permute.xlu2 %6685  ;;  %v6627_v44 = vunpack.i.l.bf16 %v9885_v61 }
 0xcd1   :  { %5485 = vmatpush.bf16.msrb.mxu2 %v5443_v1  ;;  %5498 = vmatpush.bf16.msrb.mxu3 %v5444_v4  ;;  %v6683_v23 = vunpack.i.h.bf16 %v6681_v5  ;;  %v6682_v45 = vunpack.i.l.bf16 %v6681_v5  ;;  %v6633_v1 = vunpack.i.h.bf16 %v10011_v0  ;;  %v6688_v33 = vunpack.i.h.bf16 %v10068_v63 }
 0xcd2   :  { %5390 = vmatpush.bf16.msra.mxu0 %v5372_v42  ;;  %5403 = vmatpush.bf16.msra.mxu1 %v5373_v38  ;;  %v10058_v13 = vpop.permute.xlu0 %6645  ;;  %v6687_v6 = vunpack.i.l.bf16 %v10068_v63 }
 0xcd3   :  { %v10106_v32 = vsel %vm11236_vm11, %v6683_v23, %v6643_v50  ;;  %v10112_v30 = vsel %vm11237_vm5, %v6682_v45, %v6642_v56  ;;  %v10132_v28 = vsel %vm11239_vm1, %v6633_v1, %v6638_v43  ;;  %v6648_v27 = vunpack.i.h.bf16 %v10058_v13  ;;  %vm11244_vm11 = vmmov %vm11237_vm5 }
 0xcd4   :  { %6126 = vmatmul.msk.bf16.vlgmr.msra.gmra.mxu2 %vm5121_vm7, %v6123_v19  ;;  %6127 = vmatmul.msk.bf16.vlgmr.msra.gmra.mxu3 %vm5121_vm7, %v6123_v19  ;;  %v5073_v40 = vsel %vm11172_vm3, %v10112_v30, %v10126_v62  ;;  %v5077_v42 = vsel %vm11172_vm3, %v10106_v32, %v10132_v28  ;;  %v6647_v26 = vunpack.i.l.bf16 %v10058_v13 }
 0xcd6   :  { %5458 = vmatpush.bf16.msrb.mxu0 %v5445_v18  ;;  %5471 = vmatpush.bf16.msrb.mxu1 %v5446_v55  ;;  %v6653_v18 = vunpack.i.h.bf16 %v9997_v24  ;;  %v6652_v55 = vunpack.i.l.bf16 %v9997_v24 }
 0xcd8   :  { %v6696_v24 = vpop.permute.xlu1 %6695 }
 0xcda   :  { %5459 = vmatpush.bf16.msrb.mxu0 %v5441_v3  ;;  %5472 = vmatpush.bf16.msrb.mxu1 %v5442_v20  ;;  %v6656_v60 = vpop.permute.xlu0 %6655  ;;  %v6701_v3 = vpop.permute.xlu2 %6700 }
 0xcdb   :  { %v6658_v52 = vunpack.i.h.bf16 %v6656_v60  ;;  %v6657_v48 = vunpack.i.l.bf16 %v6656_v60  ;;  %v10171_v60 = vsel %vm11244_vm11, %v6648_v27, %v6683_v23  ;;  %v11245_v23 = vpack.c.bf16 %v9351_v8, %v9347_v7  ;;  %vm11252_vm11 = vmmov %vm11237_vm5 }
 0xcdd   :  { %v10093_v4 = vsel %vm11234_vm12, %v6657_v48, %v6662_v10  ;;  %v10099_v0 = vsel %vm11235_vm6, %v6658_v52, %v6663_v54  ;;  %v10160_v5 = vsel %vm11241_vm8, %v6652_v55, %v6657_v48  ;;  %vm11242_vm12 = vmmov %vm11237_vm5  ;;  %v6703_v48 = vunpack.i.h.bf16 %v6701_v3 }
 0xcde   :  { %v5081_v57 = vsel %vm11172_vm3, %v10087_v58, %v10093_v4  ;;  %v5085_v9 = vsel %vm11172_vm3, %v10081_v29, %v10099_v0  ;;  %vm11240_vm3 = vmmov %vm11239_vm1  ;;  %v5101_v13 = vsel %vm11179_vm15, %v10099_v0, %v10081_v29  ;;  %v11267_v29 = vld [vmem:[#allocation15_spill] sm:$0xff]  ;;  %v11268_v0 = vld [vmem:[#allocation14_spill] sm:$0xff] }
 0xcdf   :  { %6124 = vmatmul.msk.bf16.vlgmr.msra.gmra.mxu0 %vm5121_vm7, %v6123_v19  ;;  %6125 = vmatmul.msk.bf16.vlgmr.msra.gmra.mxu1 %vm5121_vm7, %v6123_v19  ;;  %v5517_v17 = vpack.c.bf16 %v5085_v9, %v5081_v57  ;;  %v5513_v19 = vpack.c.bf16 %v5077_v42, %v5073_v40  ;;  %v10156_v20 = vsel %vm11240_vm3, %v6653_v18, %v6658_v52  ;;  %vm11243_vm6 = vmmov %vm11237_vm5  ;;  %v6702_v57 = vunpack.i.l.bf16 %v6701_v3 }
 0xce0   :  { %v10177_v52 = vsel %vm11237_vm5, %v6647_v26, %v6682_v45  ;;  %v10191_v45 = vsel %vm11246_vm10, %v6628_v53, %v6633_v1  ;;  %v6698_v40 = vunpack.i.h.bf16 %v6696_v24  ;;  %v6697_v42 = vunpack.i.l.bf16 %v6696_v24  ;;  %vm11247_vm3 = vmmov %vm11239_vm1 }
 0xce1   :  { %5566 = vmatpush.bf16.msra.mxu3 %v5517_v17  ;;  %v10195_v17 = vsel %vm11239_vm1, %v6627_v44, %v6632_v31  ;;  %v5076_v7 = vsel %vm6993_vm14, %v10171_v60, %v10191_v45  ;;  %v10207_v8 = vsel %vm11247_vm3, %v6687_v6, %v6652_v55  ;;  %vm11248_vm8 = vmmov %vm11239_vm1  ;;  %v5092_v51 = vsel %vm11177_vm4, %v10191_v45, %v10171_v60  ;;  %v11270_v45 = vld [vmem:[#allocation21_spill] sm:$0xff] }
 0xce2   :  { %v6671_v38 = vpop.permute.xlu0 %6670  ;;  %v10211_v1 = vsel %vm11248_vm8, %v6688_v33, %v6653_v18  ;;  %v10235_v18 = vsel %vm11252_vm11, %v6643_v50, %v6703_v48  ;;  %vm11256_vm10 = vmmov %vm11239_vm1  ;;  %v10254_v34 = vsel %vm11239_vm1, %v6638_v43, %v6698_v40  ;;  %v5088_v59 = vsel %vm11177_vm4, %v10195_v17, %v10177_v52 }
 0xce3   :  { %v6673_v39 = vunpack.i.h.bf16 %v6671_v38  ;;  %v6672_v14 = vunpack.i.l.bf16 %v6671_v38  ;;  %v5072_v38 = vsel %vm6993_vm14, %v10177_v52, %v10195_v17  ;;  %vm11257_vm3 = vmmov %vm11237_vm5 }
 0xce4   :  { %6131 = vmatmul.msk.bf16.vlgmr.msrb.gmra.mxu2 %vm5121_vm7, %v6128_v49  ;;  %6132 = vmatmul.msk.bf16.vlgmr.msrb.gmra.mxu3 %vm5121_vm7, %v6128_v49  ;;  %v5512_v50 = vpack.c.bf16 %v5076_v7, %v5072_v38  ;;  %vm11258_vm8 = vmmov %vm11257_vm3  ;;  %v5089_v38 = vsel %vm11179_vm15, %v10126_v62, %v10112_v30  ;;  %v5093_v7 = vsel %vm11179_vm15, %v10132_v28, %v10106_v32 }
 0xce5   :  { %v10164_v61 = vsel %vm11242_vm12, %v6672_v14, %v6677_v15  ;;  %v5057_v63 = vsel %vm11243_vm6, %v6673_v39, %v6678_v16  ;;  %5567 = vmatpush.bf16.msra.mxu3 %v5513_v19  ;;  %vm11249_vm12 = vmmov %vm11239_vm1  ;;  %v11254_v19 = vld [vmem:[#allocation18_spill] sm:$0xff]  ;;  %v5651_v62 = vpack.c.bf16 %v5093_v7, %v5089_v38 }
 0xce6   :  { %v5080_v15 = vsel %vm6993_vm14, %v10164_v61, %v10160_v5  ;;  %v5084_v16 = vsel %vm6993_vm14, %v5057_v63, %v10156_v20  ;;  %v10217_v31 = vsel %vm11249_vm12, %v6662_v10, %v6687_v6  ;;  %vm11250_vm6 = vmmov %vm11239_vm1  ;;  %v11255_v24 = vpack.c.bf16 %v11253_v47, %v11254_v19  ;;  %v5134_v52 = vpop.f32.mrf.mxu0  ;;  %v5147_v17 = vpop.f32.mrf.mxu1  ;;  %v11273_v47 = vld [vmem:[#allocation23_spill] sm:$0xff]  ;;  %v11274_v19 = vld [vmem:[#allocation25_spill] sm:$0xff] }
 0xce7   :  { %v5516_v9 = vpack.c.bf16 %v5084_v16, %v5080_v15  ;;  %v10223_v12 = vsel %vm11250_vm6, %v6663_v54, %v6688_v33  ;;  %vm11251_vm14 = vmmov %vm11237_vm5  ;;  %v10242_v54 = vsel %vm11237_vm5, %v6703_v48, %v6648_v27  ;;  %v11264_v15 = vld [vmem:[#allocation26_spill] sm:$0xff]  ;;  %v11275_v30 = vpack.c.bf16 %v11273_v47, %v11274_v19 }
 0xce8   :  { %v10229_v55 = vsel %vm11251_vm14, %v6642_v56, %v6702_v57  ;;  %v10248_v56 = vsel %vm11256_vm10, %v6637_v46, %v6697_v42  ;;  %vm11259_vm12 = vmmov %vm11257_vm3 }
 0xce9   :  { %5635 = vmatpush.bf16.msrb.mxu3 %v11245_v23  ;;  %5553 = vmatpush.bf16.msra.mxu2 %v5516_v9  ;;  %vm11260_vm6 = vmmov %vm11257_vm3 }
 0xcea   :  { %v6691_v3 = vpop.permute.xlu0 %6690  ;;  %vm11261_vm14 = vmmov %vm11239_vm1  ;;  %v5160_v41 = vpop.f32.mrf.mxu2 }
 0xceb   :  { %v6693_v10 = vunpack.i.h.bf16 %v6691_v3  ;;  %v6692_v6 = vunpack.i.l.bf16 %v6691_v3  ;;  %vm11262_vm11 = vmmov %vm11239_vm1  ;;  %v5173_v60 = vpop.f32.mrf.mxu3  ;;  %v11271_v3 = vld [vmem:[#allocation22_spill] sm:$0xff] }
 0xcec   :  { %vm11266_vm5 = vmmov %vm11257_vm3 }
 0xced   :  { %5636 = vmatpush.bf16.msrb.mxu3 %v11255_v24  ;;  %v5065_v27 = vsel %vm11257_vm3, %v6668_v37, %v6693_v10  ;;  %v5060_v33 = vsel %vm11258_vm8, %v6692_v6, %v6672_v14  ;;  %v5061_v46 = vsel %vm11259_vm12, %v6693_v10, %v6673_v39  ;;  %v5064_v25 = vsel %vm11260_vm6, %v6667_v36, %v6692_v6  ;;  %v11263_v14 = vld [vmem:[#allocation24_spill] sm:$0xff] }
 0xcee   :  { %5554 = vmatpush.bf16.msra.mxu2 %v5512_v50  ;;  %v5078_v43 = vsel %vm6985_vm0, %v5064_v25, %v10217_v31  ;;  %v5082_v37 = vsel %vm6985_vm0, %v5065_v27, %v10223_v12  ;;  %v5079_v39 = vsel %vm6989_vm9, %v5060_v33, %v10207_v8  ;;  %v5083_v11 = vsel %vm6989_vm9, %v5061_v46, %v10211_v1  ;;  %v11276_v50 = vld [vmem:[#allocation30_spill] sm:$0xff] }
 0xcef   :  { %6129 = vmatmul.msk.bf16.vlgmr.msrb.gmra.mxu0 %vm5121_vm7, %v6128_v49  ;;  %6130 = vmatmul.msk.bf16.vlgmr.msrb.gmra.mxu1 %vm5121_vm7, %v6128_v49  ;;  %v10284_v36 = vsel %vm11261_vm14, %v6698_v40, %v6628_v53  ;;  %v10288_v49 = vsel %vm11262_vm11, %v6697_v42, %v6627_v44  ;;  %v11265_v16 = vpack.c.bf16 %v11263_v14, %v11264_v15  ;;  %v5149_v14 = vpop.f32.mrf.mxu1 }
 0xcf0   :  { %v5514_v48 = vpack.c.bf16 %v5082_v37, %v5078_v43  ;;  %v5515_v23 = vpack.c.bf16 %v5083_v11, %v5079_v39  ;;  %v5058_v9 = vsel %vm11266_vm5, %v6702_v57, %v6647_v26  ;;  %v5096_v53 = vsel %vm11177_vm4, %v10160_v5, %v10164_v61  ;;  %v11277_v43 = vld [vmem:[#allocation31_spill] sm:$0xff] }
 0xcf1   :  { %v5100_v44 = vsel %vm11177_vm4, %v10156_v20, %v5057_v63  ;;  %v5097_v40 = vsel %vm11179_vm15, %v10093_v4, %v10087_v58  ;;  %v5070_v26 = vsel %vm6985_vm0, %v10229_v55, %v10248_v56  ;;  %v5074_v58 = vsel %vm6985_vm0, %v10235_v18, %v10254_v34 }
 0xcf2   :  { %5622 = vmatpush.bf16.msrb.mxu2 %v11265_v16  ;;  %5527 = vmatpush.bf16.msra.mxu0 %v5514_v48  ;;  %v5071_v4 = vsel %vm6989_vm9, %v5058_v9, %v10288_v49  ;;  %v5075_v20 = vsel %vm6989_vm9, %v10242_v54, %v10284_v36  ;;  %v11269_v5 = vpack.c.bf16 %v11267_v29, %v11268_v0 }
 0xcf3   :  { %5540 = vmatpush.bf16.msra.mxu1 %v5515_v23  ;;  %v5654_v61 = vpack.c.bf16 %v5100_v44, %v5096_v53  ;;  %v5655_v63 = vpack.c.bf16 %v5101_v13, %v5097_v40  ;;  %v5510_v57 = vpack.c.bf16 %v5074_v58, %v5070_v26  ;;  %v5511_v42 = vpack.c.bf16 %v5075_v20, %v5071_v4 }
 0xcf4   :  { %6136 = vmatmul.msk.bf16.vlgmr.msra.gmra.mxu2 %vm5121_vm7, %v6133_v22  ;;  %6137 = vmatmul.msk.bf16.vlgmr.msra.gmra.mxu3 %vm5121_vm7, %v6133_v22  ;;  %v11272_v10 = vpack.c.bf16 %v11270_v45, %v11271_v3  ;;  %v5650_v6 = vpack.c.bf16 %v5092_v51, %v5088_v59  ;;  %v5094_v35 = vsel %vm11183_vm2, %v10217_v31, %v5064_v25  ;;  %v11279_v31 = vld [vmem:[#allocation35_spill] sm:$0xff]  ;;  %v11280_v25 = vld [vmem:[#allocation34_spill] sm:$0xff] }
 0xcf5   :  { %5704 = vmatpush.bf16.msra.mxu3 %v5655_v63  ;;  %v5098_v32 = vsel %vm11183_vm2, %v10223_v12, %v5065_v27  ;;  %v5095_v28 = vsel %vm11181_vm13, %v10207_v8, %v5060_v33  ;;  %v5099_v24 = vsel %vm11181_vm13, %v10211_v1, %v5061_v46  ;;  %v11278_v37 = vpack.c.bf16 %v11276_v50, %v11277_v43  ;;  %v5136_v46 = vpop.f32.mrf.mxu0 }
 0xcf6   :  { %5623 = vmatpush.bf16.msrb.mxu2 %v11269_v5  ;;  %5528 = vmatpush.bf16.msra.mxu0 %v5510_v57  ;;  %v5652_v39 = vpack.c.bf16 %v5098_v32, %v5094_v35  ;;  %v11281_v11 = vpack.c.bf16 %v11279_v31, %v11280_v25  ;;  %v5653_v12 = vpack.c.bf16 %v5099_v24, %v5095_v28 }
 0xcf7   :  { %5541 = vmatpush.bf16.msra.mxu1 %v5511_v42  ;;  %v5086_v8 = vsel %vm11183_vm2, %v10248_v56, %v10229_v55  ;;  %v5090_v1 = vsel %vm11183_vm2, %v10254_v34, %v10235_v18  ;;  %v5087_v27 = vsel %vm11181_vm13, %v10288_v49, %v5058_v9  ;;  %v5091_v33 = vsel %vm11181_vm13, %v10284_v36, %v10242_v54  ;;  %v5162_v55 = vpop.f32.mrf.mxu2  ;;  %v5175_v56 = vpop.f32.mrf.mxu3  ;;  %v6138_v18 = vld [vmem:[%s10429_s7 + $0x1c] sm:$0xf] }
 0xcf8   :  { %v5648_v15 = vpack.c.bf16 %v5090_v1, %v5086_v8  ;;  %v5649_v2 = vpack.c.bf16 %v5091_v33, %v5087_v27 }
 0xcf9   :  { %5705 = vmatpush.bf16.msra.mxu3 %v5651_v62 }
 0xcfa   :  { %5691 = vmatpush.bf16.msra.mxu2 %v5654_v61  ;;  %5596 = vmatpush.bf16.msrb.mxu0 %v11272_v10 }
 0xcfb   :  { %5609 = vmatpush.bf16.msrb.mxu1 %v11275_v30 }
 0xcfe   :  { %5692 = vmatpush.bf16.msra.mxu2 %v5650_v6  ;;  %5597 = vmatpush.bf16.msrb.mxu0 %v11278_v37 }
 0xcff   :  { %5610 = vmatpush.bf16.msrb.mxu1 %v11281_v11  ;;  %6134 = vmatmul.msk.bf16.vlgmr.msra.gmra.mxu0 %vm5121_vm7, %v6133_v22 }
 0xd00   :  { %6135 = vmatmul.msk.bf16.vlgmr.msra.gmra.mxu1 %vm5121_vm7, %v6133_v22 }
 0xd02   :  { %5665 = vmatpush.bf16.msra.mxu0 %v5652_v39 }
 0xd03   :  { %5678 = vmatpush.bf16.msra.mxu1 %v5653_v12 }
 0xd04   :  { %6141 = vmatmul.msk.bf16.vlgmr.msrb.gmra.mxu2 %vm5121_vm7, %v6138_v18  ;;  %6142 = vmatmul.msk.bf16.vlgmr.msrb.gmra.mxu3 %vm5121_vm7, %v6138_v18 }
 0xd06   :  { %5666 = vmatpush.bf16.msra.mxu0 %v5648_v15 }
 0xd07   :  { %5679 = vmatpush.bf16.msra.mxu1 %v5649_v2 }
 0xd0f   :  { %6139 = vmatmul.msk.bf16.vlgmr.msrb.gmra.mxu0 %vm5121_vm7, %v6138_v18 }
 0xd10   :  { %6140 = vmatmul.msk.bf16.vlgmr.msrb.gmra.mxu1 %vm5121_vm7, %v6138_v18 }
 0xd14   :  { %6146 = vmatmul.msk.bf16.vlgmr.msra.gmra.mxu2 %vm5121_vm7, %v6143_v21  ;;  %6147 = vmatmul.msk.bf16.vlgmr.msra.gmra.mxu3 %vm5121_vm7, %v6143_v21 }
 0xd1f   :  { %6144 = vmatmul.msk.bf16.vlgmr.msra.gmra.mxu0 %vm5121_vm7, %v6143_v21 }
 0xd20   :  { %6145 = vmatmul.msk.bf16.vlgmr.msra.gmra.mxu1 %vm5121_vm7, %v6143_v21 }
 0xd23   :  { %v5202_v36 = vpop.f32.mrf.mxu1  ;;  %v5215_v49 = vpop.f32.mrf.mxu2 }
 0xd24   :  { %v5189_v54 = vpop.f32.mrf.mxu0  ;;  %v5203_v16 = vadd.f32 %v5202_v36, %v5147_v17  ;;  %v5216_v48 = vadd.f32 %v5215_v49, %v5160_v41 }
 0xd25   :  { %v5190_v34 = vadd.f32 %v5189_v54, %v5134_v52  ;;  %v5228_v23 = vpop.f32.mrf.mxu3 }
 0xd26   :  { %v5229_v9 = vadd.f32 %v5228_v23, %v5173_v60 }
 0xd2b   :  { %v5204_v44 = vpop.f32.mrf.mxu1  ;;  %v5217_v40 = vpop.f32.mrf.mxu2 }
 0xd2c   :  { %v5191_v53 = vpop.f32.mrf.mxu0 }
 0xd2d   :  { %v5230_v22 = vpop.f32.mrf.mxu3 }
 0xd33   :  { %v5267_v58 = vpop.f32.mrf.mxu1  ;;  %v5280_v4 = vpop.f32.mrf.mxu2 }
 0xd34   :  { %v5254_v13 = vpop.f32.mrf.mxu0  ;;  %v5298_v20 = vadd.f32 %v5267_v58, %v5203_v16  ;;  %v5299_v29 = vadd.f32 %v5280_v4, %v5216_v48 }
 0xd35   :  { %v5297_v26 = vadd.f32 %v5254_v13, %v5190_v34  ;;  %v5293_v0 = vpop.f32.mrf.mxu3 }
 0xd36   :  { %v5300_v5 = vadd.f32 %v5293_v0, %v5229_v9 }
 0xd3b   :  { %v5269_v63 = vpop.f32.mrf.mxu1  ;;  %v5282_v57 = vpop.f32.mrf.mxu2 }
 0xd3c   :  { %v5256_v61 = vpop.f32.mrf.mxu0 }
 0xd3d   :  { %v5295_v59 = vpop.f32.mrf.mxu3 }
 0xd47   :  { %v5349_v51 = vpop.f32.mrf.mxu2  ;;  %v5362_v42 = vpop.f32.mrf.mxu3 }
 0xd48   :  { %v5368_v38 = vadd.f32 %v5349_v51, %v5299_v29  ;;  %v5369_v7 = vadd.f32 %v5362_v42, %v5300_v5  ;;  %v11282_v42 = vld [vmem:[#allocation40_spill] sm:$0xff] }
 0xd4c   :  { %v5323_v52 = vpop.f32.mrf.mxu0  ;;  %v5336_v41 = vpop.f32.mrf.mxu1 }
 0xd4d   :  { %v5366_v17 = vadd.f32 %v5323_v52, %v5297_v26  ;;  %v5367_v60 = vadd.f32 %v5336_v41, %v5298_v20  ;;  %v11283_v41 = vld [vmem:[#allocation41_spill] sm:$0xff] }
 0xd4f   :  { %v5351_v45 = vpop.f32.mrf.mxu2  ;;  %v5364_v3 = vpop.f32.mrf.mxu3 }
 0xd54   :  { %v5325_v10 = vpop.f32.mrf.mxu0  ;;  %v5338_v6 = vpop.f32.mrf.mxu1 }
 0xd55   :  { %v11284_v10 = vld [vmem:[#allocation36_spill] sm:$0xff] }
 0xd57   :  { %v5418_v47 = vpop.f32.mrf.mxu2  ;;  %v5431_v19 = vpop.f32.mrf.mxu3 }
 0xd58   :  { %v5437_v34 = vadd.f32 %v5418_v47, %v5368_v38  ;;  %v5438_v49 = vadd.f32 %v5431_v19, %v5369_v7  ;;  %v11285_v19 = vld [vmem:[#allocation37_spill] sm:$0xff] }
 0xd5c   :  { %v5392_v30 = vpop.f32.mrf.mxu0  ;;  %v5405_v62 = vpop.f32.mrf.mxu1 }
 0xd5d   :  { %v5435_v48 = vadd.f32 %v5392_v30, %v5366_v17  ;;  %v5436_v53 = vadd.f32 %v5405_v62, %v5367_v60  ;;  %v5723_v17 = vpop.permute.xlu0 %5722 }
 0xd5f   :  { %v5420_v35 = vpop.f32.mrf.mxu2  ;;  %v5433_v32 = vpop.f32.mrf.mxu3 }
 0xd64   :  { %v5394_v28 = vpop.f32.mrf.mxu0  ;;  %v5407_v24 = vpop.f32.mrf.mxu1 }
 0xd67   :  { %v5487_v50 = vpop.f32.mrf.mxu2  ;;  %v5500_v43 = vpop.f32.mrf.mxu3 }
 0xd68   :  { %v5506_v23 = vadd.f32 %v5487_v50, %v5437_v34  ;;  %v5507_v44 = vadd.f32 %v5500_v43, %v5438_v49 }
 0xd6c   :  { %v5461_v37 = vpop.f32.mrf.mxu0  ;;  %v5474_v39 = vpop.f32.mrf.mxu1 }
 0xd6d   :  { %v5504_v40 = vadd.f32 %v5461_v37, %v5435_v48  ;;  %v5505_v13 = vadd.f32 %v5474_v39, %v5436_v53 }
 0xd6f   :  { %v5489_v31 = vpop.f32.mrf.mxu2  ;;  %v5502_v25 = vpop.f32.mrf.mxu3 }
 0xd74   :  { %v5463_v11 = vpop.f32.mrf.mxu0  ;;  %v5476_v12 = vpop.f32.mrf.mxu1 }
 0xd77   :  { %v5556_v8 = vpop.f32.mrf.mxu2  ;;  %v5569_v1 = vpop.f32.mrf.mxu3 }
 0xd78   :  { %v5575_v22 = vadd.f32 %v5556_v8, %v5506_v23  ;;  %v5576_v26 = vadd.f32 %v5569_v1, %v5507_v44 }
 0xd7c   :  { %v5530_v27 = vpop.f32.mrf.mxu0 }
 0xd7d   :  { %v5543_v33 = vpop.f32.mrf.mxu1  ;;  %v5573_v58 = vadd.f32 %v5530_v27, %v5504_v40 }
 0xd7e   :  { %v5574_v20 = vadd.f32 %v5543_v33, %v5505_v13 }
 0xd7f   :  { %v5558_v46 = vpop.f32.mrf.mxu2  ;;  %v5571_v14 = vpop.f32.mrf.mxu3 }
 0xd84   :  { %v5532_v55 = vpop.f32.mrf.mxu0 }
 0xd85   :  { %v5545_v56 = vpop.f32.mrf.mxu1 }
 0xd87   :  { %v5625_v15 = vpop.f32.mrf.mxu2  ;;  %v5638_v2 = vpop.f32.mrf.mxu3 }
 0xd88   :  { %v5644_v4 = vadd.f32 %v5625_v15, %v5575_v22  ;;  %v5645_v29 = vadd.f32 %v5638_v2, %v5576_v26 }
 0xd8c   :  { %v5599_v18 = vpop.f32.mrf.mxu0 }
 0xd8d   :  { %v5612_v21 = vpop.f32.mrf.mxu1  ;;  %v5642_v5 = vadd.f32 %v5599_v18, %v5573_v58 }
 0xd8e   :  { %v5643_v57 = vadd.f32 %v5612_v21, %v5574_v20 }
 0xd8f   :  { %v5627_v54 = vpop.f32.mrf.mxu2  ;;  %v5640_v36 = vpop.f32.mrf.mxu3 }
 0xd94   :  { %v5601_v16 = vpop.f32.mrf.mxu0 }
 0xd95   :  { %v5614_v9 = vpop.f32.mrf.mxu1 }
 0xd97   :  { %v5694_v0 = vpop.f32.mrf.mxu2  ;;  %v5707_v63 = vpop.f32.mrf.mxu3 }
 0xd98   :  { %v5713_v61 = vadd.f32 %v5694_v0, %v5644_v4  ;;  %v5714_v59 = vadd.f32 %v5707_v63, %v5645_v29 }
 0xd9a   :  { %v5717_v38 = vadd.f32 %v5713_v61, %v11282_v42  ;;  %v5718_v60 = vadd.f32 %v5714_v59, %v11283_v41 }
 0xd9c   :  { %v5668_v51 = vpop.f32.mrf.mxu0  ;;  %v5727_v3 = vadd.f32 %v5723_v17, %v5717_v38  ;;  %v5728_v47 = vadd.f32 %v5723_v17, %v5718_v60 }
 0xd9d   :  { %v5711_v7 = vadd.f32 %v5668_v51, %v5642_v5  ;;  %v5681_v52 = vpop.f32.mrf.mxu1 }
 0xd9e   :  { %v5712_v45 = vadd.f32 %v5681_v52, %v5643_v57  ;;  %v5731_v62 = vmul.f32 0.2, %v5727_v3  ;;  %v5732_v32 = vmul.f32 0.2, %v5728_v47 }
 0xd9f   :  { %v5715_v6 = vadd.f32 %v5711_v7, %v11284_v10  ;;  %v5696_v24 = vpop.f32.mrf.mxu2  ;;  %v5709_v37 = vpop.f32.mrf.mxu3 }
 0xda0   :  { %v5716_v30 = vadd.f32 %v5712_v45, %v11285_v19  ;;  %v5735_v50 = vmax.f32 %v5727_v3, %v5731_v62  ;;  %v5736_v39 = vmax.f32 %v5728_v47, %v5732_v32 }
 0xda1   :  { %v5725_v35 = vadd.f32 %v5723_v17, %v5715_v6 }
 0xda2   :  { %v5726_v28 = vadd.f32 %v5723_v17, %v5716_v30  ;;  %5739 = vst [vmem:[%s10431_s9 + $0x10] sm:$0xff] %v5735_v50 }
 0xda3   :  { %v5729_v43 = vmul.f32 0.2, %v5725_v35  ;;  %5740 = vst [vmem:[%s10431_s9 + $0x18] sm:$0xff] %v5736_v39 }
 0xda4   :  { %v5730_v31 = vmul.f32 0.2, %v5726_v28  ;;  %v5670_v25 = vpop.f32.mrf.mxu0 }
 0xda5   :  { %v5733_v11 = vmax.f32 %v5725_v35, %v5729_v43  ;;  %v5683_v12 = vpop.f32.mrf.mxu1 }
 0xda6   :  { %v5734_v8 = vmax.f32 %v5726_v28, %v5730_v31 }
 0xda7   :  { %5737 = vst [vmem:[%s10431_s9] sm:$0xff] %v5733_v11 }
 0xda8   :  { %5738 = vst [vmem:[%s10431_s9 + $0x8] sm:$0xff] %v5734_v8 }

</bundles_post_ra>
